<compile_context>
chip_gen: v7x
topology: tpu7x:2x2x1
jax: 0.10.0
libtpu: 0.0.40
codegen_flags: <defaults>
</compile_context>

<pallas_src>
import functools

import jax
import jax.numpy as jnp
from jax import lax
from jax.experimental import pallas as pl
from jax.experimental.pallas import tpu as pltpu


# ---------------------------------------------------------------------------
# Fused SuperC3 Pallas kernel
# ---------------------------------------------------------------------------
def _make_super_c3_kernel(TH, W, PAD, C1, c_, c2, K):
    THp, Wp = TH + 2 * PAD, W + 2 * PAD
    Mh, Mi = THp * Wp, TH * W
    prec = lax.Precision.HIGHEST  # keep f32 accuracy vs. the PyTorch reference

    def kernel(xt_ref, mask_ref,
               w1_ref, b1_ref, w2_ref, b2_ref,
               wb1_ref, bb1_ref, wb2_ref, bb2_ref,
               w3_ref, sc_ref, sh_ref, o_ref):
        x3 = xt_ref[...]                                   # (THp, Wp, C1) halo'd tile
        xh = x3.reshape(Mh, C1)

        # SuperC3.cv1 then SuperBottleneck.cv1 (both 1x1) on the halo'd tile.
        y1 = jnp.dot(xh, w1_ref[...], precision=prec,
                     preferred_element_type=jnp.float32) + b1_ref[...]
        h = jnp.dot(y1, wb1_ref[...], precision=prec,
                    preferred_element_type=jnp.float32) + bb1_ref[...]
        # Zero h outside the real image: the 5x5 conv's "same" padding pads h
        # with zeros, not with h evaluated on zero-padded x.
        h = h * mask_ref[...]

        # SuperBottleneck.cv2: 5x5 conv as a single im2col matmul (K = 25*c_).
        h3 = h.reshape(THp, Wp, c_)
        taps = [h3[kh:kh + TH, kw:kw + W, :] for kh in range(K) for kw in range(K)]
        im2col = jnp.concatenate(taps, axis=2).reshape(Mi, K * K * c_)
        conv = jnp.dot(im2col, wb2_ref[...], precision=prec,
                       preferred_element_type=jnp.float32) + bb2_ref[...]

        # Shortcut add (interior rows only).
        y1i = y1.reshape(THp, Wp, c_)[PAD:PAD + TH, PAD:PAD + W, :].reshape(Mi, c_)
        out1 = y1i + conv

        # SuperC3.cv2 branch on interior x.
        xi = x3[PAD:PAD + TH, PAD:PAD + W, :].reshape(Mi, C1)
        out2 = jnp.dot(xi, w2_ref[...], precision=prec,
                       preferred_element_type=jnp.float32) + b2_ref[...]

        # concat (channel dim) + cv3 1x1 + folded BN + SiLU.
        cat = jnp.concatenate([out1, out2], axis=1)        # (Mi, 2*c_)
        y = jnp.dot(cat, w3_ref[...], precision=prec,
                    preferred_element_type=jnp.float32)
        y = y * sc_ref[...] + sh_ref[...]
        silu = y * pl.reciprocal(1.0 + jnp.exp(-y), approx=True)

        # Channel-major, lane-dense store: (c2, TH*W) slots straight into NCHW.
        o_ref[...] = jnp.transpose(silu)

    return kernel


def _pick_row_tile(H, W, max_elems=2048):
    """Largest row tile TH dividing H with a lane-aligned (TH*W % 128 == 0),
    VMEM-friendly output block; falls back to the full image."""
    cands = [th for th in range(1, H + 1)
             if H % th == 0 and th * W <= max_elems and (th * W) % 128 == 0]
    return max(cands) if cands else H


def super_c3_forward(x_nchw, p, gkeys, row_tile=None):
    N, C1, H, W = x_nchw.shape
    c_ = p['cv1_w'].shape[0]
    c2 = p['cv3_w'].shape[0]
    K = p['bcv2_w'].shape[-1]             # 5
    PAD = K // 2

    pw = prepare_weights(p, gkeys)

    # Flatten conv weights into matmul-ready (Cin, Cout) matrices.
    w1m = pw['w_cv1'].reshape(c_, C1).T
    w2m = pw['w_cv2'].reshape(c_, C1).T
    wb1m = pw['w_bcv1'].reshape(c_, c_).T
    wb2m = jnp.transpose(pw['w_bcv2'], (2, 3, 1, 0)).reshape(K * K * c_, c_)
    w3m = p['cv3_w'].reshape(c2, 2 * c_).T
    b1 = p['cv1_b'].reshape(1, c_)
    b2 = p['cv2_b'].reshape(1, c_)
    bb1 = p['bcv1_b'].reshape(1, c_)
    bb2 = p['bcv2_b'].reshape(1, c_)
    sc3 = pw['scale3'].reshape(1, c2)
    sh3 = pw['shift3'].reshape(1, c2)

    # Spatial row tiling.
    TH = row_tile if row_tile is not None else _pick_row_tile(H, W)
    assert H % TH == 0, "row tile must divide H"
    n_th = H // TH
    if n_th > 1:
        assert (TH * W) % 128 == 0, "row tile must give lane-aligned output blocks"
    THp, Wp = TH + 2 * PAD, W + 2 * PAD
    Mh, Mi = THp * Wp, TH * W

    # Halo'd per-tile input slabs (only x, the smallest tensor, is duplicated
    # slightly — all intermediates stay in VMEM).
    xp = jnp.transpose(
        jnp.pad(x_nchw.astype(jnp.float32), ((0, 0), (0, 0), (PAD, PAD), (PAD, PAD))),
        (0, 2, 3, 1))                                               # (N, H+2P, W+2P, C1)
    tiles = jnp.stack([xp[:, i * TH:i * TH + THp] for i in range(n_th)], axis=1)

    # Per-tile validity mask for h (so the 5x5 conv sees true zero padding).
    row = jnp.arange(n_th)[:, None, None] * TH + jnp.arange(THp)[None, :, None] - PAD
    col = jnp.arange(Wp)[None, None, :] - PAD
    valid = (row >= 0) & (row < H) & (col >= 0) & (col < W)         # (n_th, THp, Wp)
    mask = valid.astype(jnp.float32).reshape(n_th, Mh, 1)

    kernel = _make_super_c3_kernel(TH, W, PAD, C1, c_, c2, K)
    wspec = lambda shape: pl.BlockSpec(shape, lambda n, t: (0, 0))

    out = pl.pallas_call(
        kernel,
        grid=(N, n_th),
        in_specs=[
            pl.BlockSpec((None, None, THp, Wp, C1), lambda n, t: (n, t, 0, 0, 0)),
            pl.BlockSpec((None, Mh, 1), lambda n, t: (t, 0, 0)),
            wspec((C1, c_)), wspec((1, c_)),                 # cv1
            wspec((C1, c_)), wspec((1, c_)),                 # cv2
            wspec((c_, c_)), wspec((1, c_)),                 # bottleneck cv1
            wspec((K * K * c_, c_)), wspec((1, c_)),         # bottleneck cv2 (im2col)
            wspec((2 * c_, c2)), wspec((1, c2)), wspec((1, c2)),  # cv3 + folded BN
        ],
        out_specs=pl.BlockSpec((None, c2, Mi), lambda n, t: (n, 0, t)),
        out_shape=jax.ShapeDtypeStruct((N, c2, H * W), jnp.float32),
        compiler_params=pltpu.CompilerParams(
            dimension_semantics=("parallel", "parallel")),
    )(tiles, mask, w1m, b1, w2m, b2, wb1m, bb1, wb2m, bb2, w3m, sc3, sh3)

    # (N, c2, H*W) and NCHW share the same memory layout -> free reshape.
    return out.reshape(N, c2, H, W)


# ---------------------------------------------------------------------------
# SuperConv2d weight-masking glue (matches the PyTorch module semantics)
# ---------------------------------------------------------------------------
def gumbel_hard_one_hot(key, logits, tau=0.1):
    # Forward value of F.gumbel_softmax(..., tau, hard=True): one-hot sample.
    g = jax.random.gumbel(key, logits.shape, dtype=logits.dtype)
    idx = jnp.argmax((logits + g) / tau)
    return jax.nn.one_hot(idx, logits.shape[0], dtype=logits.dtype)


def channel_masks(out_channels_list, max_out):
    return jnp.stack([
        jnp.concatenate([jnp.ones((oc,), jnp.float32),
                         jnp.zeros((max_out - oc,), jnp.float32)])
        for oc in out_channels_list])                               # (num, max_out)


def kernel_mask_sum(kernel_size_list, max_k, kernel_scores):
    masks = []
    for ks in kernel_size_list:
        if ks == 'dilated':
            m = jnp.zeros((max_k, max_k), jnp.float32).at[0::2, 0::2].set(1.0)
        else:
            pd = (max_k - ks) // 2
            m = jnp.pad(jnp.ones((ks, ks), jnp.float32), ((pd, pd), (pd, pd)))
        masks.append(m)
    masks = jnp.stack(masks)                                        # (num, k, k)
    return (masks * jax.nn.sigmoid(kernel_scores)[:, None, None]).sum(0)


def masked_weight(weight, ch_masks, ch_scores, gumbel_key, kmask_sum=None):
    onehot = gumbel_hard_one_hot(gumbel_key, ch_scores)
    ch_mask = (ch_masks * onehot[:, None]).sum(0)                   # (max_out,)
    w = weight * ch_mask[:, None, None, None]
    if kmask_sum is not None:
        w = w * kmask_sum[None, None, :, :]
    return w


def prepare_weights(p, gkeys, bn_eps=1e-3):
    """Apply differentiable-NAS weight masking and fold cv3's BatchNorm."""
    # TODO(synk): the reference `Conv` class is not in the spec; eps=1e-3 assumes
    # the Ultralytics Conv default — switch to 1e-5 if it uses plain BatchNorm2d.
    w_cv1 = masked_weight(p['cv1_w'], p['cv1_ch_masks'], p['cv1_ch_scores'], gkeys['cv1'])
    w_cv2 = masked_weight(p['cv2_w'], p['cv2_ch_masks'], p['cv2_ch_scores'], gkeys['cv2'])
    w_bcv1 = masked_weight(p['bcv1_w'], p['bcv1_ch_masks'], p['bcv1_ch_scores'], gkeys['bcv1'])
    kmask = kernel_mask_sum([1, 3, 5, 'dilated'], 5, p['bcv2_kernel_scores'])
    w_bcv2 = masked_weight(p['bcv2_w'], p['bcv2_ch_masks'], p['bcv2_ch_scores'],
                           gkeys['bcv2'], kmask_sum=kmask)
    scale = p['cv3_bn_gamma'] / jnp.sqrt(p['cv3_bn_var'] + bn_eps)
    shift = p['cv3_bn_beta'] - p['cv3_bn_mean'] * scale
    return dict(w_cv1=w_cv1, w_cv2=w_cv2, w_bcv1=w_bcv1, w_bcv2=w_bcv2,
                scale3=scale, shift3=shift)


# ---------------------------------------------------------------------------
# Parameter init
# ---------------------------------------------------------------------------
def kaiming_normal(key, shape):
    # nn.init.kaiming_normal_(w, mode='fan_out'), gain = sqrt(2)
    fan_out = shape[0] * shape[2] * shape[3]
    return ((2.0 / fan_out) ** 0.5) * jax.random.normal(key, shape, jnp.float32)


def init_super_c3(key, c1, c2, e_list=(0.75, 1.0),
                  bottleneck_e_list=(0.5, 0.75, 1.0)):
    c_ = int(c2 * 0.5)
    ks = jax.random.split(key, 6)
    oc_list = [int(e * c_) for e in e_list]
    b_oc_list = [int(e * c_) for e in bottleneck_e_list]
    p = {
        'cv1_w': kaiming_normal(ks[0], (c_, c1, 1, 1)),
        'cv1_b': jnp.zeros((c_,), jnp.float32),
        'cv1_ch_masks': channel_masks(oc_list, c_),
        'cv1_ch_scores': jnp.zeros((len(oc_list),), jnp.float32),
        'cv2_w': kaiming_normal(ks[1], (c_, c1, 1, 1)),
        'cv2_b': jnp.zeros((c_,), jnp.float32),
        'cv2_ch_masks': channel_masks(oc_list, c_),
        'cv2_ch_scores': jnp.zeros((len(oc_list),), jnp.float32),
        'bcv1_w': kaiming_normal(ks[2], (c_, c_, 1, 1)),
        'bcv1_b': jnp.zeros((c_,), jnp.float32),
        'bcv1_ch_masks': channel_masks(b_oc_list, c_),
        'bcv1_ch_scores': jnp.zeros((len(b_oc_list),), jnp.float32),
        'bcv2_w': kaiming_normal(ks[3], (c_, c_, 5, 5)),
        'bcv2_b': jnp.zeros((c_,), jnp.float32),
        'bcv2_ch_masks': channel_masks(b_oc_list, c_),
        'bcv2_ch_scores': jnp.zeros((len(b_oc_list),), jnp.float32),
        'bcv2_kernel_scores': jnp.zeros((4,), jnp.float32),
        'cv3_w': kaiming_normal(ks[4], (c2, 2 * c_, 1, 1)),
        'cv3_bn_gamma': jnp.ones((c2,), jnp.float32),
        'cv3_bn_beta': jnp.zeros((c2,), jnp.float32),
        'cv3_bn_mean': jnp.zeros((c2,), jnp.float32),
        'cv3_bn_var': jnp.ones((c2,), jnp.float32),
    }
    gkeys = dict(zip(['cv1', 'cv2', 'bcv1', 'bcv2'], jax.random.split(ks[5], 4)))
    return p, gkeys, c_


# ---------------------------------------------------------------------------
# Pure-JAX reference (same masked weights / gumbel keys) for self-check
# ---------------------------------------------------------------------------
def super_c3_reference(x_nchw, p, gkeys, bn_eps=1e-3):
    pw = prepare_weights(p, gkeys, bn_eps)

    def conv(x, w, b=None, pad=0):
        y = lax.conv_general_dilated(
            x, w, window_strides=(1, 1), padding=[(pad, pad), (pad, pad)],
            dimension_numbers=('NCHW', 'OIHW', 'NCHW'),
            precision=lax.Precision.HIGHEST)
        return y if b is None else y + b[None, :, None, None]

    y1 = conv(x_nchw, pw['w_cv1'], p['cv1_b'])
    h = conv(y1, pw['w_bcv1'], p['bcv1_b'])
    out1 = y1 + conv(h, pw['w_bcv2'], p['bcv2_b'], pad=p['bcv2_w'].shape[-1] // 2)
    out2 = conv(x_nchw, pw['w_cv2'], p['cv2_b'])
    cat = jnp.concatenate([out1, out2], axis=1)
    y = conv(cat, p['cv3_w'])
    y = y * pw['scale3'][None, :, None, None] + pw['shift3'][None, :, None, None]
    return y * jax.nn.sigmoid(y)


if __name__ == "__main__":
    c1, c2 = 8, 8
    N, H, W = 2, 16, 16
    params, gumbel_keys, c_ = init_super_c3(jax.random.PRNGKey(1), c1, c2)
    x = jax.random.normal(jax.random.PRNGKey(0), (N, c1, H, W), jnp.float32)

    fwd = jax.jit(functools.partial(super_c3_forward, row_tile=8))  # 2 row tiles
    out = jax.block_until_ready(fwd(x, params, gumbel_keys))

    assert out.shape == (N, c2, H, W), out.shape
    assert bool(jnp.all(jnp.isfinite(out)))

    ref = jax.jit(super_c3_reference)(x, params, gumbel_keys)
    max_err = float(jnp.max(jnp.abs(out - ref)))
    assert bool(jnp.allclose(out, ref, atol=2e-2, rtol=2e-2)), max_err

    print("KERNEL_OK")
</pallas_src>

<mosaic_0001>
module attributes {stable_mosaic.version = 11 : i64} {
  func.func @kernel(%arg0: i32, %arg1: i32, %arg2: memref<1x1x12x20x8xf32, #tpu.memory_space<vmem>>, %arg3: memref<1x240x1xf32, #tpu.memory_space<vmem>>, %arg4: memref<8x4xf32, #tpu.memory_space<vmem>>, %arg5: memref<1x4xf32, #tpu.memory_space<vmem>>, %arg6: memref<8x4xf32, #tpu.memory_space<vmem>>, %arg7: memref<1x4xf32, #tpu.memory_space<vmem>>, %arg8: memref<4x4xf32, #tpu.memory_space<vmem>>, %arg9: memref<1x4xf32, #tpu.memory_space<vmem>>, %arg10: memref<100x4xf32, #tpu.memory_space<vmem>>, %arg11: memref<1x4xf32, #tpu.memory_space<vmem>>, %arg12: memref<8x8xf32, #tpu.memory_space<vmem>>, %arg13: memref<1x8xf32, #tpu.memory_space<vmem>>, %arg14: memref<1x8xf32, #tpu.memory_space<vmem>>, %arg15: memref<1x8x128xf32, #tpu.memory_space<vmem>>) attributes {dimension_semantics = [#tpu.dimension_semantics<parallel>, #tpu.dimension_semantics<parallel>], iteration_bounds = array<i64: 2, 2>, scalar_prefetch = 0 : i64, scratch_operands = 0 : i64, tpu.core_type = #tpu.core_type<tc>, window_params = [{transform_indices = @transform_0, window_bounds = array<i64: 1, 1, 12, 20, 8>}, {transform_indices = @transform_1, window_bounds = array<i64: 1, 240, 1>}, {pipeline_mode = #tpu.pipeline_mode<synchronous>, transform_indices = @transform_2, window_bounds = array<i64: 8, 4>}, {pipeline_mode = #tpu.pipeline_mode<synchronous>, transform_indices = @transform_3, window_bounds = array<i64: 1, 4>}, {pipeline_mode = #tpu.pipeline_mode<synchronous>, transform_indices = @transform_4, window_bounds = array<i64: 8, 4>}, {pipeline_mode = #tpu.pipeline_mode<synchronous>, transform_indices = @transform_5, window_bounds = array<i64: 1, 4>}, {pipeline_mode = #tpu.pipeline_mode<synchronous>, transform_indices = @transform_6, window_bounds = array<i64: 4, 4>}, {pipeline_mode = #tpu.pipeline_mode<synchronous>, transform_indices = @transform_7, window_bounds = array<i64: 1, 4>}, {pipeline_mode = #tpu.pipeline_mode<synchronous>, transform_indices = @transform_8, window_bounds = array<i64: 100, 4>}, {pipeline_mode = #tpu.pipeline_mode<synchronous>, transform_indices = @transform_9, window_bounds = array<i64: 1, 4>}, {pipeline_mode = #tpu.pipeline_mode<synchronous>, transform_indices = @transform_10, window_bounds = array<i64: 8, 8>}, {pipeline_mode = #tpu.pipeline_mode<synchronous>, transform_indices = @transform_11, window_bounds = array<i64: 1, 8>}, {pipeline_mode = #tpu.pipeline_mode<synchronous>, transform_indices = @transform_12, window_bounds = array<i64: 1, 8>}, {transform_indices = @transform_13, window_bounds = array<i64: 1, 8, 128>}]} {
    %c0 = arith.constant 0 : index
    %c0_0 = arith.constant 0 : index
    %c0_1 = arith.constant 0 : index
    %c0_2 = arith.constant 0 : index
    %c0_3 = arith.constant 0 : index
    %0 = vector.load %arg2[%c0, %c0_0, %c0_1, %c0_2, %c0_3] : memref<1x1x12x20x8xf32, #tpu.memory_space<vmem>>, vector<1x1x12x20x8xf32>
    %1 = vector.shape_cast %0 : vector<1x1x12x20x8xf32> to vector<12x20x8xf32>
    %2 = vector.shape_cast %1 : vector<12x20x8xf32> to vector<240x8xf32>
    %c0_4 = arith.constant 0 : index
    %c0_5 = arith.constant 0 : index
    %3 = vector.load %arg4[%c0_4, %c0_5] : memref<8x4xf32, #tpu.memory_space<vmem>>, vector<8x4xf32>
    %cst = arith.constant dense<0.000000e+00> : vector<240x4xf32>
    %4 = tpu.matmul %2, %3, %cst {dimension_numbers = #tpu.dot_dimension_numbers<[1], [0], [0], [1], [0, 0, 1, 1], [], []>, precision = #tpu.contract_precision<fp32>} : vector<240x8xf32>, vector<8x4xf32>, vector<240x4xf32> -> vector<240x4xf32>
    %c0_6 = arith.constant 0 : index
    %c0_7 = arith.constant 0 : index
    %5 = vector.load %arg5[%c0_6, %c0_7] : memref<1x4xf32, #tpu.memory_space<vmem>>, vector<1x4xf32>
    %6 = vector.broadcast %5 : vector<1x4xf32> to vector<240x4xf32>
    %7 = arith.addf %4, %6 : vector<240x4xf32>
    %c0_8 = arith.constant 0 : index
    %c0_9 = arith.constant 0 : index
    %8 = vector.load %arg8[%c0_8, %c0_9] : memref<4x4xf32, #tpu.memory_space<vmem>>, vector<4x4xf32>
    %cst_10 = arith.constant dense<0.000000e+00> : vector<240x4xf32>
    %9 = tpu.matmul %7, %8, %cst_10 {dimension_numbers = #tpu.dot_dimension_numbers<[1], [0], [0], [1], [0, 0, 1, 1], [], []>, precision = #tpu.contract_precision<fp32>} : vector<240x4xf32>, vector<4x4xf32>, vector<240x4xf32> -> vector<240x4xf32>
    %c0_11 = arith.constant 0 : index
    %c0_12 = arith.constant 0 : index
    %10 = vector.load %arg9[%c0_11, %c0_12] : memref<1x4xf32, #tpu.memory_space<vmem>>, vector<1x4xf32>
    %11 = vector.broadcast %10 : vector<1x4xf32> to vector<240x4xf32>
    %12 = arith.addf %9, %11 : vector<240x4xf32>
    %c0_13 = arith.constant 0 : index
    %c0_14 = arith.constant 0 : index
    %c0_15 = arith.constant 0 : index
    %13 = vector.load %arg3[%c0_13, %c0_14, %c0_15] : memref<1x240x1xf32, #tpu.memory_space<vmem>>, vector<1x240x1xf32>
    %14 = vector.shape_cast %13 : vector<1x240x1xf32> to vector<240x1xf32>
    %15 = vector.broadcast %14 : vector<240x1xf32> to vector<240x4xf32>
    %16 = arith.mulf %12, %15 : vector<240x4xf32>
    %17 = vector.shape_cast %16 : vector<240x4xf32> to vector<12x20x4xf32>
    %18 = vector.extract_strided_slice %17 {offsets = [0, 0, 0], sizes = [8, 16, 4], strides = [1, 1, 1]} : vector<12x20x4xf32> to vector<8x16x4xf32>
    %19 = vector.extract_strided_slice %17 {offsets = [0, 1, 0], sizes = [8, 16, 4], strides = [1, 1, 1]} : vector<12x20x4xf32> to vector<8x16x4xf32>
    %20 = vector.extract_strided_slice %17 {offsets = [0, 2, 0], sizes = [8, 16, 4], strides = [1, 1, 1]} : vector<12x20x4xf32> to vector<8x16x4xf32>
    %21 = vector.extract_strided_slice %17 {offsets = [0, 3, 0], sizes = [8, 16, 4], strides = [1, 1, 1]} : vector<12x20x4xf32> to vector<8x16x4xf32>
    %22 = vector.extract_strided_slice %17 {offsets = [0, 4, 0], sizes = [8, 16, 4], strides = [1, 1, 1]} : vector<12x20x4xf32> to vector<8x16x4xf32>
    %23 = vector.extract_strided_slice %17 {offsets = [1, 0, 0], sizes = [8, 16, 4], strides = [1, 1, 1]} : vector<12x20x4xf32> to vector<8x16x4xf32>
    %24 = vector.extract_strided_slice %17 {offsets = [1, 1, 0], sizes = [8, 16, 4], strides = [1, 1, 1]} : vector<12x20x4xf32> to vector<8x16x4xf32>
    %25 = vector.extract_strided_slice %17 {offsets = [1, 2, 0], sizes = [8, 16, 4], strides = [1, 1, 1]} : vector<12x20x4xf32> to vector<8x16x4xf32>
    %26 = vector.extract_strided_slice %17 {offsets = [1, 3, 0], sizes = [8, 16, 4], strides = [1, 1, 1]} : vector<12x20x4xf32> to vector<8x16x4xf32>
    %27 = vector.extract_strided_slice %17 {offsets = [1, 4, 0], sizes = [8, 16, 4], strides = [1, 1, 1]} : vector<12x20x4xf32> to vector<8x16x4xf32>
    %28 = vector.extract_strided_slice %17 {offsets = [2, 0, 0], sizes = [8, 16, 4], strides = [1, 1, 1]} : vector<12x20x4xf32> to vector<8x16x4xf32>
    %29 = vector.extract_strided_slice %17 {offsets = [2, 1, 0], sizes = [8, 16, 4], strides = [1, 1, 1]} : vector<12x20x4xf32> to vector<8x16x4xf32>
    %30 = vector.extract_strided_slice %17 {offsets = [2, 2, 0], sizes = [8, 16, 4], strides = [1, 1, 1]} : vector<12x20x4xf32> to vector<8x16x4xf32>
    %31 = vector.extract_strided_slice %17 {offsets = [2, 3, 0], sizes = [8, 16, 4], strides = [1, 1, 1]} : vector<12x20x4xf32> to vector<8x16x4xf32>
    %32 = vector.extract_strided_slice %17 {offsets = [2, 4, 0], sizes = [8, 16, 4], strides = [1, 1, 1]} : vector<12x20x4xf32> to vector<8x16x4xf32>
    %33 = vector.extract_strided_slice %17 {offsets = [3, 0, 0], sizes = [8, 16, 4], strides = [1, 1, 1]} : vector<12x20x4xf32> to vector<8x16x4xf32>
    %34 = vector.extract_strided_slice %17 {offsets = [3, 1, 0], sizes = [8, 16, 4], strides = [1, 1, 1]} : vector<12x20x4xf32> to vector<8x16x4xf32>
    %35 = vector.extract_strided_slice %17 {offsets = [3, 2, 0], sizes = [8, 16, 4], strides = [1, 1, 1]} : vector<12x20x4xf32> to vector<8x16x4xf32>
    %36 = vector.extract_strided_slice %17 {offsets = [3, 3, 0], sizes = [8, 16, 4], strides = [1, 1, 1]} : vector<12x20x4xf32> to vector<8x16x4xf32>
    %37 = vector.extract_strided_slice %17 {offsets = [3, 4, 0], sizes = [8, 16, 4], strides = [1, 1, 1]} : vector<12x20x4xf32> to vector<8x16x4xf32>
    %38 = vector.extract_strided_slice %17 {offsets = [4, 0, 0], sizes = [8, 16, 4], strides = [1, 1, 1]} : vector<12x20x4xf32> to vector<8x16x4xf32>
    %39 = vector.extract_strided_slice %17 {offsets = [4, 1, 0], sizes = [8, 16, 4], strides = [1, 1, 1]} : vector<12x20x4xf32> to vector<8x16x4xf32>
    %40 = vector.extract_strided_slice %17 {offsets = [4, 2, 0], sizes = [8, 16, 4], strides = [1, 1, 1]} : vector<12x20x4xf32> to vector<8x16x4xf32>
    %41 = vector.extract_strided_slice %17 {offsets = [4, 3, 0], sizes = [8, 16, 4], strides = [1, 1, 1]} : vector<12x20x4xf32> to vector<8x16x4xf32>
    %42 = vector.extract_strided_slice %17 {offsets = [4, 4, 0], sizes = [8, 16, 4], strides = [1, 1, 1]} : vector<12x20x4xf32> to vector<8x16x4xf32>
    %43 = tpu.concatenate %18, %19, %20, %21, %22, %23, %24, %25, %26, %27, %28, %29, %30, %31, %32, %33 in 2 : vector<8x16x4xf32>, vector<8x16x4xf32>, vector<8x16x4xf32>, vector<8x16x4xf32>, vector<8x16x4xf32>, vector<8x16x4xf32>, vector<8x16x4xf32>, vector<8x16x4xf32>, vector<8x16x4xf32>, vector<8x16x4xf32>, vector<8x16x4xf32>, vector<8x16x4xf32>, vector<8x16x4xf32>, vector<8x16x4xf32>, vector<8x16x4xf32>, vector<8x16x4xf32> -> vector<8x16x64xf32>
    %44 = tpu.concatenate %34, %35, %36, %37, %38, %39, %40, %41, %42 in 2 : vector<8x16x4xf32>, vector<8x16x4xf32>, vector<8x16x4xf32>, vector<8x16x4xf32>, vector<8x16x4xf32>, vector<8x16x4xf32>, vector<8x16x4xf32>, vector<8x16x4xf32>, vector<8x16x4xf32> -> vector<8x16x36xf32>
    %45 = tpu.concatenate %43, %44 in 2 : vector<8x16x64xf32>, vector<8x16x36xf32> -> vector<8x16x100xf32>
    %46 = vector.shape_cast %45 : vector<8x16x100xf32> to vector<128x100xf32>
    %c0_16 = arith.constant 0 : index
    %c0_17 = arith.constant 0 : index
    %47 = vector.load %arg10[%c0_16, %c0_17] : memref<100x4xf32, #tpu.memory_space<vmem>>, vector<100x4xf32>
    %cst_18 = arith.constant dense<0.000000e+00> : vector<128x4xf32>
    %48 = tpu.matmul %46, %47, %cst_18 {dimension_numbers = #tpu.dot_dimension_numbers<[1], [0], [0], [1], [0, 0, 1, 1], [], []>, precision = #tpu.contract_precision<fp32>} : vector<128x100xf32>, vector<100x4xf32>, vector<128x4xf32> -> vector<128x4xf32>
    %c0_19 = arith.constant 0 : index
    %c0_20 = arith.constant 0 : index
    %49 = vector.load %arg11[%c0_19, %c0_20] : memref<1x4xf32, #tpu.memory_space<vmem>>, vector<1x4xf32>
    %50 = vector.broadcast %49 : vector<1x4xf32> to vector<128x4xf32>
    %51 = arith.addf %48, %50 : vector<128x4xf32>
    %52 = vector.shape_cast %7 : vector<240x4xf32> to vector<12x20x4xf32>
    %53 = vector.extract_strided_slice %52 {offsets = [2, 2, 0], sizes = [8, 16, 4], strides = [1, 1, 1]} : vector<12x20x4xf32> to vector<8x16x4xf32>
    %54 = vector.shape_cast %53 : vector<8x16x4xf32> to vector<128x4xf32>
    %55 = arith.addf %54, %51 : vector<128x4xf32>
    %56 = vector.extract_strided_slice %1 {offsets = [2, 2, 0], sizes = [8, 16, 8], strides = [1, 1, 1]} : vector<12x20x8xf32> to vector<8x16x8xf32>
    %57 = vector.shape_cast %56 : vector<8x16x8xf32> to vector<128x8xf32>
    %c0_21 = arith.constant 0 : index
    %c0_22 = arith.constant 0 : index
    %58 = vector.load %arg6[%c0_21, %c0_22] : memref<8x4xf32, #tpu.memory_space<vmem>>, vector<8x4xf32>
    %cst_23 = arith.constant dense<0.000000e+00> : vector<128x4xf32>
    %59 = tpu.matmul %57, %58, %cst_23 {dimension_numbers = #tpu.dot_dimension_numbers<[1], [0], [0], [1], [0, 0, 1, 1], [], []>, precision = #tpu.contract_precision<fp32>} : vector<128x8xf32>, vector<8x4xf32>, vector<128x4xf32> -> vector<128x4xf32>
    %c0_24 = arith.constant 0 : index
    %c0_25 = arith.constant 0 : index
    %60 = vector.load %arg7[%c0_24, %c0_25] : memref<1x4xf32, #tpu.memory_space<vmem>>, vector<1x4xf32>
    %61 = vector.broadcast %60 : vector<1x4xf32> to vector<128x4xf32>
    %62 = arith.addf %59, %61 : vector<128x4xf32>
    %63 = tpu.concatenate %55, %62 in 1 : vector<128x4xf32>, vector<128x4xf32> -> vector<128x8xf32>
    %c0_26 = arith.constant 0 : index
    %c0_27 = arith.constant 0 : index
    %64 = vector.load %arg12[%c0_26, %c0_27] : memref<8x8xf32, #tpu.memory_space<vmem>>, vector<8x8xf32>
    %cst_28 = arith.constant dense<0.000000e+00> : vector<128x8xf32>
    %65 = tpu.matmul %63, %64, %cst_28 {dimension_numbers = #tpu.dot_dimension_numbers<[1], [0], [0], [1], [0, 0, 1, 1], [], []>, precision = #tpu.contract_precision<fp32>} : vector<128x8xf32>, vector<8x8xf32>, vector<128x8xf32> -> vector<128x8xf32>
    %c0_29 = arith.constant 0 : index
    %c0_30 = arith.constant 0 : index
    %66 = vector.load %arg13[%c0_29, %c0_30] : memref<1x8xf32, #tpu.memory_space<vmem>>, vector<1x8xf32>
    %67 = vector.broadcast %66 : vector<1x8xf32> to vector<128x8xf32>
    %68 = arith.mulf %65, %67 : vector<128x8xf32>
    %c0_31 = arith.constant 0 : index
    %c0_32 = arith.constant 0 : index
    %69 = vector.load %arg14[%c0_31, %c0_32] : memref<1x8xf32, #tpu.memory_space<vmem>>, vector<1x8xf32>
    %70 = vector.broadcast %69 : vector<1x8xf32> to vector<128x8xf32>
    %71 = arith.addf %68, %70 : vector<128x8xf32>
    %cst_33 = arith.constant 0.000000e+00 : f32
    %72 = vector.broadcast %cst_33 : f32 to vector<128x8xf32>
    %73 = arith.subf %72, %71 : vector<128x8xf32>
    %74 = math.exp %73 : vector<128x8xf32>
    %cst_34 = arith.constant 1.000000e+00 : f32
    %75 = vector.broadcast %cst_34 : f32 to vector<128x8xf32>
    %76 = arith.addf %75, %74 : vector<128x8xf32>
    %77 = tpu.reciprocal %76 {approx = true} : vector<128x8xf32> -> vector<128x8xf32>
    %78 = arith.mulf %71, %77 : vector<128x8xf32>
    %79 = tpu.transpose %78, [1, 0] : vector<128x8xf32> -> vector<8x128xf32>
    %c0_35 = arith.constant 0 : index
    %c0_36 = arith.constant 0 : index
    %c0_37 = arith.constant 0 : index
    %80 = vector.load %arg15[%c0_35, %c0_36, %c0_37] : memref<1x8x128xf32, #tpu.memory_space<vmem>>, vector<1x8x128xf32>
    %81 = vector.shape_cast %80 : vector<1x8x128xf32> to vector<8x128xf32>
    %82 = vector.shape_cast %79 : vector<8x128xf32> to vector<1x8x128xf32>
    tpu.vector_store %arg15[%c0_35, %c0_36, %c0_37], %82 {strides = array<i32>} : memref<1x8x128xf32, #tpu.memory_space<vmem>>, vector<1x8x128xf32>,
    return
  }
  func.func @transform_0(%arg0: i32, %arg1: i32) -> (i32, i32, i32, i32, i32) {
    %c0_i32 = arith.constant 0 : i32
    %c0_i32_0 = arith.constant 0 : i32
    %c0_i32_1 = arith.constant 0 : i32
    %c0_i32_2 = arith.constant 0 : i32
    return %arg0, %arg1, %c0_i32, %c0_i32_0, %c0_i32_1 : i32, i32, i32, i32, i32
  }
  func.func @transform_1(%arg0: i32, %arg1: i32) -> (i32, i32, i32) {
    %c0_i32 = arith.constant 0 : i32
    %c0_i32_0 = arith.constant 0 : i32
    %c0_i32_1 = arith.constant 0 : i32
    return %arg1, %c0_i32, %c0_i32_0 : i32, i32, i32
  }
  func.func @transform_2(%arg0: i32, %arg1: i32) -> (i32, i32) {
    %c0_i32 = arith.constant 0 : i32
    %c0_i32_0 = arith.constant 0 : i32
    %c0_i32_1 = arith.constant 0 : i32
    return %c0_i32, %c0_i32_0 : i32, i32
  }
  func.func @transform_3(%arg0: i32, %arg1: i32) -> (i32, i32) {
    %c0_i32 = arith.constant 0 : i32
    %c0_i32_0 = arith.constant 0 : i32
    %c0_i32_1 = arith.constant 0 : i32
    return %c0_i32, %c0_i32_0 : i32, i32
  }
  func.func @transform_4(%arg0: i32, %arg1: i32) -> (i32, i32) {
    %c0_i32 = arith.constant 0 : i32
    %c0_i32_0 = arith.constant 0 : i32
    %c0_i32_1 = arith.constant 0 : i32
    return %c0_i32, %c0_i32_0 : i32, i32
  }
  func.func @transform_5(%arg0: i32, %arg1: i32) -> (i32, i32) {
    %c0_i32 = arith.constant 0 : i32
    %c0_i32_0 = arith.constant 0 : i32
    %c0_i32_1 = arith.constant 0 : i32
    return %c0_i32, %c0_i32_0 : i32, i32
  }
  func.func @transform_6(%arg0: i32, %arg1: i32) -> (i32, i32) {
    %c0_i32 = arith.constant 0 : i32
    %c0_i32_0 = arith.constant 0 : i32
    %c0_i32_1 = arith.constant 0 : i32
    return %c0_i32, %c0_i32_0 : i32, i32
  }
  func.func @transform_7(%arg0: i32, %arg1: i32) -> (i32, i32) {
    %c0_i32 = arith.constant 0 : i32
    %c0_i32_0 = arith.constant 0 : i32
    %c0_i32_1 = arith.constant 0 : i32
    return %c0_i32, %c0_i32_0 : i32, i32
  }
  func.func @transform_8(%arg0: i32, %arg1: i32) -> (i32, i32) {
    %c0_i32 = arith.constant 0 : i32
    %c0_i32_0 = arith.constant 0 : i32
    %c0_i32_1 = arith.constant 0 : i32
    return %c0_i32, %c0_i32_0 : i32, i32
  }
  func.func @transform_9(%arg0: i32, %arg1: i32) -> (i32, i32) {
    %c0_i32 = arith.constant 0 : i32
    %c0_i32_0 = arith.constant 0 : i32
    %c0_i32_1 = arith.constant 0 : i32
    return %c0_i32, %c0_i32_0 : i32, i32
  }
  func.func @transform_10(%arg0: i32, %arg1: i32) -> (i32, i32) {
    %c0_i32 = arith.constant 0 : i32
    %c0_i32_0 = arith.constant 0 : i32
    %c0_i32_1 = arith.constant 0 : i32
    return %c0_i32, %c0_i32_0 : i32, i32
  }
  func.func @transform_11(%arg0: i32, %arg1: i32) -> (i32, i32) {
    %c0_i32 = arith.constant 0 : i32
    %c0_i32_0 = arith.constant 0 : i32
    %c0_i32_1 = arith.constant 0 : i32
    return %c0_i32, %c0_i32_0 : i32, i32
  }
  func.func @transform_12(%arg0: i32, %arg1: i32) -> (i32, i32) {
    %c0_i32 = arith.constant 0 : i32
    %c0_i32_0 = arith.constant 0 : i32
    %c0_i32_1 = arith.constant 0 : i32
    return %c0_i32, %c0_i32_0 : i32, i32
  }
  func.func @transform_13(%arg0: i32, %arg1: i32) -> (i32, i32, i32) {
    %c0_i32 = arith.constant 0 : i32
    %c0_i32_0 = arith.constant 0 : i32
    return %arg0, %c0_i32, %arg1 : i32, i32, i32
  }
}

</mosaic_0001>

<bundles_post_ra>
// kernel: super_c3_forward.1
= control target key start
LH: loop header
LB: loop body
LE: loop exit
PB: predicated region body
PF: predicated region fallthrough
CT: control target
= control target key end

     0   :  { %s13779_s25 = smov 0   ;;  %s13781_s26 = smov 0   ;;  %s20037_s0 = inlined_call_operand.vmem [shape: f32[2,2,12,20,8], index: 0, kind: input, shape index: {}]   ;;  %s20038_s1 = inlined_call_operand.vmem [shape: f32[2,240,1], index: 1, kind: input, shape index: {}]   ;;  %s20039_s2 = inlined_call_operand.vmem [shape: f32[8,4], index: 2, kind: input, shape index: {}]   ;;  %s20040_s3 = inlined_call_operand.vmem [shape: f32[1,4], index: 3, kind: input, shape index: {}]   ;;  %s20041_s4 = inlined_call_operand.vmem [shape: f32[8,4], index: 4, kind: input, shape index: {}]   ;;  %s20042_s5 = inlined_call_operand.vmem [shape: f32[1,4], index: 5, kind: input, shape index: {}]   ;;  %s20043_s6 = inlined_call_operand.vmem [shape: f32[4,4], index: 6, kind: input, shape index: {}]   ;;  %s20044_s7 = inlined_call_operand.vmem [shape: f32[1,4], index: 7, kind: input, shape index: {}]   ;;  %s20045_s8 = inlined_call_operand.vmem [shape: f32[100,4], index: 8, kind: input, shape index: {}]   ;;  %s20046_s9 = inlined_call_operand.vmem [shape: f32[1,4], index: 9, kind: input, shape index: {}]   ;;  %s20047_s10 = inlined_call_operand.vmem [shape: f32[8,8], index: 10, kind: input, shape index: {}]   ;;  %s20048_s11 = inlined_call_operand.vmem [shape: f32[1,8], index: 11, kind: input, shape index: {}]   ;;  %s20049_s12 = inlined_call_operand.vmem [shape: f32[1,8], index: 12, kind: input, shape index: {}]   ;;  %s20050_s13 = inlined_call_operand.vmem [shape: f32[2,8,256], index: 13, kind: output, shape index: {}]  }
   0x1   :  { %20461 = sst [smem:[#allocation368_spill]] %s20037_s0  ;;  %s13783_s27 = smov 0  }
   0x2   :  { %20462 = sst [smem:[#allocation369_spill]] %s20038_s1  ;;  %s13785_s28 = smov 0  }
   0x3   :  { %20463 = sst [smem:[#allocation370_spill]] %s20039_s2  ;;  %s13787_s29 = smov 0  }
   0x4   :  { %20464 = sst [smem:[#allocation371_spill]] %s20040_s3 }
   0x5   :  { %20465 = sst [smem:[#allocation372_spill]] %s20043_s6 }
   0x6   :  { %20466 = sst [smem:[#allocation373_spill]] %s20044_s7 }
   0x7 LB: > { %s32_s30 = sadd.s32 1, %s13682_s27  ;;  %s35_s14 = sadd.s32 1, %s13686_s28  ;;  %s13690_s29 = sphi %s13787_s29, %s23_s29   ;;  %s13686_s28 = sphi %s13785_s28, %s21708_s28   ;;  %s13682_s27 = sphi %s13783_s27, %s21707_s27   ;;  %s13678_s26 = sphi %s13781_s26, %s21706_s26   ;;  %s13674_s25 = sphi %s13779_s25, %s21705_s25  }
   0x8   : > { %p33_p0 = scmp.ge.s32.totalorder %s32_s30, 2  ;;  %p10741_p1 = scmp.ge.s32.totalorder %s13690_s29, 1 }
   0x9   : > { %p417_p2 = scmp.lt.s32.totalorder %s13690_s29, 5 }
   0xa   : > { %s21710_s30 = smov (%p33_p0, %s32_s30), 0  ;;  %s21712_s14 = smov (!%p33_p0, %s35_s14), %s13686_s28 }
   0xb   : > { %20467 = sst [smem:[#allocation2_spill]] %s21710_s30  ;;  %p418_p3 = pnand %p10741_p1, %p417_p2 }
   0xc   : > { %p37_p4 = scmp.ge.s32.totalorder %s21712_s14, 2 }
   0xd   : > { %421 = sbr.rel (%p418_p3) target bundleno = 2907 (0xb5b), region = 72 }
   0xe   : > { %s21714_s14 = smov (%p37_p4, %s21712_s14), 0 }
   0xf   : > { %20468 = sst [smem:[#allocation3_spill]] %s21714_s14 }
  0x14   : > { %s20469_s2 = sld [smem:[#allocation370_spill]]  ;;  %p473_p5 = scmp.lt.s32.totalorder %s13678_s26, 1  ;;  %vm20434_vm0 = vcmask 64512   ;;  %vm4574_vm1 = vcmask 1045504   ;;  %vm2482_vm2 = vcmask 1043456   ;;  %vm20435_vm3 = vcmask 31744  }
  0x15   : > { %p475_p6 = scmp.lt.s32.totalorder %s13674_s25, 1  ;;  %s20470_s0 = sld [smem:[#allocation368_spill]]  ;;  %vm7787_vm4 = vcmask 1041408   ;;  %vm7788_vm5 = vcmask 1045508   ;;  %vm20433_vm7 = vcmask 1046528   ;;  %vm4663_vm8 = vcmask 1044480  }
  0x16   : > { %s21716_s26 = smov (!%p473_p5, %s13678_s26), 1  ;;  %s20508_s6 = sld [smem:[#allocation372_spill]]  ;;  %vm14964_vm6 = vmor %vm7787_vm4, %vm7788_vm5  ;;  %vm5739_vm9 = vcmask 1040384   ;;  %vm5416_vm10 = vcmask 97280   ;;  %vm5433_vm11 = vcmask 130048   ;;  %vm5450_vm12 = vcmask 162816  }
  0x17   : > { %s21718_s25 = smov (!%p475_p6, %s13674_s25), 1  ;;  %s13467_s17 = smul.u32 72, %s21716_s26  ;;  %vm5467_vm13 = vcmask 195584   ;;  %vm5484_vm14 = vcmask 228352   ;;  %vm5501_vm15 = vcmask 261120   ;;  %vm5552_vm4 = vcmask 359424  }
  0x18   : > { %s13466_s18 = smul.u32 36, %s21718_s25  ;;  %s20520_s3 = sld [smem:[#allocation371_spill]]  ;;  %vm5569_vm5 = vcmask 392192  }
  0x19   : > { %s20689_s1 = sld [smem:[#allocation369_spill]]  ;;  %s20728_s7 = sld [smem:[#allocation373_spill]] }
  0x1a   : > { %v591_v0 = vld [vmem:[%s20469_s2] sm:$0xff]  ;;  %s479_s19 = sadd.s32 %s13467_s17, %s13466_s18  ;;  %s13468_s18 = smul.u32 240, %s21718_s25 }
  0x1b   : > { %v13812_v1 = vand.u32 4294901760, %v591_v0  ;;  %s10742_s20 = sshll.u32 %s479_s19, 3  ;;  %s20312_s15 = smov 16  }
  0x1c   : > { %s13831_s23 = scalar_lea.vmem %s20470_s0, %s10742_s20  ;;  %s20291_s16 = smov 4  }
  0x1d   : > { %v1058_v2 = vsub.f32 %v591_v0, %v13812_v1  ;;  %11512 = vmatprep.subr.mxu1 %v13812_v1  ;;  %v495_v6 = vld [vmem:[%s13831_s23] sm:$0xff]  ;;  %v496_v7 = vld [vmem:[%s13831_s23 + $0x8] sm:$0xff]  ;;  %v497_v8 = vld [vmem:[%s13831_s23 + $0x10] sm:$0xf]  ;;  %s20295_s17 = smov 8   ;;  %s20307_s19 = smov 20  }
  0x1e   : > { %11513 = vmatpush3.msra.mxu1 %v13812_v1  ;;  %v567_v9 = vcombine.high %v495_v6, %v495_v6  ;;  %v568_v10 = vcombine.high %v496_v7, %v496_v7  ;;  %v498_v11 = vld [vmem:[%s13831_s23 + $0x18] sm:$0xff]  ;;  %v499_v12 = vld [vmem:[%s13831_s23 + $0x20] sm:$0xff]  ;;  %v500_v13 = vld [vmem:[%s13831_s23 + $0x28] sm:$0xf]  ;;  %s20299_s20 = smov 36   ;;  %s20261_s22 = smov 24  }
  0x1f   : > { %v13822_v3 = vand.u32 4294901760, %v1058_v2  ;;  %v601_v14 = vcombine.low %v497_v8, %v498_v11  ;;  %v569_v15 = vcombine.high %v498_v11, %v498_v11  ;;  %v570_v16 = vcombine.high %v499_v12, %v499_v12  ;;  %v501_v17 = vld [vmem:[%s13831_s23 + $0x30] sm:$0xff]  ;;  %v13844_v18 = vld [vmem:[%s13831_s23 + $0x38] sm:$0xff]  ;;  %v504_v33 = vld [vmem:[%s13831_s23 + $0x48] sm:$0xff]  ;;  %s15170_s21 = scalar_lea.vmem %s20689_s1, %s13468_s18  ;;  %s20301_s18 = smov 12  }
  0x20   : > { %20471 = vst [vmem:[#allocation4_spill] sm:$0xff] %v13844_v18  ;;  %v599_v19 = vcombine.low %v495_v6, %v567_v9  ;;  %v600_v20 = vcombine.low %v496_v7, %v568_v10  ;;  %v571_v21 = vcombine.high %v501_v17, %v501_v17  ;;  %v572_v25 = vcombine.high %v13844_v18, %v13844_v18  ;;  %v503_v36 = vld [vmem:[%s13831_s23 + $0x40] sm:$0xf]  ;;  %v505_v37 = vld [vmem:[%s13831_s23 + $0x50] sm:$0xff]  ;;  %v506_v50 = vld [vmem:[%s13831_s23 + $0x58] sm:$0xf] }
  0x21   : > { %v1060_v4 = vsub.f32 %v1058_v2, %v13822_v3  ;;  %v13847_v22 = vsel %vm20434_vm0, %v601_v14, 0  ;;  %v602_v23 = vcombine.low %v569_v15, %v499_v12  ;;  %v603_v24 = vcombine.low %v570_v16, %v500_v13  ;;  %v507_v42 = vld [vmem:[%s13831_s23 + $0x60] sm:$0xff]  ;;  %v508_v51 = vld [vmem:[%s13831_s23 + $0x68] sm:$0xff]  ;;  %v510_v11 = vld [vmem:[%s13831_s23 + $0x78] sm:$0xff]  ;;  %s20271_s24 = smov 28   ;;  %s20801_s0 = smov 44  }
  0x22   : > { %v630_v26 = vsel %vm20434_vm0, %v599_v19, 0  ;;  %v632_v27 = vsel %vm20434_vm0, %v600_v20, 0  ;;  %v13854_v28 = vand.u32 4294901760, %v13847_v22  ;;  %v604_v32 = vcombine.low %v501_v17, %v571_v21  ;;  %v509_v12 = vld [vmem:[%s13831_s23 + $0x70] sm:$0xf]  ;;  %v511_v14 = vld [vmem:[%s13831_s23 + $0x80] sm:$0xff] }
  0x23   : > { %v13826_v5 = vand.u32 4294901760, %v1060_v4  ;;  %v13856_v29 = vand.u32 4294901760, %v630_v26  ;;  %v13858_v30 = vand.u32 4294901760, %v632_v27  ;;  %v636_v31 = vsel %vm20434_vm0, %v602_v23, 0  ;;  %v513_v20 = vld [vmem:[%s13831_s23 + $0x90] sm:$0xff]  ;;  %s20802_s1 = smov 20  }
  0x24   : > { %20472 = vst [vmem:[#allocation5_spill] sm:$0xff] %v13854_v28  ;;  %v638_v34 = vsel %vm20434_vm0, %v603_v24, 0  ;;  %v605_v35 = vcombine.low %v13844_v18, %v572_v25  ;;  %v20051_v38 = vrot.slane %v13844_v18, 2  ;;  %v13869_v39 = vand.u32 4294901760, %v636_v31  ;;  %v512_v23 = vld [vmem:[%s13831_s23 + $0x88] sm:$0xf] }
  0x25   : > { %11559 = vmatprep.subr.mxu0 %v13826_v5  ;;  %12832 = vmatprep.subr.mxu1 %v13826_v5  ;;  %v8009_v40 = vrot.slane %v503_v36, 2  ;;  %v573_v41 = vcombine.high %v504_v33, %v504_v33  ;;  %v13873_v43 = vand.u32 4294901760, %v638_v34  ;;  %v640_v44 = vsel %vm20434_vm0, %v604_v32, 0  ;;  %s20807_s2 = smov 48  }
  0x26   : > { %11560 = vmatpush3.msra.mxu0 %v13826_v5  ;;  %11561 = vmatprep.mubr.f32.mxu0 %v13856_v29  ;;  %20473 = vst [vmem:[#allocation6_spill] sm:$0xff] %v13869_v39  ;;  %v606_v45 = vcombine.low %v503_v36, %v504_v33  ;;  %v574_v46 = vcombine.high %v505_v37, %v505_v37  ;;  %v642_v47 = vsel %vm20434_vm0, %v605_v35, 0  ;;  %v13886_v53 = vand.u32 4294901760, %v640_v44  ;;  %v516_v35 = vld [vmem:[%s13831_s23 + $0xa8] sm:$0xff] }
  0x27   : > { %11606 = vmatprep.subr.mxu0 %v1058_v2  ;;  %11562 = vmatmul.mubr.f32.vlgmr.msra.gmra.mrb[0].mxu0 %v13858_v30  ;;  %20474 = vst [vmem:[#allocation7_spill] sm:$0xff] %v13873_v43  ;;  %v13880_v48 = vsel %vm4574_vm1, %v20051_v38, %v8009_v40  ;;  %v607_v49 = vcombine.low %v573_v41, %v505_v37  ;;  %v13889_v54 = vand.u32 4294901760, %v642_v47 }
  0x28   : > { %11607 = vmatpush3.msra.mxu0 %v1058_v2  ;;  %11564 = vmatprep.mubr.f32.mxu0 %v13854_v28  ;;  %20475 = vst [vmem:[#allocation8_spill] sm:$0xff] %v13880_v48  ;;  %v575_v52 = vcombine.high %v507_v42, %v507_v42  ;;  %20476 = vst [vmem:[#allocation9_spill] sm:$0xff] %v13886_v53  ;;  %v644_v55 = vsel %vm20434_vm0, %v606_v45, 0  ;;  %v608_v56 = vcombine.low %v574_v46, %v506_v50  ;;  %v517_v46 = vld [vmem:[%s13831_s23 + $0xb0] sm:$0xff] }
  0x29   : > { %11653 = vmatprep.subr.mxu0 %v13812_v1  ;;  %20477 = vst [vmem:[#allocation10_spill] sm:$0xff] %v13889_v54  ;;  %v576_v57 = vcombine.high %v508_v51, %v508_v51  ;;  %v646_v58 = vsel %vm20434_vm0, %v607_v49, 0  ;;  %v13894_v60 = vand.u32 4294901760, %v644_v55  ;;  %v13913_v8 = vsub.f32 %v630_v26, %v13856_v29 }
  0x2a   : > { %v609_v59 = vcombine.low %v507_v42, %v575_v52  ;;  %v13897_v61 = vand.u32 4294901760, %v646_v58  ;;  %v648_v62 = vsel %vm20434_vm0, %v608_v56, 0  ;;  %v13916_v9 = vsub.f32 %v632_v27, %v13858_v30  ;;  %v514_v27 = vld [vmem:[%s13831_s23 + $0x98] sm:$0xff]  ;;  %v519_v56 = vld [vmem:[%s13831_s23 + $0xc0] sm:$0xff] }
  0x2b   : > { %11565 = vmatmul.mubr.f32.gmra.mrb[2].mxu0 %v13869_v39  ;;  %20478 = vst [vmem:[#allocation11_spill] sm:$0xff] %v13894_v60  ;;  %v610_v63 = vcombine.low %v508_v51, %v576_v57  ;;  %v13902_v2 = vand.u32 4294901760, %v648_v62  ;;  %v13922_v10 = vsub.f32 %v13847_v22, %v13854_v28  ;;  %v13928_v13 = vsub.f32 %v636_v31, %v13869_v39 }
  0x2c   : > { %11567 = vmatprep.mubr.f32.mxu0 %v13873_v43  ;;  %20479 = vst [vmem:[#allocation12_spill] sm:$0xff] %v13897_v61  ;;  %v650_v0 = vsel %vm20434_vm0, %v609_v59, 0  ;;  %v577_v15 = vcombine.high %v510_v11, %v510_v11  ;;  %v13934_v16 = vsub.f32 %v638_v34, %v13873_v43  ;;  %v611_v17 = vcombine.low %v509_v12, %v510_v11  ;;  %v515_v34 = vld [vmem:[%s13831_s23 + $0xa0] sm:$0xf] }
  0x2d   : > { %20480 = vst [vmem:[#allocation13_spill] sm:$0xff] %v13902_v2  ;;  %v13905_v4 = vand.u32 4294901760, %v650_v0  ;;  %v652_v6 = vsel %vm20434_vm0, %v610_v63, 0  ;;  %v578_v19 = vcombine.high %v511_v14, %v511_v14  ;;  %v13940_v21 = vsub.f32 %v640_v44, %v13886_v53 }
  0x2e   : > { %v13909_v7 = vand.u32 4294901760, %v652_v6  ;;  %v612_v22 = vcombine.low %v577_v15, %v511_v14  ;;  %v13945_v24 = vsub.f32 %v642_v47, %v13889_v54  ;;  %v654_v25 = vsel %vm20434_vm0, %v611_v17, 0 }
  0x2f   : > { %11568 = vmatmul.mubr.f32.gmra.mrb[4].mxu0 %v13886_v53  ;;  %20481 = vst [vmem:[#allocation14_spill] sm:$0xff] %v13905_v4  ;;  %v579_v26 = vcombine.high %v513_v20, %v513_v20  ;;  %v613_v31 = vcombine.low %v578_v19, %v512_v23  ;;  %v13951_v32 = vsub.f32 %v644_v55, %v13894_v60  ;;  %v13960_v37 = vand.u32 4294901760, %v654_v25 }
  0x30   : > { %11570 = vmatprep.mubr.f32.mxu0 %v13889_v54  ;;  %20482 = vst [vmem:[#allocation15_spill] sm:$0xff] %v13909_v7  ;;  %v656_v33 = vsel %vm20434_vm0, %v612_v22, 0  ;;  %v13958_v36 = vsub.f32 %v646_v58, %v13897_v61  ;;  %v580_v40 = vcombine.high %v514_v27, %v514_v27  ;;  %v616_v45 = vcombine.low %v515_v34, %v516_v35  ;;  %v520_v22 = vld [vmem:[%s13831_s23 + $0xc8] sm:$0xff] }
  0x31   : > { %v614_v41 = vcombine.low %v513_v20, %v579_v26  ;;  %v13962_v42 = vand.u32 4294901760, %v656_v33  ;;  %v658_v44 = vsel %vm20434_vm0, %v613_v31, 0  ;;  %v13968_v47 = vsub.f32 %v648_v62, %v13902_v2 }
  0x32   : > { %v581_v49 = vcombine.high %v516_v35, %v516_v35  ;;  %v13972_v50 = vsub.f32 %v650_v0, %v13905_v4  ;;  %v13975_v51 = vsub.f32 %v652_v6, %v13909_v7  ;;  %v13978_v52 = vsub.f32 %v654_v25, %v13960_v37  ;;  %v518_v6 = vld [vmem:[%s13831_s23 + $0xb8] sm:$0xf] }
  0x33   : > { %11571 = vmatmul.mubr.f32.gmra.mrb[6].mxu0 %v13894_v60  ;;  %v615_v55 = vcombine.low %v514_v27, %v580_v40  ;;  %v13981_v57 = vand.u32 4294901760, %v658_v44  ;;  %v660_v58 = vsel %vm20434_vm0, %v614_v41, 0  ;;  %v582_v59 = vcombine.high %v517_v46, %v517_v46 }
  0x34   : > { %11573 = vmatprep.mubr.f32.mxu0 %v13897_v61  ;;  %v20058_v62 = vand.u32 4294901760, %v13913_v8  ;;  %v13986_v63 = vsub.f32 %v656_v33, %v13962_v42  ;;  %v664_v0 = vsel %vm20434_vm0, %v616_v45, 0  ;;  %v20057_v11 = vand.u32 4294901760, %v13916_v9 }
  0x35   : > { %v20055_v12 = vand.u32 4294901760, %v13922_v10  ;;  %v617_v14 = vcombine.low %v581_v49, %v517_v46  ;;  %v583_v15 = vcombine.high %v519_v56, %v519_v56  ;;  %v20054_v17 = vand.u32 4294901760, %v13928_v13 }
  0x36   : > { %v759_v19 = vsub.f32 %v13913_v8, %v20058_v62  ;;  %v13998_v20 = vand.u32 4294901760, %v660_v58  ;;  %v20052_v23 = vand.u32 4294901760, %v13934_v16  ;;  %v769_v25 = vsub.f32 %v13916_v9, %v20057_v11 }
  0x37   : > { %11574 = vmatmul.mubr.f32.gmra.mrb[8].mxu0 %v13902_v2  ;;  %v779_v26 = vsub.f32 %v13922_v10, %v20055_v12  ;;  %v662_v27 = vsel %vm20434_vm0, %v615_v55, 0  ;;  %v618_v31 = vcombine.low %v582_v59, %v518_v6  ;;  %v789_v34 = vsub.f32 %v13928_v13, %v20054_v17  ;;  %v521_v59 = vld [vmem:[%s13831_s23 + $0xd0] sm:$0xf]  ;;  %v522_v6 = vld [vmem:[%s13831_s23 + $0xd8] sm:$0xff] }
  0x38   : > { %11576 = vmatprep.mubr.f32.mxu0 %v13905_v4  ;;  %v760_v33 = vand.u32 4294901760, %v759_v19  ;;  %v20053_v35 = vand.u32 4294901760, %v13940_v21  ;;  %v770_v40 = vand.u32 4294901760, %v769_v25  ;;  %v799_v45 = vsub.f32 %v13934_v16, %v20052_v23  ;;  %v523_v23 = vld [vmem:[%s13831_s23 + $0xe0] sm:$0xff] }
  0x39   : > { %v780_v41 = vand.u32 4294901760, %v779_v26  ;;  %v666_v46 = vsel %vm20434_vm0, %v617_v14, 0  ;;  %v619_v49 = vcombine.low %v519_v56, %v583_v15  ;;  %v584_v55 = vcombine.high %v520_v22, %v520_v22 }
  0x3a   : > { %v20056_v19 = vand.u32 4294901760, %v13945_v24  ;;  %11514 = vmatprep.mubr.f32.mxu1 %v760_v33  ;;  %v14023_v25 = vsub.f32 %v658_v44, %v13981_v57  ;;  %v14025_v26 = vand.u32 4294901760, %v662_v27  ;;  %v790_v38 = vand.u32 4294901760, %v789_v34 }
  0x3b   : > { %11577 = vmatmul.mubr.f32.gmra.mrb[10].mxu0 %v13909_v7  ;;  %11515 = vmatmul.mubr.f32.vlgmr.msra.gmra.mrb[0].mxu1 %v770_v40  ;;  %v809_v14 = vsub.f32 %v13940_v21, %v20053_v35  ;;  %v14031_v56 = vsub.f32 %v660_v58, %v13998_v20  ;;  %v14033_v15 = vand.u32 4294901760, %v664_v0  ;;  %v800_v33 = vand.u32 4294901760, %v799_v45 }
  0x3c   : > { %11608 = vmatprep.mubr.f32.mxu0 %v13913_v8  ;;  %11517 = vmatprep.mubr.f32.mxu1 %v780_v41  ;;  %v819_v44 = vsub.f32 %v13945_v24, %v20056_v19  ;;  %v14040_v34 = vand.u32 4294901760, %v666_v46  ;;  %v668_v40 = vsel %vm20434_vm0, %v618_v31, 0  ;;  %v621_v35 = vcombine.low %v521_v59, %v522_v6  ;;  %v525_v31 = vld [vmem:[%s13831_s23 + $0xf0] sm:$0xff] }
  0x3d   : > { %12833 = vmatpush3.msra.mxu1 %v13826_v5  ;;  %v20059_v58 = vand.u32 4294901760, %v13951_v32  ;;  %v670_v41 = vsel %vm20434_vm0, %v619_v49, 0  ;;  %v620_v45 = vcombine.low %v520_v22, %v584_v55  ;;  %v585_v17 = vcombine.high %v522_v6, %v522_v6  ;;  %v524_v49 = vld [vmem:[%s13831_s23 + $0xe8] sm:$0xf]  ;;  %v526_v55 = vld [vmem:[%s13831_s23 + $0xf8] sm:$0xff] }
  0x3e   : > { %v20061_v12 = vand.u32 4294901760, %v13958_v36  ;;  %v14049_v5 = vsub.f32 %v662_v27, %v14025_v26  ;;  %v586_v19 = vcombine.high %v523_v23, %v523_v23  ;;  %v810_v59 = vand.u32 4294901760, %v809_v14 }
  0x3f   : > { %11609 = vmatmul.mubr.f32.vlgmr.msra.gmra.mrb[0].mxu0 %v13916_v9  ;;  %11518 = vmatmul.mubr.f32.gmra.mrb[2].mxu1 %v790_v38  ;;  %v829_v11 = vsub.f32 %v13951_v32, %v20059_v58  ;;  %v14056_v62 = vsub.f32 %v664_v0, %v14033_v15  ;;  %v14058_v22 = vand.u32 4294901760, %v668_v40  ;;  %v820_v6 = vand.u32 4294901760, %v819_v44 }
  0x40   : > { %11654 = vmatpush3.msra.mxu0 %v13812_v1  ;;  %11611 = vmatprep.mubr.f32.mxu0 %v13922_v10  ;;  %v839_v27 = vsub.f32 %v13958_v36, %v20061_v12  ;;  %v14066_v38 = vsub.f32 %v666_v46, %v14040_v34  ;;  %v14068_v14 = vand.u32 4294901760, %v670_v41  ;;  %v674_v58 = vsel %vm20434_vm0, %v621_v35, 0  ;;  %v528_v46 = vld [vmem:[%s13831_s23 + $0x108] sm:$0xff] }
  0x41   : > { %11700 = vmatprep.subr.mxu0 %v13822_v3  ;;  %11520 = vmatprep.mubr.f32.mxu1 %v800_v33  ;;  %v20068_v0 = vand.u32 4294901760, %v13968_v47  ;;  %v672_v48 = vsel %vm20434_vm0, %v620_v45, 0  ;;  %v622_v18 = vcombine.low %v585_v17, %v523_v23  ;;  %v587_v33 = vcombine.high %v525_v31, %v525_v31 }
  0x42   : > { %v20071_v44 = vand.u32 4294901760, %v13972_v50  ;;  %v623_v12 = vcombine.low %v586_v19, %v524_v49  ;;  %v588_v7 = vcombine.high %v526_v55, %v526_v55  ;;  %v830_v4 = vand.u32 4294901760, %v829_v11 }
  0x43   : > { %11612 = vmatmul.mubr.f32.gmra.mrb[2].mxu0 %v13928_v13  ;;  %11521 = vmatmul.mubr.f32.gmra.mrb[4].mxu1 %v810_v59  ;;  %v849_v35 = vsub.f32 %v13968_v47, %v20068_v0  ;;  %v14080_v2 = vand.u32 4294901760, %v674_v58  ;;  %v840_v17 = vand.u32 4294901760, %v839_v27  ;;  %v14086_v19 = vsub.f32 %v668_v40, %v14058_v22  ;;  %v527_v27 = vld [vmem:[%s13831_s23 + $0x100] sm:$0xf] }
  0x44   : > { %11614 = vmatprep.mubr.f32.mxu0 %v13934_v16  ;;  %11523 = vmatprep.mubr.f32.mxu1 %v820_v6  ;;  %v859_v23 = vsub.f32 %v13972_v50, %v20071_v44  ;;  %v14089_v45 = vsub.f32 %v670_v41, %v14068_v14  ;;  %v14091_v11 = vand.u32 4294901760, %v672_v48  ;;  %v20079_v59 = vand.u32 4294901760, %v13975_v51  ;;  %v529_v41 = vld [vmem:[%s13831_s23 + $0x110] sm:$0xff] }
  0x45   : > { %v676_v49 = vsel %vm20434_vm0, %v622_v18, 0  ;;  %v624_v6 = vcombine.low %v525_v31, %v587_v33  ;;  %v589_v0 = vcombine.high %v528_v46, %v528_v46  ;;  %v20078_v61 = vand.u32 4294901760, %v13978_v52 }
  0x46   : > { %v678_v40 = vsel %vm20434_vm0, %v623_v12, 0  ;;  %v625_v44 = vcombine.low %v526_v55, %v588_v7  ;;  %v850_v60 = vand.u32 4294901760, %v849_v35  ;;  %v869_v54 = vsub.f32 %v13975_v51, %v20079_v59 }
  0x47   : > { %11615 = vmatmul.mubr.f32.gmra.mrb[4].mxu0 %v13940_v21  ;;  %11524 = vmatmul.mubr.f32.gmra.mrb[6].mxu1 %v830_v4  ;;  %v14105_v53 = vsub.f32 %v674_v58, %v14080_v2  ;;  %v860_v18 = vand.u32 4294901760, %v859_v23  ;;  %v879_v31 = vsub.f32 %v13978_v52, %v20078_v61  ;;  %v14111_v12 = vsub.f32 %v672_v48, %v14091_v11 }
  0x48   : > { %11617 = vmatprep.mubr.f32.mxu0 %v13945_v24  ;;  %11526 = vmatprep.mubr.f32.mxu1 %v840_v17  ;;  %v14113_v7 = vand.u32 4294901760, %v676_v49  ;;  %v626_v4 = vcombine.low %v527_v27, %v528_v46  ;;  %v20081_v55 = vand.u32 4294901760, %v13986_v63  ;;  %v14117_v33 = vand.u32 4294901760, %v678_v40  ;;  %v530_v27 = vld [vmem:[%s13831_s23 + $0x118] sm:$0xf] }
  0x49   : > { %v627_v58 = vcombine.low %v589_v0, %v529_v41  ;;  %v590_v35 = vcombine.high %v529_v41, %v529_v41  ;;  %v20080_v17 = vand.u32 4294901760, %v14023_v25  ;;  %v680_v23 = vsel %vm20434_vm0, %v624_v6, 0 }
  0x4a   : > { %v682_v48 = vsel %vm20434_vm0, %v625_v44, 0  ;;  %v870_v61 = vand.u32 4294901760, %v869_v54  ;;  %v889_v46 = vsub.f32 %v13986_v63, %v20081_v55  ;;  %v880_v59 = vand.u32 4294901760, %v879_v31 }
  0x4b   : > { %11618 = vmatmul.mubr.f32.gmra.mrb[6].mxu0 %v13951_v32  ;;  %11527 = vmatmul.mubr.f32.gmra.mrb[8].mxu1 %v850_v60  ;;  %v899_v0 = vsub.f32 %v14023_v25, %v20080_v17  ;;  %v14131_v41 = vsub.f32 %v676_v49, %v14113_v7  ;;  %v684_v6 = vsel %vm20434_vm0, %v626_v4, 0  ;;  %v20087_v44 = vand.u32 4294901760, %v14031_v56 }
  0x4c   : > { %11620 = vmatprep.mubr.f32.mxu0 %v13958_v36  ;;  %11529 = vmatprep.mubr.f32.mxu1 %v860_v18  ;;  %v14136_v54 = vand.u32 4294901760, %v680_v23  ;;  %v14138_v60 = vand.u32 4294901760, %v682_v48  ;;  %v686_v18 = vsel %vm20434_vm0, %v627_v58, 0  ;;  %v20086_v31 = vand.u32 4294901760, %v14049_v5 }
  0x4d   : > { %v14144_v17 = vsub.f32 %v678_v40, %v14117_v33  ;;  %v628_v49 = vcombine.low %v590_v35, %v530_v27  ;;  %v890_v4 = vand.u32 4294901760, %v889_v46  ;;  %v909_v55 = vsub.f32 %v14031_v56, %v20087_v44 }
  0x4e   : > { %v900_v43 = vand.u32 4294901760, %v899_v0  ;;  %v919_v58 = vsub.f32 %v14049_v5, %v20086_v31  ;;  %v20091_v39 = vand.u32 4294901760, %v14056_v62  ;;  %v14155_v40 = vsub.f32 %v680_v23, %v14136_v54 }
  0x4f   : > { %11621 = vmatmul.mubr.f32.gmra.mrb[8].mxu0 %v13968_v47  ;;  %11530 = vmatmul.mubr.f32.gmra.mrb[10].mxu1 %v870_v61  ;;  %v14157_v35 = vand.u32 4294901760, %v684_v6  ;;  %v14159_v61 = vand.u32 4294901760, %v686_v18  ;;  %v20090_v46 = vand.u32 4294901760, %v14066_v38  ;;  %v688_v27 = vsel %vm20434_vm0, %v628_v49, 0 }
  0x50   : > { %11623 = vmatprep.mubr.f32.mxu0 %v13972_v50  ;;  %11532 = vmatprep.mubr.f32.mxu1 %v880_v59  ;;  %v14164_v59 = vsub.f32 %v682_v48, %v14138_v60  ;;  %v910_v0 = vand.u32 4294901760, %v909_v55  ;;  %v929_v23 = vsub.f32 %v14056_v62, %v20091_v39  ;;  %v920_v31 = vand.u32 4294901760, %v919_v58 }
  0x51   : > { %v939_v44 = vsub.f32 %v14066_v38, %v20090_v46  ;;  %v20093_v28 = vand.u32 4294901760, %v14086_v19  ;;  %v14176_v48 = vsub.f32 %v684_v6, %v14157_v35  ;;  %v14178_v49 = vand.u32 4294901760, %v688_v27 }
  0x52   : > { %v20092_v55 = vand.u32 4294901760, %v14089_v45 }
  0x53   : > { %11624 = vmatmul.mubr.f32.gmra.mrb[10].mxu0 %v13975_v51  ;;  %11533 = vmatmul.mubr.f32.gmra.mrb[12].mxu1 %v890_v4  ;;  %v930_v4 = vand.u32 4294901760, %v929_v23  ;;  %v949_v58 = vsub.f32 %v14086_v19, %v20093_v28  ;;  %v940_v46 = vand.u32 4294901760, %v939_v44  ;;  %v14193_v39 = vsub.f32 %v688_v27, %v14178_v49 }
  0x54   : > { %11626 = vmatprep.mubr.f32.mxu0 %v13978_v52  ;;  %11535 = vmatprep.mubr.f32.mxu1 %v900_v43  ;;  %v14183_v43 = vsub.f32 %v686_v18, %v14159_v61  ;;  %v959_v6 = vsub.f32 %v14089_v45, %v20092_v55  ;;  %v20095_v18 = vand.u32 4294901760, %v14111_v12  ;;  %v988_v27 = vand.u32 4294901760, %v14131_v41 }
  0x55   : > { %v950_v23 = vand.u32 4294901760, %v949_v58  ;;  %v20483_v28 = vand.u32 4294901760, %v13913_v8  ;;  %v1008_v8 = vand.u32 4294901760, %v14155_v40 }
  0x56   : > { %v969_v44 = vsub.f32 %v14111_v12, %v20095_v18  ;;  %v989_v58 = vsub.f32 %v14131_v41, %v988_v27  ;;  %v20484_v18 = vand.u32 4294901760, %v13916_v9 }
  0x57   : > { %11627 = vmatmul.mubr.f32.gmra.mrb[12].mxu0 %v13986_v63  ;;  %11536 = vmatmul.mubr.f32.gmra.mrb[14].mxu1 %v910_v0  ;;  %v20094_v0 = vand.u32 4294901760, %v14105_v53 }
  0x58   : > { %11629 = vmatprep.mubr.f32.mxu0 %v14023_v25  ;;  %11538 = vmatprep.mubr.f32.mxu1 %v920_v31  ;;  %v960_v31 = vand.u32 4294901760, %v959_v6 }
  0x59   : > { %v979_v55 = vsub.f32 %v14105_v53, %v20094_v0 }
  0x5b   : > { %11630 = vmatmul.mubr.f32.gmra.mrb[14].mxu0 %v14031_v56  ;;  %11539 = vmatmul.mubr.f32.gmra.mrb[16].mxu1 %v930_v4  ;;  %v998_v4 = vand.u32 4294901760, %v14144_v17  ;;  %v980_v6 = vand.u32 4294901760, %v979_v55  ;;  %v990_v55 = vand.u32 4294901760, %v989_v58 }
  0x5c   : > { %11632 = vmatprep.mubr.f32.mxu0 %v14049_v5  ;;  %11541 = vmatprep.mubr.f32.mxu1 %v940_v46  ;;  %v970_v46 = vand.u32 4294901760, %v969_v44  ;;  %v20487_v44 = vand.u32 4294901760, %v13934_v16 }
  0x5d   : > { %v999_v0 = vsub.f32 %v14144_v17, %v998_v4 }
  0x5f   : > { %11633 = vmatmul.mubr.f32.gmra.mrb[16].mxu0 %v14056_v62  ;;  %11542 = vmatmul.mubr.f32.gmra.mrb[18].mxu1 %v950_v23  ;;  %v20096_v23 = vand.u32 4294901760, %v14164_v59  ;;  %v1000_v9 = vand.u32 4294901760, %v999_v0 }
  0x60   : > { %11635 = vmatprep.mubr.f32.mxu0 %v14066_v38  ;;  %11544 = vmatprep.mubr.f32.mxu1 %v960_v31  ;;  %v1009_v31 = vsub.f32 %v14155_v40, %v1008_v8 }
  0x62   : > { %v1010_v58 = vand.u32 4294901760, %v1009_v31  ;;  %v20491_v31 = vand.u32 4294901760, %v13958_v36  ;;  %v20496_v36 = vand.u32 4294901760, %v13986_v63  ;;  %v20501_v63 = vand.u32 4294901760, %v14066_v38  ;;  %v20507_v38 = vld [vmem:[#allocation5_spill] sm:$0xff] }
  0x63   : > { %11636 = vmatmul.mubr.f32.gmra.mrb[18].mxu0 %v14086_v19  ;;  %11545 = vmatmul.mubr.f32.gmra.mrb[20].mxu1 %v970_v46  ;;  %v1038_v46 = vand.u32 4294901760, %v14183_v43 }
  0x64   : > { %11638 = vmatprep.mubr.f32.mxu0 %v14089_v45  ;;  %11547 = vmatprep.mubr.f32.mxu1 %v980_v6 }
  0x65   : > { %v1039_v6 = vsub.f32 %v14183_v43, %v1038_v46 }
  0x67   : > { %11639 = vmatmul.mubr.f32.gmra.mrb[20].mxu0 %v14111_v12  ;;  %11548 = vmatmul.mubr.f32.gmra.mrb[22].mxu1 %v990_v55  ;;  %v1040_v55 = vand.u32 4294901760, %v1039_v6 }
  0x68   : > { %11641 = vmatprep.mubr.f32.mxu0 %v14105_v53  ;;  %11550 = vmatprep.mubr.f32.mxu1 %v1000_v9 }
  0x6b   : > { %11642 = vmatmul.mubr.f32.gmra.mrb[22].mxu0 %v14131_v41  ;;  %11551 = vmatmul.mubr.f32.gmra.mrb[24].mxu1 %v1010_v58  ;;  %v20511_v41 = vld [vmem:[#allocation7_spill] sm:$0xff] }
  0x6c   : > { %11644 = vmatprep.mubr.f32.mxu0 %v14144_v17 }
  0x6f   : > { %11645 = vmatmul.mubr.f32.gmra.mrb[24].mxu0 %v14155_v40  ;;  %v20513_v40 = vld [vmem:[#allocation10_spill] sm:$0xff] }
  0x70   : > { %11647 = vmatprep.mubr.f32.mxu0 %v14164_v59 }
  0x73   : > { %11648 = vmatmul.mubr.f32.gmra.mrb[26].mxu0 %v14176_v48 }
  0x74   : > { %11650 = vmatprep.mubr.f32.mxu0 %v14183_v43  ;;  %v20492_v43 = vand.u32 4294901760, %v13968_v47  ;;  %v20497_v47 = vand.u32 4294901760, %v14023_v25  ;;  %v20502_v25 = vand.u32 4294901760, %v14086_v19  ;;  %v2383_v19 = vld [vmem:[%s20508_s6] sm:$0xf]  ;;  %s20824_s6 = smov 56  }
  0x77   : > { %11651 = vmatmul.mubr.f32.gmra.mrb[28].mxu0 %v14193_v39 }
  0x78   : > { %11655 = vmatprep.mubr.f32.mxu0 %v20483_v28  ;;  %v20485_v28 = vand.u32 4294901760, %v13922_v10  ;;  %v1028_v10 = vand.u32 4294901760, %v14176_v48 }
  0x7b   : > { %11656 = vmatmul.mubr.f32.vlgmr.msra.gmra.mrb[0].mxu0 %v20484_v18  ;;  %v1019_v18 = vsub.f32 %v14164_v59, %v20096_v23  ;;  %v20488_v23 = vand.u32 4294901760, %v13940_v21 }
  0x7c   : > { %11701 = vmatpush3.msra.mxu0 %v13822_v3  ;;  %11658 = vmatprep.mubr.f32.mxu0 %v20485_v28  ;;  %v20486_v3 = vand.u32 4294901760, %v13928_v13  ;;  %v1029_v28 = vsub.f32 %v14176_v48, %v1028_v10  ;;  %v1048_v13 = vand.u32 4294901760, %v14193_v39  ;;  %v20490_v48 = vand.u32 4294901760, %v13951_v32 }
  0x7d   : > { %11747 = vmatprep.subr.mxu0 %v13812_v1  ;;  %v1020_v0 = vand.u32 4294901760, %v1019_v18  ;;  %v20495_v32 = vand.u32 4294901760, %v13978_v52  ;;  %v20500_v52 = vand.u32 4294901760, %v14056_v62  ;;  %v20504_v62 = vand.u32 4294901760, %v14111_v12  ;;  %v20509_v12 = vld [vmem:[#allocation6_spill] sm:$0xff] }
  0x7e   : > { %v1030_v16 = vand.u32 4294901760, %v1029_v28 }
  0x7f   : > { %11659 = vmatmul.mubr.f32.gmra.mrb[2].mxu0 %v20486_v3  ;;  %v20489_v3 = vand.u32 4294901760, %v13945_v24  ;;  %11553 = vmatprep.mubr.f32.mxu1 %v1020_v0  ;;  %v20493_v24 = vand.u32 4294901760, %v13972_v50  ;;  %v20498_v50 = vand.u32 4294901760, %v14031_v56  ;;  %v20503_v56 = vand.u32 4294901760, %v14089_v45 }
  0x80   : > { %11661 = vmatprep.mubr.f32.mxu0 %v20487_v44  ;;  %v1049_v44 = vsub.f32 %v14193_v39, %v1048_v13  ;;  %11554 = vmatmul.mubr.f32.gmra.mrb[26].mxu1 %v1030_v16  ;;  %v20494_v39 = vand.u32 4294901760, %v13975_v51  ;;  %v20499_v51 = vand.u32 4294901760, %v14049_v5  ;;  %v20505_v5 = vand.u32 4294901760, %v14105_v53 }
  0x81   : > { %11556 = vmatprep.mubr.f32.mxu1 %v1040_v55  ;;  %v20506_v53 = vand.u32 4294901760, %v14164_v59  ;;  %v14309_v45 = vsel %vm2482_vm2, %v2383_v19, 0  ;;  %v20514_v59 = vld [vmem:[#allocation11_spill] sm:$0xff] }
  0x82   : > { %v1050_v21 = vand.u32 4294901760, %v1049_v44  ;;  %v14313_v17 = vand.u32 4294901760, %v14309_v45 }
  0x83   : > { %11662 = vmatmul.mubr.f32.gmra.mrb[4].mxu0 %v20488_v23  ;;  %v20518_v23 = vld [vmem:[#allocation15_spill] sm:$0xff] }
  0x84   : > { %11664 = vmatprep.mubr.f32.mxu0 %v20489_v3  ;;  %11557 = vmatmul.mubr.f32.gmra.mrb[28].mxu1 %v1050_v21  ;;  %20510 = vst [vmem:[#allocation5_spill] sm:$0xff] %v14313_v17 }
  0x85   : > { %11579 = vmatprep.mubr.f32.mxu1 %v13960_v37  ;;  %11794 = vmatprep.subr.mxu1 %v14313_v17 }
  0x87   : > { %11665 = vmatmul.mubr.f32.gmra.mrb[6].mxu0 %v20490_v48 }
  0x88   : > { %11667 = vmatprep.mubr.f32.mxu0 %v20491_v31  ;;  %11580 = vmatmul.mubr.f32.vlgmr.msra.gmra.mrb[12].mxu1 %v13962_v42  ;;  %v14434_v31 = vld [vmem:[%s20520_s3] ss:$0 sm:$0xff]  ;;  %s20817_s3 = smov 52  }
  0x89   : > { %11582 = vmatprep.mubr.f32.mxu1 %v13981_v57  ;;  %11795 = vmatpush3.msra.mxu1 %v14313_v17 }
  0x8b   : > { %11668 = vmatmul.mubr.f32.gmra.mrb[8].mxu0 %v20492_v43 }
  0x8c   : > { %11670 = vmatprep.mubr.f32.mxu0 %v20493_v24  ;;  %11583 = vmatmul.mubr.f32.gmra.mrb[14].mxu1 %v13998_v20 }
  0x8d   : > { %11585 = vmatprep.mubr.f32.mxu1 %v14025_v26 }
  0x8f   : > { %11671 = vmatmul.mubr.f32.gmra.mrb[10].mxu0 %v20494_v39 }
  0x90   : > { %11673 = vmatprep.mubr.f32.mxu0 %v20495_v32  ;;  %11586 = vmatmul.mubr.f32.gmra.mrb[16].mxu1 %v14033_v15 }
  0x91   : > { %11588 = vmatprep.mubr.f32.mxu1 %v14040_v34 }
  0x93   : > { %11674 = vmatmul.mubr.f32.gmra.mrb[12].mxu0 %v20496_v36 }
  0x94   : > { %11676 = vmatprep.mubr.f32.mxu0 %v20497_v47  ;;  %11589 = vmatmul.mubr.f32.gmra.mrb[18].mxu1 %v14058_v22 }
  0x95   : > { %11591 = vmatprep.mubr.f32.mxu1 %v14068_v14 }
  0x97   : > { %11677 = vmatmul.mubr.f32.gmra.mrb[14].mxu0 %v20498_v50 }
  0x98   : > { %11679 = vmatprep.mubr.f32.mxu0 %v20499_v51  ;;  %11592 = vmatmul.mubr.f32.gmra.mrb[20].mxu1 %v14091_v11 }
  0x99   : > { %11594 = vmatprep.mubr.f32.mxu1 %v14080_v2 }
  0x9b   : > { %11680 = vmatmul.mubr.f32.gmra.mrb[16].mxu0 %v20500_v52 }
  0x9c   : > { %11682 = vmatprep.mubr.f32.mxu0 %v20501_v63  ;;  %11595 = vmatmul.mubr.f32.gmra.mrb[22].mxu1 %v14113_v7 }
  0x9d   : > { %11597 = vmatprep.mubr.f32.mxu1 %v14117_v33 }
  0x9f   : > { %11683 = vmatmul.mubr.f32.gmra.mrb[18].mxu0 %v20502_v25 }
  0xa0   : > { %11685 = vmatprep.mubr.f32.mxu0 %v20503_v56  ;;  %11598 = vmatmul.mubr.f32.gmra.mrb[24].mxu1 %v14136_v54 }
  0xa1   : > { %11600 = vmatprep.mubr.f32.mxu1 %v14138_v60 }
  0xa3   : > { %11686 = vmatmul.mubr.f32.gmra.mrb[20].mxu0 %v20504_v62 }
  0xa4   : > { %11688 = vmatprep.mubr.f32.mxu0 %v20505_v5  ;;  %11601 = vmatmul.mubr.f32.gmra.mrb[26].mxu1 %v14157_v35 }
  0xa5   : > { %11603 = vmatprep.mubr.f32.mxu1 %v14159_v61 }
  0xa7   : > { %11689 = vmatmul.mubr.f32.gmra.mrb[22].mxu0 %v988_v27  ;;  %v20515_v27 = vld [vmem:[#allocation12_spill] sm:$0xff] }
  0xa8   : > { %11691 = vmatprep.mubr.f32.mxu0 %v998_v4  ;;  %11604 = vmatmul.mubr.f32.gmra.mrb[28].mxu1 %v14178_v49  ;;  %v20516_v4 = vld [vmem:[#allocation13_spill] sm:$0xff] }
  0xab   : > { %11692 = vmatmul.mubr.f32.gmra.mrb[24].mxu0 %v1008_v8  ;;  %v20517_v8 = vld [vmem:[#allocation14_spill] sm:$0xff] }
  0xac   : > { %11694 = vmatprep.mubr.f32.mxu0 %v20506_v53 }
  0xaf   : > { %11695 = vmatmul.mubr.f32.gmra.mrb[26].mxu0 %v1028_v10 }
  0xb0   : > { %11697 = vmatprep.mubr.f32.mxu0 %v1038_v46 }
  0xb3   : > { %11698 = vmatmul.mubr.f32.gmra.mrb[28].mxu0 %v1048_v13 }
  0xb4   : > { %11702 = vmatprep.mubr.f32.mxu0 %v13856_v29 }
  0xb7   : > { %11703 = vmatmul.mubr.f32.vlgmr.msra.gmra.mrb[0].mxu0 %v13858_v30 }
  0xb8   : > { %11748 = vmatpush3.msra.mxu0 %v13812_v1  ;;  %11705 = vmatprep.mubr.f32.mxu0 %v20507_v38  ;;  %v20512_v1 = vld [vmem:[#allocation9_spill] sm:$0xff] }
  0xbb   : > { %11706 = vmatmul.mubr.f32.gmra.mrb[2].mxu0 %v20509_v12 }
  0xbc   : > { %11708 = vmatprep.mubr.f32.mxu0 %v20511_v41 }
  0xbf   : > { %11709 = vmatmul.mubr.f32.gmra.mrb[4].mxu0 %v20512_v1 }
  0xc0   : > { %11711 = vmatprep.mubr.f32.mxu0 %v20513_v40 }
  0xc3   : > { %11712 = vmatmul.mubr.f32.gmra.mrb[6].mxu0 %v20514_v59 }
  0xc4   : > { %11714 = vmatprep.mubr.f32.mxu0 %v20515_v27 }
  0xc7   : > { %11715 = vmatmul.mubr.f32.gmra.mrb[8].mxu0 %v20516_v4 }
  0xc8   : > { %11717 = vmatprep.mubr.f32.mxu0 %v20517_v8 }
  0xcb   : > { %11718 = vmatmul.mubr.f32.gmra.mrb[10].mxu0 %v20518_v23 }
  0xcc   : > { %11720 = vmatprep.mubr.f32.mxu0 %v13960_v37 }
  0xcf   : > { %11721 = vmatmul.mubr.f32.gmra.mrb[12].mxu0 %v13962_v42 }
  0xd0   : > { %11723 = vmatprep.mubr.f32.mxu0 %v13981_v57 }
  0xd3   : > { %11724 = vmatmul.mubr.f32.gmra.mrb[14].mxu0 %v13998_v20 }
  0xd4   : > { %11726 = vmatprep.mubr.f32.mxu0 %v14025_v26 }
  0xd7   : > { %11727 = vmatmul.mubr.f32.gmra.mrb[16].mxu0 %v14033_v15 }
  0xd8   : > { %11729 = vmatprep.mubr.f32.mxu0 %v14040_v34 }
  0xdb   : > { %11730 = vmatmul.mubr.f32.gmra.mrb[18].mxu0 %v14058_v22 }
  0xdc   : > { %11732 = vmatprep.mubr.f32.mxu0 %v14068_v14 }
  0xdf   : > { %11733 = vmatmul.mubr.f32.gmra.mrb[20].mxu0 %v14091_v11 }
  0xe0   : > { %11735 = vmatprep.mubr.f32.mxu0 %v14080_v2 }
  0xe3   : > { %11736 = vmatmul.mubr.f32.gmra.mrb[22].mxu0 %v14113_v7 }
  0xe4   : > { %11738 = vmatprep.mubr.f32.mxu0 %v14117_v33 }
  0xe7   : > { %11739 = vmatmul.mubr.f32.gmra.mrb[24].mxu0 %v14136_v54 }
  0xe8   : > { %11741 = vmatprep.mubr.f32.mxu0 %v14138_v60 }
  0xeb   : > { %11742 = vmatmul.mubr.f32.gmra.mrb[26].mxu0 %v14157_v35 }
  0xec   : > { %11744 = vmatprep.mubr.f32.mxu0 %v14159_v61 }
  0xef   : > { %11745 = vmatmul.mubr.f32.gmra.mrb[28].mxu0 %v14178_v49 }
  0xf0   : > { %11749 = vmatprep.mubr.f32.mxu0 %v13856_v29 }
  0xf3   : > { %11750 = vmatmul.mubr.f32.vlgmr.msra.gmra.mrb[0].mxu0 %v13858_v30 }
  0xf4   : > { %11752 = vmatprep.mubr.f32.mxu0 %v20507_v38 }
  0xf7   : > { %11753 = vmatmul.mubr.f32.gmra.mrb[2].mxu0 %v20509_v12 }
  0xf8   : > { %11755 = vmatprep.mubr.f32.mxu0 %v20511_v41 }
  0xfb   : > { %11756 = vmatmul.mubr.f32.gmra.mrb[4].mxu0 %v20512_v1 }
  0xfc   : > { %11758 = vmatprep.mubr.f32.mxu0 %v20513_v40 }
  0xff   : > { %11759 = vmatmul.mubr.f32.gmra.mrb[6].mxu0 %v20514_v59 }
 0x100   : > { %11761 = vmatprep.mubr.f32.mxu0 %v20515_v27 }
 0x103   : > { %11762 = vmatmul.mubr.f32.gmra.mrb[8].mxu0 %v20516_v4 }
 0x104   : > { %11764 = vmatprep.mubr.f32.mxu0 %v20517_v8 }
 0x107   : > { %11765 = vmatmul.mubr.f32.gmra.mrb[10].mxu0 %v20518_v23 }
 0x108   : > { %11767 = vmatprep.mubr.f32.mxu0 %v13960_v37 }
 0x10b   : > { %11768 = vmatmul.mubr.f32.gmra.mrb[12].mxu0 %v13962_v42 }
 0x10c   : > { %11770 = vmatprep.mubr.f32.mxu0 %v13981_v57 }
 0x10e   : > { %v11516_v29 = vpop.f32.mrb[0].mxu1 }
 0x10f   : > { %11771 = vmatmul.mubr.f32.gmra.mrb[14].mxu0 %v13998_v20  ;;  %v762_v30 = vpop.f32.mrb[1].mxu1  ;;  %v773_v21 = vadd.f32 %v11516_v29, %v14434_v31 }
 0x110   : > { %11773 = vmatprep.mubr.f32.mxu0 %v14025_v26  ;;  %v763_v43 = vadd.f32 %v14434_v31, %v762_v30 }
 0x112   : > { %v11519_v37 = vpop.f32.mrb[2].mxu1 }
 0x113   : > { %11774 = vmatmul.mubr.f32.gmra.mrb[16].mxu0 %v14033_v15  ;;  %v782_v42 = vpop.f32.mrb[3].mxu1  ;;  %v793_v47 = vadd.f32 %v11519_v37, %v14434_v31 }
 0x114   : > { %11776 = vmatprep.mubr.f32.mxu0 %v14040_v34  ;;  %v783_v51 = vadd.f32 %v14434_v31, %v782_v42 }
 0x116   : > { %v11522_v57 = vpop.f32.mrb[4].mxu1 }
 0x117   : > { %11777 = vmatmul.mubr.f32.gmra.mrb[18].mxu0 %v14058_v22  ;;  %v813_v19 = vadd.f32 %v11522_v57, %v14434_v31 }
 0x118   : > { %11779 = vmatprep.mubr.f32.mxu0 %v14068_v14 }
 0x11b   : > { %11780 = vmatmul.mubr.f32.gmra.mrb[20].mxu0 %v14091_v11  ;;  %v14385_v11 = vsub.f32 %v14309_v45, %v14313_v17 }
 0x11c   : > { %11782 = vmatprep.mubr.f32.mxu0 %v14080_v2  ;;  %v802_v2 = vpop.f32.mrb[5].mxu1 }
 0x11d   : > { %v11525_v20 = vpop.f32.mrb[6].mxu1  ;;  %v803_v12 = vadd.f32 %v14434_v31, %v802_v2 }
 0x11e   : > { %v14373_v26 = vpop.f32.mrb[7].mxu1  ;;  %v833_v30 = vadd.f32 %v11525_v20, %v14434_v31 }
 0x11f   : > { %11783 = vmatmul.mubr.f32.gmra.mrb[22].mxu0 %v14113_v7  ;;  %v14375_v15 = vpop.f32.mrb[8].mxu1  ;;  %v14388_v7 = vand.u32 4294901760, %v14385_v11  ;;  %v823_v2 = vadd.f32 %v14434_v31, %v14373_v26 }
 0x120   : > { %11785 = vmatprep.mubr.f32.mxu0 %v14117_v33  ;;  %v14377_v34 = vpop.f32.mrb[9].mxu1 }
 0x121   : > { %20519 = vst [vmem:[#allocation6_spill] sm:$0xff] %v14388_v7  ;;  %v2856_v33 = vsub.f32 %v14385_v11, %v14388_v7 }
 0x122   : > { %v14379_v22 = vpop.f32.mrb[10].mxu1 }
 0x123   : > { %11786 = vmatmul.mubr.f32.gmra.mrb[24].mxu0 %v14136_v54  ;;  %v14381_v14 = vpop.f32.mrb[11].mxu1  ;;  %v14392_v54 = vand.u32 4294901760, %v2856_v33 }
 0x124   : > { %11788 = vmatprep.mubr.f32.mxu0 %v14138_v60 }
 0x125   : > { %11841 = vmatprep.subr.mxu1 %v14392_v54 }
 0x127   : > { %11789 = vmatmul.mubr.f32.gmra.mrb[26].mxu0 %v14157_v35 }
 0x128   : > { %11791 = vmatprep.mubr.f32.mxu0 %v14159_v61 }
 0x12b   : > { %11792 = vmatmul.mubr.f32.gmra.mrb[28].mxu0 %v14178_v49 }
 0x15b   : > { %v14395_v60 = vpop.f32.mrb[12].mxu1 }
 0x15c   : > { %v14397_v35 = vpop.f32.mrb[13].mxu1 }
 0x15f   : > { %v14399_v61 = vpop.f32.mrb[14].mxu1 }
 0x160   : > { %v14401_v49 = vpop.f32.mrb[15].mxu1 }
 0x163   : > { %v14403_v9 = vpop.f32.mrb[16].mxu1 }
 0x164   : > { %v14405_v18 = vpop.f32.mrb[17].mxu1 }
 0x167   : > { %v14407_v10 = vpop.f32.mrb[18].mxu1 }
 0x168   : > { %v14409_v46 = vpop.f32.mrb[19].mxu1 }
 0x16b   : > { %v14411_v58 = vpop.f32.mrb[20].mxu1 }
 0x16c   : > { %v14413_v28 = vpop.f32.mrb[21].mxu1 }
 0x16f   : > { %v14415_v0 = vpop.f32.mrb[22].mxu1 }
 0x170   : > { %v14417_v6 = vpop.f32.mrb[23].mxu1 }
 0x173   : > { %v14419_v13 = vpop.f32.mrb[24].mxu1 }
 0x174   : > { %v14421_v3 = vpop.f32.mrb[25].mxu1 }
 0x177   : > { %v14423_v16 = vpop.f32.mrb[26].mxu1 }
 0x178   : > { %v14425_v44 = vpop.f32.mrb[27].mxu1 }
 0x17b   : > { %v14427_v55 = vpop.f32.mrb[28].mxu1 }
 0x17c   : > { %v14429_v48 = vpop.f32.mrb[29].mxu1 }
 0x1c6   : > { %v11751_v24 = vpop.f32.mrb[0].mxu0 }
 0x1c7   : > { %v12835_v39 = vadd.f32 %v11751_v24, %v773_v21  ;;  %v2205_v32 = vpop.f32.mrb[1].mxu0 }
 0x1c8   : > { %v12837_v36 = vadd.f32 %v2205_v32, %v763_v43 }
 0x1c9   : > { %v2396_v50 = vsel %vm20435_vm3, %v12835_v39, 0 }
 0x1ca   : > { %v14441_v52 = vand.u32 4294901760, %v2396_v50  ;;  %v2393_v63 = vsel %vm20435_vm3, %v12837_v36, 0  ;;  %v11754_v25 = vpop.f32.mrb[2].mxu0 }
 0x1cb   : > { %v14444_v56 = vand.u32 4294901760, %v2393_v63  ;;  %v12839_v62 = vadd.f32 %v11754_v25, %v793_v47  ;;  %v2217_v5 = vpop.f32.mrb[3].mxu0  ;;  %v853_v47 = vadd.f32 %v14375_v15, %v14434_v31 }
 0x1cc   : > { %v14447_v53 = vsub.f32 %v2396_v50, %v14441_v52  ;;  %v12841_v38 = vadd.f32 %v2217_v5, %v783_v51  ;;  %v843_v51 = vadd.f32 %v14434_v31, %v14377_v34 }
 0x1cd   : > { %v14451_v45 = vsub.f32 %v2393_v63, %v14444_v56  ;;  %v2402_v1 = vsel %vm20435_vm3, %v12839_v62, 0 }
 0x1ce   : > { %20521 = vst [vmem:[#allocation7_spill] sm:$0xff] %v14447_v53  ;;  %v20100_v41 = vand.u32 4294901760, %v14447_v53  ;;  %v2399_v40 = vsel %vm20435_vm3, %v12841_v38, 0  ;;  %v11757_v59 = vpop.f32.mrb[4].mxu0  ;;  %v14466_v42 = vand.u32 4294901760, %v2402_v1 }
 0x1cf   : > { %20522 = vst [vmem:[#allocation9_spill] sm:$0xff] %v14451_v45  ;;  %v14457_v27 = vand.u32 4294901760, %v2399_v40  ;;  %v14459_v4 = vadd.f32 %v11757_v59, %v813_v19  ;;  %v2229_v8 = vpop.f32.mrb[5].mxu0  ;;  %v20101_v23 = vand.u32 4294901760, %v14451_v45  ;;  %v12858_v59 = vadd.f32 %v14395_v60, %v14434_v31 }
 0x1d0   : > { %v12845_v29 = vadd.f32 %v2229_v8, %v803_v12  ;;  %v2565_v37 = vsub.f32 %v14447_v53, %v20100_v41  ;;  %20525 = vst [vmem:[#allocation12_spill] sm:$0xff] %v14466_v42  ;;  %v14485_v26 = vsub.f32 %v2402_v1, %v14466_v42  ;;  %v873_v12 = vadd.f32 %v14379_v22, %v14434_v31 }
 0x1d1   : > { %20523 = vst [vmem:[#allocation10_spill] sm:$0xff] %v14457_v27  ;;  %20524 = vst [vmem:[#allocation11_spill] sm:$0xff] %v14459_v4  ;;  %v14469_v57 = vsub.f32 %v2399_v40, %v14457_v27  ;;  %v2555_v21 = vsub.f32 %v14451_v45, %v20101_v23  ;;  %v2408_v25 = vsel %vm20435_vm3, %v14459_v4, 0  ;;  %v863_v1 = vadd.f32 %v14434_v31, %v14381_v14 }
 0x1d2   : > { %v11760_v33 = vpop.f32.mrb[6].mxu0  ;;  %v2405_v24 = vsel %vm20435_vm3, %v12845_v29, 0  ;;  %v2566_v50 = vand.u32 4294901760, %v2565_v37  ;;  %20528 = vst [vmem:[#allocation15_spill] sm:$0xff] %v14485_v26  ;;  %v20097_v40 = vand.u32 4294901760, %v14485_v26  ;;  %v14515_v8 = vadd.f32 %v14399_v61, %v14434_v31 }
 0x1d3   : > { %20526 = vst [vmem:[#allocation13_spill] sm:$0xff] %v14469_v57  ;;  %v14476_v43 = vadd.f32 %v11760_v33, %v833_v30  ;;  %v2241_v20 = vpop.f32.mrb[7].mxu0  ;;  %v2556_v32 = vand.u32 4294901760, %v2555_v21  ;;  %v20098_v36 = vand.u32 4294901760, %v14469_v57  ;;  %v14491_v62 = vand.u32 4294901760, %v2405_v24 }
 0x1d4   : > { %v14479_v39 = vadd.f32 %v2241_v20, %v823_v2  ;;  %v14517_v29 = vand.u32 4294901760, %v2408_v25  ;;  %v14521_v14 = vadd.f32 %v14434_v31, %v14401_v49  ;;  %v14525_v30 = vadd.f32 %v14403_v9, %v14434_v31 }
 0x1d5   : > { %11796 = vmatprep.mubr.f32.mxu1 %v2556_v32  ;;  %20529 = vst [vmem:[#allocation16_spill] sm:$0xff] %v14491_v62  ;;  %v2575_v34 = vsub.f32 %v14469_v57, %v20098_v36  ;;  %v14528_v60 = vsub.f32 %v2405_v24, %v14491_v62  ;;  %v14534_v61 = vadd.f32 %v14434_v31, %v14405_v18  ;;  %v2414_v20 = vsel %vm20435_vm3, %v14476_v43, 0 }
 0x1d6   : > { %20527 = vst [vmem:[#allocation14_spill] sm:$0xff] %v14479_v39  ;;  %v11763_v63 = vpop.f32.mrb[8].mxu0  ;;  %11797 = vmatmul.mubr.f32.vlgmr.msra.gmra.mrb[30].mxu1 %v2566_v50  ;;  %v2411_v15 = vsel %vm20435_vm3, %v14479_v39, 0  ;;  %20532 = vst [vmem:[#allocation19_spill] sm:$0xff] %v14517_v29  ;;  %v14538_v2 = vadd.f32 %v14407_v10, %v14434_v31  ;;  %v14544_v9 = vadd.f32 %v14434_v31, %v14409_v46 }
 0x1d7   : > { %v14493_v5 = vadd.f32 %v11763_v63, %v853_v47  ;;  %v2253_v38 = vpop.f32.mrb[9].mxu0  ;;  %11842 = vmatpush3.msra.mxu1 %v14392_v54  ;;  %v12860_v54 = vadd.f32 %v14434_v31, %v14397_v35  ;;  %20533 = vst [vmem:[#allocation20_spill] sm:$0xff] %v14528_v60  ;;  %v14530_v37 = vand.u32 4294901760, %v2411_v15  ;;  %v2576_v49 = vand.u32 4294901760, %v2575_v34 }
 0x1d8   : > { %v14498_v19 = vadd.f32 %v2253_v38, %v843_v51  ;;  %11888 = vmatprep.subr.mxu1 %v14385_v11  ;;  %v14548_v21 = vadd.f32 %v14411_v58, %v14434_v31  ;;  %v2585_v18 = vsub.f32 %v14485_v26, %v20097_v40  ;;  %v14556_v10 = vsub.f32 %v2408_v25, %v14517_v29 }
 0x1d9   : > { %20530 = vst [vmem:[#allocation17_spill] sm:$0xff] %v14493_v5  ;;  %20534 = vst [vmem:[#allocation21_spill] sm:$0xff] %v14530_v37  ;;  %v7767_v24 = vcombine.high %v14459_v4, %v14459_v4  ;;  %11799 = vmatprep.mubr.f32.mxu1 %v2576_v49  ;;  %v14566_v47 = vadd.f32 %v14434_v31, %v14413_v28  ;;  %v14569_v50 = vsub.f32 %v2411_v15, %v14530_v37 }
 0x1da   : > { %20531 = vst [vmem:[#allocation18_spill] sm:$0xff] %v14498_v19  ;;  %v11766_v22 = vpop.f32.mrb[10].mxu0  ;;  %20536 = vst [vmem:[#allocation23_spill] sm:$0xff] %v14556_v10  ;;  %v2417_v46 = vsel %vm20435_vm3, %v14498_v19, 0  ;;  %v2586_v51 = vand.u32 4294901760, %v2585_v18  ;;  %v20099_v63 = vand.u32 4294901760, %v14528_v60  ;;  %v14574_v38 = vadd.f32 %v14415_v0, %v14434_v31 }
 0x1db   : > { %v2265_v35 = vpop.f32.mrb[11].mxu0  ;;  %v14540_v33 = vadd.f32 %v11766_v22, %v873_v12  ;;  %20538 = vst [vmem:[#allocation25_spill] sm:$0xff] %v14569_v50  ;;  %v14578_v34 = vadd.f32 %v14434_v31, %v14417_v6  ;;  %v14582_v12 = vadd.f32 %v14419_v13, %v14434_v31  ;;  %v14584_v28 = vand.u32 4294901760, %v2414_v20 }
 0x1dc   : > { %v14562_v32 = vadd.f32 %v2265_v35, %v863_v1  ;;  %v14588_v15 = vadd.f32 %v14434_v31, %v14421_v3  ;;  %v14592_v1 = vadd.f32 %v14423_v16, %v14434_v31  ;;  %v14594_v0 = vand.u32 4294901760, %v2417_v46  ;;  %11800 = vmatmul.mubr.f32.gmra.mrb[32].mxu1 %v2586_v51 }
 0x1dd   : > { %20535 = vst [vmem:[#allocation22_spill] sm:$0xff] %v14540_v33  ;;  %20539 = vst [vmem:[#allocation26_spill] sm:$0xff] %v14584_v28  ;;  %v2595_v6 = vsub.f32 %v14528_v60, %v20099_v63  ;;  %v14599_v22 = vrot.slane %v7767_v24, 6  ;;  %v7768_v13 = vcombine.high %v14479_v39, %v14479_v39  ;;  %v20102_v3 = vand.u32 4294901760, %v14556_v10 }
 0x1de   : > { %20537 = vst [vmem:[#allocation24_spill] sm:$0xff] %v14562_v32  ;;  %v11769_v58 = vpop.f32.mrb[12].mxu0  ;;  %20540 = vst [vmem:[#allocation27_spill] sm:$0xff] %v14594_v0  ;;  %v2420_v16 = vsel %vm20435_vm3, %v14493_v5, 0  ;;  %v20114_v51 = vand.u32 4294901760, %v14569_v50  ;;  %v14612_v24 = vsub.f32 %v2414_v20, %v14584_v28  ;;  %v14616_v63 = vadd.f32 %v14434_v31, %v14425_v44 }
 0x1df   : > { %v2277_v25 = vpop.f32.mrb[13].mxu0  ;;  %20541 = vst [vmem:[#allocation28_spill] sm:$0xff] %v14599_v22  ;;  %v14603_v35 = vadd.f32 %v12858_v59, %v11769_v58  ;;  %v2596_v18 = vand.u32 4294901760, %v2595_v6  ;;  %v14620_v59 = vadd.f32 %v14427_v55, %v14434_v31  ;;  %v14624_v58 = vadd.f32 %v14434_v31, %v14429_v48 }
 0x1e0   : > { %v14608_v40 = vadd.f32 %v12860_v54, %v2277_v25  ;;  %20543 = vst [vmem:[#allocation30_spill] sm:$0xff] %v14612_v24  ;;  %v14627_v54 = vsub.f32 %v2417_v46, %v14594_v0  ;;  %v2426_v25 = vsel %vm20435_vm3, %v14540_v33, 0  ;;  %v2423_v20 = vsel %vm20435_vm3, %v14562_v32, 0 }
 0x1e1   : > { %20542 = vst [vmem:[#allocation29_spill] sm:$0xff] %v14603_v35  ;;  %11802 = vmatprep.mubr.f32.mxu1 %v2596_v18  ;;  %v2605_v44 = vsub.f32 %v14556_v10, %v20102_v3  ;;  %v7769_v48 = vcombine.high %v14476_v43, %v14476_v43  ;;  %v14639_v31 = vrot.slane %v7768_v13, 6  ;;  %v14641_v46 = vand.u32 4294901760, %v2420_v16 }
 0x1e2   : > { %v11772_v49 = vpop.f32.mrb[14].mxu0  ;;  %20544 = vst [vmem:[#allocation31_spill] sm:$0xff] %v14627_v54  ;;  %v7770_v41 = vcombine.high %v14498_v19, %v14498_v19  ;;  %v7773_v18 = vcombine.high %v14540_v33, %v14540_v33  ;;  %v2615_v3 = vsub.f32 %v14569_v50, %v20114_v51  ;;  %v14650_v4 = vand.u32 4294901760, %v2426_v25 }
 0x1e3   : > { %v2289_v36 = vpop.f32.mrb[15].mxu0  ;;  %20545 = vst [vmem:[#allocation32_spill] sm:$0xff] %v14639_v31  ;;  %20546 = vst [vmem:[#allocation33_spill] sm:$0xff] %v14641_v46  ;;  %v2606_v23 = vand.u32 4294901760, %v2605_v44  ;;  %v14652_v10 = vand.u32 4294901760, %v2423_v20  ;;  %v14655_v13 = vadd.f32 %v14515_v8, %v11772_v49  ;;  %v20117_v60 = vand.u32 4294901760, %v14612_v24 }
 0x1e4   : > { %20547 = vst [vmem:[#allocation34_spill] sm:$0xff] %v14650_v4  ;;  %v2616_v26 = vand.u32 4294901760, %v2615_v3  ;;  %v14659_v7 = vadd.f32 %v14521_v14, %v2289_v36  ;;  %v20127_v44 = vand.u32 4294901760, %v14627_v54  ;;  %v14666_v50 = vrot.slane %v7769_v48, 10 }
 0x1e5   : > { %20548 = vst [vmem:[#allocation35_spill] sm:$0xff] %v14652_v10  ;;  %20549 = vst [vmem:[#allocation36_spill] sm:$0xff] %v14655_v13  ;;  %11803 = vmatmul.mubr.f32.gmra.mrb[34].mxu1 %v2606_v23  ;;  %v7772_v8 = vcombine.high %v14562_v32, %v14562_v32  ;;  %v2625_v23 = vsub.f32 %v14612_v24, %v20117_v60  ;;  %v14675_v14 = vsub.f32 %v2420_v16, %v14641_v46 }
 0x1e6   : > { %v11775_v6 = vpop.f32.mrb[16].mxu0  ;;  %20550 = vst [vmem:[#allocation37_spill] sm:$0xff] %v14659_v7  ;;  %v14677_v49 = vrot.slane %v7770_v41, 6  ;;  %11805 = vmatprep.mubr.f32.mxu1 %v2616_v26  ;;  %v2432_v51 = vsel %vm20435_vm3, %v14603_v35, 0  ;;  %v2635_v36 = vsub.f32 %v14627_v54, %v20127_v44  ;;  %v14692_v32 = vsub.f32 %v2426_v25, %v14650_v4 }
 0x1e7   : > { %v2301_v55 = vpop.f32.mrb[17].mxu0  ;;  %v14663_v57 = vadd.f32 %v14525_v30, %v11775_v6  ;;  %20551 = vst [vmem:[#allocation38_spill] sm:$0xff] %v14675_v14  ;;  %v2429_v30 = vsel %vm20435_vm3, %v14608_v40, 0  ;;  %v14682_v6 = vsub.f32 %v2423_v20, %v14652_v10  ;;  %v2626_v60 = vand.u32 4294901760, %v2625_v23 }
 0x1e8   : > { %20552 = vst [vmem:[#allocation39_spill] sm:$0xff] %v14677_v49  ;;  %20554 = vst [vmem:[#allocation41_spill] sm:$0xff] %v14692_v32  ;;  %v14694_v26 = vrot.slane %v7773_v18, 6  ;;  %v14697_v24 = vrot.slane %v7772_v8, 6  ;;  %v14699_v53 = vand.u32 4294901760, %v2429_v30  ;;  %v2636_v23 = vand.u32 4294901760, %v2635_v36 }
 0x1e9   : > { %20553 = vst [vmem:[#allocation40_spill] sm:$0xff] %v14682_v6  ;;  %11806 = vmatmul.mubr.f32.gmra.mrb[36].mxu1 %v2626_v60  ;;  %v14701_v10 = vand.u32 4294901760, %v2432_v51  ;;  %v2435_v44 = vsel %vm20435_vm3, %v14659_v7, 0  ;;  %v20132_v41 = vand.u32 4294901760, %v14675_v14  ;;  %v14707_v25 = vadd.f32 %v14534_v61, %v2301_v55 }
 0x1ea   : > { %v11778_v3 = vpop.f32.mrb[18].mxu0  ;;  %20555 = vst [vmem:[#allocation42_spill] sm:$0xff] %v14694_v26  ;;  %20556 = vst [vmem:[#allocation43_spill] sm:$0xff] %v14697_v24  ;;  %11808 = vmatprep.mubr.f32.mxu1 %v2636_v23  ;;  %v20139_v60 = vand.u32 4294901760, %v14682_v6  ;;  %v7775_v54 = vcombine.high %v14603_v35, %v14603_v35  ;;  %v14723_v20 = vsub.f32 %v2429_v30, %v14699_v53  ;;  %v2438_v23 = vsel %vm20435_vm3, %v14655_v13, 0 }
 0x1eb   : > { %v2313_v48 = vpop.f32.mrb[19].mxu0  ;;  %20557 = vst [vmem:[#allocation44_spill] sm:$0xff] %v14699_v53  ;;  %20558 = vst [vmem:[#allocation45_spill] sm:$0xff] %v14701_v10  ;;  %v14713_v36 = vadd.f32 %v14538_v2, %v11778_v3  ;;  %v2645_v61 = vsub.f32 %v14675_v14, %v20132_v41  ;;  %v14727_v8 = vand.u32 4294901760, %v2435_v44  ;;  %v14734_v4 = vsub.f32 %v2432_v51, %v14701_v10 }
 0x1ec   : > { %20559 = vst [vmem:[#allocation46_spill] sm:$0xff] %v14707_v25  ;;  %20561 = vst [vmem:[#allocation48_spill] sm:$0xff] %v14723_v20  ;;  %v2655_v2 = vsub.f32 %v14682_v6, %v20139_v60  ;;  %v7774_v14 = vcombine.high %v14608_v40, %v14608_v40  ;;  %v7777_v53 = vcombine.high %v14655_v13, %v14655_v13  ;;  %v2441_v46 = vsel %vm20435_vm3, %v14707_v25, 0 }
 0x1ed   : > { %20560 = vst [vmem:[#allocation47_spill] sm:$0xff] %v14713_v36  ;;  %20562 = vst [vmem:[#allocation49_spill] sm:$0xff] %v14727_v8  ;;  %v2646_v55 = vand.u32 4294901760, %v2645_v61  ;;  %v14743_v6 = vrot.slane %v7775_v54, 6  ;;  %v14745_v16 = vand.u32 4294901760, %v2438_v23  ;;  %v2444_v51 = vsel %vm20435_vm3, %v14663_v57, 0 }
 0x1ee   : > { %v11781_v45 = vpop.f32.mrb[20].mxu0  ;;  %20563 = vst [vmem:[#allocation50_spill] sm:$0xff] %v14734_v4  ;;  %v2656_v60 = vand.u32 4294901760, %v2655_v2  ;;  %v20566_v61 = vand.u32 4294901760, %v14692_v32  ;;  %v14753_v10 = vsub.f32 %v2435_v44, %v14727_v8  ;;  %v14756_v13 = vadd.f32 %v14544_v9, %v2313_v48 }
 0x1ef   : > { %v2325_v18 = vpop.f32.mrb[21].mxu0  ;;  %20564 = vst [vmem:[#allocation51_spill] sm:$0xff] %v14743_v6  ;;  %20565 = vst [vmem:[#allocation52_spill] sm:$0xff] %v14745_v16  ;;  %11809 = vmatmul.mubr.f32.gmra.mrb[38].mxu1 %v2646_v55  ;;  %v20155_v54 = vand.u32 4294901760, %v14723_v20  ;;  %v14760_v2 = vadd.f32 %v14548_v21, %v11781_v45  ;;  %v14762_v28 = vand.u32 4294901760, %v2441_v46  ;;  %v14772_v9 = vand.u32 4294901760, %v2444_v51 }
 0x1f0   : > { %v2665_v41 = vsub.f32 %v14692_v32, %v20566_v61  ;;  %20567 = vst [vmem:[#allocation53_spill] sm:$0xff] %v14753_v10  ;;  %11811 = vmatprep.mubr.f32.mxu1 %v2656_v60  ;;  %20568 = vst [vmem:[#allocation54_spill] sm:$0xff] %v14756_v13  ;;  %v14766_v61 = vadd.f32 %v14566_v47, %v2325_v18  ;;  %v14770_v60 = vrot.slane %v7777_v53, 6  ;;  %v14781_v37 = vrot.slane %v7774_v14, 10 }
 0x1f1   : > { %20569 = vst [vmem:[#allocation55_spill] sm:$0xff] %v14760_v2  ;;  %20570 = vst [vmem:[#allocation56_spill] sm:$0xff] %v14762_v28  ;;  %v7779_v48 = vcombine.high %v14663_v57, %v14663_v57  ;;  %v2675_v45 = vsub.f32 %v14723_v20, %v20155_v54  ;;  %v7778_v47 = vcombine.high %v14707_v25, %v14707_v25  ;;  %v2450_v18 = vsel %vm20435_vm3, %v14713_v36, 0 }
 0x1f2   : > { %v11784_v3 = vpop.f32.mrb[22].mxu0  ;;  %v2666_v55 = vand.u32 4294901760, %v2665_v41  ;;  %20571 = vst [vmem:[#allocation57_spill] sm:$0xff] %v14766_v61  ;;  %20572 = vst [vmem:[#allocation58_spill] sm:$0xff] %v14770_v60  ;;  %v14786_v53 = vsub.f32 %v2438_v23, %v14745_v16  ;;  %v14793_v41 = vsub.f32 %v2441_v46, %v14762_v28  ;;  %v2447_v14 = vsel %vm20435_vm3, %v14756_v13, 0 }
 0x1f3   : > { %v2337_v30 = vpop.f32.mrb[23].mxu0  ;;  %20573 = vst [vmem:[#allocation59_spill] sm:$0xff] %v14772_v9  ;;  %v2676_v32 = vand.u32 4294901760, %v2675_v45  ;;  %v14802_v45 = vsub.f32 %v2444_v51, %v14772_v9  ;;  %v14805_v29 = vrot.slane %v7779_v48, 10  ;;  %v14807_v46 = vrot.slane %v7778_v47, 6 }
 0x1f4   : > { %11812 = vmatmul.mubr.f32.gmra.mrb[40].mxu1 %v2666_v55  ;;  %20574 = vst [vmem:[#allocation60_spill] sm:$0xff] %v14786_v53  ;;  %20575 = vst [vmem:[#allocation61_spill] sm:$0xff] %v14793_v41  ;;  %v20576_v55 = vand.u32 4294901760, %v14734_v4  ;;  %v14809_v21 = vand.u32 4294901760, %v2450_v18  ;;  %v2456_v28 = vsel %vm20435_vm3, %v14760_v2, 0  ;;  %v20581_v16 = vand.u32 4294901760, %v14753_v10 }
 0x1f5   : > { %20577 = vst [vmem:[#allocation62_spill] sm:$0xff] %v14802_v45  ;;  %11814 = vmatprep.mubr.f32.mxu1 %v2676_v32  ;;  %20578 = vst [vmem:[#allocation63_spill] sm:$0xff] %v14807_v46  ;;  %v7780_v47 = vcombine.high %v14756_v13, %v14756_v13  ;;  %v14825_v8 = vadd.f32 %v14578_v34, %v2337_v30  ;;  %v20584_v34 = vand.u32 4294901760, %v14786_v53 }
 0x1f6   : > { %v11787_v0 = vpop.f32.mrb[24].mxu0  ;;  %v2685_v23 = vsub.f32 %v14734_v4, %v20576_v55  ;;  %20579 = vst [vmem:[#allocation64_spill] sm:$0xff] %v14809_v21  ;;  %v14813_v55 = vand.u32 4294901760, %v2447_v14  ;;  %v2695_v51 = vsub.f32 %v14753_v10, %v20581_v16  ;;  %v14819_v4 = vadd.f32 %v14574_v38, %v11784_v3 }
 0x1f7   : > { %v14768_v44 = vpop.f32.mrb[25].mxu0  ;;  %v12883_v9 = vadd.f32 %v14582_v12, %v11787_v0  ;;  %v14830_v10 = vand.u32 4294901760, %v2456_v28  ;;  %v2453_v38 = vsel %vm20435_vm3, %v14766_v61, 0  ;;  %v2705_v30 = vsub.f32 %v14786_v53, %v20584_v34 }
 0x1f8   : > { %v2686_v62 = vand.u32 4294901760, %v2685_v23  ;;  %20580 = vst [vmem:[#allocation65_spill] sm:$0xff] %v14813_v55  ;;  %20582 = vst [vmem:[#allocation66_spill] sm:$0xff] %v14819_v4  ;;  %v2696_v3 = vand.u32 4294901760, %v2695_v51  ;;  %v2459_v12 = vsel %vm20435_vm3, %v14825_v8, 0  ;;  %v14844_v16 = vsub.f32 %v2450_v18, %v14809_v21 }
 0x1f9   : > { %20583 = vst [vmem:[#allocation67_spill] sm:$0xff] %v14830_v10  ;;  %v14847_v23 = vsub.f32 %v2447_v14, %v14813_v55  ;;  %v7783_v51 = vcombine.high %v14760_v2, %v14760_v2  ;;  %v14851_v48 = vrot.slane %v7780_v47, 6  ;;  %v14853_v17 = vand.u32 4294901760, %v2453_v38 }
 0x1fa   : > { %v11790_v54 = vpop.f32.mrb[26].mxu0  ;;  %11815 = vmatmul.mubr.f32.gmra.mrb[42].mxu1 %v2686_v62  ;;  %v2462_v62 = vsel %vm20435_vm3, %v14819_v4, 0  ;;  %20585 = vst [vmem:[#allocation68_spill] sm:$0xff] %v14844_v16  ;;  %v2706_v34 = vand.u32 4294901760, %v2705_v30  ;;  %v20588_v53 = vand.u32 4294901760, %v14793_v41  ;;  %v14859_v0 = vsub.f32 %v2456_v28, %v14830_v10 }
 0x1fb   : > { %v2361_v20 = vpop.f32.mrb[27].mxu0  ;;  %20586 = vst [vmem:[#allocation69_spill] sm:$0xff] %v14847_v23  ;;  %11817 = vmatprep.mubr.f32.mxu1 %v2696_v3  ;;  %20587 = vst [vmem:[#allocation70_spill] sm:$0xff] %v14851_v48  ;;  %v14861_v18 = vand.u32 4294901760, %v2462_v62  ;;  %v14863_v14 = vand.u32 4294901760, %v2459_v12  ;;  %v2468_v21 = vsel %vm20435_vm3, %v12883_v9, 0  ;;  %v14871_v30 = vadd.f32 %v14588_v15, %v14768_v44 }
 0x1fc   : > { %v2715_v27 = vsub.f32 %v14793_v41, %v20588_v53  ;;  %20589 = vst [vmem:[#allocation71_spill] sm:$0xff] %v14859_v0  ;;  %v14866_v47 = vand.u32 4294901760, %v2468_v21  ;;  %v20188_v55 = vand.u32 4294901760, %v14802_v45  ;;  %v20190_v53 = vand.u32 4294901760, %v14847_v23 }
 0x1fd   : > { %20591 = vst [vmem:[#allocation73_spill] sm:$0xff] %v14871_v30  ;;  %v12887_v28 = vadd.f32 %v14592_v1, %v11790_v54  ;;  %v20195_v41 = vand.u32 4294901760, %v14844_v16  ;;  %v12889_v10 = vadd.f32 %v14616_v63, %v2361_v20  ;;  %v14878_v9 = vsub.f32 %v2453_v38, %v14853_v17 }
 0x1fe   : > { %v11793_v32 = vpop.f32.mrb[28].mxu0  ;;  %11818 = vmatmul.mubr.f32.gmra.mrb[44].mxu1 %v2706_v34  ;;  %v2716_v3 = vand.u32 4294901760, %v2715_v27  ;;  %20590 = vst [vmem:[#allocation72_spill] sm:$0xff] %v14866_v47  ;;  %v7782_v27 = vcombine.high %v14766_v61, %v14766_v61  ;;  %v2725_v15 = vsub.f32 %v14802_v45, %v20188_v55  ;;  %v2465_v44 = vsel %vm20435_vm3, %v14871_v30, 0 }
 0x1ff   : > { %v2373_v42 = vpop.f32.mrb[29].mxu0  ;;  %20592 = vst [vmem:[#allocation74_spill] sm:$0xff] %v14878_v9  ;;  %v14888_v1 = vsub.f32 %v2459_v12, %v14863_v14  ;;  %v14890_v63 = vand.u32 4294901760, %v2465_v44  ;;  %v2735_v20 = vsub.f32 %v14847_v23, %v20190_v53  ;;  %v2474_v54 = vsel %vm20435_vm3, %v12887_v28, 0 }
 0x200   : > { %11820 = vmatprep.mubr.f32.mxu1 %v2716_v3  ;;  %v14897_v38 = vsub.f32 %v2462_v62, %v14861_v18  ;;  %v7785_v34 = vcombine.high %v14819_v4, %v14819_v4  ;;  %v2726_v3 = vand.u32 4294901760, %v2725_v15  ;;  %v2745_v12 = vsub.f32 %v14844_v16, %v20195_v41 }
 0x201   : > { %20593 = vst [vmem:[#allocation75_spill] sm:$0xff] %v14888_v1  ;;  %v14905_v55 = vsub.f32 %v2468_v21, %v14866_v47  ;;  %v14908_v61 = vsub.f32 %v2465_v44, %v14890_v63  ;;  %v2736_v53 = vand.u32 4294901760, %v2735_v20  ;;  %v2471_v28 = vsel %vm20435_vm3, %v12889_v10, 0 }
 0x202   : > { %11821 = vmatmul.mubr.f32.gmra.mrb[46].mxu1 %v2726_v3  ;;  %v14911_v62 = vand.u32 4294901760, %v2474_v54  ;;  %v2746_v23 = vand.u32 4294901760, %v2745_v12  ;;  %v14913_v45 = vand.u32 4294901760, %v2471_v28  ;;  %v20198_v15 = vand.u32 4294901760, %v14878_v9 }
 0x203   : > { %11823 = vmatprep.mubr.f32.mxu1 %v2736_v53  ;;  %v12891_v41 = vadd.f32 %v14620_v59, %v11793_v32  ;;  %v20199_v21 = vand.u32 4294901760, %v14859_v0  ;;  %v12893_v16 = vadd.f32 %v14624_v58, %v2373_v42  ;;  %v20202_v44 = vand.u32 4294901760, %v14888_v1 }
 0x204   : > { %20594 = vst [vmem:[#allocation76_spill] sm:$0xff] %v14911_v62  ;;  %20595 = vst [vmem:[#allocation77_spill] sm:$0xff] %v14913_v45  ;;  %v14921_v20 = vsub.f32 %v2471_v28, %v14913_v45  ;;  %v2755_v10 = vsub.f32 %v14878_v9, %v20198_v15  ;;  %v14936_v32 = vrot.slane %v7783_v51, 6  ;;  %v14958_v9 = vrot.slane %v7782_v27, 6 }
 0x205   : > { %v2480_v53 = vsel %vm20435_vm3, %v12891_v41, 0  ;;  %v2765_v59 = vsub.f32 %v14859_v0, %v20199_v21  ;;  %v2477_v42 = vsel %vm20435_vm3, %v12893_v16, 0  ;;  %v2775_v58 = vsub.f32 %v14888_v1, %v20202_v44 }
 0x206   : > { %20596 = vst [vmem:[#allocation78_spill] sm:$0xff] %v14936_v32  ;;  %11824 = vmatmul.mubr.f32.gmra.mrb[48].mxu1 %v2746_v23  ;;  %v2756_v28 = vand.u32 4294901760, %v2755_v10  ;;  %v14938_v15 = vand.u32 4294901760, %v2480_v53  ;;  %v14940_v3 = vand.u32 4294901760, %v2477_v42  ;;  %v14943_v41 = vsub.f32 %v2474_v54, %v14911_v62  ;;  %20601 = vst [vmem:[#allocation81_spill] sm:$0xff] %v14958_v9 }
 0x207   : > { %v2776_v12 = vand.u32 4294901760, %v2775_v58  ;;  %v20599_v21 = vand.u32 4294901760, %v14897_v38  ;;  %v20600_v0 = vand.u32 4294901760, %v14908_v61  ;;  %v2766_v51 = vand.u32 4294901760, %v2765_v59 }
 0x208   : > { %20597 = vst [vmem:[#allocation79_spill] sm:$0xff] %v14938_v15  ;;  %20598 = vst [vmem:[#allocation80_spill] sm:$0xff] %v14940_v3  ;;  %11826 = vmatprep.mubr.f32.mxu1 %v2756_v28  ;;  %v14952_v23 = vsub.f32 %v2477_v42, %v14940_v3  ;;  %v20212_v1 = vand.u32 4294901760, %v14921_v20  ;;  %v7862_v58 = vrot.slane %v14851_v48, 4  ;;  %v7878_v59 = vrot.slane %v14936_v32, 4 }
 0x209   : > { %v2785_v16 = vsub.f32 %v14897_v38, %v20599_v21  ;;  %v2795_v44 = vsub.f32 %v14908_v61, %v20600_v0  ;;  %v14960_v21 = vrot.slane %v7785_v34, 6  ;;  %v20603_v0 = vmov 0 }
 0x20a   : > { %v20604_v0 = vsel %vm14964_vm6, 4294967295, %v20603_v0  ;;  %v7784_v42 = vcombine.high %v14825_v8, %v14825_v8  ;;  %v14972_v28 = vsub.f32 %v2480_v53, %v14938_v15  ;;  %11827 = vmatmul.mubr.f32.gmra.mrb[50].mxu1 %v2766_v51  ;;  %v20606_v27 = vrot.slane %v14476_v43, 6 }
 0x20b   : > { %20602 = vst [vmem:[#allocation82_spill] sm:$0xff] %v14960_v21  ;;  %20605 = vst [vmem:[#allocation83_spill] sm:$0xff] %v20604_v0  ;;  %v20607_v34 = vrot.slane %v14639_v31, 4  ;;  %11829 = vmatprep.mubr.f32.mxu1 %v2776_v12  ;;  %v2796_v10 = vand.u32 4294901760, %v2795_v44  ;;  %v2815_v32 = vsub.f32 %v14921_v20, %v20212_v1  ;;  %v20609_v53 = vrot.slane %v14479_v39, 6  ;;  %v20680_v0 = vld [vmem:[#allocation48_spill] sm:$0xff] }
 0x20c   : > { %v20610_v51 = vrot.slane %v14599_v22, 4  ;;  %v2786_v31 = vand.u32 4294901760, %v2785_v16  ;;  %v20614_v1 = vrot.slane %v14677_v49, 4  ;;  %v7879_v16 = vrot.slane %v14825_v8, 6  ;;  %v20678_v49 = vld [vmem:[#allocation40_spill] sm:$0xff]  ;;  %v20679_v22 = vld [vmem:[#allocation41_spill] sm:$0xff] }
 0x20d   : > { %v14980_v54 = vsel %vm14964_vm6, %v20607_v34, %v20606_v27  ;;  %v20612_v27 = vand.u32 4294901760, %v14905_v55  ;;  %v20613_v34 = vrot.slane %v14493_v5, 6  ;;  %v10756_v44 = vrot.slane %v7784_v42, 10  ;;  %v20688_v39 = vld [vmem:[#allocation74_spill] sm:$0xff]  ;;  %v4187_v5 = vld [vmem:[%s15170_s21 + $0x40] sm:$0xff] }
 0x20e   : > { %20608 = vst [vmem:[#allocation84_spill] sm:$0xff] %v14980_v54  ;;  %v14992_v43 = vsel %vm14964_vm6, %v20610_v51, %v20609_v53  ;;  %v7872_v54 = vrot.slane %v14958_v9, 4  ;;  %v7888_v53 = vrot.slane %v14960_v21, 4  ;;  %v20616_v51 = vrot.slane %v14498_v19, 6  ;;  %11830 = vmatmul.mubr.f32.gmra.mrb[52].mxu1 %v2786_v31 }
 0x20f   : > { %20611 = vst [vmem:[#allocation85_spill] sm:$0xff] %v14992_v43  ;;  %v2805_v12 = vsub.f32 %v14905_v55, %v20612_v27  ;;  %v15004_v48 = vsel %vm14964_vm6, %v20614_v1, %v20613_v34  ;;  %v20618_v34 = vrot.slane %v14608_v40, 6  ;;  %v20619_v9 = vrot.slane %v14694_v26, 4  ;;  %11832 = vmatprep.mubr.f32.mxu1 %v2796_v10  ;;  %v20677_v26 = vld [vmem:[#allocation38_spill] sm:$0xff] }
 0x210   : > { %20615 = vst [vmem:[#allocation86_spill] sm:$0xff] %v15004_v48  ;;  %v15014_v27 = vsel %vm14964_vm6, %v14666_v50, %v20616_v51  ;;  %v2816_v21 = vand.u32 4294901760, %v2815_v32  ;;  %v20621_v48 = vand.u32 4294901760, %v14952_v23  ;;  %v20622_v42 = vrot.slane %v14540_v33, 6  ;;  %v20686_v33 = vld [vmem:[#allocation69_spill] sm:$0xff] }
 0x211   : > { %20617 = vst [vmem:[#allocation87_spill] sm:$0xff] %v15014_v27  ;;  %v15024_v8 = vsel %vm14964_vm6, %v20619_v9, %v20618_v34  ;;  %v20623_v31 = vrot.slane %v14697_v24, 4  ;;  %v20625_v40 = vrot.slane %v14659_v7, 6  ;;  %v20626_v1 = vrot.slane %v14743_v6, 4  ;;  %v20672_v27 = vld [vmem:[#allocation20_spill] sm:$0xff]  ;;  %v20675_v6 = vld [vmem:[#allocation30_spill] sm:$0xff] }
 0x212   : > { %20620 = vst [vmem:[#allocation88_spill] sm:$0xff] %v15024_v8  ;;  %v2835_v50 = vsub.f32 %v14952_v23, %v20621_v48  ;;  %v2806_v32 = vand.u32 4294901760, %v2805_v12  ;;  %v20628_v10 = vand.u32 4294901760, %v14943_v41  ;;  %v20629_v34 = vrot.slane %v14603_v35, 6  ;;  %v20671_v8 = vld [vmem:[#allocation15_spill] sm:$0xff]  ;;  %v20685_v35 = vld [vmem:[#allocation62_spill] sm:$0xff] }
 0x213   : > { %v15035_v51 = vsel %vm14964_vm6, %v20623_v31, %v20622_v42  ;;  %v15043_v9 = vsel %vm14964_vm6, %v20626_v1, %v20625_v40  ;;  %v20631_v31 = vrot.slane %v14663_v57, 6  ;;  %v20632_v43 = vrot.slane %v14807_v46, 4  ;;  %v20674_v46 = vld [vmem:[#allocation25_spill] sm:$0xff]  ;;  %v20676_v24 = vld [vmem:[#allocation31_spill] sm:$0xff] }
 0x214   : > { %20624 = vst [vmem:[#allocation89_spill] sm:$0xff] %v15035_v51  ;;  %20627 = vst [vmem:[#allocation90_spill] sm:$0xff] %v15043_v9  ;;  %v2825_v48 = vsub.f32 %v14943_v41, %v20628_v10  ;;  %v15053_v42 = vsel %vm14964_vm6, %v14781_v37, %v20629_v34  ;;  %v20217_v12 = vrot.slane %v14760_v2, 6  ;;  %v20634_v40 = vrot.slane %v14707_v25, 6  ;;  %11833 = vmatmul.mubr.f32.gmra.mrb[54].mxu1 %v2806_v32  ;;  %v20670_v51 = vld [vmem:[#allocation6_spill] sm:$0xff]  ;;  %v20682_v2 = vld [vmem:[#allocation53_spill] sm:$0xff] }
 0x215   : > { %20630 = vst [vmem:[#allocation91_spill] sm:$0xff] %v15053_v42  ;;  %v15061_v1 = vsel %vm14964_vm6, %v20632_v43, %v20631_v31  ;;  %v20635_v10 = vrot.slane %v14770_v60, 4  ;;  %v20637_v37 = vrot.slane %v14713_v36, 6  ;;  %v20216_v34 = vrot.slane %v14819_v4, 6  ;;  %11835 = vmatprep.mubr.f32.mxu1 %v2816_v21  ;;  %v20669_v42 = vld [vmem:[#allocation13_spill] sm:$0xff]  ;;  %v20673_v60 = vld [vmem:[#allocation23_spill] sm:$0xff] }
 0x216   : > { %20633 = vst [vmem:[#allocation92_spill] sm:$0xff] %v15061_v1  ;;  %v20639_v43 = vrot.slane %v14756_v13, 6  ;;  %v20643_v32 = vrot.slane %v14871_v30, 6  ;;  %v20668_v1 = vld [vmem:[#allocation7_spill] sm:$0xff]  ;;  %v20681_v4 = vld [vmem:[#allocation50_spill] sm:$0xff]  ;;  %v20683_v13 = vld [vmem:[#allocation60_spill] sm:$0xff] }
 0x217   : > { %v15070_v9 = vsel %vm14964_vm6, %v20635_v10, %v20634_v40  ;;  %v15076_v57 = vsel %vm14964_vm6, %v7862_v58, %v20637_v37  ;;  %v15088_v40 = vsel %vm14964_vm6, %v7878_v59, %v7879_v16  ;;  %v2836_v10 = vand.u32 4294901760, %v2835_v50  ;;  %v20648_v16 = vld [vmem:[#allocation5_spill] sm:$0xff]  ;;  %v20649_v50 = vld [vmem:[#allocation12_spill] sm:$0xff]  ;;  %v4186_v36 = vld [vmem:[%s15170_s21 + $0x38] sm:$0xff] }
 0x218   : > { %20636 = vst [vmem:[#allocation93_spill] sm:$0xff] %v15070_v9  ;;  %20638 = vst [vmem:[#allocation94_spill] sm:$0xff] %v15076_v57  ;;  %v15084_v31 = vsel %vm14964_vm6, %v14805_v29, %v20639_v43  ;;  %v15094_v58 = vsel %vm14964_vm6, %v7872_v54, %v20217_v12  ;;  %v15100_v37 = vsel %vm14964_vm6, %v7888_v53, %v20643_v32  ;;  %v2826_v29 = vand.u32 4294901760, %v2825_v48  ;;  %v20647_v53 = vld [vmem:[#allocation10_spill] sm:$0xff]  ;;  %v20650_v48 = vld [vmem:[#allocation16_spill] sm:$0xff] }
 0x219   : > { %20640 = vst [vmem:[#allocation95_spill] sm:$0xff] %v15084_v31  ;;  %20641 = vst [vmem:[#allocation96_spill] sm:$0xff] %v15088_v40  ;;  %v20645_v43 = vand.u32 4294901760, %v14972_v28  ;;  %v15109_v21 = vsel %vm14964_vm6, %v10756_v44, %v20216_v34  ;;  %v20651_v44 = vld [vmem:[#allocation19_spill] sm:$0xff]  ;;  %v20652_v32 = vld [vmem:[#allocation21_spill] sm:$0xff]  ;;  %v13692_v19 = vmov 0  }
 0x21a   : > { %20642 = vst [vmem:[#allocation97_spill] sm:$0xff] %v15094_v58  ;;  %20644 = vst [vmem:[#allocation98_spill] sm:$0xff] %v15100_v37  ;;  %11836 = vmatmul.mubr.f32.gmra.mrb[56].mxu1 %v2826_v29  ;;  %v20654_v29 = vld [vmem:[#allocation27_spill] sm:$0xff]  ;;  %v20659_v34 = vld [vmem:[#allocation45_spill] sm:$0xff]  ;;  %13526 = vset.pattern.permute.xlu0 %v13692_v19 }
 0x21b   : > { %v2845_v59 = vsub.f32 %v14972_v28, %v20645_v43  ;;  %20646 = vst [vmem:[#allocation99_spill] sm:$0xff] %v15109_v21  ;;  %11838 = vmatprep.mubr.f32.mxu1 %v2836_v10  ;;  %v20653_v10 = vld [vmem:[#allocation26_spill] sm:$0xff]  ;;  %v20655_v43 = vld [vmem:[#allocation33_spill] sm:$0xff]  ;;  %v20661_v21 = vld [vmem:[#allocation52_spill] sm:$0xff]  ;;  %13527 = vset.pattern.permute.xlu1 %v13692_v19 }
 0x21c   : > { %v20660_v12 = vld [vmem:[#allocation49_spill] sm:$0xff]  ;;  %v20662_v37 = vld [vmem:[#allocation56_spill] sm:$0xff]  ;;  %v20663_v58 = vld [vmem:[#allocation59_spill] sm:$0xff]  ;;  %4246 = vperm.xlu0 %13526, %v4186_v36  }
 0x21d   : > { %v2846_v54 = vand.u32 4294901760, %v2845_v59  ;;  %v20656_v59 = vld [vmem:[#allocation35_spill] sm:$0xff]  ;;  %v20664_v40 = vld [vmem:[#allocation65_spill] sm:$0xff]  ;;  %v20665_v31 = vld [vmem:[#allocation64_spill] sm:$0xff] }
 0x21e   : > { %v20666_v57 = vld [vmem:[#allocation67_spill] sm:$0xff]  ;;  %v20667_v9 = vld [vmem:[#allocation9_spill] sm:$0xff]  ;;  %v20687_v30 = vld [vmem:[#allocation68_spill] sm:$0xff] }
 0x21f   : > { %11839 = vmatmul.mubr.f32.gmra.mrb[58].mxu1 %v2846_v54  ;;  %v20658_v54 = vld [vmem:[#allocation44_spill] sm:$0xff]  ;;  %v20684_v25 = vld [vmem:[#allocation61_spill] sm:$0xff]  ;;  %v20690_v19 = vld [vmem:[#allocation71_spill] sm:$0xff] }
 0x220   : > { %11843 = vmatprep.mubr.f32.mxu1 %v14444_v56  ;;  %v4188_v7 = vld [vmem:[%s15170_s21 + $0x48] sm:$0xff]  ;;  %4251 = vperm.xlu0 %13526, %v4187_v5   ;;  %v4193_v36 = vld [vmem:[%s15170_s21 + $0x70] sm:$0xff]  ;;  %v4194_v5 = vld [vmem:[%s15170_s21 + $0x78] sm:$0xff] }
 0x221   : > { %4256 = vperm.xlu1 %13527, %v4188_v7   ;;  %v4192_v7 = vld [vmem:[%s15170_s21 + $0x68] sm:$0xff] }
 0x223   : > { %11844 = vmatmul.mubr.f32.vlgmr.msra.gmra.mrb[30].mxu1 %v14441_v52 }
 0x224   : > { %11889 = vmatpush3.msra.mxu1 %v14385_v11  ;;  %11846 = vmatprep.mubr.f32.mxu1 %v20647_v53  ;;  %v20657_v11 = vld [vmem:[#allocation34_spill] sm:$0xff] }
 0x225   : > { %11935 = vmatprep.subr.mxu1 %v20648_v16 }
 0x227   : > { %11847 = vmatmul.mubr.f32.gmra.mrb[32].mxu1 %v20649_v50 }
 0x228   : > { %11849 = vmatprep.mubr.f32.mxu1 %v20650_v48 }
 0x22b   : > { %11850 = vmatmul.mubr.f32.gmra.mrb[34].mxu1 %v20651_v44 }
 0x22c   : > { %11852 = vmatprep.mubr.f32.mxu1 %v20652_v32 }
 0x22f   : > { %11853 = vmatmul.mubr.f32.gmra.mrb[36].mxu1 %v20653_v10 }
 0x230   : > { %11855 = vmatprep.mubr.f32.mxu1 %v20654_v29 }
 0x233   : > { %11856 = vmatmul.mubr.f32.gmra.mrb[38].mxu1 %v20655_v43 }
 0x234   : > { %11858 = vmatprep.mubr.f32.mxu1 %v20656_v59 }
 0x237   : > { %11859 = vmatmul.mubr.f32.gmra.mrb[40].mxu1 %v20657_v11 }
 0x238   : > { %11861 = vmatprep.mubr.f32.mxu1 %v20658_v54 }
 0x23b   : > { %11862 = vmatmul.mubr.f32.gmra.mrb[42].mxu1 %v20659_v34 }
 0x23c   : > { %11864 = vmatprep.mubr.f32.mxu1 %v20660_v12 }
 0x23f   : > { %11865 = vmatmul.mubr.f32.gmra.mrb[44].mxu1 %v20661_v21 }
 0x240   : > { %11867 = vmatprep.mubr.f32.mxu1 %v20662_v37 }
 0x243   : > { %11868 = vmatmul.mubr.f32.gmra.mrb[46].mxu1 %v20663_v58 }
 0x244   : > { %11870 = vmatprep.mubr.f32.mxu1 %v20664_v40 }
 0x247   : > { %11871 = vmatmul.mubr.f32.gmra.mrb[48].mxu1 %v20665_v31 }
 0x248   : > { %11873 = vmatprep.mubr.f32.mxu1 %v14853_v17 }
 0x24b   : > { %11874 = vmatmul.mubr.f32.gmra.mrb[50].mxu1 %v20666_v57 }
 0x24c   : > { %11876 = vmatprep.mubr.f32.mxu1 %v14863_v14 }
 0x24f   : > { %11877 = vmatmul.mubr.f32.gmra.mrb[52].mxu1 %v14861_v18 }
 0x250   : > { %11879 = vmatprep.mubr.f32.mxu1 %v14890_v63 }
 0x253   : > { %11880 = vmatmul.mubr.f32.gmra.mrb[54].mxu1 %v14866_v47  ;;  %v4197_v47 = vld [vmem:[%s15170_s21 + $0x90] sm:$0xff] }
 0x254   : > { %11882 = vmatprep.mubr.f32.mxu1 %v14913_v45  ;;  %v4191_v45 = vld [vmem:[%s15170_s21 + $0x60] sm:$0xff] }
 0x257   : > { %11883 = vmatmul.mubr.f32.gmra.mrb[56].mxu1 %v14911_v62  ;;  %v4190_v62 = vld [vmem:[%s15170_s21 + $0x58] sm:$0xff] }
 0x258   : > { %11885 = vmatprep.mubr.f32.mxu1 %v14940_v3  ;;  %v4189_v3 = vld [vmem:[%s15170_s21 + $0x50] sm:$0xff]  ;;  %4266 = vperm.xlu0 %13526, %v4190_v62   ;;  %v20692_v62 = vand.u32 4294901760, %v20667_v9 }
 0x259   : > { %4261 = vperm.xlu1 %13527, %v4189_v3   ;;  %v4195_v3 = vld [vmem:[%s15170_s21 + $0x80] sm:$0xff] }
 0x25b   : > { %11886 = vmatmul.mubr.f32.gmra.mrb[58].mxu1 %v14938_v15  ;;  %v20691_v15 = vld [vmem:[#allocation75_spill] sm:$0xff] }
 0x25c   : > { %11890 = vmatprep.mubr.f32.mxu1 %v20667_v9  ;;  %4276 = vperm.xlu0 %13526, %v4192_v7   ;;  %v20693_v7 = vand.u32 4294901760, %v20668_v1  ;;  %v20695_v9 = vand.u32 4294901760, %v20671_v8 }
 0x25d   : > { %4271 = vperm.xlu1 %13527, %v4191_v45   ;;  %v4196_v45 = vld [vmem:[%s15170_s21 + $0x88] sm:$0xff] }
 0x25f   : > { %11891 = vmatmul.mubr.f32.vlgmr.msra.gmra.mrb[30].mxu1 %v20668_v1  ;;  %v20696_v1 = vand.u32 4294901760, %v20672_v27 }
 0x260   : > { %11936 = vmatpush3.msra.mxu1 %v20648_v16  ;;  %11893 = vmatprep.mubr.f32.mxu1 %v20669_v42 }
 0x261   : > { %11982 = vmatprep.subr.mxu1 %v20670_v51  ;;  %4281 = vperm.xlu1 %13527, %v4193_v36   ;;  %v4198_v36 = vld [vmem:[%s15170_s21 + $0x98] sm:$0xff] }
 0x262   : > { %4286 = vperm.xlu0 %13526, %v4194_v5   ;;  %v20694_v5 = vand.u32 4294901760, %v20669_v42  ;;  %v4202_v42 = vld [vmem:[%s15170_s21 + $0xb8] sm:$0xff] }
 0x263   : > { %11894 = vmatmul.mubr.f32.gmra.mrb[32].mxu1 %v20671_v8  ;;  %v20699_v8 = vand.u32 4294901760, %v20675_v6 }
 0x264   : > { %11896 = vmatprep.mubr.f32.mxu1 %v20672_v27  ;;  %v4204_v27 = vld [vmem:[%s15170_s21 + $0xc8] sm:$0xff] }
 0x265   : > { %4291 = vperm.xlu1 %13527, %v4195_v3   ;;  %v4199_v3 = vld [vmem:[%s15170_s21 + $0xa0] sm:$0xff] }
 0x266   : > { %4296 = vperm.xlu0 %13526, %v4196_v45   ;;  %v4201_v45 = vld [vmem:[%s15170_s21 + $0xb0] sm:$0xff] }
 0x267   : > { %11897 = vmatmul.mubr.f32.gmra.mrb[34].mxu1 %v20673_v60 }
 0x268   : > { %11899 = vmatprep.mubr.f32.mxu1 %v20674_v46 }
 0x269   : > { %4301 = vperm.xlu1 %13527, %v4197_v47   ;;  %v4200_v47 = vld [vmem:[%s15170_s21 + $0xa8] sm:$0xff] }
 0x26a   : > { %4306 = vperm.xlu0 %13526, %v4198_v36   ;;  %v20700_v36 = vand.u32 4294901760, %v20676_v24 }
 0x26b   : > { %11900 = vmatmul.mubr.f32.gmra.mrb[36].mxu1 %v20675_v6  ;;  %v20703_v6 = vand.u32 4294901760, %v20679_v22 }
 0x26c   : > { %11902 = vmatprep.mubr.f32.mxu1 %v20676_v24  ;;  %v4208_v24 = vld [vmem:[%s15170_s21 + $0xe8] sm:$0xff] }
 0x26d   : > { %4311 = vperm.xlu1 %13527, %v4199_v3   ;;  %v20702_v3 = vand.u32 4294901760, %v20678_v49 }
 0x26e   : > { %4316 = vperm.xlu0 %13526, %v4200_v47   ;;  %v20704_v47 = vand.u32 4294901760, %v20680_v0 }
 0x26f   : > { %11903 = vmatmul.mubr.f32.gmra.mrb[38].mxu1 %v20677_v26 }
 0x270   : > { %11905 = vmatprep.mubr.f32.mxu1 %v20678_v49  ;;  %v4180_v49 = vld [vmem:[%s15170_s21 + $0x8] sm:$0xff] }
 0x271   : > { %4321 = vperm.xlu1 %13527, %v4201_v45   ;;  %v20706_v45 = vand.u32 4294901760, %v20682_v2 }
 0x272   : > { %4326 = vperm.xlu0 %13526, %v4202_v42   ;;  %v20708_v42 = vand.u32 4294901760, %v20684_v25 }
 0x273   : > { %11906 = vmatmul.mubr.f32.gmra.mrb[40].mxu1 %v20679_v22  ;;  %v20707_v22 = vand.u32 4294901760, %v20683_v13 }
 0x274   : > { %11908 = vmatprep.mubr.f32.mxu1 %v20680_v0  ;;  %v4182_v0 = vld [vmem:[%s15170_s21 + $0x18] sm:$0xff] }
 0x276   : > { %4336 = vperm.xlu0 %13526, %v4204_v27   ;;  %v20712_v27 = vand.u32 4294901760, %v20688_v39 }
 0x277   : > { %11909 = vmatmul.mubr.f32.gmra.mrb[42].mxu1 %v20681_v4 }
 0x278   : > { %11911 = vmatprep.mubr.f32.mxu1 %v20682_v2  ;;  %v20710_v2 = vand.u32 4294901760, %v20686_v33 }
 0x27b   : > { %11912 = vmatmul.mubr.f32.gmra.mrb[44].mxu1 %v20683_v13  ;;  %v20711_v13 = vand.u32 4294901760, %v20687_v30 }
 0x27c   : > { %11914 = vmatprep.mubr.f32.mxu1 %v20684_v25  ;;  %v20713_v25 = vand.u32 4294901760, %v20690_v19 }
 0x27f   : > { %11915 = vmatmul.mubr.f32.gmra.mrb[46].mxu1 %v20685_v35 }
 0x280   : > { %11917 = vmatprep.mubr.f32.mxu1 %v20686_v33  ;;  %v20716_v33 = vand.u32 4294901760, %v14908_v61 }
 0x283   : > { %11918 = vmatmul.mubr.f32.gmra.mrb[48].mxu1 %v20687_v30  ;;  %v20718_v30 = vand.u32 4294901760, %v14921_v20 }
 0x284   : > { %11920 = vmatprep.mubr.f32.mxu1 %v20688_v39  ;;  %v20719_v39 = vand.u32 4294901760, %v14943_v41 }
 0x287   : > { %11921 = vmatmul.mubr.f32.gmra.mrb[50].mxu1 %v20690_v19  ;;  %v20720_v19 = vand.u32 4294901760, %v14952_v23 }
 0x288   : > { %11923 = vmatprep.mubr.f32.mxu1 %v20691_v15 }
 0x28b   : > { %11924 = vmatmul.mubr.f32.gmra.mrb[52].mxu1 %v14897_v38 }
 0x28c   : > { %11926 = vmatprep.mubr.f32.mxu1 %v14908_v61  ;;  %v20722_v61 = vld [vmem:[#allocation72_spill] sm:$0xff] }
 0x28f   : > { %11927 = vmatmul.mubr.f32.gmra.mrb[54].mxu1 %v14905_v55 }
 0x290   : > { %11929 = vmatprep.mubr.f32.mxu1 %v14921_v20  ;;  %v20725_v20 = vld [vmem:[#allocation80_spill] sm:$0xff] }
 0x293   : > { %11930 = vmatmul.mubr.f32.gmra.mrb[56].mxu1 %v14943_v41  ;;  %v20726_v41 = vld [vmem:[#allocation79_spill] sm:$0xff] }
 0x294   : > { %11932 = vmatprep.mubr.f32.mxu1 %v14952_v23 }
 0x297   : > { %11933 = vmatmul.mubr.f32.gmra.mrb[58].mxu1 %v14972_v28 }
 0x298   : > { %11937 = vmatprep.mubr.f32.mxu1 %v20692_v62  ;;  %v20698_v62 = vand.u32 4294901760, %v20674_v46  ;;  %v4206_v46 = vld [vmem:[%s15170_s21 + $0xd8] sm:$0xff] }
 0x299   : > { %4346 = vperm.xlu0 %13526, %v4206_v46  }
 0x29b   : > { %11938 = vmatmul.mubr.f32.vlgmr.msra.gmra.mrb[30].mxu1 %v20693_v7  ;;  %v4203_v7 = vld [vmem:[%s15170_s21 + $0xc0] sm:$0xff] }
 0x29c   : > { %11983 = vmatpush3.msra.mxu1 %v20670_v51  ;;  %11940 = vmatprep.mubr.f32.mxu1 %v20694_v5  ;;  %v20697_v51 = vand.u32 4294901760, %v20673_v60  ;;  %v4205_v5 = vld [vmem:[%s15170_s21 + $0xd0] sm:$0xff]  ;;  %v20701_v60 = vand.u32 4294901760, %v20677_v26  ;;  %v20705_v26 = vand.u32 4294901760, %v20681_v4  ;;  %v20709_v4 = vand.u32 4294901760, %v20685_v35 }
 0x29d   : > { %12029 = vmatprep.subr.mxu1 %v20648_v16  ;;  %4331 = vperm.xlu1 %13527, %v4203_v7   ;;  %v4184_v7 = vld [vmem:[%s15170_s21 + $0x28] sm:$0xff]  ;;  %v20715_v35 = vand.u32 4294901760, %v14897_v38  ;;  %v20724_v38 = vld [vmem:[#allocation76_spill] sm:$0xff] }
 0x29e   : > { %4356 = vperm.xlu0 %13526, %v4208_v24  }
 0x29f   : > { %11941 = vmatmul.mubr.f32.gmra.mrb[32].mxu1 %v20695_v9  ;;  %v4207_v9 = vld [vmem:[%s15170_s21 + $0xe0] sm:$0xff] }
 0x2a0   : > { %11943 = vmatprep.mubr.f32.mxu1 %v20696_v1  ;;  %v4179_v1 = vld [vmem:[%s15170_s21] sm:$0xff] }
 0x2a1   : > { %4341 = vperm.xlu1 %13527, %v4205_v5   ;;  %v20717_v5 = vand.u32 4294901760, %v14905_v55  ;;  %v20723_v55 = vld [vmem:[#allocation77_spill] sm:$0xff] }
 0x2a2   : > { %4216 = vperm.xlu0 %13526, %v4180_v49  }
 0x2a3   : > { %11944 = vmatmul.mubr.f32.gmra.mrb[34].mxu1 %v20697_v51  ;;  %v4181_v51 = vld [vmem:[%s15170_s21 + $0x10] sm:$0xff] }
 0x2a4   : > { %11946 = vmatprep.mubr.f32.mxu1 %v20698_v62  ;;  %v4183_v62 = vld [vmem:[%s15170_s21 + $0x20] sm:$0xff] }
 0x2a5   : > { %4351 = vperm.xlu1 %13527, %v4207_v9  }
 0x2a6   : > { %4226 = vperm.xlu0 %13526, %v4182_v0  }
 0x2a7   : > { %11947 = vmatmul.mubr.f32.gmra.mrb[36].mxu1 %v20699_v8  ;;  %v4185_v8 = vld [vmem:[%s15170_s21 + $0x30] sm:$0xff]  ;;  %s20297_s21 = smov 40  }
 0x2a8   : > { %11949 = vmatprep.mubr.f32.mxu1 %v20700_v36  ;;  %v20714_v36 = vand.u32 4294901760, %v20691_v15  ;;  %v20721_v15 = vand.u32 4294901760, %v14972_v28 }
 0x2a9   : > { %4211 = vperm.xlu1 %13527, %v4179_v1  }
 0x2aa   : > { %4236 = vperm.xlu0 %13526, %v4184_v7  }
 0x2ab   : > { %11950 = vmatmul.mubr.f32.gmra.mrb[38].mxu1 %v20701_v60 }
 0x2ac   : > { %11952 = vmatprep.mubr.f32.mxu1 %v20702_v3 }
 0x2ad   : > { %4221 = vperm.xlu1 %13527, %v4181_v51  }
 0x2af   : > { %11953 = vmatmul.mubr.f32.gmra.mrb[40].mxu1 %v20703_v6 }
 0x2b0   : > { %11955 = vmatprep.mubr.f32.mxu1 %v20704_v47 }
 0x2b1   : > { %4231 = vperm.xlu1 %13527, %v4183_v62  }
 0x2b3   : > { %11956 = vmatmul.mubr.f32.gmra.mrb[42].mxu1 %v20705_v26 }
 0x2b4   : > { %11958 = vmatprep.mubr.f32.mxu1 %v20706_v45 }
 0x2b5   : > { %4241 = vperm.xlu1 %13527, %v4185_v8  }
 0x2b7   : > { %11959 = vmatmul.mubr.f32.gmra.mrb[44].mxu1 %v20707_v22 }
 0x2b8   : > { %11961 = vmatprep.mubr.f32.mxu1 %v20708_v42 }
 0x2bb   : > { %11962 = vmatmul.mubr.f32.gmra.mrb[46].mxu1 %v20709_v4 }
 0x2bc   : > { %11964 = vmatprep.mubr.f32.mxu1 %v20710_v2 }
 0x2bf   : > { %11965 = vmatmul.mubr.f32.gmra.mrb[48].mxu1 %v20711_v13 }
 0x2c0   : > { %11967 = vmatprep.mubr.f32.mxu1 %v20712_v27 }
 0x2c3   : > { %11968 = vmatmul.mubr.f32.gmra.mrb[50].mxu1 %v20713_v25 }
 0x2c4   : > { %11970 = vmatprep.mubr.f32.mxu1 %v20714_v36 }
 0x2c7   : > { %11971 = vmatmul.mubr.f32.gmra.mrb[52].mxu1 %v20715_v35 }
 0x2c8   : > { %11973 = vmatprep.mubr.f32.mxu1 %v20716_v33 }
 0x2cb   : > { %11974 = vmatmul.mubr.f32.gmra.mrb[54].mxu1 %v20717_v5 }
 0x2cc   : > { %11976 = vmatprep.mubr.f32.mxu1 %v20718_v30 }
 0x2cf   : > { %11977 = vmatmul.mubr.f32.gmra.mrb[56].mxu1 %v20719_v39 }
 0x2d0   : > { %11979 = vmatprep.mubr.f32.mxu1 %v20720_v19 }
 0x2d3   : > { %11980 = vmatmul.mubr.f32.gmra.mrb[58].mxu1 %v20721_v15 }
 0x2d4   : > { %11984 = vmatprep.mubr.f32.mxu1 %v14444_v56 }
 0x2d7   : > { %11985 = vmatmul.mubr.f32.vlgmr.msra.gmra.mrb[30].mxu1 %v14441_v52 }
 0x2d8   : > { %12030 = vmatpush3.msra.mxu1 %v20648_v16  ;;  %11987 = vmatprep.mubr.f32.mxu1 %v20647_v53 }
 0x2db   : > { %11988 = vmatmul.mubr.f32.gmra.mrb[32].mxu1 %v20649_v50 }
 0x2dc   : > { %11990 = vmatprep.mubr.f32.mxu1 %v20650_v48 }
 0x2df   : > { %11991 = vmatmul.mubr.f32.gmra.mrb[34].mxu1 %v20651_v44 }
 0x2e0   : > { %11993 = vmatprep.mubr.f32.mxu1 %v20652_v32 }
 0x2e3   : > { %11994 = vmatmul.mubr.f32.gmra.mrb[36].mxu1 %v20653_v10 }
 0x2e4   : > { %11996 = vmatprep.mubr.f32.mxu1 %v20654_v29 }
 0x2e7   : > { %11997 = vmatmul.mubr.f32.gmra.mrb[38].mxu1 %v20655_v43 }
 0x2e8   : > { %11999 = vmatprep.mubr.f32.mxu1 %v20656_v59 }
 0x2eb   : > { %12000 = vmatmul.mubr.f32.gmra.mrb[40].mxu1 %v20657_v11 }
 0x2ec   : > { %12002 = vmatprep.mubr.f32.mxu1 %v20658_v54 }
 0x2ef   : > { %12003 = vmatmul.mubr.f32.gmra.mrb[42].mxu1 %v20659_v34 }
 0x2f0   : > { %12005 = vmatprep.mubr.f32.mxu1 %v20660_v12 }
 0x2f3   : > { %12006 = vmatmul.mubr.f32.gmra.mrb[44].mxu1 %v20661_v21 }
 0x2f4   : > { %12008 = vmatprep.mubr.f32.mxu1 %v20662_v37 }
 0x2f7   : > { %12009 = vmatmul.mubr.f32.gmra.mrb[46].mxu1 %v20663_v58 }
 0x2f8   : > { %12011 = vmatprep.mubr.f32.mxu1 %v20664_v40 }
 0x2fb   : > { %12012 = vmatmul.mubr.f32.gmra.mrb[48].mxu1 %v20665_v31 }
 0x2fc   : > { %12014 = vmatprep.mubr.f32.mxu1 %v14853_v17 }
 0x2ff   : > { %12015 = vmatmul.mubr.f32.gmra.mrb[50].mxu1 %v20666_v57 }
 0x300   : > { %12017 = vmatprep.mubr.f32.mxu1 %v14863_v14 }
 0x303   : > { %12018 = vmatmul.mubr.f32.gmra.mrb[52].mxu1 %v14861_v18 }
 0x304   : > { %12020 = vmatprep.mubr.f32.mxu1 %v14890_v63 }
 0x307   : > { %12021 = vmatmul.mubr.f32.gmra.mrb[54].mxu1 %v20722_v61 }
 0x308   : > { %12023 = vmatprep.mubr.f32.mxu1 %v20723_v55 }
 0x30b   : > { %12024 = vmatmul.mubr.f32.gmra.mrb[56].mxu1 %v20724_v38 }
 0x30c   : > { %12026 = vmatprep.mubr.f32.mxu1 %v20725_v20 }
 0x30f   : > { %12027 = vmatmul.mubr.f32.gmra.mrb[58].mxu1 %v20726_v41 }
 0x310   : > { %12031 = vmatprep.mubr.f32.mxu1 %v14444_v56 }
 0x313   : > { %12032 = vmatmul.mubr.f32.vlgmr.msra.gmra.mrb[30].mxu1 %v14441_v52  ;;  %v15334_v52 = vpop.permute.xlu0 %4246 }
 0x314   : > { %12034 = vmatprep.mubr.f32.mxu1 %v20647_v53 }
 0x317   : > { %12035 = vmatmul.mubr.f32.gmra.mrb[32].mxu1 %v20649_v50  ;;  %v15338_v56 = vpop.permute.xlu0 %4251 }
 0x318   : > { %12037 = vmatprep.mubr.f32.mxu1 %v20650_v48 }
 0x31b   : > { %12038 = vmatmul.mubr.f32.gmra.mrb[34].mxu1 %v20651_v44 }
 0x31c   : > { %12040 = vmatprep.mubr.f32.mxu1 %v20652_v32 }
 0x31f   : > { %12041 = vmatmul.mubr.f32.gmra.mrb[36].mxu1 %v20653_v10 }
 0x320   : > { %12043 = vmatprep.mubr.f32.mxu1 %v20654_v29 }
 0x323   : > { %12044 = vmatmul.mubr.f32.gmra.mrb[38].mxu1 %v20655_v43  ;;  %v15383_v43 = vld [vmem:[%s20728_s7] ss:$0 sm:$0xff]  ;;  %s20827_s7 = smov 16  }
 0x324   : > { %12046 = vmatprep.mubr.f32.mxu1 %v20656_v59 }
 0x327   : > { %12047 = vmatmul.mubr.f32.gmra.mrb[40].mxu1 %v20657_v11 }
 0x328   : > { %12049 = vmatprep.mubr.f32.mxu1 %v20658_v54 }
 0x32b   : > { %12050 = vmatmul.mubr.f32.gmra.mrb[42].mxu1 %v20659_v34 }
 0x32c   : > { %12052 = vmatprep.mubr.f32.mxu1 %v20660_v12 }
 0x32f   : > { %12053 = vmatmul.mubr.f32.gmra.mrb[44].mxu1 %v20661_v21 }
 0x330   : > { %12055 = vmatprep.mubr.f32.mxu1 %v20662_v37 }
 0x333   : > { %12056 = vmatmul.mubr.f32.gmra.mrb[46].mxu1 %v20663_v58 }
 0x334   : > { %12058 = vmatprep.mubr.f32.mxu1 %v20664_v40 }
 0x337   : > { %12059 = vmatmul.mubr.f32.gmra.mrb[48].mxu1 %v20665_v31 }
 0x338   : > { %12061 = vmatprep.mubr.f32.mxu1 %v14853_v17  ;;  %v15336_v17 = vpop.permute.xlu1 %4256 }
 0x33b   : > { %12062 = vmatmul.mubr.f32.gmra.mrb[50].mxu1 %v20666_v57 }
 0x33c   : > { %12064 = vmatprep.mubr.f32.mxu1 %v14863_v14  ;;  %v15340_v14 = vpop.permute.xlu1 %4261 }
 0x33f   : > { %12065 = vmatmul.mubr.f32.gmra.mrb[52].mxu1 %v14861_v18  ;;  %v15342_v18 = vpop.permute.xlu0 %4266 }
 0x340   : > { %12067 = vmatprep.mubr.f32.mxu1 %v14890_v63  ;;  %v15344_v63 = vpop.permute.xlu1 %4271 }
 0x343   : > { %12068 = vmatmul.mubr.f32.gmra.mrb[54].mxu1 %v20722_v61  ;;  %v15346_v23 = vpop.permute.xlu0 %4276 }
 0x344   : > { %12070 = vmatprep.mubr.f32.mxu1 %v20723_v55  ;;  %v15348_v28 = vpop.permute.xlu1 %4281 }
 0x347   : > { %12071 = vmatmul.mubr.f32.gmra.mrb[56].mxu1 %v20724_v38  ;;  %v15350_v12 = vpop.permute.xlu0 %4286 }
 0x348   : > { %12073 = vmatprep.mubr.f32.mxu1 %v20725_v20  ;;  %v15352_v57 = vpop.permute.xlu1 %4291 }
 0x34b   : > { %12074 = vmatmul.mubr.f32.gmra.mrb[58].mxu1 %v20726_v41  ;;  %v15354_v34 = vpop.permute.xlu0 %4296 }
 0x34c   : > { %v15356_v31 = vpop.permute.xlu1 %4301 }
 0x34f   : > { %v15358_v40 = vpop.permute.xlu0 %4306 }
 0x350   : > { %v15360_v58 = vpop.permute.xlu1 %4311 }
 0x353   : > { %v15362_v37 = vpop.permute.xlu0 %4316 }
 0x354   : > { %v15364_v21 = vpop.permute.xlu1 %4321 }
 0x355   : > { %20727 = vst [vmem:[#allocation10_spill] sm:$0xff] %v15364_v21 }
 0x357   : > { %v15366_v53 = vpop.permute.xlu0 %4326 }
 0x358   : > { %v15368_v16 = vpop.permute.xlu1 %4331 }
 0x35b   : > { %v15370_v50 = vpop.permute.xlu0 %4336 }
 0x35c   : > { %v15372_v48 = vpop.permute.xlu1 %4341 }
 0x35f   : > { %v15374_v44 = vpop.permute.xlu0 %4346 }
 0x360   : > { %v15376_v32 = vpop.permute.xlu1 %4351 }
 0x363   : > { %v15378_v10 = vpop.permute.xlu0 %4356 }
 0x364   : > { %v4212_v29 = vpop.permute.xlu1 %4211 }
 0x367   : > { %v4217_v11 = vpop.permute.xlu0 %4216 }
 0x368   : > { %v4222_v9 = vpop.permute.xlu1 %4221 }
 0x36b   : > { %v4227_v51 = vpop.permute.xlu0 %4226 }
 0x36c   : > { %v4232_v13 = vpop.permute.xlu1 %4231 }
 0x3e6   : > { %v12033_v59 = vpop.f32.mrb[30].mxu1 }
 0x3e7   : > { %v12894_v54 = vadd.f32 %v12033_v59, %v15383_v43  ;;  %v4001_v60 = vpop.f32.mrb[31].mxu1  ;;  %v4242_v59 = vpop.permute.xlu1 %4241 }
 0x3e8   : > { %v12895_v46 = vadd.f32 %v15383_v43, %v4001_v60 }
 0x3e9   : > { %v4360_v3 = vmul.f32 %v12894_v54, %v4217_v11 }
 0x3ea   : > { %v4359_v6 = vmul.f32 %v12895_v46, %v4212_v29  ;;  %v12036_v24 = vpop.f32.mrb[32].mxu1 }
 0x3eb   : > { %v4420_v47 = vcombine.high %v4360_v3, %v4360_v3  ;;  %v12896_v1 = vadd.f32 %v12036_v24, %v15383_v43  ;;  %v4013_v26 = vpop.f32.mrb[33].mxu1 }
 0x3ec   : > { %v4419_v49 = vcombine.high %v4359_v6, %v4359_v6  ;;  %v12897_v45 = vadd.f32 %v15383_v43, %v4013_v26  ;;  %v4237_v26 = vpop.permute.xlu0 %4236 }
 0x3ed   : > { %v15389_v22 = vcombine.low %v4360_v3, %v4420_v47  ;;  %v15391_v0 = vmul.f32 %v12896_v1, %v4227_v51 }
 0x3ee   : > { %v4361_v42 = vmul.f32 %v12897_v45, %v4222_v9  ;;  %v12039_v62 = vpop.f32.mrb[34].mxu1  ;;  %v4752_v4 = vcombine.low %v4419_v49, %v4360_v3  ;;  %v15393_v7 = vcombine.low %v4359_v6, %v4419_v49 }
 0x3ef   : > { %20729 = vst [vmem:[#allocation5_spill] sm:$0xff] %v15389_v22  ;;  %v4025_v2 = vpop.f32.mrb[35].mxu1  ;;  %v4487_v8 = vrot.slane %v15389_v22, 1  ;;  %v4576_v35 = vrot.slane %v15389_v22, 2  ;;  %v4422_v19 = vcombine.high %v15391_v0, %v15391_v0  ;;  %v12898_v41 = vadd.f32 %v12039_v62, %v15383_v43 }
 0x3f0   : > { %20730 = vst [vmem:[#allocation12_spill] sm:$0xff] %v15393_v7  ;;  %v12899_v27 = vadd.f32 %v15383_v43, %v4025_v2  ;;  %4768 = vrot.lane.b32.xlu0 %v4752_v4, %s20312_s15  ;;  %v4489_v25 = vrot.slane %v4361_v42, 1  ;;  %v4753_v36 = vcombine.low %v4420_v47, %v4361_v42  ;;  %v4578_v39 = vrot.slane %v4361_v42, 2 }
 0x3f1   : > { %v4486_v55 = vrot.slane %v15393_v7, 1  ;;  %v4665_v29 = vrot.slane %v15389_v22, 3  ;;  %v4667_v46 = vrot.slane %v4361_v42, 3  ;;  %v4421_v3 = vcombine.high %v4361_v42, %v4361_v42 }
 0x3f2   : > { %v15399_v33 = vmul.f32 %v12899_v27, %v4232_v13  ;;  %v12042_v5 = vpop.f32.mrb[36].mxu1  ;;  %v4490_v30 = vsel %vm20433_vm7, %v4487_v8, %v4489_v25  ;;  %v4579_v60 = vsel %vm4574_vm1, %v4576_v35, %v4578_v39  ;;  %v4575_v1 = vrot.slane %v15393_v7, 2 }
 0x3f3   : > { %v12900_v15 = vadd.f32 %v12042_v5, %v15383_v43  ;;  %v4037_v61 = vpop.f32.mrb[37].mxu1  ;;  %4528 = vrot.lane.b32.xlu1 %v4490_v30, %s20291_s16  ;;  %v4488_v47 = vsel %vm20433_vm7, %v4486_v55, %v4487_v8  ;;  %v15427_v49 = vcombine.low %v4421_v3, %v15391_v0  ;;  %v4364_v45 = vmul.f32 %v12898_v41, %v4237_v26 }
 0x3f4   : > { %v12901_v38 = vadd.f32 %v15383_v43, %v4037_v61  ;;  %4770 = vrot.lane.b32.xlu0 %v4753_v36, %s20312_s15  ;;  %v15410_v20 = vcombine.low %v4422_v19, %v15399_v33  ;;  %v4668_v4 = vsel %vm4663_vm8, %v4665_v29, %v4667_v46  ;;  %v4577_v27 = vsel %vm4574_vm1, %v4575_v1, %v4576_v35 }
 0x3f5   : > { %v15415_v11 = vmul.f32 %v12900_v15, %v15334_v52  ;;  %20732 = vst [vmem:[#allocation19_spill] sm:$0xff] %v15427_v49  ;;  %v4424_v39 = vcombine.high %v4364_v45, %v4364_v45  ;;  %v4754_v15 = vcombine.low %v15391_v0, %v4422_v19  ;;  %v4669_v22 = vrot.slane %v15427_v49, 3 }
 0x3f6   : > { %20731 = vst [vmem:[#allocation16_spill] sm:$0xff] %v15410_v20  ;;  %v12045_v54 = vpop.f32.mrb[38].mxu1  ;;  %v15418_v9 = vmul.f32 %v12901_v38, %v4242_v59 }
 0x3f7   : > { %v12902_v6 = vadd.f32 %v12045_v54, %v15383_v43  ;;  %v4049_v24 = vpop.f32.mrb[39].mxu1  ;;  %4617 = vrot.lane.b32.xlu1 %v4579_v60, %s20295_s17  ;;  %v4426_v42 = vcombine.high %v15415_v11, %v15415_v11 }
 0x3f8   : > { %v12903_v52 = vadd.f32 %v15383_v43, %v4049_v24  ;;  %4526 = vrot.lane.b32.xlu0 %v4488_v47, %s20291_s16  ;;  %v15435_v2 = vcombine.high %v15418_v9, %v15418_v9  ;;  %v15456_v59 = vcombine.low %v4424_v39, %v15418_v9 }
 0x3f9   : > { %v4368_v25 = vmul.f32 %v12902_v6, %v15336_v17 }
 0x3fa   : > { %v4367_v51 = vmul.f32 %v12903_v52, %v15338_v56  ;;  %v12048_v62 = vpop.f32.mrb[40].mxu1  ;;  %v4664_v56 = vrot.slane %v15393_v7, 3  ;;  %v15471_v19 = vcombine.low %v15435_v2, %v15415_v11 }
 0x3fb   : > { %v12904_v8 = vadd.f32 %v12048_v62, %v15383_v43  ;;  %v4061_v13 = vpop.f32.mrb[41].mxu1  ;;  %4706 = vrot.lane.b32.xlu1 %v4668_v4, %s20301_s18  ;;  %v15487_v24 = vcombine.high %v4368_v25, %v4368_v25 }
 0x3fc   : > { %v4427_v36 = vcombine.high %v4367_v51, %v4367_v51  ;;  %v15442_v5 = vcombine.low %v4426_v42, %v4367_v51  ;;  %v12905_v30 = vadd.f32 %v15383_v43, %v4061_v13  ;;  %4615 = vrot.lane.b32.xlu0 %v4577_v27, %s20295_s17  ;;  %v4666_v17 = vsel %vm4663_vm8, %v4664_v56, %v4665_v29 }
 0x3fd   : > { %v15459_v54 = vmul.f32 %v12904_v8, %v15342_v18  ;;  %v15475_v29 = vcombine.high %v15399_v33, %v15399_v33  ;;  %20735 = vst [vmem:[#allocation27_spill] sm:$0xff] %v15487_v24  ;;  %v15508_v8 = vcombine.low %v4368_v25, %v15487_v24  ;;  %v15519_v13 = vcombine.low %v4364_v45, %v4424_v39 }
 0x3fe   : > { %20733 = vst [vmem:[#allocation21_spill] sm:$0xff] %v15442_v5  ;;  %v15447_v61 = vcombine.low %v4427_v36, %v4368_v25  ;;  %v15450_v55 = vmul.f32 %v12905_v30, %v15340_v14  ;;  %v12051_v35 = vpop.f32.mrb[42].mxu1  ;;  %v4492_v30 = vrot.slane %v15410_v20, 1 }
 0x3ff   : > { %v12906_v38 = vadd.f32 %v12051_v35, %v15383_v43  ;;  %v4073_v41 = vpop.f32.mrb[43].mxu1  ;;  %4772 = vrot.lane.b32.xlu1 %v4754_v15, %s20312_s15  ;;  %v4755_v1 = vcombine.low %v15399_v33, %v15475_v29  ;;  %20737 = vst [vmem:[#allocation35_spill] sm:$0xff] %v15519_v13 }
 0x400   : > { %20734 = vst [vmem:[#allocation26_spill] sm:$0xff] %v15447_v61  ;;  %v15463_v0 = vcombine.high %v15450_v55, %v15450_v55  ;;  %v15466_v14 = vadd.f32 %v15383_v43, %v4073_v41  ;;  %4704 = vrot.lane.b32.xlu0 %v4666_v17, %s20301_s18 }
 0x401   : > { %v15482_v60 = vmul.f32 %v12906_v38, %v15346_v23 }
 0x402   : > { %v15479_v18 = vcombine.low %v15463_v0, %v15459_v54  ;;  %v12054_v46 = vpop.f32.mrb[44].mxu1 }
 0x403   : > { %v12908_v3 = vadd.f32 %v12054_v46, %v15383_v43  ;;  %v4085_v6 = vpop.f32.mrb[45].mxu1  ;;  %4818 = vrot.lane.b32.xlu1 %v15427_v49, %s20307_s19  ;;  %v15495_v23 = vcombine.high %v15482_v60, %v15482_v60  ;;  %v4581_v46 = vrot.slane %v15410_v20, 2 }
 0x404   : > { %v12909_v47 = vadd.f32 %v15383_v43, %v4085_v6  ;;  %5027 = vrot.lane.b32.xlu0 %v4754_v15, %s20299_s20 }
 0x405   : > { %v15498_v26 = vmul.f32 %v12908_v3, %v15350_v12 }
 0x406   : > { %v15501_v52 = vmul.f32 %v12909_v47, %v15348_v28  ;;  %v12057_v42 = vpop.f32.mrb[46].mxu1  ;;  %v15517_v28 = vcombine.low %v4367_v51, %v4427_v36  ;;  %v20256_v36 = vrot.slane %v15508_v8, 7  ;;  %v4494_v47 = vrot.slane %v15475_v29, 1 }
 0x407   : > { %v15504_v62 = vadd.f32 %v12057_v42, %v15383_v43  ;;  %v4097_v4 = vpop.f32.mrb[47].mxu1  ;;  %4774 = vrot.lane.b32.xlu1 %v4755_v1, %s20312_s15  ;;  %v15523_v27 = vcombine.high %v15498_v26, %v15498_v26 }
 0x408   : > { %v15512_v33 = vcombine.low %v15495_v23, %v15501_v52  ;;  %v12911_v12 = vadd.f32 %v15383_v43, %v4097_v4  ;;  %4820 = vrot.lane.b32.xlu0 %v15410_v20, %s20307_s19  ;;  %v20255_v39 = vrot.slane %v15517_v28, 7 }
 0x40a   : > { %20736 = vst [vmem:[#allocation33_spill] sm:$0xff] %v15512_v33  ;;  %v15526_v56 = vmul.f32 %v12911_v12, %v15352_v57  ;;  %v12060_v25 = vpop.f32.mrb[48].mxu1  ;;  %v4491_v57 = vrot.slane %v15427_v49, 1  ;;  %v4580_v12 = vrot.slane %v15427_v49, 2 }
 0x40b   : > { %v12912_v15 = vadd.f32 %v12060_v25, %v15383_v43  ;;  %v4109_v35 = vpop.f32.mrb[49].mxu1  ;;  %5029 = vrot.lane.b32.xlu1 %v4755_v1, %s20299_s20  ;;  %v15554_v1 = vsel %vm5739_vm9, %v20255_v39, %v20256_v36  ;;  %v4583_v39 = vrot.slane %v15475_v29, 2 }
 0x40c   : > { %v15533_v45 = vcombine.low %v15523_v27, %v15526_v56  ;;  %v12913_v51 = vadd.f32 %v15383_v43, %v4109_v35  ;;  %4822 = vrot.lane.b32.xlu0 %v15519_v13, %s20307_s19  ;;  %v4493_v17 = vsel %vm20433_vm7, %v4491_v57, %v4492_v30 }
 0x40e   : > { %v15542_v38 = vmul.f32 %v12913_v51, %v15356_v31  ;;  %v12063_v41 = vpop.f32.mrb[50].mxu1  ;;  %v15557_v31 = vmul.f32 %v12912_v15, %v15358_v40  ;;  %v4582_v51 = vsel %vm4574_vm1, %v4580_v12, %v4581_v46 }
 0x40f   : > { %v12914_v3 = vadd.f32 %v12063_v41, %v15383_v43  ;;  %v4121_v6 = vpop.f32.mrb[51].mxu1  ;;  %4530 = vrot.lane.b32.xlu1 %v4493_v17, %s20291_s16 }
 0x410   : > { %v4437_v42 = vcombine.high %v15542_v38, %v15542_v38  ;;  %v12915_v4 = vadd.f32 %v15383_v43, %v4121_v6  ;;  %5077 = vrot.lane.b32.xlu0 %v15519_v13, %s20297_s21  ;;  %v4495_v6 = vsel %vm20433_vm7, %v4492_v30, %v4494_v47 }
 0x411   : > { %v15580_v36 = vmul.f32 %v12914_v3, %v15362_v37  ;;  %v4670_v37 = vrot.slane %v15410_v20, 3  ;;  %v4672_v20 = vrot.slane %v15475_v29, 3 }
 0x412   : > { %v15566_v25 = vcombine.low %v4437_v42, %v15557_v31  ;;  %v15569_v35 = vcombine.low %v15542_v38, %v4437_v42  ;;  %v15572_v40 = vmul.f32 %v12915_v4, %v15360_v58  ;;  %v12066_v15 = vpop.f32.mrb[52].mxu1 }
 0x413   : > { %v12916_v57 = vadd.f32 %v12066_v15, %v15383_v43  ;;  %v4133_v41 = vpop.f32.mrb[53].mxu1  ;;  %4619 = vrot.lane.b32.xlu1 %v4582_v51, %s20295_s17  ;;  %v4584_v15 = vsel %vm4574_vm1, %v4581_v46, %v4583_v39  ;;  %v4671_v46 = vsel %vm4663_vm8, %v4669_v22, %v4670_v37 }
 0x414   : > { %20738 = vst [vmem:[#allocation34_spill] sm:$0xff] %v15566_v25  ;;  %20739 = vst [vmem:[#allocation44_spill] sm:$0xff] %v15572_v40  ;;  %v15584_v42 = vcombine.high %v15572_v40, %v15572_v40  ;;  %v15587_v58 = vadd.f32 %v15383_v43, %v4133_v41  ;;  %4532 = vrot.lane.b32.xlu0 %v4495_v6, %s20291_s16 }
 0x415   : > { %v15595_v30 = vmul.f32 %v12916_v57, %v15366_v53  ;;  %v15606_v53 = vmul.f32 %v15466_v14, %v15344_v63 }
 0x416   : > { %20740 = vst [vmem:[#allocation45_spill] sm:$0xff] %v15584_v42  ;;  %20741 = vst [vmem:[#allocation49_spill] sm:$0xff] %v15587_v58  ;;  %v15592_v4 = vcombine.low %v15584_v42, %v15580_v36  ;;  %v12069_v47 = vpop.f32.mrb[54].mxu1 }
 0x417   : > { %20743 = vst [vmem:[#allocation56_spill] sm:$0xff] %v15595_v30  ;;  %v12918_v3 = vadd.f32 %v12069_v47, %v15383_v43  ;;  %v4145_v12 = vpop.f32.mrb[55].mxu1  ;;  %4871 = vrot.lane.b32.xlu1 %v4493_v17, %s20261_s22  ;;  %20744 = vst [vmem:[#allocation59_spill] sm:$0xff] %v15606_v53  ;;  %v15610_v57 = vcombine.high %v15595_v30, %v15595_v30 }
 0x418   : > { %20742 = vst [vmem:[#allocation52_spill] sm:$0xff] %v15592_v4  ;;  %v12919_v41 = vadd.f32 %v15383_v43, %v4145_v12  ;;  %4621 = vrot.lane.b32.xlu0 %v4584_v15, %s20295_s17  ;;  %v15621_v12 = vcombine.high %v15459_v54, %v15459_v54 }
 0x419   : > { %20745 = vst [vmem:[#allocation65_spill] sm:$0xff] %v15610_v57  ;;  %v15613_v47 = vmul.f32 %v12918_v3, %v15370_v50 }
 0x41a   : > { %v15616_v17 = vmul.f32 %v12919_v41, %v15368_v16  ;;  %v12072_v39 = vpop.f32.mrb[56].mxu1  ;;  %v15634_v22 = vcombine.low %v15621_v12, %v15606_v53 }
 0x41b   : > { %20746 = vst [vmem:[#allocation64_spill] sm:$0xff] %v15613_v47  ;;  %v12920_v63 = vadd.f32 %v12072_v39, %v15383_v43  ;;  %v4157_v14 = vpop.f32.mrb[57].mxu1  ;;  %4708 = vrot.lane.b32.xlu1 %v4671_v46, %s20301_s18  ;;  %v15638_v3 = vcombine.high %v15613_v47, %v15613_v47  ;;  %v15738_v47 = vrot.slane %v15569_v35, 7 }
 0x41c   : > { %20747 = vst [vmem:[#allocation67_spill] sm:$0xff] %v15616_v17  ;;  %v15628_v50 = vcombine.low %v15610_v57, %v15616_v17  ;;  %v12921_v16 = vadd.f32 %v15383_v43, %v4157_v14  ;;  %4873 = vrot.lane.b32.xlu0 %v4495_v6, %s20261_s22  ;;  %v4673_v6 = vsel %vm4663_vm8, %v4670_v37, %v4672_v20  ;;  %s20265_s22 = smov 32  }
 0x41d   : > { %20749 = vst [vmem:[#allocation7_spill] sm:$0xff] %v15638_v3  ;;  %v15671_v37 = vcombine.low %v15482_v60, %v15495_v23  ;;  %v15696_v23 = vcombine.low %v15418_v9, %v15435_v2  ;;  %v15720_v2 = vrot.slane %v15533_v45, 7 }
 0x41e   : > { %20748 = vst [vmem:[#allocation9_spill] sm:$0xff] %v15628_v50  ;;  %v15641_v41 = vmul.f32 %v12921_v16, %v15372_v48  ;;  %v12075_v29 = vpop.f32.mrb[58].mxu1  ;;  %v15652_v48 = vcombine.high %v15501_v52, %v15501_v52  ;;  %v15655_v16 = vrot.slane %v15479_v18, 7 }
 0x41f   : > { %v12922_v39 = vadd.f32 %v12075_v29, %v15383_v43  ;;  %v4169_v49 = vpop.f32.mrb[59].mxu1  ;;  %4924 = vrot.lane.b32.xlu1 %v4582_v51, %s20271_s24  ;;  %v15658_v29 = vrot.slane %v15634_v22, 7  ;;  %20754 = vst [vmem:[#allocation23_spill] sm:$0xff] %v15696_v23  ;;  %v4497_v40 = vrot.slane %v15696_v23, 1 }
 0x420   : > { %20750 = vst [vmem:[#allocation13_spill] sm:$0xff] %v15641_v41  ;;  %v5737_v14 = vcombine.low %v15638_v3, %v15641_v41  ;;  %v12923_v7 = vadd.f32 %v15383_v43, %v4169_v49  ;;  %4710 = vrot.lane.b32.xlu0 %v4673_v6, %s20301_s18  ;;  %20751 = vst [vmem:[#allocation6_spill] sm:$0xff] %v15652_v48  ;;  %v15762_v57 = vcombine.high %v15641_v41, %v15641_v41 }
 0x421   : > { %v15665_v43 = vsel %vm5739_vm9, %v15655_v16, %v15658_v29  ;;  %v4388_v20 = vmul.f32 %v12922_v39, %v15378_v10  ;;  %v15685_v10 = vmul.f32 %v15504_v62, %v15354_v34  ;;  %v20283_v41 = vrot.slane %v15487_v24, 1 }
 0x422   : > { %v4387_v51 = vmul.f32 %v12923_v7, %v15376_v32  ;;  %v15675_v32 = vcombine.low %v15501_v52, %v15652_v48  ;;  %v15679_v7 = vcombine.high %v15526_v56, %v15526_v56  ;;  %v15699_v52 = vrot.slane %v15671_v37, 7  ;;  %20757 = vst [vmem:[#allocation31_spill] sm:$0xff] %v15762_v57 }
 0x423   : > { %4977 = vrot.lane.b32.xlu1 %v4671_v46, %s20265_s22  ;;  %20752 = vst [vmem:[#allocation15_spill] sm:$0xff] %v15685_v10  ;;  %v15753_v17 = vcombine.high %v4388_v20, %v4388_v20 }
 0x424   : > { %v4447_v49 = vcombine.high %v4387_v51, %v4387_v51  ;;  %4926 = vrot.lane.b32.xlu0 %v4584_v15, %s20271_s24  ;;  %v15689_v15 = vcombine.high %v15557_v31, %v15557_v31  ;;  %v15702_v39 = vrot.slane %v15675_v32, 7  ;;  %v15706_v34 = vcombine.low %v15679_v7, %v15685_v10  ;;  %s20293_s24 = smov 60  }
 0x425   : > { %v6071_v30 = vcombine.low %v4388_v20, %v15753_v17 }
 0x426   : > { %v15681_v46 = vcombine.low %v4447_v49, %v4388_v20  ;;  %20753 = vst [vmem:[#allocation20_spill] sm:$0xff] %v15689_v15  ;;  %v15710_v62 = vcombine.low %v15557_v31, %v15689_v15  ;;  %v15717_v9 = vsel %vm5739_vm9, %v15699_v52, %v15702_v39  ;;  %v6070_v4 = vcombine.low %v4387_v51, %v4447_v49 }
 0x427   : > { %4979 = vrot.lane.b32.xlu1 %v4673_v6, %s20265_s22  ;;  %v15723_v6 = vrot.slane %v15706_v34, 7  ;;  %s20314_s22 = smov 56   ;;  %v15781_v20 = vrot.slane %v5737_v14, 7  ;;  %v20289_v14 = vrot.slane %v15753_v17, 1 }
 0x428   : > { %4776 = vrot.lane.b32.xlu0 %v15456_v59, %s20312_s15  ;;  %v15735_v50 = vrot.slane %v15710_v62, 7  ;;  %v15791_v58 = vrot.slane %v6070_v4, 7  ;;  %v20290_v4 = vrot.slane %v15753_v17, 2 }
 0x429   : > { %v15730_v31 = vsel %vm5739_vm9, %v15720_v2, %v15723_v6 }
 0x42a   : > { %v15745_v3 = vsel %vm5739_vm9, %v15738_v47, %v15735_v50 }
 0x42b   : > { %4824 = vrot.lane.b32.xlu1 %v15696_v23, %s20307_s19  ;;  %20755 = vst [vmem:[#allocation25_spill] sm:$0xff] %v15745_v3  ;;  %v4585_v3 = vrot.slane %v15519_v13, 2 }
 0x42c   : > { %5031 = vrot.lane.b32.xlu0 %v15456_v59, %s20299_s20 }
 0x42f   : > { %5079 = vrot.lane.b32.xlu1 %v15696_v23, %s20297_s21 }
 0x430   : > { %5286 = vrot.lane.b32.xlu0 %v15456_v59, %s20314_s22  ;;  %v15758_v59 = vmul.f32 %v12920_v63, %v15374_v44  ;;  %v20282_v44 = vrot.slane %v15487_v24, 2 }
 0x432   : > { %20756 = vst [vmem:[#allocation30_spill] sm:$0xff] %v15758_v59  ;;  %v5738_v63 = vcombine.low %v15762_v57, %v15758_v59  ;;  %v4499_v57 = vrot.slane %v15415_v11, 1 }
 0x433   : > { %4778 = vrot.lane.b32.xlu1 %v15471_v19, %s20312_s15 }
 0x434   : > { %5288 = vrot.lane.b32.xlu0 %v15471_v19, %s20314_s22  ;;  %v15783_v49 = vrot.slane %v5738_v63, 7  ;;  %v20288_v63 = vrot.slane %v15681_v46, 1 }
 0x436   : > { %20758 = vst [vmem:[#allocation38_spill] sm:$0xff] %v15783_v49 }
 0x437   : > { %5033 = vrot.lane.b32.xlu1 %v15471_v19, %s20299_s20  ;;  %v4446_v19 = vcombine.high %v15758_v59, %v15758_v59  ;;  %v15789_v59 = vrot.slane %v6071_v30, 7  ;;  %v4588_v30 = vrot.slane %v15415_v11, 2  ;;  %s20303_s20 = smov 48  }
 0x438   : > { %4826 = vrot.lane.b32.xlu0 %v15442_v5, %s20307_s19 }
 0x439   : > { %v15776_v42 = vcombine.low %v4446_v19, %v4387_v51  ;;  %v4496_v51 = vrot.slane %v15519_v13, 1  ;;  %v15797_v19 = vsel %vm5739_vm9, %v15781_v20, %v15783_v49  ;;  %v20761_v49 = vrot.slane %v15681_v46, 2 }
 0x43a   : > { %20759 = vst [vmem:[#allocation40_spill] sm:$0xff] %v15797_v19  ;;  %v20309_v19 = vrot.slane %v15681_v46, 7 }
 0x43b   : > { %5336 = vrot.lane.b32.xlu1 %v15442_v5, %s20293_s24  ;;  %v4498_v21 = vsel %vm20433_vm7, %v4496_v51, %v4497_v40  ;;  %v15828_v51 = vsel %vm5739_vm9, %v15791_v58, %v15789_v59  ;;  %s20767_s24 = smov 28  }
 0x43c   : > { %5081 = vrot.lane.b32.xlu0 %v15442_v5, %s20297_s21  ;;  %20763 = vst [vmem:[#allocation50_spill] sm:$0xff] %v15828_v51  ;;  %v4677_v51 = vrot.slane %v15415_v11, 3  ;;  %s20768_s21 = smov 32  }
 0x43f   : > { %5695 = vrot.lane.b32.xlu1 %v20282_v44, %s20295_s17  ;;  %v4500_v44 = vsel %vm20433_vm7, %v4497_v40, %v4499_v57  ;;  %v15814_v57 = vsel %vm20433_vm7, %v20288_v63, %v20289_v14  ;;  %v15823_v40 = vsel %vm4574_vm1, %v20761_v49, %v20290_v4  ;;  %v20764_v63 = vrot.slane %v15776_v42, 7 }
 0x440   : > { %5648 = vrot.lane.b32.xlu0 %v20283_v41, %s20291_s16  ;;  %v4586_v41 = vrot.slane %v15696_v23, 2  ;;  %20760 = vst [vmem:[#allocation41_spill] sm:$0xff] %v15814_v57  ;;  %20762 = vst [vmem:[#allocation48_spill] sm:$0xff] %v15823_v40  ;;  %v4675_v4 = vrot.slane %v15696_v23, 3  ;;  %v4674_v40 = vrot.slane %v15519_v13, 3  ;;  %v4591_v13 = vrot.slane %v15447_v61, 2 }
 0x441   : > { %v15836_v14 = vsel %vm5739_vm9, %v20764_v63, %v20309_v19  ;;  %v20783_v19 = vrot.slane %v15487_v24, 1 }
 0x442   : > { %20765 = vst [vmem:[#allocation53_spill] sm:$0xff] %v15836_v14  ;;  %v4589_v57 = vsel %vm4574_vm1, %v4586_v41, %v4588_v30  ;;  %v4587_v49 = vsel %vm4574_vm1, %v4585_v3, %v4586_v41  ;;  %v4678_v63 = vsel %vm4663_vm8, %v4675_v4, %v4677_v51  ;;  %v4676_v30 = vsel %vm4663_vm8, %v4674_v40, %v4675_v4 }
 0x443   : > { %4536 = vrot.lane.b32.xlu1 %v4500_v44, %s20291_s16 }
 0x444   : > { %4534 = vrot.lane.b32.xlu0 %v4498_v21, %s20291_s16  ;;  %s20766_s16 = smov 24  }
 0x447   : > { %4625 = vrot.lane.b32.xlu1 %v4589_v57, %s20295_s17 }
 0x448   : > { %4623 = vrot.lane.b32.xlu0 %v4587_v49, %s20295_s17  ;;  %s20316_s17 = smov 44  }
 0x44b   : > { %4877 = vrot.lane.b32.xlu1 %v4500_v44, %s20766_s16 }
 0x44c   : > { %4875 = vrot.lane.b32.xlu0 %v4498_v21, %s20766_s16 }
 0x44f   : > { %4714 = vrot.lane.b32.xlu1 %v4678_v63, %s20301_s18 }
 0x450   : > { %4712 = vrot.lane.b32.xlu0 %v4676_v30, %s20301_s18  ;;  %s20305_s18 = smov 52  }
 0x453   : > { %4930 = vrot.lane.b32.xlu1 %v4589_v57, %s20767_s24 }
 0x454   : > { %4928 = vrot.lane.b32.xlu0 %v4587_v49, %s20767_s24 }
 0x457   : > { %5132 = vrot.lane.b32.xlu1 %v4500_v44, %s20316_s17 }
 0x458   : > { %5130 = vrot.lane.b32.xlu0 %v4498_v21, %s20316_s17  ;;  %s20789_s17 = smov 12  }
 0x45b   : > { %4983 = vrot.lane.b32.xlu1 %v4678_v63, %s20768_s21 }
 0x45c   : > { %4981 = vrot.lane.b32.xlu0 %v4676_v30, %s20768_s21 }
 0x45f   : > { %5185 = vrot.lane.b32.xlu1 %v4589_v57, %s20303_s20 }
 0x460   : > { %5183 = vrot.lane.b32.xlu0 %v4587_v49, %s20303_s20  ;;  %s20774_s20 = smov 36   ;;  %v4502_v49 = vrot.slane %v15447_v61, 1 }
 0x462   : > { %v15859_v11 = vpop.permute.xlu0 %4768  ;;  %v4505_v23 = vsel %vm20433_vm7, %v4502_v49, %v20783_v19  ;;  %v20790_v19 = vrot.slane %v15508_v8, 7 }
 0x463   : > { %20769 = vst [vmem:[#allocation60_spill] sm:$0xff] %v15859_v11  ;;  %5238 = vrot.lane.b32.xlu1 %v4678_v63, %s20305_s18 }
 0x464   : > { %5236 = vrot.lane.b32.xlu0 %v4676_v30, %s20305_s18  ;;  %s20777_s18 = smov 40  }
 0x465   : > { %v15863_v3 = vpop.permute.xlu1 %4528 }
 0x466   : > { %20770 = vst [vmem:[#allocation61_spill] sm:$0xff] %v15863_v3  ;;  %v15865_v41 = vpop.permute.xlu0 %4770 }
 0x467   : > { %20771 = vst [vmem:[#allocation62_spill] sm:$0xff] %v15865_v41  ;;  %5292 = vrot.lane.b32.xlu1 %v15508_v8, %s20314_s22 }
 0x468   : > { %4782 = vrot.lane.b32.xlu0 %v15508_v8, %s20312_s15 }
 0x469   : > { %v15871_v21 = vpop.permute.xlu1 %4617 }
 0x46a   : > { %20772 = vst [vmem:[#allocation69_spill] sm:$0xff] %v15871_v21  ;;  %v15873_v44 = vpop.permute.xlu0 %4526  ;;  %v4680_v21 = vrot.slane %v15447_v61, 3 }
 0x46b   : > { %20773 = vst [vmem:[#allocation68_spill] sm:$0xff] %v15873_v44  ;;  %4828 = vrot.lane.b32.xlu1 %v15447_v61, %s20307_s19  ;;  %s20780_s19 = smov 60  }
 0x46c   : > { %5037 = vrot.lane.b32.xlu0 %v15508_v8, %s20774_s20  ;;  %v4501_v8 = vrot.slane %v15442_v5, 1 }
 0x46d   : > { %v15879_v4 = vpop.permute.xlu1 %4706 }
 0x46e   : > { %20775 = vst [vmem:[#allocation74_spill] sm:$0xff] %v15879_v4  ;;  %v15881_v57 = vpop.permute.xlu0 %4615  ;;  %v20787_v4 = vrot.slane %v15487_v24, 2 }
 0x46f   : > { %20776 = vst [vmem:[#allocation71_spill] sm:$0xff] %v15881_v57  ;;  %4780 = vrot.lane.b32.xlu1 %v15517_v28, %s20312_s15  ;;  %s20784_s15 = smov 4  }
 0x470   : > { %5083 = vrot.lane.b32.xlu0 %v15447_v61, %s20777_s18 }
 0x471   : > { %v15887_v40 = vpop.permute.xlu1 %4772 }
 0x472   : > { %20778 = vst [vmem:[#allocation75_spill] sm:$0xff] %v15887_v40  ;;  %v15889_v51 = vpop.permute.xlu0 %4704 }
 0x473   : > { %20779 = vst [vmem:[#allocation72_spill] sm:$0xff] %v15889_v51  ;;  %5290 = vrot.lane.b32.xlu1 %v15517_v28, %s20314_s22  ;;  %s20788_s22 = smov 8  }
 0x474   : > { %5338 = vrot.lane.b32.xlu0 %v15447_v61, %s20780_s19 }
 0x475   : > { %v15896_v63 = vpop.permute.xlu1 %4818 }
 0x476   : > { %20781 = vst [vmem:[#allocation77_spill] sm:$0xff] %v15896_v63  ;;  %v15898_v30 = vpop.permute.xlu0 %5027  ;;  %v4594_v63 = vsel %vm4574_vm1, %v4591_v13, %v20787_v4  ;;  %v4679_v4 = vrot.slane %v15442_v5, 3 }
 0x477   : > { %20782 = vst [vmem:[#allocation76_spill] sm:$0xff] %v15898_v30  ;;  %4540 = vrot.lane.b32.xlu1 %v4505_v23, %s20784_s15 }
 0x478   : > { %5035 = vrot.lane.b32.xlu0 %v15517_v28, %s20774_s20 }
 0x479   : > { %v15907_v40 = vpop.permute.xlu1 %4774 }
 0x47a   : > { %20785 = vst [vmem:[#allocation80_spill] sm:$0xff] %v15907_v40  ;;  %v15909_v41 = vpop.permute.xlu0 %4820  ;;  %v20793_v40 = vrot.slane %v15517_v28, 7 }
 0x47b   : > { %20786 = vst [vmem:[#allocation79_spill] sm:$0xff] %v15909_v41  ;;  %4629 = vrot.lane.b32.xlu1 %v4594_v63, %s20788_s22 }
 0x47c   : > { %5768 = vrot.lane.b32.xlu0 %v20790_v19, %s20789_s17 }
 0x47d   : > { %v15918_v30 = vpop.permute.xlu1 %5029 }
 0x47e   : > { %20791 = vst [vmem:[#allocation100_spill] sm:$0xff] %v15918_v30  ;;  %v15920_v11 = vpop.permute.xlu0 %4822  ;;  %v4681_v30 = vsel %vm4663_vm8, %v4679_v4, %v4680_v21  ;;  %v15950_v4 = vcombine.low %v15459_v54, %v15621_v12  ;;  %v4682_v54 = vrot.slane %v15487_v24, 3 }
 0x47f   : > { %20792 = vst [vmem:[#allocation101_spill] sm:$0xff] %v15920_v11  ;;  %5766 = vrot.lane.b32.xlu1 %v15554_v1, %s20789_s17  ;;  %v4503_v11 = vsel %vm20433_vm7, %v4501_v8, %v4502_v49  ;;  %v4590_v1 = vrot.slane %v15442_v5, 2  ;;  %v17025_v5 = vld [vmem:[%s13831_s23 + $0xe0] sm:$0xff] }
 0x480   : > { %5764 = vrot.lane.b32.xlu0 %v20793_v40, %s20789_s17  ;;  %20799 = vst [vmem:[#allocation107_spill] sm:$0xff] %v15950_v4 }
 0x481   : > { %v15929_v41 = vpop.permute.xlu1 %4530 }
 0x482   : > { %20794 = vst [vmem:[#allocation102_spill] sm:$0xff] %v15929_v41  ;;  %v15932_v19 = vpop.permute.xlu0 %5077  ;;  %v4592_v41 = vsel %vm4574_vm1, %v4590_v1, %v4591_v13 }
 0x483   : > { %20795 = vst [vmem:[#allocation103_spill] sm:$0xff] %v15932_v19  ;;  %4716 = vrot.lane.b32.xlu1 %v4681_v30, %s20789_s17 }
 0x484   : > { %4538 = vrot.lane.b32.xlu0 %v4503_v11, %s20784_s15 }
 0x485   : > { %v15939_v28 = vpop.permute.xlu1 %4619 }
 0x486   : > { %20796 = vst [vmem:[#allocation104_spill] sm:$0xff] %v15939_v28  ;;  %v15941_v40 = vpop.permute.xlu0 %4532 }
 0x487   : > { %20797 = vst [vmem:[#allocation105_spill] sm:$0xff] %v15941_v40  ;;  %4932 = vrot.lane.b32.xlu1 %v4592_v41, %s20767_s24 }
 0x488   : > { %4627 = vrot.lane.b32.xlu0 %v4592_v41, %s20788_s22 }
 0x489   : > { %v15946_v19 = vpop.permute.xlu1 %4871 }
 0x48a   : > { %20798 = vst [vmem:[#allocation106_spill] sm:$0xff] %v15946_v19  ;;  %v15952_v49 = vpop.permute.xlu0 %4621 }
 0x48b   : > { %20800 = vst [vmem:[#allocation108_spill] sm:$0xff] %v15952_v49  ;;  %5134 = vrot.lane.b32.xlu1 %v4503_v11, %s20801_s0 }
 0x48c   : > { %4832 = vrot.lane.b32.xlu0 %v15950_v4, %s20802_s1 }
 0x48d   : > { %v15957_v8 = vpop.permute.xlu1 %4708 }
 0x48e   : > { %20803 = vst [vmem:[#allocation109_spill] sm:$0xff] %v15957_v8  ;;  %v15959_v13 = vpop.permute.xlu0 %4873  ;;  %v4601_v8 = vrot.slane %v15512_v33, 2 }
 0x48f   : > { %20804 = vst [vmem:[#allocation110_spill] sm:$0xff] %v15959_v13  ;;  %4985 = vrot.lane.b32.xlu1 %v4681_v30, %s20768_s21  ;;  %v4683_v13 = vsel %vm4663_vm8, %v4680_v21, %v4682_v54  ;;  %v15992_v21 = vcombine.low %v15450_v55, %v15463_v0 }
 0x490   : > { %4879 = vrot.lane.b32.xlu0 %v4503_v11, %s20766_s16 }
 0x491   : > { %v15963_v1 = vpop.permute.xlu1 %4924  ;;  %20814 = vst [vmem:[#allocation119_spill] sm:$0xff] %v15992_v21 }
 0x492   : > { %20805 = vst [vmem:[#allocation111_spill] sm:$0xff] %v15963_v1  ;;  %v15965_v40 = vpop.permute.xlu0 %4710 }
 0x493   : > { %20806 = vst [vmem:[#allocation112_spill] sm:$0xff] %v15965_v40  ;;  %5187 = vrot.lane.b32.xlu1 %v4592_v41, %s20807_s2 }
 0x494   : > { %4881 = vrot.lane.b32.xlu0 %v4505_v23, %s20766_s16 }
 0x495   : > { %v15970_v12 = vpop.permute.xlu1 %4977 }
 0x496   : > { %20808 = vst [vmem:[#allocation113_spill] sm:$0xff] %v15970_v12  ;;  %v15972_v49 = vpop.permute.xlu0 %4926 }
 0x497   : > { %20809 = vst [vmem:[#allocation114_spill] sm:$0xff] %v15972_v49  ;;  %4987 = vrot.lane.b32.xlu1 %v4683_v13, %s20768_s21  ;;  %v4507_v49 = vrot.slane %v15950_v4, 1 }
 0x498   : > { %4718 = vrot.lane.b32.xlu0 %v4683_v13, %s20789_s17 }
 0x499   : > { %v15977_v11 = vpop.permute.xlu1 %4979 }
 0x49a   : > { %20810 = vst [vmem:[#allocation115_spill] sm:$0xff] %v15977_v11  ;;  %v15979_v1 = vpop.permute.xlu0 %4776 }
 0x49b   : > { %20811 = vst [vmem:[#allocation116_spill] sm:$0xff] %v15979_v1  ;;  %5189 = vrot.lane.b32.xlu1 %v4594_v63, %s20807_s2 }
 0x49c   : > { %4934 = vrot.lane.b32.xlu0 %v4594_v63, %s20767_s24 }
 0x49d   : > { %v15983_v41 = vpop.permute.xlu1 %4824 }
 0x49e   : > { %20812 = vst [vmem:[#allocation117_spill] sm:$0xff] %v15983_v41  ;;  %v15985_v40 = vpop.permute.xlu0 %5031 }
 0x49f   : > { %20813 = vst [vmem:[#allocation118_spill] sm:$0xff] %v15985_v40  ;;  %5087 = vrot.lane.b32.xlu1 %v15950_v4, %s20777_s18 }
 0x4a0   : > { %5136 = vrot.lane.b32.xlu0 %v4505_v23, %s20801_s0 }
 0x4a1   : > { %v15994_v54 = vpop.permute.xlu1 %5079 }
 0x4a2   : > { %20815 = vst [vmem:[#allocation120_spill] sm:$0xff] %v15994_v54  ;;  %v15996_v1 = vpop.permute.xlu0 %5286  ;;  %v4509_v54 = vrot.slane %v15606_v53, 1 }
 0x4a3   : > { %20816 = vst [vmem:[#allocation121_spill] sm:$0xff] %v15996_v1  ;;  %4830 = vrot.lane.b32.xlu1 %v15992_v21, %s20802_s1 }
 0x4a4   : > { %5240 = vrot.lane.b32.xlu0 %v4681_v30, %s20817_s3  ;;  %v4510_v19 = vsel %vm20433_vm7, %v4507_v49, %v4509_v54 }
 0x4a5   : > { %v16001_v63 = vpop.permute.xlu1 %4778 }
 0x4a6   : > { %20818 = vst [vmem:[#allocation122_spill] sm:$0xff] %v16001_v63  ;;  %v16003_v40 = vpop.permute.xlu0 %5288 }
 0x4a7   : > { %20819 = vst [vmem:[#allocation123_spill] sm:$0xff] %v16003_v40  ;;  %5934 = vrot.lane.b32.xlu1 %v15606_v53, %s20802_s1  ;;  %v5839_v40 = vrot.slane %v15950_v4, 7 }
 0x4a8   : > { %5242 = vrot.lane.b32.xlu0 %v4683_v13, %s20817_s3 }
 0x4a9   : > { %v16008_v55 = vpop.permute.xlu1 %5033 }
 0x4aa   : > { %20820 = vst [vmem:[#allocation124_spill] sm:$0xff] %v16008_v55  ;;  %v16010_v0 = vpop.permute.xlu0 %4826 }
 0x4ab   : > { %20821 = vst [vmem:[#allocation125_spill] sm:$0xff] %v16010_v0  ;;  %5085 = vrot.lane.b32.xlu1 %v15992_v21, %s20777_s18 }
 0x4ac   : > { %5342 = vrot.lane.b32.xlu0 %v15950_v4, %s20780_s19 }
 0x4ad   : > { %v16016_v23 = vpop.permute.xlu1 %5336 }
 0x4ae   : > { %20822 = vst [vmem:[#allocation126_spill] sm:$0xff] %v16016_v23  ;;  %v16018_v30 = vpop.permute.xlu0 %5081 }
 0x4af   : > { %20823 = vst [vmem:[#allocation127_spill] sm:$0xff] %v16018_v30  ;;  %5294 = vrot.lane.b32.xlu1 %v15479_v18, %s20824_s6  ;;  %v5838_v30 = vrot.slane %v15992_v21, 7 }
 0x4b0   : > { %5340 = vrot.lane.b32.xlu0 %v15992_v21, %s20780_s19 }
 0x4b1   : > { %v16024_v13 = vpop.permute.xlu1 %5695 }
 0x4b2   : > { %20825 = vst [vmem:[#allocation128_spill] sm:$0xff] %v16024_v13  ;;  %v16027_v1 = vpop.permute.xlu0 %5648 }
 0x4b3   : > { %20826 = vst [vmem:[#allocation129_spill] sm:$0xff] %v16027_v1  ;;  %5866 = vrot.lane.b32.xlu1 %v5839_v40, %s20827_s7 }
 0x4b4   : > { %4784 = vrot.lane.b32.xlu0 %v15479_v18, %s20827_s7 }
 0x4b5   : > { %v16032_v23 = vpop.permute.xlu1 %4536 }
 0x4b6   : > { %20828 = vst [vmem:[#allocation130_spill] sm:$0xff] %v16032_v23  ;;  %v16035_v55 = vpop.permute.xlu0 %4534  ;;  %v4598_v23 = vrot.slane %v15606_v53, 2 }
 0x4b7   : > { %20829 = vst [vmem:[#allocation131_spill] sm:$0xff] %v16035_v55  ;;  %5862 = vrot.lane.b32.xlu1 %v5838_v30, %s20827_s7 }
 0x4b8   : > { %5039 = vrot.lane.b32.xlu0 %v15479_v18, %s20774_s20 }
 0x4b9   : > { %v16040_v0 = vpop.permute.xlu1 %4625 }
 0x4ba   : > { %20830 = vst [vmem:[#allocation132_spill] sm:$0xff] %v16040_v0  ;;  %v16042_v63 = vpop.permute.xlu0 %4623 }
 0x4bb   : > { %20831 = vst [vmem:[#allocation133_spill] sm:$0xff] %v16042_v63  ;;  %5770 = vrot.lane.b32.xlu1 %v15655_v16, %s20789_s17 }
 0x4bc   : > { %5650 = vrot.lane.b32.xlu0 %v4509_v54, %s20784_s15 }
 0x4bd   : > { %v16048_v41 = vpop.permute.xlu1 %4877 }
 0x4be   : > { %20832 = vst [vmem:[#allocation134_spill] sm:$0xff] %v16048_v41  ;;  %v16050_v11 = vpop.permute.xlu0 %4875 }
 0x4bf   : > { %20833 = vst [vmem:[#allocation135_spill] sm:$0xff] %v16050_v11  ;;  %5981 = vrot.lane.b32.xlu1 %v4509_v54, %s20766_s16  ;;  %v4506_v11 = vrot.slane %v15992_v21, 1 }
 0x4c0   : > { %5697 = vrot.lane.b32.xlu0 %v4598_v23, %s20788_s22 }
 0x4c1   : > { %v16055_v18 = vpop.permute.xlu1 %4714 }
 0x4c2   : > { %20834 = vst [vmem:[#allocation136_spill] sm:$0xff] %v16055_v18  ;;  %v16057_v0 = vpop.permute.xlu0 %4712 }
 0x4c3   : > { %20835 = vst [vmem:[#allocation137_spill] sm:$0xff] %v16057_v0  ;;  %6028 = vrot.lane.b32.xlu1 %v4598_v23, %s20767_s24 }
 0x4c4   : > { %6075 = vrot.lane.b32.xlu0 %v15655_v16, %s20768_s21  ;;  %v4508_v16 = vsel %vm20433_vm7, %v4506_v11, %v4507_v49 }
 0x4c5   : > { %v16062_v63 = vpop.permute.xlu1 %4930 }
 0x4c6   : > { %20836 = vst [vmem:[#allocation138_spill] sm:$0xff] %v16062_v63  ;;  %v16064_v41 = vpop.permute.xlu0 %4928  ;;  %v4596_v63 = vrot.slane %v15950_v4, 2 }
 0x4c7   : > { %20837 = vst [vmem:[#allocation139_spill] sm:$0xff] %v16064_v41  ;;  %5296 = vrot.lane.b32.xlu1 %v15634_v22, %s20824_s6 }
 0x4c8   : > { %4786 = vrot.lane.b32.xlu0 %v15634_v22, %s20827_s7  ;;  %v4599_v12 = vsel %vm4574_vm1, %v4596_v63, %v4598_v23 }
 0x4c9   : > { %v16072_v18 = vpop.permute.xlu1 %5132 }
 0x4ca   : > { %20838 = vst [vmem:[#allocation140_spill] sm:$0xff] %v16072_v18  ;;  %v16074_v0 = vpop.permute.xlu0 %5130  ;;  %v5840_v18 = vsel %vm5739_vm9, %v5838_v30, %v5839_v40  ;;  %v4685_v40 = vrot.slane %v15950_v4, 3  ;;  %v4687_v30 = vrot.slane %v15606_v53, 3 }
 0x4cb   : > { %20839 = vst [vmem:[#allocation141_spill] sm:$0xff] %v16074_v0  ;;  %4542 = vrot.lane.b32.xlu1 %v4508_v16, %s20784_s15 }
 0x4cc   : > { %5041 = vrot.lane.b32.xlu0 %v15634_v22, %s20774_s20  ;;  %v4595_v22 = vrot.slane %v15992_v21, 2 }
 0x4cd   : > { %v16081_v41 = vpop.permute.xlu1 %4983 }
 0x4ce   : > { %20840 = vst [vmem:[#allocation142_spill] sm:$0xff] %v16081_v41  ;;  %v16083_v55 = vpop.permute.xlu0 %4981 }
 0x4cf   : > { %20841 = vst [vmem:[#allocation143_spill] sm:$0xff] %v16083_v55  ;;  %4633 = vrot.lane.b32.xlu1 %v4599_v12, %s20788_s22 }
 0x4d0   : > { %5864 = vrot.lane.b32.xlu0 %v5840_v18, %s20827_s7  ;;  %v4597_v18 = vsel %vm4574_vm1, %v4595_v22, %v4596_v63 }
 0x4d1   : > { %v16089_v11 = vpop.permute.xlu1 %5185 }
 0x4d2   : > { %20842 = vst [vmem:[#allocation144_spill] sm:$0xff] %v16089_v11  ;;  %v16091_v0 = vpop.permute.xlu0 %5183  ;;  %v4688_v11 = vsel %vm4663_vm8, %v4685_v40, %v4687_v30 }
 0x4d3   : > { %20843 = vst [vmem:[#allocation145_spill] sm:$0xff] %v16091_v0  ;;  %4885 = vrot.lane.b32.xlu1 %v4510_v19, %s20766_s16 }
 0x4d4   : > { %4544 = vrot.lane.b32.xlu0 %v4510_v19, %s20784_s15 }
 0x4d5   : > { %v16097_v55 = vpop.permute.xlu1 %5238 }
 0x4d6   : > { %20844 = vst [vmem:[#allocation146_spill] sm:$0xff] %v16097_v55  ;;  %v16099_v23 = vpop.permute.xlu0 %5236  ;;  %v4684_v55 = vrot.slane %v15992_v21, 3 }
 0x4d7   : > { %20845 = vst [vmem:[#allocation147_spill] sm:$0xff] %v16099_v23  ;;  %4938 = vrot.lane.b32.xlu1 %v4599_v12, %s20767_s24 }
 0x4d8   : > { %4631 = vrot.lane.b32.xlu0 %v4597_v18, %s20788_s22  ;;  %v4686_v63 = vsel %vm4663_vm8, %v4684_v55, %v4685_v40 }
 0x4d9   : > { %v16106_v49 = vpop.permute.xlu1 %5292 }
 0x4da   : > { %20846 = vst [vmem:[#allocation148_spill] sm:$0xff] %v16106_v49  ;;  %v16108_v54 = vpop.permute.xlu0 %4782 }
 0x4db   : > { %20847 = vst [vmem:[#allocation149_spill] sm:$0xff] %v16108_v54  ;;  %4722 = vrot.lane.b32.xlu1 %v4688_v11, %s20789_s17 }
 0x4dc   : > { %4883 = vrot.lane.b32.xlu0 %v4508_v16, %s20766_s16 }
 0x4dd   : > { %v16114_v23 = vpop.permute.xlu1 %4828 }
 0x4de   : > { %20848 = vst [vmem:[#allocation150_spill] sm:$0xff] %v16114_v23  ;;  %v16116_v0 = vpop.permute.xlu0 %5037 }
 0x4df   : > { %20849 = vst [vmem:[#allocation151_spill] sm:$0xff] %v16116_v0  ;;  %4989 = vrot.lane.b32.xlu1 %v4686_v63, %s20768_s21 }
 0x4e0   : > { %4936 = vrot.lane.b32.xlu0 %v4597_v18, %s20767_s24 }
 0x4e1   : > { %v16121_v22 = vpop.permute.xlu1 %4780 }
 0x4e2   : > { %20850 = vst [vmem:[#allocation152_spill] sm:$0xff] %v16121_v22  ;;  %v16123_v49 = vpop.permute.xlu0 %5083 }
 0x4e3   : > { %20851 = vst [vmem:[#allocation153_spill] sm:$0xff] %v16123_v49  ;;  %5191 = vrot.lane.b32.xlu1 %v4597_v18, %s20807_s2 }
 0x4e4   : > { %4720 = vrot.lane.b32.xlu0 %v4686_v63, %s20789_s17 }
 0x4e5   : > { %v16127_v30 = vpop.permute.xlu1 %5290 }
 0x4e6   : > { %20852 = vst [vmem:[#allocation154_spill] sm:$0xff] %v16127_v30  ;;  %v16129_v54 = vpop.permute.xlu0 %5338 }
 0x4e7   : > { %20853 = vst [vmem:[#allocation155_spill] sm:$0xff] %v16129_v54  ;;  %4991 = vrot.lane.b32.xlu1 %v4688_v11, %s20768_s21 }
 0x4e8   : > { %5138 = vrot.lane.b32.xlu0 %v4508_v16, %s20801_s0  ;;  %v4431_v16 = vcombine.high %v15606_v53, %v15606_v53  ;;  %v16865_v53 = vld [vmem:[%s13831_s23 + $0x98] sm:$0xff] }
 0x4e9   : > { %v16133_v55 = vpop.permute.xlu1 %4540 }
 0x4ea   : > { %20854 = vst [vmem:[#allocation156_spill] sm:$0xff] %v16133_v55  ;;  %v16135_v40 = vpop.permute.xlu0 %5035 }
 0x4eb   : > { %20855 = vst [vmem:[#allocation157_spill] sm:$0xff] %v16135_v40  ;;  %5193 = vrot.lane.b32.xlu1 %v4599_v12, %s20807_s2 }
 0x4ec   : > { %5140 = vrot.lane.b32.xlu0 %v4510_v19, %s20801_s0  ;;  %v16156_v19 = vcombine.low %v4431_v16, %v15482_v60 }
 0x4ed   : > { %v16139_v0 = vpop.permute.xlu1 %4629 }
 0x4ee   : > { %20856 = vst [vmem:[#allocation158_spill] sm:$0xff] %v16139_v0  ;;  %v16141_v18 = vpop.permute.xlu0 %5768  ;;  %20860 = vst [vmem:[#allocation162_spill] sm:$0xff] %v16156_v19  ;;  %v4511_v44 = vrot.slane %v16156_v19, 1 }
 0x4ef   : > { %20857 = vst [vmem:[#allocation159_spill] sm:$0xff] %v16141_v18  ;;  %5298 = vrot.lane.b32.xlu1 %v15671_v37, %s20824_s6  ;;  %v13639_v18 = vld [vmem:[%s13831_s23 + $0xc8] sm:$0xff] }
 0x4f0   : > { %5244 = vrot.lane.b32.xlu0 %v4686_v63, %s20817_s3  ;;  %v8037_v13 = vrot.slane %v13639_v18, 2  ;;  %v16998_v18 = vld [vmem:[%s13831_s23 + $0xd8] sm:$0xff] }
 0x4f1   : > { %v16148_v30 = vpop.permute.xlu1 %5766 }
 0x4f2   : > { %20858 = vst [vmem:[#allocation160_spill] sm:$0xff] %v16148_v30  ;;  %v16150_v22 = vpop.permute.xlu0 %5764 }
 0x4f3   : > { %20859 = vst [vmem:[#allocation161_spill] sm:$0xff] %v16150_v22  ;;  %6079 = vrot.lane.b32.xlu1 %v15658_v29, %s20768_s21 }
 0x4f4   : > { %5246 = vrot.lane.b32.xlu0 %v4688_v11, %s20817_s3 }
 0x4f5   : > { %v16158_v12 = vpop.permute.xlu1 %4716 }
 0x4f6   : > { %20861 = vst [vmem:[#allocation163_spill] sm:$0xff] %v16158_v12  ;;  %v16160_v40 = vpop.permute.xlu0 %4538  ;;  %v5841_v12 = vrot.slane %v16156_v19, 7 }
 0x4f7   : > { %20862 = vst [vmem:[#allocation164_spill] sm:$0xff] %v16160_v40  ;;  %5089 = vrot.lane.b32.xlu1 %v16156_v19, %s20777_s18 }
 0x4f8   : > { %4788 = vrot.lane.b32.xlu0 %v15671_v37, %s20827_s7 }
 0x4f9   : > { %v16166_v63 = vpop.permute.xlu1 %4932 }
 0x4fa   : > { %20863 = vst [vmem:[#allocation165_spill] sm:$0xff] %v16166_v63  ;;  %v16168_v54 = vpop.permute.xlu0 %4627 }
 0x4fb   : > { %20864 = vst [vmem:[#allocation166_spill] sm:$0xff] %v16168_v54  ;;  %6077 = vrot.lane.b32.xlu1 %v15665_v43, %s20768_s21 }
 0x4fc   : > { %5043 = vrot.lane.b32.xlu0 %v15671_v37, %s20774_s20 }
 0x4fd   : > { %v16174_v60 = vpop.permute.xlu1 %5134 }
 0x4fe   : > { %20865 = vst [vmem:[#allocation167_spill] sm:$0xff] %v16174_v60  ;;  %v16176_v11 = vpop.permute.xlu0 %4832 }
 0x4ff   : > { %20866 = vst [vmem:[#allocation168_spill] sm:$0xff] %v16176_v11  ;;  %5776 = vrot.lane.b32.xlu1 %v15699_v52, %s20789_s17 }
 0x500   : > { %5774 = vrot.lane.b32.xlu0 %v15658_v29, %s20789_s17 }
 0x501   : > { %v16182_v16 = vpop.permute.xlu1 %4985 }
 0x502   : > { %20867 = vst [vmem:[#allocation169_spill] sm:$0xff] %v16182_v16  ;;  %v16185_v49 = vpop.permute.xlu0 %4879 }
 0x503   : > { %20868 = vst [vmem:[#allocation170_spill] sm:$0xff] %v16185_v49  ;;  %5868 = vrot.lane.b32.xlu1 %v5841_v12, %s20827_s7  ;;  %v4512_v49 = vrot.slane %v15512_v33, 1 }
 0x504   : > { %4834 = vrot.lane.b32.xlu0 %v16156_v19, %s20802_s1 }
 0x505   : > { %v16190_v37 = vpop.permute.xlu1 %5187 }
 0x506   : > { %20869 = vst [vmem:[#allocation171_spill] sm:$0xff] %v16190_v37  ;;  %v16192_v60 = vpop.permute.xlu0 %4881 }
 0x507   : > { %20870 = vst [vmem:[#allocation172_spill] sm:$0xff] %v16192_v60  ;;  %4836 = vrot.lane.b32.xlu1 %v15512_v33, %s20802_s1 }
 0x508   : > { %5344 = vrot.lane.b32.xlu0 %v16156_v19, %s20780_s19 }
 0x509   : > { %v16198_v29 = vpop.permute.xlu1 %4987 }
 0x50a   : > { %20871 = vst [vmem:[#allocation173_spill] sm:$0xff] %v16198_v29  ;;  %v16200_v16 = vpop.permute.xlu0 %4718 }
 0x50b   : > { %20872 = vst [vmem:[#allocation174_spill] sm:$0xff] %v16200_v16  ;;  %5936 = vrot.lane.b32.xlu1 %v15652_v48, %s20802_s1 }
 0x50c   : > { %5772 = vrot.lane.b32.xlu0 %v15665_v43, %s20789_s17  ;;  %v16224_v43 = vcombine.low %v15498_v26, %v15523_v27  ;;  %v4603_v27 = vrot.slane %v15652_v48, 2 }
 0x50d   : > { %v16206_v63 = vpop.permute.xlu1 %5189 }
 0x50e   : > { %20873 = vst [vmem:[#allocation175_spill] sm:$0xff] %v16206_v63  ;;  %v16208_v37 = vpop.permute.xlu0 %4934  ;;  %20877 = vst [vmem:[#allocation179_spill] sm:$0xff] %v16224_v43  ;;  %v4604_v28 = vsel %vm4574_vm1, %v4601_v8, %v4603_v27  ;;  %v20318_v57 = vrot.slane %v16224_v43, 7 }
 0x50f   : > { %20874 = vst [vmem:[#allocation176_spill] sm:$0xff] %v16208_v37  ;;  %5091 = vrot.lane.b32.xlu1 %v15512_v33, %s20777_s18  ;;  %v5842_v37 = vrot.slane %v15512_v33, 7 }
 0x510   : > { %6081 = vrot.lane.b32.xlu0 %v15699_v52, %s20768_s21 }
 0x511   : > { %v16214_v60 = vpop.permute.xlu1 %5087 }
 0x512   : > { %20875 = vst [vmem:[#allocation177_spill] sm:$0xff] %v16214_v60  ;;  %v16216_v29 = vpop.permute.xlu0 %5136  ;;  %v4514_v60 = vrot.slane %v15652_v48, 1 }
 0x513   : > { %20876 = vst [vmem:[#allocation178_spill] sm:$0xff] %v16216_v29  ;;  %5938 = vrot.lane.b32.xlu1 %v15685_v10, %s20802_s1 }
 0x514   : > { %5346 = vrot.lane.b32.xlu0 %v15512_v33, %s20780_s19  ;;  %v16263_v41 = vsel %vm20433_vm7, %v4512_v49, %v4514_v60 }
 0x515   : > { %v16226_v63 = vpop.permute.xlu1 %4830 }
 0x516   : > { %20878 = vst [vmem:[#allocation180_spill] sm:$0xff] %v16226_v63  ;;  %v16228_v16 = vpop.permute.xlu0 %5240 }
 0x517   : > { %20879 = vst [vmem:[#allocation181_spill] sm:$0xff] %v16228_v16  ;;  %5093 = vrot.lane.b32.xlu1 %v16224_v43, %s20777_s18 }
 0x518   : > { %4838 = vrot.lane.b32.xlu0 %v16224_v43, %s20802_s1 }
 0x519   : > { %v16234_v52 = vpop.permute.xlu1 %5934 }
 0x51a   : > { %20880 = vst [vmem:[#allocation182_spill] sm:$0xff] %v16234_v52  ;;  %v16237_v29 = vpop.permute.xlu0 %5242  ;;  %v16855_v52 = vld [vmem:[%s13831_s23 + $0x90] sm:$0xff] }
 0x51b   : > { %20881 = vst [vmem:[#allocation183_spill] sm:$0xff] %v16237_v29  ;;  %5983 = vrot.lane.b32.xlu1 %v4514_v60, %s20766_s16 }
 0x51c   : > { %5348 = vrot.lane.b32.xlu0 %v16224_v43, %s20780_s19 }
 0x51d   : > { %v16242_v26 = vpop.permute.xlu1 %5085 }
 0x51e   : > { %20882 = vst [vmem:[#allocation184_spill] sm:$0xff] %v16242_v26  ;;  %v16245_v16 = vpop.permute.xlu0 %5342 }
 0x51f   : > { %20883 = vst [vmem:[#allocation185_spill] sm:$0xff] %v16245_v16  ;;  %6030 = vrot.lane.b32.xlu1 %v4603_v27, %s20767_s24 }
 0x520   : > { %5872 = vrot.lane.b32.xlu0 %v5842_v37, %s20827_s7 }
 0x521   : > { %v16250_v23 = vpop.permute.xlu1 %5294 }
 0x522   : > { %20884 = vst [vmem:[#allocation186_spill] sm:$0xff] %v16250_v23  ;;  %v16252_v29 = vpop.permute.xlu0 %5340 }
 0x523   : > { %20885 = vst [vmem:[#allocation187_spill] sm:$0xff] %v16252_v29  ;;  %5300 = vrot.lane.b32.xlu1 %v15675_v32, %s20824_s6 }
 0x524   : > { %5652 = vrot.lane.b32.xlu0 %v4514_v60, %s20784_s15 }
 0x525   : > { %v16258_v26 = vpop.permute.xlu1 %5866 }
 0x526   : > { %20886 = vst [vmem:[#allocation188_spill] sm:$0xff] %v16258_v26  ;;  %v16260_v16 = vpop.permute.xlu0 %4784 }
 0x527   : > { %20887 = vst [vmem:[#allocation189_spill] sm:$0xff] %v16260_v16  ;;  %4548 = vrot.lane.b32.xlu1 %v16263_v41, %s20784_s15 }
 0x528   : > { %5699 = vrot.lane.b32.xlu0 %v4603_v27, %s20788_s22  ;;  %v5843_v27 = vsel %vm5739_vm9, %v5841_v12, %v5842_v37  ;;  %v16306_v12 = vrot.slane %v15685_v10, 1  ;;  %v4600_v37 = vrot.slane %v16156_v19, 2 }
 0x529   : > { %v16269_v23 = vpop.permute.xlu1 %5862 }
 0x52a   : > { %20888 = vst [vmem:[#allocation190_spill] sm:$0xff] %v16269_v23  ;;  %v16271_v29 = vpop.permute.xlu0 %5039 }
 0x52b   : > { %20889 = vst [vmem:[#allocation191_spill] sm:$0xff] %v16271_v29  ;;  %4637 = vrot.lane.b32.xlu1 %v4604_v28, %s20788_s22 }
 0x52c   : > { %4790 = vrot.lane.b32.xlu0 %v15675_v32, %s20827_s7 }
 0x52d   : > { %v16277_v60 = vpop.permute.xlu1 %5770 }
 0x52e   : > { %20890 = vst [vmem:[#allocation192_spill] sm:$0xff] %v16277_v60  ;;  %v16279_v16 = vpop.permute.xlu0 %5650 }
 0x52f   : > { %20891 = vst [vmem:[#allocation193_spill] sm:$0xff] %v16279_v16  ;;  %4889 = vrot.lane.b32.xlu1 %v16263_v41, %s20766_s16  ;;  %v16869_v16 = vld [vmem:[%s13831_s23 + $0xa0] sm:$0xf] }
 0x530   : > { %5045 = vrot.lane.b32.xlu0 %v15675_v32, %s20774_s20  ;;  %v4513_v32 = vsel %vm20433_vm7, %v4511_v44, %v4512_v49  ;;  %v16318_v44 = vrot.slane %v15685_v10, 2 }
 0x531   : > { %v16285_v3 = vpop.permute.xlu1 %5981 }
 0x532   : > { %20892 = vst [vmem:[#allocation194_spill] sm:$0xff] %v16285_v3  ;;  %v16287_v29 = vpop.permute.xlu0 %5697 }
 0x533   : > { %20893 = vst [vmem:[#allocation195_spill] sm:$0xff] %v16287_v29  ;;  %4942 = vrot.lane.b32.xlu1 %v4604_v28, %s20767_s24 }
 0x534   : > { %5870 = vrot.lane.b32.xlu0 %v5843_v27, %s20827_s7 }
 0x535   : > { %v16292_v51 = vpop.permute.xlu1 %6028 }
 0x536   : > { %20894 = vst [vmem:[#allocation196_spill] sm:$0xff] %v16292_v51  ;;  %v16296_v60 = vpop.permute.xlu0 %6075  ;;  %v4692_v51 = vrot.slane %v15652_v48, 3 }
 0x537   : > { %20895 = vst [vmem:[#allocation197_spill] sm:$0xff] %v16296_v60  ;;  %5874 = vrot.lane.b32.xlu1 %v20318_v57, %s20827_s7  ;;  %v4602_v60 = vsel %vm4574_vm1, %v4600_v37, %v4601_v8 }
 0x538   : > { %4546 = vrot.lane.b32.xlu0 %v4513_v32, %s20784_s15 }
 0x539   : > { %v16303_v29 = vpop.permute.xlu1 %5296 }
 0x53a   : > { %20896 = vst [vmem:[#allocation198_spill] sm:$0xff] %v16303_v29  ;;  %v16309_v27 = vpop.permute.xlu0 %4786  ;;  %v4690_v29 = vrot.slane %v15512_v33, 3 }
 0x53b   : > { %20897 = vst [vmem:[#allocation199_spill] sm:$0xff] %v16309_v27  ;;  %5985 = vrot.lane.b32.xlu1 %v16306_v12, %s20766_s16 }
 0x53c   : > { %4635 = vrot.lane.b32.xlu0 %v4602_v60, %s20788_s22  ;;  %v4693_v37 = vsel %vm4663_vm8, %v4690_v29, %v4692_v51 }
 0x53d   : > { %v16315_v57 = vpop.permute.xlu1 %4542 }
 0x53e   : > { %20898 = vst [vmem:[#allocation200_spill] sm:$0xff] %v16315_v57  ;;  %v16320_v49 = vpop.permute.xlu0 %5041 }
 0x53f   : > { %20899 = vst [vmem:[#allocation201_spill] sm:$0xff] %v16320_v49  ;;  %6032 = vrot.lane.b32.xlu1 %v16318_v44, %s20767_s24  ;;  %v4689_v49 = vrot.slane %v16156_v19, 3 }
 0x540   : > { %4887 = vrot.lane.b32.xlu0 %v4513_v32, %s20766_s16 }
 0x541   : > { %v16327_v27 = vpop.permute.xlu1 %4633  ;;  %v4691_v11 = vsel %vm4663_vm8, %v4689_v49, %v4690_v29 }
 0x542   : > { %20900 = vst [vmem:[#allocation202_spill] sm:$0xff] %v16327_v27  ;;  %v16329_v8 = vpop.permute.xlu0 %5864 }
 0x543   : > { %20901 = vst [vmem:[#allocation203_spill] sm:$0xff] %v16329_v8  ;;  %4726 = vrot.lane.b32.xlu1 %v4693_v37, %s20789_s17 }
 0x544   : > { %4940 = vrot.lane.b32.xlu0 %v4602_v60, %s20767_s24 }
 0x545   : > { %v16335_v33 = vpop.permute.xlu1 %4885 }
 0x546   : > { %20902 = vst [vmem:[#allocation204_spill] sm:$0xff] %v16335_v33  ;;  %v16337_v48 = vpop.permute.xlu0 %4544 }
 0x547   : > { %20903 = vst [vmem:[#allocation205_spill] sm:$0xff] %v16337_v48  ;;  %4993 = vrot.lane.b32.xlu1 %v4691_v11, %s20768_s21 }
 0x548   : > { %5654 = vrot.lane.b32.xlu0 %v16306_v12, %s20784_s15 }
 0x549   : > { %v16343_v27 = vpop.permute.xlu1 %4938 }
 0x54a   : > { %20904 = vst [vmem:[#allocation206_spill] sm:$0xff] %v16343_v27  ;;  %v16345_v51 = vpop.permute.xlu0 %4631 }
 0x54b   : > { %20905 = vst [vmem:[#allocation207_spill] sm:$0xff] %v16345_v51  ;;  %5195 = vrot.lane.b32.xlu1 %v4602_v60, %s20807_s2  ;;  %v21024_v51 = vld [vmem:[#allocation56_spill] sm:$0xff] }
 0x54c   : > { %5701 = vrot.lane.b32.xlu0 %v16318_v44, %s20788_s22 }
 0x54d   : > { %v16350_v19 = vpop.permute.xlu1 %4722 }
 0x54e   : > { %20906 = vst [vmem:[#allocation208_spill] sm:$0xff] %v16350_v19  ;;  %v16352_v33 = vpop.permute.xlu0 %4883 }
 0x54f   : > { %20907 = vst [vmem:[#allocation209_spill] sm:$0xff] %v16352_v33  ;;  %4995 = vrot.lane.b32.xlu1 %v4693_v37, %s20768_s21 }
 0x550   : > { %4724 = vrot.lane.b32.xlu0 %v4691_v11, %s20789_s17 }
 0x551   : > { %v16356_v29 = vpop.permute.xlu1 %4989 }
 0x552   : > { %20908 = vst [vmem:[#allocation210_spill] sm:$0xff] %v16356_v29  ;;  %v16358_v49 = vpop.permute.xlu0 %4936 }
 0x553   : > { %20909 = vst [vmem:[#allocation211_spill] sm:$0xff] %v16358_v49  ;;  %5197 = vrot.lane.b32.xlu1 %v4604_v28, %s20807_s2 }
 0x554   : > { %5142 = vrot.lane.b32.xlu0 %v4513_v32, %s20801_s0 }
 0x555   : > { %v16362_v60 = vpop.permute.xlu1 %5191 }
 0x556   : > { %20910 = vst [vmem:[#allocation212_spill] sm:$0xff] %v16362_v60  ;;  %v16364_v27 = vpop.permute.xlu0 %4720 }
 0x557   : > { %20911 = vst [vmem:[#allocation213_spill] sm:$0xff] %v16364_v27  ;;  %6085 = vrot.lane.b32.xlu1 %v15702_v39, %s20768_s21 }
 0x558   : > { %5144 = vrot.lane.b32.xlu0 %v16263_v41, %s20801_s0  ;;  %v16386_v41 = vcombine.low %v15526_v56, %v15679_v7 }
 0x559   : > { %v16370_v19 = vpop.permute.xlu1 %4991 }
 0x55a   : > { %20912 = vst [vmem:[#allocation214_spill] sm:$0xff] %v16370_v19  ;;  %v16372_v33 = vpop.permute.xlu0 %5138  ;;  %20916 = vst [vmem:[#allocation218_spill] sm:$0xff] %v16386_v41 }
 0x55b   : > { %20913 = vst [vmem:[#allocation215_spill] sm:$0xff] %v16372_v33  ;;  %5302 = vrot.lane.b32.xlu1 %v15533_v45, %s20824_s6 }
 0x55c   : > { %5248 = vrot.lane.b32.xlu0 %v4691_v11, %s20817_s3 }
 0x55d   : > { %v16377_v28 = vpop.permute.xlu1 %5193 }
 0x55e   : > { %20914 = vst [vmem:[#allocation216_spill] sm:$0xff] %v16377_v28  ;;  %v16379_v32 = vpop.permute.xlu0 %5140 }
 0x55f   : > { %20915 = vst [vmem:[#allocation217_spill] sm:$0xff] %v16379_v32  ;;  %6083 = vrot.lane.b32.xlu1 %v15717_v9, %s20768_s21 }
 0x560   : > { %5250 = vrot.lane.b32.xlu0 %v4693_v37, %s20817_s3 }
 0x561   : > { %v16388_v60 = vpop.permute.xlu1 %5298 }
 0x562   : > { %20917 = vst [vmem:[#allocation219_spill] sm:$0xff] %v16388_v60  ;;  %v16390_v33 = vpop.permute.xlu0 %5244 }
 0x563   : > { %20918 = vst [vmem:[#allocation220_spill] sm:$0xff] %v16390_v33  ;;  %4840 = vrot.lane.b32.xlu1 %v16386_v41, %s20802_s1 }
 0x564   : > { %5780 = vrot.lane.b32.xlu0 %v15702_v39, %s20789_s17 }
 0x565   : > { %v16396_v11 = vpop.permute.xlu1 %6079 }
 0x566   : > { %20919 = vst [vmem:[#allocation221_spill] sm:$0xff] %v16396_v11  ;;  %v16398_v28 = vpop.permute.xlu0 %5246 }
 0x567   : > { %20920 = vst [vmem:[#allocation222_spill] sm:$0xff] %v16398_v28  ;;  %5782 = vrot.lane.b32.xlu1 %v15720_v2, %s20789_s17 }
 0x568   : > { %4792 = vrot.lane.b32.xlu0 %v15533_v45, %s20827_s7 }
 0x569   : > { %v16404_v56 = vpop.permute.xlu1 %5089 }
 0x56a   : > { %20921 = vst [vmem:[#allocation223_spill] sm:$0xff] %v16404_v56  ;;  %v16406_v7 = vpop.permute.xlu0 %4788 }
 0x56b   : > { %20922 = vst [vmem:[#allocation224_spill] sm:$0xff] %v16406_v7  ;;  %5095 = vrot.lane.b32.xlu1 %v16386_v41, %s20777_s18 }
 0x56c   : > { %5047 = vrot.lane.b32.xlu0 %v15533_v45, %s20774_s20 }
 0x56d   : > { %v16412_v39 = vpop.permute.xlu1 %6077 }
 0x56e   : > { %20923 = vst [vmem:[#allocation225_spill] sm:$0xff] %v16412_v39  ;;  %v16414_v37 = vpop.permute.xlu0 %5043  ;;  %v4695_v39 = vrot.slane %v16386_v41, 3 }
 0x56f   : > { %20924 = vst [vmem:[#allocation226_spill] sm:$0xff] %v16414_v37  ;;  %5304 = vrot.lane.b32.xlu1 %v15706_v34, %s20824_s6  ;;  %v4436_v37 = vcombine.high %v15685_v10, %v15685_v10 }
 0x570   : > { %5778 = vrot.lane.b32.xlu0 %v15717_v9, %s20789_s17 }
 0x571   : > { %v16420_v60 = vpop.permute.xlu1 %5776  ;;  %v16439_v9 = vcombine.low %v4436_v37, %v15542_v38  ;;  %v4606_v37 = vrot.slane %v16386_v41, 2 }
 0x572   : > { %20925 = vst [vmem:[#allocation227_spill] sm:$0xff] %v16420_v60  ;;  %v16422_v28 = vpop.permute.xlu0 %5774  ;;  %v5845_v60 = vrot.slane %v16386_v41, 7 }
 0x573   : > { %20926 = vst [vmem:[#allocation228_spill] sm:$0xff] %v16422_v28  ;;  %5940 = vrot.lane.b32.xlu1 %v15689_v15, %s20802_s1  ;;  %20929 = vst [vmem:[#allocation231_spill] sm:$0xff] %v16439_v9  ;;  %v4609_v29 = vsel %vm4574_vm1, %v4606_v37, %v16318_v44 }
 0x574   : > { %6087 = vrot.lane.b32.xlu0 %v15720_v2, %s20768_s21  ;;  %v4517_v2 = vrot.slane %v16386_v41, 1 }
 0x575   : > { %v16428_v45 = vpop.permute.xlu1 %5868 }
 0x576   : > { %20927 = vst [vmem:[#allocation229_spill] sm:$0xff] %v16428_v45  ;;  %v16430_v7 = vpop.permute.xlu0 %4834  ;;  %v16456_v38 = vsel %vm20433_vm7, %v4517_v2, %v16306_v12  ;;  %v13627_v45 = vld [vmem:[%s13831_s23 + $0x68] sm:$0xff] }
 0x577   : > { %20928 = vst [vmem:[#allocation230_spill] sm:$0xff] %v16430_v7  ;;  %6091 = vrot.lane.b32.xlu1 %v15723_v6, %s20768_s21 }
 0x578   : > { %5350 = vrot.lane.b32.xlu0 %v16386_v41, %s20780_s19 }
 0x579   : > { %v16441_v33 = vpop.permute.xlu1 %4836 }
 0x57a   : > { %20930 = vst [vmem:[#allocation232_spill] sm:$0xff] %v16441_v33  ;;  %v16443_v56 = vpop.permute.xlu0 %5344 }
 0x57b   : > { %20931 = vst [vmem:[#allocation233_spill] sm:$0xff] %v16443_v56  ;;  %5097 = vrot.lane.b32.xlu1 %v16439_v9, %s20777_s18 }
 0x57c   : > { %4794 = vrot.lane.b32.xlu0 %v15706_v34, %s20827_s7 }
 0x57d   : > { %v16450_v32 = vpop.permute.xlu1 %5936 }
 0x57e   : > { %20932 = vst [vmem:[#allocation234_spill] sm:$0xff] %v16450_v32  ;;  %v16452_v19 = vpop.permute.xlu0 %5772 }
 0x57f   : > { %20933 = vst [vmem:[#allocation235_spill] sm:$0xff] %v16452_v19  ;;  %4552 = vrot.lane.b32.xlu1 %v16456_v38, %s20784_s15  ;;  %v13631_v19 = vld [vmem:[%s13831_s23 + $0x88] sm:$0xf] }
 0x580   : > { %5049 = vrot.lane.b32.xlu0 %v15706_v34, %s20774_s20  ;;  %v8024_v3 = vrot.slane %v13631_v19, 2 }
 0x581   : > { %v16463_v56 = vpop.permute.xlu1 %5091 }
 0x582   : > { %20934 = vst [vmem:[#allocation236_spill] sm:$0xff] %v16463_v56  ;;  %v16465_v27 = vpop.permute.xlu0 %6081 }
 0x583   : > { %20935 = vst [vmem:[#allocation237_spill] sm:$0xff] %v16465_v27  ;;  %4641 = vrot.lane.b32.xlu1 %v4609_v29, %s20788_s22 }
 0x584   : > { %5878 = vrot.lane.b32.xlu0 %v5845_v60, %s20827_s7 }
 0x585   : > { %v16472_v12 = vpop.permute.xlu1 %5938 }
 0x586   : > { %20936 = vst [vmem:[#allocation238_spill] sm:$0xff] %v16472_v12  ;;  %v16474_v32 = vpop.permute.xlu0 %5346 }
 0x587   : > { %20937 = vst [vmem:[#allocation239_spill] sm:$0xff] %v16474_v32  ;;  %4893 = vrot.lane.b32.xlu1 %v16456_v38, %s20766_s16 }
 0x588   : > { %5786 = vrot.lane.b32.xlu0 %v15723_v6, %s20789_s17 }
 0x589   : > { %v16480_v34 = vpop.permute.xlu1 %5093 }
 0x58a   : > { %20938 = vst [vmem:[#allocation240_spill] sm:$0xff] %v16480_v34  ;;  %v16482_v56 = vpop.permute.xlu0 %4838  ;;  %v16498_v34 = vrot.slane %v15689_v15, 1 }
 0x58b   : > { %20939 = vst [vmem:[#allocation241_spill] sm:$0xff] %v16482_v56  ;;  %4946 = vrot.lane.b32.xlu1 %v4609_v29, %s20767_s24  ;;  %v20944_v56 = vrot.slane %v16224_v43, 7 }
 0x58c   : > { %4842 = vrot.lane.b32.xlu0 %v16439_v9, %s20802_s1 }
 0x58d   : > { %v16487_v44 = vpop.permute.xlu1 %5983 }
 0x58e   : > { %20940 = vst [vmem:[#allocation242_spill] sm:$0xff] %v16487_v44  ;;  %v16489_v12 = vpop.permute.xlu0 %5348  ;;  %v16511_v44 = vrot.slane %v15689_v15, 2 }
 0x58f   : > { %20941 = vst [vmem:[#allocation243_spill] sm:$0xff] %v16489_v12  ;;  %6089 = vrot.lane.b32.xlu1 %v15730_v31, %s20768_s21  ;;  %v5846_v12 = vsel %vm5739_vm9, %v20944_v56, %v5845_v60  ;;  %v4697_v60 = vrot.slane %v15685_v10, 3 }
 0x590   : > { %5352 = vrot.lane.b32.xlu0 %v16439_v9, %s20780_s19 }
 0x591   : > { %v16495_v6 = vpop.permute.xlu1 %6030  ;;  %v4698_v33 = vsel %vm4663_vm8, %v4695_v39, %v4697_v60 }
 0x592   : > { %20942 = vst [vmem:[#allocation244_spill] sm:$0xff] %v16495_v6  ;;  %v16500_v32 = vpop.permute.xlu0 %5872  ;;  %v4516_v6 = vrot.slane %v16224_v43, 1 }
 0x593   : > { %20943 = vst [vmem:[#allocation245_spill] sm:$0xff] %v16500_v32  ;;  %5987 = vrot.lane.b32.xlu1 %v16498_v34, %s20766_s16 }
 0x594   : > { %5876 = vrot.lane.b32.xlu0 %v5846_v12, %s20827_s7  ;;  %v4518_v11 = vsel %vm20433_vm7, %v4516_v6, %v4517_v2  ;;  %v4605_v12 = vrot.slane %v16224_v43, 2  ;;  %v4694_v2 = vrot.slane %v16224_v43, 3 }
 0x595   : > { %v16508_v27 = vpop.permute.xlu1 %5300 }
 0x596   : > { %20945 = vst [vmem:[#allocation246_spill] sm:$0xff] %v16508_v27  ;;  %v16514_v7 = vpop.permute.xlu0 %5652  ;;  %v4607_v41 = vsel %vm4574_vm1, %v4605_v12, %v4606_v37  ;;  %v4696_v10 = vsel %vm4663_vm8, %v4694_v2, %v4695_v39 }
 0x597   : > { %20946 = vst [vmem:[#allocation247_spill] sm:$0xff] %v16514_v7  ;;  %6034 = vrot.lane.b32.xlu1 %v16511_v44, %s20767_s24 }
 0x598   : > { %4550 = vrot.lane.b32.xlu0 %v4518_v11, %s20784_s15 }
 0x599   : > { %v16522_v56 = vpop.permute.xlu1 %4548 }
 0x59a   : > { %20947 = vst [vmem:[#allocation248_spill] sm:$0xff] %v16522_v56  ;;  %v16525_v27 = vpop.permute.xlu0 %5699 }
 0x59b   : > { %20948 = vst [vmem:[#allocation249_spill] sm:$0xff] %v16525_v27  ;;  %4730 = vrot.lane.b32.xlu1 %v4698_v33, %s20789_s17 }
 0x59c   : > { %4639 = vrot.lane.b32.xlu0 %v4607_v41, %s20788_s22 }
 0x59d   : > { %v16532_v6 = vpop.permute.xlu1 %4637 }
 0x59e   : > { %20949 = vst [vmem:[#allocation250_spill] sm:$0xff] %v16532_v6  ;;  %v16534_v7 = vpop.permute.xlu0 %4790 }
 0x59f   : > { %20950 = vst [vmem:[#allocation251_spill] sm:$0xff] %v16534_v7  ;;  %4997 = vrot.lane.b32.xlu1 %v4696_v10, %s20768_s21 }
 0x5a0   : > { %4891 = vrot.lane.b32.xlu0 %v4518_v11, %s20766_s16 }
 0x5a1   : > { %v16539_v27 = vpop.permute.xlu1 %4889 }
 0x5a2   : > { %20951 = vst [vmem:[#allocation252_spill] sm:$0xff] %v16539_v27  ;;  %v16541_v60 = vpop.permute.xlu0 %5045  ;;  %v21020_v27 = vld [vmem:[#allocation8_spill] sm:$0xff] }
 0x5a3   : > { %20952 = vst [vmem:[#allocation253_spill] sm:$0xff] %v16541_v60  ;;  %5199 = vrot.lane.b32.xlu1 %v4607_v41, %s20807_s2 }
 0x5a4   : > { %4944 = vrot.lane.b32.xlu0 %v4607_v41, %s20767_s24  ;;  %v20332_v41 = vrot.slane %v16439_v9, 7 }
 0x5a5   : > { %v16545_v37 = vpop.permute.xlu1 %4942 }
 0x5a6   : > { %20953 = vst [vmem:[#allocation254_spill] sm:$0xff] %v16545_v37  ;;  %v16547_v12 = vpop.permute.xlu0 %5870 }
 0x5a7   : > { %20954 = vst [vmem:[#allocation255_spill] sm:$0xff] %v16547_v12  ;;  %4999 = vrot.lane.b32.xlu1 %v4698_v33, %s20768_s21 }
 0x5a8   : > { %5784 = vrot.lane.b32.xlu0 %v15730_v31, %s20789_s17 }
 0x5a9   : > { %v16552_v39 = vpop.permute.xlu1 %5874 }
 0x5aa   : > { %20955 = vst [vmem:[#allocation256_spill] sm:$0xff] %v16552_v39  ;;  %v16554_v2 = vpop.permute.xlu0 %4546  ;;  %v4700_v39 = vrot.slane %v15566_v25, 3 }
 0x5ab   : > { %20956 = vst [vmem:[#allocation257_spill] sm:$0xff] %v16554_v2  ;;  %5201 = vrot.lane.b32.xlu1 %v4609_v29, %s20807_s2 }
 0x5ac   : > { %5656 = vrot.lane.b32.xlu0 %v16498_v34, %s20784_s15 }
 0x5ad   : > { %v16559_v60 = vpop.permute.xlu1 %5985 }
 0x5ae   : > { %20957 = vst [vmem:[#allocation258_spill] sm:$0xff] %v16559_v60  ;;  %v16562_v7 = vpop.permute.xlu0 %4635 }
 0x5af   : > { %20958 = vst [vmem:[#allocation259_spill] sm:$0xff] %v16562_v7  ;;  %5880 = vrot.lane.b32.xlu1 %v20332_v41, %s20827_s7 }
 0x5b0   : > { %5703 = vrot.lane.b32.xlu0 %v16511_v44, %s20788_s22 }
 0x5b1   : > { %v16569_v31 = vpop.permute.xlu1 %6032 }
 0x5b2   : > { %20959 = vst [vmem:[#allocation260_spill] sm:$0xff] %v16569_v31  ;;  %v16571_v43 = vpop.permute.xlu0 %4887 }
 0x5b3   : > { %20960 = vst [vmem:[#allocation261_spill] sm:$0xff] %v16571_v43  ;;  %4844 = vrot.lane.b32.xlu1 %v15566_v25, %s20802_s1  ;;  %v8056_v43 = vsel %vm20434_vm0, %v21020_v27, 0 }
 0x5b4   : > { %4728 = vrot.lane.b32.xlu0 %v4696_v10, %s20789_s17  ;;  %v16831_v32 = vand.u32 4294901760, %v8056_v43 }
 0x5b5   : > { %v16576_v29 = vpop.permute.xlu1 %4726 }
 0x5b6   : > { %20961 = vst [vmem:[#allocation262_spill] sm:$0xff] %v16576_v29  ;;  %v16578_v60 = vpop.permute.xlu0 %4940 }
 0x5b7   : > { %20962 = vst [vmem:[#allocation263_spill] sm:$0xff] %v16578_v60  ;;  %5099 = vrot.lane.b32.xlu1 %v15566_v25, %s20777_s18 }
 0x5b8   : > { %5146 = vrot.lane.b32.xlu0 %v4518_v11, %s20801_s0 }
 0x5b9   : > { %v16583_v41 = vpop.permute.xlu1 %4993 }
 0x5ba   : > { %20963 = vst [vmem:[#allocation264_spill] sm:$0xff] %v16583_v41  ;;  %v16585_v37 = vpop.permute.xlu0 %5654 }
 0x5bb   : > { %20964 = vst [vmem:[#allocation265_spill] sm:$0xff] %v16585_v37  ;;  %5306 = vrot.lane.b32.xlu1 %v15569_v35, %s20824_s6  ;;  %v4522_v37 = vrot.slane %v15566_v25, 1 }
 0x5bc   : > { %5148 = vrot.lane.b32.xlu0 %v16456_v38, %s20801_s0 }
 0x5bd   : > { %v16591_v31 = vpop.permute.xlu1 %5195 }
 0x5be   : > { %20965 = vst [vmem:[#allocation266_spill] sm:$0xff] %v16591_v31  ;;  %v16593_v29 = vpop.permute.xlu0 %5701 }
 0x5bf   : > { %20966 = vst [vmem:[#allocation267_spill] sm:$0xff] %v16593_v29  ;;  %6097 = vrot.lane.b32.xlu1 %v15735_v50, %s20768_s21  ;;  %v16612_v29 = vsel %vm20433_vm7, %v4522_v37, %v16498_v34 }
 0x5c0   : > { %5252 = vrot.lane.b32.xlu0 %v4696_v10, %s20817_s3  ;;  %v4611_v10 = vrot.slane %v15566_v25, 2 }
 0x5c1   : > { %v16598_v11 = vpop.permute.xlu1 %4995 }
 0x5c2   : > { %20967 = vst [vmem:[#allocation268_spill] sm:$0xff] %v16598_v11  ;;  %v16600_v41 = vpop.permute.xlu0 %4724 }
 0x5c3   : > { %20968 = vst [vmem:[#allocation269_spill] sm:$0xff] %v16600_v41  ;;  %5788 = vrot.lane.b32.xlu1 %v15738_v47, %s20789_s17 }
 0x5c4   : > { %5254 = vrot.lane.b32.xlu0 %v4698_v33, %s20817_s3  ;;  %v4614_v33 = vsel %vm4574_vm1, %v4611_v10, %v16511_v44  ;;  %v16645_v44 = vcombine.high %v15580_v36, %v15580_v36 }
 0x5c5   : > { %v16606_v38 = vpop.permute.xlu1 %5197 }
 0x5c6   : > { %20969 = vst [vmem:[#allocation270_spill] sm:$0xff] %v16606_v38  ;;  %v16608_v31 = vpop.permute.xlu0 %5142 }
 0x5c7   : > { %20970 = vst [vmem:[#allocation271_spill] sm:$0xff] %v16608_v31  ;;  %4556 = vrot.lane.b32.xlu1 %v16612_v29, %s20784_s15 }
 0x5c8   : > { %4798 = vrot.lane.b32.xlu0 %v15710_v62, %s20827_s7 }
 0x5c9   : > { %v16619_v11 = vpop.permute.xlu1 %6085 }
 0x5ca   : > { %20971 = vst [vmem:[#allocation272_spill] sm:$0xff] %v16619_v11  ;;  %v16621_v41 = vpop.permute.xlu0 %5144  ;;  %v20979_v11 = vld [vmem:[#allocation25_spill] sm:$0xff] }
 0x5cb   : > { %20972 = vst [vmem:[#allocation273_spill] sm:$0xff] %v16621_v41  ;;  %4645 = vrot.lane.b32.xlu1 %v4614_v33, %s20788_s22 }
 0x5cc   : > { %5053 = vrot.lane.b32.xlu0 %v15710_v62, %s20774_s20 }
 0x5cd   : > { %v16628_v34 = vpop.permute.xlu1 %5302 }
 0x5ce   : > { %20973 = vst [vmem:[#allocation274_spill] sm:$0xff] %v16628_v34  ;;  %v16630_v38 = vpop.permute.xlu0 %5248 }
 0x5cf   : > { %20974 = vst [vmem:[#allocation275_spill] sm:$0xff] %v16630_v38  ;;  %4897 = vrot.lane.b32.xlu1 %v16612_v29, %s20766_s16 }
 0x5d0   : > { %5308 = vrot.lane.b32.xlu0 %v15710_v62, %s20824_s6  ;;  %v16657_v62 = vcombine.low %v15580_v36, %v16645_v44 }
 0x5d1   : > { %v16636_v31 = vpop.permute.xlu1 %6083 }
 0x5d2   : > { %20975 = vst [vmem:[#allocation276_spill] sm:$0xff] %v16636_v31  ;;  %v16638_v41 = vpop.permute.xlu0 %5250  ;;  %v21027_v19 = vrot.slane %v16657_v62, 1 }
 0x5d3   : > { %20976 = vst [vmem:[#allocation277_spill] sm:$0xff] %v16638_v41  ;;  %4950 = vrot.lane.b32.xlu1 %v4614_v33, %s20767_s24 }
 0x5d4   : > { %4796 = vrot.lane.b32.xlu0 %v15569_v35, %s20827_s7 }
 0x5d5   : > { %v16647_v34 = vpop.permute.xlu1 %4840 }
 0x5d6   : > { %20977 = vst [vmem:[#allocation278_spill] sm:$0xff] %v16647_v34  ;;  %v16649_v38 = vpop.permute.xlu0 %5780  ;;  %v4702_v34 = vrot.slane %v15689_v15, 3 }
 0x5d7   : > { %20978 = vst [vmem:[#allocation279_spill] sm:$0xff] %v16649_v38  ;;  %6095 = vrot.lane.b32.xlu1 %v20979_v11, %s20768_s21 }
 0x5d8   : > { %5354 = vrot.lane.b32.xlu0 %v15566_v25, %s20780_s19  ;;  %v16674_v36 = vsel %vm4663_vm8, %v4700_v39, %v4702_v34  ;;  %v4610_v34 = vrot.slane %v16439_v9, 2 }
 0x5d9   : > { %v16659_v41 = vpop.permute.xlu1 %5782 }
 0x5da   : > { %20980 = vst [vmem:[#allocation25_spill] sm:$0xff] %v16659_v41  ;;  %v16661_v31 = vpop.permute.xlu0 %4792 }
 0x5db   : > { %20981 = vst [vmem:[#allocation280_spill] sm:$0xff] %v16661_v31  ;;  %4848 = vrot.lane.b32.xlu1 %v16657_v62, %s20802_s1  ;;  %v4699_v31 = vrot.slane %v16439_v9, 3 }
 0x5dc   : > { %5051 = vrot.lane.b32.xlu0 %v15569_v35, %s20774_s20 }
 0x5dd   : > { %v16669_v38 = vpop.permute.xlu1 %5095  ;;  %v4701_v15 = vsel %vm4663_vm8, %v4699_v31, %v4700_v39 }
 0x5de   : > { %20982 = vst [vmem:[#allocation281_spill] sm:$0xff] %v16669_v38  ;;  %v16671_v6 = vpop.permute.xlu0 %5047  ;;  %v5848_v38 = vrot.slane %v15566_v25, 7 }
 0x5df   : > { %20983 = vst [vmem:[#allocation282_spill] sm:$0xff] %v16671_v6  ;;  %4734 = vrot.lane.b32.xlu1 %v16674_v36, %s20789_s17 }
 0x5e0   : > { %5792 = vrot.lane.b32.xlu0 %v15735_v50, %s20789_s17  ;;  %v4612_v50 = vsel %vm4574_vm1, %v4610_v34, %v4611_v10  ;;  %v4521_v10 = vrot.slane %v16439_v9, 1 }
 0x5e1   : > { %v16681_v41 = vpop.permute.xlu1 %5304 }
 0x5e2   : > { %20984 = vst [vmem:[#allocation283_spill] sm:$0xff] %v16681_v41  ;;  %v16683_v35 = vpop.permute.xlu0 %5778  ;;  %v20990_v41 = vrot.slane %v16439_v9, 7 }
 0x5e3   : > { %20985 = vst [vmem:[#allocation284_spill] sm:$0xff] %v16683_v35  ;;  %5001 = vrot.lane.b32.xlu1 %v4701_v15, %s20768_s21 }
 0x5e4   : > { %5884 = vrot.lane.b32.xlu0 %v5848_v38, %s20827_s7 }
 0x5e5   : > { %v16690_v6 = vpop.permute.xlu1 %5940 }
 0x5e6   : > { %20986 = vst [vmem:[#allocation285_spill] sm:$0xff] %v16690_v6  ;;  %v16692_v60 = vpop.permute.xlu0 %6087  ;;  %v5849_v6 = vsel %vm5739_vm9, %v20990_v41, %v5848_v38  ;;  %v20999_v38 = vld [vmem:[#allocation44_spill] sm:$0xff] }
 0x5e7   : > { %20987 = vst [vmem:[#allocation286_spill] sm:$0xff] %v16692_v60  ;;  %5203 = vrot.lane.b32.xlu1 %v4612_v50, %s20807_s2 }
 0x5e8   : > { %6093 = vrot.lane.b32.xlu0 %v15738_v47, %s20768_s21  ;;  %v4523_v47 = vsel %vm20433_vm7, %v4521_v10, %v4522_v37 }
 0x5e9   : > { %v16698_v39 = vpop.permute.xlu1 %6091 }
 0x5ea   : > { %20988 = vst [vmem:[#allocation287_spill] sm:$0xff] %v16698_v39  ;;  %v16700_v31 = vpop.permute.xlu0 %5350  ;;  %v20994_v39 = vld [vmem:[#allocation49_spill] sm:$0xff] }
 0x5eb   : > { %20989 = vst [vmem:[#allocation288_spill] sm:$0xff] %v16700_v31  ;;  %5003 = vrot.lane.b32.xlu1 %v16674_v36, %s20768_s21  ;;  %v20993_v31 = vld [vmem:[#allocation10_spill] sm:$0xff] }
 0x5ec   : > { %5882 = vrot.lane.b32.xlu0 %v5849_v6, %s20827_s7  ;;  %v16718_v60 = vmul.f32 %v20994_v39, %v20993_v31  ;;  %v20998_v6 = vld [vmem:[#allocation45_spill] sm:$0xff] }
 0x5ed   : > { %v16708_v25 = vpop.permute.xlu1 %5097 }
 0x5ee   : > { %20991 = vst [vmem:[#allocation289_spill] sm:$0xff] %v16708_v25  ;;  %v16711_v34 = vpop.permute.xlu0 %4794  ;;  %20995 = vst [vmem:[#allocation10_spill] sm:$0xff] %v16718_v60 }
 0x5ef   : > { %20992 = vst [vmem:[#allocation290_spill] sm:$0xff] %v16711_v34  ;;  %5205 = vrot.lane.b32.xlu1 %v4614_v33, %s20807_s2  ;;  %v16729_v33 = vcombine.low %v20999_v38, %v20998_v6  ;;  %v21008_v34 = vld [vmem:[#allocation52_spill] sm:$0xff] }
 0x5f0   : > { %4554 = vrot.lane.b32.xlu0 %v4523_v47, %s20784_s15  ;;  %v16758_v9 = vrot.slane %v21008_v34, 7 }
 0x5f1   : > { %v16720_v35 = vpop.permute.xlu1 %4552  ;;  %21000 = vst [vmem:[#allocation45_spill] sm:$0xff] %v16729_v33  ;;  %v20339_v38 = vrot.slane %v16729_v33, 7 }
 0x5f2   : > { %20996 = vst [vmem:[#allocation49_spill] sm:$0xff] %v16720_v35  ;;  %v16722_v41 = vpop.permute.xlu0 %5049  ;;  %v4920_v35 = vrot.slane %v16657_v62, 2 }
 0x5f3   : > { %20997 = vst [vmem:[#allocation291_spill] sm:$0xff] %v16722_v41  ;;  %5942 = vrot.lane.b32.xlu1 %v16718_v60, %s20802_s1 }
 0x5f4   : > { %4643 = vrot.lane.b32.xlu0 %v4612_v50, %s20788_s22 }
 0x5f5   : > { %v16731_v37 = vpop.permute.xlu1 %4641 }
 0x5f6   : > { %21001 = vst [vmem:[#allocation44_spill] sm:$0xff] %v16731_v37  ;;  %v16733_v10 = vpop.permute.xlu0 %5878  ;;  %v13622_v37 = vld [vmem:[%s13831_s23 + $0x30] sm:$0xff] }
 0x5f7   : > { %21002 = vst [vmem:[#allocation292_spill] sm:$0xff] %v16733_v10  ;;  %5101 = vrot.lane.b32.xlu1 %v16729_v33, %s20777_s18 }
 0x5f8   : > { %4895 = vrot.lane.b32.xlu0 %v4523_v47, %s20766_s16 }
 0x5f9   : > { %v16738_v39 = vpop.permute.xlu1 %4893 }
 0x5fa   : > { %21003 = vst [vmem:[#allocation293_spill] sm:$0xff] %v16738_v39  ;;  %v16740_v31 = vpop.permute.xlu0 %5786  ;;  %v8006_v39 = vrot.slane %v13622_v37, 2  ;;  %v13625_v37 = vld [vmem:[%s13831_s23 + $0x58] sm:$0xf] }
 0x5fb   : > { %21004 = vst [vmem:[#allocation294_spill] sm:$0xff] %v16740_v31  ;;  %5356 = vrot.lane.b32.xlu1 %v16729_v33, %s20780_s19  ;;  %v8014_v56 = vrot.slane %v13625_v37, 2 }
 0x5fc   : > { %4948 = vrot.lane.b32.xlu0 %v4612_v50, %s20767_s24 }
 0x5fd   : > { %v16745_v6 = vpop.permute.xlu1 %4946 }
 0x5fe   : > { %21005 = vst [vmem:[#allocation295_spill] sm:$0xff] %v16745_v6  ;;  %v16748_v25 = vpop.permute.xlu0 %4842 }
 0x5ff   : > { %21006 = vst [vmem:[#allocation296_spill] sm:$0xff] %v16748_v25  ;;  %5886 = vrot.lane.b32.xlu1 %v20339_v38, %s20827_s7  ;;  %v16768_v38 = vrot.slane %v16718_v60, 1 }
 0x600   : > { %5790 = vrot.lane.b32.xlu0 %v20979_v11, %s20789_s17 }
 0x601   : > { %v16755_v41 = vpop.permute.xlu1 %6089 }
 0x602   : > { %21007 = vst [vmem:[#allocation297_spill] sm:$0xff] %v16755_v41  ;;  %v16760_v31 = vpop.permute.xlu0 %5352 }
 0x603   : > { %21009 = vst [vmem:[#allocation298_spill] sm:$0xff] %v16760_v31  ;;  %5794 = vrot.lane.b32.xlu1 %v16758_v9, %s20789_s17  ;;  %v16778_v31 = vrot.slane %v16718_v60, 2 }
 0x604   : > { %4732 = vrot.lane.b32.xlu0 %v4701_v15, %s20789_s17 }
 0x605   : > { %v16765_v50 = vpop.permute.xlu1 %5987 }
 0x606   : > { %21010 = vst [vmem:[#allocation299_spill] sm:$0xff] %v16765_v50  ;;  %v16770_v25 = vpop.permute.xlu0 %5876  ;;  %v20343_v50 = vrot.slane %v16657_v62, 1 }
 0x607   : > { %21011 = vst [vmem:[#allocation300_spill] sm:$0xff] %v16770_v25  ;;  %5989 = vrot.lane.b32.xlu1 %v16768_v38, %s20766_s16 }
 0x608   : > { %5150 = vrot.lane.b32.xlu0 %v4523_v47, %s20801_s0 }
 0x609   : > { %v16775_v11 = vpop.permute.xlu1 %6034 }
 0x60a   : > { %21012 = vst [vmem:[#allocation301_spill] sm:$0xff] %v16775_v11  ;;  %v16780_v41 = vpop.permute.xlu0 %4550  ;;  %v16795_v11 = vsel %vm20433_vm7, %v20343_v50, %v16768_v38  ;;  %v13624_v50 = vld [vmem:[%s13831_s23 + $0x50] sm:$0xff] }
 0x60b   : > { %21013 = vst [vmem:[#allocation302_spill] sm:$0xff] %v16780_v41  ;;  %6036 = vrot.lane.b32.xlu1 %v16778_v31, %s20767_s24  ;;  %v13623_v41 = vld [vmem:[%s13831_s23 + $0x48] sm:$0xff]  ;;  %v8012_v25 = vrot.slane %v13624_v50, 2  ;;  %v13626_v50 = vld [vmem:[%s13831_s23 + $0x60] sm:$0xff] }
 0x60c   : > { %5152 = vrot.lane.b32.xlu0 %v16612_v29, %s20801_s0  ;;  %v8011_v10 = vrot.slane %v13623_v41, 2  ;;  %v8016_v7 = vrot.slane %v13626_v50, 2 }
 0x60d   : > { %v16787_v6 = vpop.permute.xlu1 %4730 }
 0x60e   : > { %21014 = vst [vmem:[#allocation303_spill] sm:$0xff] %v16787_v6  ;;  %v16789_v47 = vpop.permute.xlu0 %4639  ;;  %v8013_v63 = vsel %vm4574_vm1, %v8011_v10, %v8012_v25 }
 0x60f   : > { %21015 = vst [vmem:[#allocation304_spill] sm:$0xff] %v16789_v47  ;;  %5660 = vrot.lane.b32.xlu1 %v16795_v11, %s20784_s15  ;;  %v4919_v47 = vrot.slane %v16729_v33, 2  ;;  %v8058_v8 = vsel %vm20434_vm0, %v8013_v63, 0 }
 0x610   : > { %5256 = vrot.lane.b32.xlu0 %v4701_v15, %s20817_s3  ;;  %v16817_v15 = vld [vmem:[%s20041_s4] sm:$0xff] }
 0x611   : > { %v16801_v29 = vpop.permute.xlu1 %4997 }
 0x612   : > { %21016 = vst [vmem:[#allocation305_spill] sm:$0xff] %v16801_v29  ;;  %v16803_v6 = vpop.permute.xlu0 %4891  ;;  %v21018_v29 = vld [vmem:[#allocation4_spill] sm:$0xff] }
 0x613   : > { %21017 = vst [vmem:[#allocation306_spill] sm:$0xff] %v16803_v6  ;;  %4901 = vrot.lane.b32.xlu1 %v16795_v11, %s20766_s16  ;;  %v21019_v6 = vrot.slane %v21018_v29, 2  ;;  %v8017_v29 = vrot.slane %v13627_v45, 2  ;;  %v4866_v45 = vrot.slane %v16729_v33, 1 }
 0x614   : > { %5258 = vrot.lane.b32.xlu0 %v16674_v36, %s20817_s3  ;;  %v16828_v36 = vand.u32 4294901760, %v16817_v15 }
 0x615   : > { %v8008_v41 = vsel %vm4574_vm1, %v8006_v39, %v21019_v6  ;;  %v16825_v37 = vpop.permute.xlu1 %5199  ;;  %v4441_v39 = vcombine.high %v16718_v60, %v16718_v60  ;;  %v16839_v6 = vsel %vm4574_vm1, %v4919_v47, %v4920_v35  ;;  %v13630_v47 = vld [vmem:[%s13831_s23 + $0x80] sm:$0xff]  ;;  %v16892_v10 = vsel %vm20433_vm7, %v4866_v45, %v21027_v19 }
 0x616   : > { %21021 = vst [vmem:[#allocation4_spill] sm:$0xff] %v16825_v37  ;;  %v8054_v2 = vsel %vm20434_vm0, %v8008_v41, 0  ;;  %v16836_v27 = vpop.permute.xlu0 %4944  ;;  %v13628_v37 = vld [vmem:[%s13831_s23 + $0x70] sm:$0xf]  ;;  %v13629_v41 = vld [vmem:[%s13831_s23 + $0x78] sm:$0xff]  ;;  %12376 = vmatprep.subr.mxu1 %v16828_v36  ;;  %v8022_v12 = vrot.slane %v13630_v47, 2  ;;  %v8018_v45 = vsel %vm4574_vm1, %v8016_v7, %v8017_v29 }
 0x617   : > { %21022 = vst [vmem:[#allocation8_spill] sm:$0xff] %v16836_v27  ;;  %v16841_v50 = vand.u32 4294901760, %v8054_v2  ;;  %v8019_v28 = vrot.slane %v13628_v37, 2  ;;  %v8021_v49 = vrot.slane %v13629_v41, 2  ;;  %5705 = vrot.lane.b32.xlu1 %v16839_v6, %s20788_s22  ;;  %v16850_v27 = vsub.f32 %v8056_v43, %v16831_v32  ;;  %12377 = vmatpush3.msra.mxu1 %v16828_v36 }
 0x618   : > { %5103 = vrot.lane.b32.xlu0 %v16657_v62, %s20777_s18  ;;  %v16877_v4 = vcombine.low %v4441_v39, %v21024_v51  ;;  %v8062_v23 = vsel %vm20434_vm0, %v8018_v45, 0  ;;  %v8025_v45 = vsel %vm4574_vm1, %v8022_v12, %v8024_v3 }
 0x619   : > { %v16862_v41 = vsub.f32 %v8054_v2, %v16841_v50  ;;  %v16872_v47 = vpop.permute.xlu1 %4999  ;;  %v20353_v37 = vand.u32 4294901760, %v16850_v27  ;;  %v16883_v2 = vsel %vm4574_vm1, %v4920_v35, %v16778_v31  ;;  %v16898_v35 = vand.u32 4294901760, %v8058_v8 }
 0x61a   : > { %21023 = vst [vmem:[#allocation307_spill] sm:$0xff] %v16872_v47  ;;  %21025 = vst [vmem:[#allocation56_spill] sm:$0xff] %v16877_v4  ;;  %v16879_v48 = vpop.permute.xlu0 %5784  ;;  %v8020_v19 = vsel %vm4574_vm1, %v8017_v29, %v8019_v28  ;;  %v21031_v29 = vrot.slane %v16657_v62, 7 }
 0x61b   : > { %21026 = vst [vmem:[#allocation308_spill] sm:$0xff] %v16879_v48  ;;  %v20354_v43 = vand.u32 4294901760, %v16862_v41  ;;  %4954 = vrot.lane.b32.xlu1 %v16883_v2, %s20767_s24  ;;  %v8165_v47 = vsub.f32 %v16850_v27, %v20353_v37  ;;  %v8015_v48 = vsel %vm4574_vm1, %v8012_v25, %v8014_v56  ;;  %v16911_v37 = vsub.f32 %v8058_v8, %v16898_v35 }
 0x61c   : > { %4846 = vrot.lane.b32.xlu0 %v16729_v33, %s20802_s1  ;;  %v8060_v57 = vsel %vm20434_vm0, %v8015_v48, 0  ;;  %v16919_v25 = vand.u32 4294901760, %v8062_v23  ;;  %v8064_v7 = vsel %vm20434_vm0, %v8020_v19, 0  ;;  %v16926_v8 = vcombine.low %v16645_v44, %v16718_v60 }
 0x61d   : > { %v8155_v63 = vsub.f32 %v16862_v41, %v20354_v43  ;;  %v16908_v39 = vpop.permute.xlu1 %5201  ;;  %v8166_v21 = vand.u32 4294901760, %v8165_v47  ;;  %v16917_v43 = vand.u32 4294901760, %v8060_v57  ;;  %v20355_v48 = vand.u32 4294901760, %v16911_v37 }
 0x61e   : > { %21028 = vst [vmem:[#allocation309_spill] sm:$0xff] %v16908_v39  ;;  %v16915_v26 = vpop.permute.xlu0 %5656  ;;  %21030 = vst [vmem:[#allocation311_spill] sm:$0xff] %v16926_v8  ;;  %v16929_v28 = vand.u32 4294901760, %v8064_v7  ;;  %v8023_v56 = vsel %vm4574_vm1, %v8021_v49, %v8022_v12  ;;  %v16988_v0 = vrot.slane %v16926_v8, 7  ;;  %v21038_v8 = vld [vmem:[#allocation65_spill] sm:$0xff] }
 0x61f   : > { %21029 = vst [vmem:[#allocation310_spill] sm:$0xff] %v16915_v26  ;;  %v8156_v22 = vand.u32 4294901760, %v8155_v63  ;;  %5154 = vrot.lane.b32.xlu1 %v16892_v10, %s20801_s0  ;;  %v16936_v47 = vsub.f32 %v8060_v57, %v16917_v43  ;;  %v16939_v63 = vsub.f32 %v8062_v23, %v16919_v25  ;;  %v8066_v44 = vsel %vm20434_vm0, %v8023_v56, 0  ;;  %v13637_v26 = vld [vmem:[%s13831_s23 + $0xb8] sm:$0xf] }
 0x620   : > { %5890 = vrot.lane.b32.xlu0 %v21031_v29, %s20827_s7  ;;  %v8175_v49 = vsub.f32 %v16911_v37, %v20355_v48  ;;  %v16951_v57 = vand.u32 4294901760, %v8066_v44  ;;  %v8068_v23 = vsel %vm20434_vm0, %v8025_v45, 0  ;;  %v13635_v29 = vld [vmem:[%s13831_s23 + $0xa8] sm:$0xff]  ;;  %v16962_v48 = vld [vmem:[%s13831_s23 + $0xb0] sm:$0xff] }
 0x621   : > { %12378 = vmatprep.mubr.f32.mxu1 %v8156_v22  ;;  %v16943_v19 = vpop.permute.xlu1 %5880  ;;  %v16949_v22 = vsub.f32 %v8064_v7, %v16929_v28  ;;  %v8031_v39 = vrot.slane %v13635_v29, 2  ;;  %v20356_v3 = vand.u32 4294901760, %v16936_v47  ;;  %v16959_v12 = vand.u32 4294901760, %v8068_v23 }
 0x622   : > { %21032 = vst [vmem:[#allocation312_spill] sm:$0xff] %v16943_v19  ;;  %12379 = vmatmul.mubr.f32.vlgmr.msra.gmra.mrb[60].mxu1 %v8166_v21  ;;  %v16955_v56 = vpop.permute.xlu0 %5703  ;;  %v8032_v7 = vrot.slane %v16962_v48, 2  ;;  %v8034_v19 = vrot.slane %v13637_v26, 2  ;;  %v8176_v45 = vand.u32 4294901760, %v8175_v49  ;;  %v16978_v26 = vsub.f32 %v8066_v44, %v16951_v57  ;;  %v13638_v49 = vld [vmem:[%s13831_s23 + $0xc0] sm:$0xff] }
 0x623   : > { %21033 = vst [vmem:[#allocation313_spill] sm:$0xff] %v16955_v56  ;;  %5944 = vrot.lane.b32.xlu1 %v16877_v4, %s20802_s1  ;;  %v8185_v21 = vsub.f32 %v16936_v47, %v20356_v3  ;;  %v21034_v56 = vand.u32 4294901760, %v16939_v63  ;;  %v16981_v30 = vsub.f32 %v8068_v23, %v16959_v12  ;;  %v8036_v29 = vrot.slane %v13638_v49, 2  ;;  %v13640_v44 = vld [vmem:[%s13831_s23 + $0xd0] sm:$0xf] }
 0x624   : > { %5662 = vrot.lane.b32.xlu0 %v16768_v38, %s20784_s15  ;;  %12381 = vmatprep.mubr.f32.mxu1 %v8176_v45  ;;  %v21036_v3 = vand.u32 4294901760, %v16949_v22  ;;  %v8039_v61 = vrot.slane %v13640_v44, 2  ;;  %v20362_v49 = vand.u32 4294901760, %v16978_v26  ;;  %v17003_v45 = vcombine.low %v21024_v51, %v21038_v8 }
 0x625   : > { %v8195_v48 = vsub.f32 %v16939_v63, %v21034_v56  ;;  %v16985_v38 = vpop.permute.xlu1 %4844  ;;  %v8186_v23 = vand.u32 4294901760, %v8185_v21  ;;  %v21040_v44 = vrot.slane %v16865_v53, 2  ;;  %v21041_v21 = vrot.slane %v16855_v52, 2 }
 0x626   : > { %21035 = vst [vmem:[#allocation314_spill] sm:$0xff] %v16985_v38  ;;  %v8205_v56 = vsub.f32 %v16949_v22, %v21036_v3  ;;  %v16994_v55 = vpop.permute.xlu0 %4728  ;;  %v8041_v38 = vrot.slane %v16998_v18, 2  ;;  %21039 = vst [vmem:[#allocation65_spill] sm:$0xff] %v17003_v45  ;;  %v8215_v51 = vsub.f32 %v16978_v26, %v20362_v49  ;;  %v21042_v3 = vrot.slane %v16869_v16, 2  ;;  %v13643_v49 = vld [vmem:[%s13831_s23 + $0xe8] sm:$0xf] }
 0x627   : > { %21037 = vst [vmem:[#allocation315_spill] sm:$0xff] %v16994_v55  ;;  %v8196_v54 = vand.u32 4294901760, %v8195_v48  ;;  %6103 = vrot.lane.b32.xlu1 %v16988_v0, %s20768_s21  ;;  %v8028_v48 = vsel %vm4574_vm1, %v21041_v21, %v21040_v44  ;;  %12382 = vmatmul.mubr.f32.gmra.mrb[62].mxu1 %v8186_v23  ;;  %v21043_v55 = vmov %v21040_v44  ;;  %v17041_v53 = vsel %vm5739_vm9, %v16758_v9, %v16988_v0 }
 0x628   : > { %5709 = vrot.lane.b32.xlu0 %v16778_v31, %s20788_s22  ;;  %v8206_v18 = vand.u32 4294901760, %v8205_v56  ;;  %v8070_v8 = vsel %vm20434_vm0, %v8028_v48, 0  ;;  %v8030_v52 = vsel %vm4574_vm1, %v21043_v55, %v21042_v3  ;;  %v21045_v56 = vand.u32 4294901760, %v16981_v30 }
 0x629   : > { %v17028_v31 = vpop.permute.xlu1 %5099  ;;  %12384 = vmatprep.mubr.f32.mxu1 %v8196_v54  ;;  %v17033_v21 = vand.u32 4294901760, %v8070_v8  ;;  %v8072_v48 = vsel %vm20434_vm0, %v8030_v52, 0  ;;  %v8216_v55 = vand.u32 4294901760, %v8215_v51  ;;  %v8033_v54 = vsel %vm4574_vm1, %v8031_v39, %v8032_v7 }
 0x62a   : > { %21044 = vst [vmem:[#allocation316_spill] sm:$0xff] %v17028_v31  ;;  %v8225_v23 = vsub.f32 %v16981_v30, %v21045_v56  ;;  %v17036_v16 = vpop.permute.xlu0 %5146  ;;  %v17043_v3 = vand.u32 4294901760, %v8072_v48  ;;  %v8044_v44 = vrot.slane %v13643_v49, 2  ;;  %v17050_v56 = vrot.slane %v17003_v45, 7 }
 0x62b   : > { %21046 = vst [vmem:[#allocation317_spill] sm:$0xff] %v17036_v16  ;;  %6101 = vrot.lane.b32.xlu1 %v17041_v53, %s20768_s21  ;;  %v17053_v52 = vsub.f32 %v8070_v8, %v17033_v21  ;;  %v8074_v16 = vsel %vm20434_vm0, %v8033_v54, 0  ;;  %12385 = vmatmul.mubr.f32.gmra.mrb[64].mxu1 %v8206_v18  ;;  %v8035_v31 = vsel %vm4574_vm1, %v8032_v7, %v8034_v19  ;;  %v21049_v7 = vrot.slane %v16657_v62, 7 }
 0x62c   : > { %6099 = vrot.lane.b32.xlu0 %v16758_v9, %s20768_s21  ;;  %v8226_v51 = vand.u32 4294901760, %v8225_v23  ;;  %v17059_v39 = vsub.f32 %v8072_v48, %v17043_v3  ;;  %v17061_v49 = vand.u32 4294901760, %v8074_v16  ;;  %12387 = vmatprep.mubr.f32.mxu1 %v8216_v55  ;;  %v8076_v45 = vsel %vm20434_vm0, %v8035_v31, 0 }
 0x62d   : > { %v17064_v40 = vpop.permute.xlu1 %5306  ;;  %v20365_v8 = vand.u32 4294901760, %v17053_v52  ;;  %v8038_v54 = vsel %vm4574_vm1, %v8036_v29, %v8037_v13  ;;  %v8040_v9 = vsel %vm4574_vm1, %v8037_v13, %v8039_v61  ;;  %v17076_v24 = vand.u32 4294901760, %v8076_v45 }
 0x62e   : > { %21047 = vst [vmem:[#allocation318_spill] sm:$0xff] %v17064_v40  ;;  %v17070_v18 = vpop.permute.xlu0 %5148  ;;  %v20366_v23 = vand.u32 4294901760, %v17059_v39  ;;  %v17074_v48 = vsub.f32 %v8074_v16, %v17061_v49  ;;  %v8078_v19 = vsel %vm20434_vm0, %v8038_v54, 0  ;;  %v21050_v29 = vrot.slane %v16729_v33, 7 }
 0x62f   : > { %21048 = vst [vmem:[#allocation319_spill] sm:$0xff] %v17070_v18  ;;  %5800 = vrot.lane.b32.xlu1 %v17050_v56, %s20789_s17  ;;  %v8235_v13 = vsub.f32 %v17053_v52, %v20365_v8  ;;  %v17089_v31 = vand.u32 4294901760, %v8078_v19  ;;  %v8080_v16 = vsel %vm20434_vm0, %v8040_v9, 0  ;;  %12388 = vmatmul.mubr.f32.gmra.mrb[66].mxu1 %v8226_v51 }
 0x630   : > { %v5852_v61 = vsel %vm5739_vm9, %v21050_v29, %v21049_v7  ;;  %v8245_v54 = vsub.f32 %v17059_v39, %v20366_v23  ;;  %v20369_v40 = vand.u32 4294901760, %v17074_v48  ;;  %v17099_v7 = vsub.f32 %v8076_v45, %v17076_v24 }
 0x631   : > { %5888 = vrot.lane.b32.xlu0 %v5852_v61, %s20827_s7  ;;  %v17101_v29 = vpop.permute.xlu1 %6097  ;;  %v8236_v8 = vand.u32 4294901760, %v8235_v13  ;;  %v17104_v18 = vsub.f32 %v8078_v19, %v17089_v31  ;;  %v17106_v9 = vand.u32 4294901760, %v8080_v16  ;;  %v21052_v61 = vrot.slane %v17025_v5, 2 }
 0x632   : > { %21051 = vst [vmem:[#allocation320_spill] sm:$0xff] %v17101_v29  ;;  %v17111_v55 = vpop.permute.xlu0 %5252  ;;  %v8246_v23 = vand.u32 4294901760, %v8245_v54  ;;  %v8255_v45 = vsub.f32 %v17074_v48, %v20369_v40  ;;  %v20370_v33 = vand.u32 4294901760, %v17099_v7  ;;  %v21054_v19 = vrot.slane %v16877_v4, 7  ;;  %v21055_v54 = vld [vmem:[#allocation67_spill] sm:$0xff] }
 0x633   : > { %v8043_v51 = vsel %vm4574_vm1, %v8041_v38, %v21052_v61  ;;  %21053 = vst [vmem:[#allocation321_spill] sm:$0xff] %v17111_v55  ;;  %12390 = vmatprep.mubr.f32.mxu1 %v8236_v8  ;;  %v20371_v29 = vand.u32 4294901760, %v17104_v18  ;;  %v17123_v38 = vsub.f32 %v8080_v16, %v17106_v9  ;;  %v17129_v55 = vcombine.high %v21055_v54, %v21055_v54 }
 0x634   : > { %v8082_v13 = vsel %vm20434_vm0, %v8043_v51, 0  ;;  %5892 = vrot.lane.b32.xlu1 %v21054_v19, %s20827_s7  ;;  %12391 = vmatmul.mubr.f32.gmra.mrb[68].mxu1 %v8246_v23  ;;  %v8256_v51 = vand.u32 4294901760, %v8255_v45  ;;  %v8265_v8 = vsub.f32 %v17099_v7, %v20370_v33  ;;  %v21057_v19 = vrot.slane %v17025_v5, 2 }
 0x635   : > { %v17125_v61 = vand.u32 4294901760, %v8082_v13  ;;  %21056 = vst [vmem:[#allocation67_spill] sm:$0xff] %v17129_v55  ;;  %5658 = vrot.lane.b32.xlu0 %v16892_v10, %s20784_s15  ;;  %v17139_v40 = vpop.permute.xlu1 %5788  ;;  %v8275_v1 = vsub.f32 %v17104_v18, %v20371_v29  ;;  %v20372_v14 = vand.u32 4294901760, %v17123_v38 }
 0x636   : > { %v8045_v16 = vsel %vm4574_vm1, %v21057_v19, %v8044_v44  ;;  %21058 = vst [vmem:[#allocation322_spill] sm:$0xff] %v17139_v40  ;;  %v17149_v45 = vpop.permute.xlu0 %5254  ;;  %12393 = vmatprep.mubr.f32.mxu1 %v8256_v51  ;;  %v8266_v33 = vand.u32 4294901760, %v8265_v8  ;;  %v8314_v44 = vsub.f32 %v16817_v15, %v16828_v36  ;;  %v21060_v15 = vld [vmem:[#allocation7_spill] sm:$0xff] }
 0x637   : > { %v17146_v34 = vsub.f32 %v8082_v13, %v17125_v61  ;;  %v8084_v23 = vsel %vm20434_vm0, %v8045_v16, 0  ;;  %21059 = vst [vmem:[#allocation323_spill] sm:$0xff] %v17149_v45  ;;  %v8276_v19 = vand.u32 4294901760, %v8275_v1  ;;  %v8285_v13 = vsub.f32 %v17123_v38, %v20372_v14  ;;  %v21061_v16 = vld [vmem:[#allocation64_spill] sm:$0xff] }
 0x638   : > { %v17151_v5 = vand.u32 4294901760, %v8084_v23  ;;  %5948 = vrot.lane.b32.xlu1 %v17129_v55, %s20802_s1  ;;  %12394 = vmatmul.mubr.f32.gmra.mrb[70].mxu1 %v8266_v33  ;;  %v17166_v8 = vand.u32 4294901760, %v8314_v44  ;;  %v17170_v45 = vcombine.low %v21061_v16, %v21060_v15 }
 0x639   : > { %v20375_v29 = vand.u32 4294901760, %v17146_v34  ;;  %4899 = vrot.lane.b32.xlu0 %v16892_v10, %s20766_s16  ;;  %v17172_v1 = vpop.permute.xlu1 %4556  ;;  %12396 = vmatprep.mubr.f32.mxu1 %v8276_v19  ;;  %v8286_v40 = vand.u32 4294901760, %v8285_v13 }
 0x63a   : > { %v17164_v51 = vsub.f32 %v8084_v23, %v17151_v5  ;;  %21062 = vst [vmem:[#allocation7_spill] sm:$0xff] %v17170_v45  ;;  %21063 = vst [vmem:[#allocation64_spill] sm:$0xff] %v17172_v1  ;;  %v17177_v60 = vpop.permute.xlu0 %4798  ;;  %v8316_v10 = vsub.f32 %v8314_v44, %v17166_v8  ;;  %v5125_v1 = vrot.slane %v16877_v4, 1 }
 0x63b   : > { %v8295_v14 = vsub.f32 %v17146_v34, %v20375_v29  ;;  %21064 = vst [vmem:[#allocation324_spill] sm:$0xff] %v17177_v60  ;;  %v21067_v60 = vld [vmem:[#allocation30_spill] sm:$0xff] }
 0x63c   : > { %v20376_v33 = vand.u32 4294901760, %v17164_v51  ;;  %5950 = vrot.lane.b32.xlu1 %v17170_v45, %s20802_s1  ;;  %12397 = vmatmul.mubr.f32.gmra.mrb[72].mxu1 %v8286_v40  ;;  %v8317_v13 = vand.u32 4294901760, %v8316_v10  ;;  %v5128_v40 = vrot.slane %v17129_v55, 1 }
 0x63d   : > { %v8296_v23 = vand.u32 4294901760, %v8295_v14  ;;  %5707 = vrot.lane.b32.xlu0 %v16883_v2, %s20788_s22  ;;  %v17188_v15 = vpop.permute.xlu1 %4645 }
 0x63e   : > { %v8305_v19 = vsub.f32 %v17164_v51, %v20376_v33  ;;  %21065 = vst [vmem:[#allocation325_spill] sm:$0xff] %v17188_v15  ;;  %v17190_v16 = vpop.permute.xlu0 %5053  ;;  %12402 = vmatprep.subr.mxu1 %v8317_v13 }
 0x63f   : > { %12399 = vmatprep.mubr.f32.mxu1 %v8296_v23  ;;  %21066 = vst [vmem:[#allocation326_spill] sm:$0xff] %v17190_v16  ;;  %12403 = vmatpush3.msra.mxu1 %v8317_v13  ;;  %v21072_v13 = vld [vmem:[#allocation9_spill] sm:$0xff] }
 0x640   : > { %v8306_v29 = vand.u32 4294901760, %v8305_v19  ;;  %5954 = vrot.lane.b32.xlu1 %v21067_v60, %s20802_s1  ;;  %12428 = vmatprep.subr.mxu1 %v8314_v44  ;;  %v5126_v33 = vrot.slane %v21072_v13, 1 }
 0x641   : > { %4952 = vrot.lane.b32.xlu0 %v16839_v6, %s20767_s24  ;;  %v17196_v14 = vpop.permute.xlu1 %4897 }
 0x642   : > { %12400 = vmatmul.mubr.f32.gmra.mrb[74].mxu1 %v8306_v29  ;;  %21068 = vst [vmem:[#allocation327_spill] sm:$0xff] %v17196_v14  ;;  %v17200_v10 = vpop.permute.xlu0 %5308  ;;  %v5181_v29 = vrot.slane %v17129_v55, 2  ;;  %v5854_v14 = vrot.slane %v21072_v13, 7 }
 0x643   : > { %12404 = vmatprep.mubr.f32.mxu1 %v16841_v50  ;;  %21069 = vst [vmem:[#allocation328_spill] sm:$0xff] %v17200_v10 }
 0x644   : > { %5995 = vrot.lane.b32.xlu1 %v5128_v40, %s20766_s16 }
 0x645   : > { %5798 = vrot.lane.b32.xlu0 %v16988_v0, %s20789_s17  ;;  %v17206_v23 = vpop.permute.xlu1 %4950 }
 0x646   : > { %12405 = vmatmul.mubr.f32.vlgmr.msra.gmra.mrb[60].mxu1 %v16831_v32  ;;  %21070 = vst [vmem:[#allocation329_spill] sm:$0xff] %v17206_v23  ;;  %v17210_v19 = vpop.permute.xlu0 %4796 }
 0x647   : > { %12407 = vmatprep.mubr.f32.mxu1 %v16898_v35  ;;  %12429 = vmatpush3.msra.mxu1 %v8314_v44  ;;  %21071 = vst [vmem:[#allocation330_spill] sm:$0xff] %v17210_v19  ;;  %v17224_v44 = vsel %vm20433_vm7, %v5126_v33, %v5128_v40  ;;  %v5179_v19 = vrot.slane %v21072_v13, 2 }
 0x648   : > { %12454 = vmatprep.subr.mxu1 %v16828_v36  ;;  %6042 = vrot.lane.b32.xlu1 %v5181_v29, %s20767_s24  ;;  %21075 = vst [vmem:[#allocation332_spill] sm:$0xff] %v17224_v44 }
 0x649   : > { %5796 = vrot.lane.b32.xlu0 %v17041_v53, %s20789_s17  ;;  %v17218_v0 = vpop.permute.xlu1 %6095  ;;  %v5178_v53 = vrot.slane %v16877_v4, 2 }
 0x64a   : > { %12408 = vmatmul.mubr.f32.gmra.mrb[62].mxu1 %v16917_v43  ;;  %21073 = vst [vmem:[#allocation9_spill] sm:$0xff] %v17218_v0  ;;  %v17221_v10 = vpop.permute.xlu0 %5354 }
 0x64b   : > { %12410 = vmatprep.mubr.f32.mxu1 %v16919_v25  ;;  %21074 = vst [vmem:[#allocation331_spill] sm:$0xff] %v17221_v10  ;;  %v17239_v0 = vsel %vm4574_vm1, %v5178_v53, %v5179_v19 }
 0x64c   : > { %5666 = vrot.lane.b32.xlu1 %v17224_v44, %s20784_s15 }
 0x64d   : > { %6105 = vrot.lane.b32.xlu0 %v17050_v56, %s20768_s21  ;;  %v17233_v16 = vpop.permute.xlu1 %4848 }
 0x64e   : > { %12411 = vmatmul.mubr.f32.gmra.mrb[64].mxu1 %v16929_v28  ;;  %21076 = vst [vmem:[#allocation333_spill] sm:$0xff] %v17233_v16  ;;  %v17236_v10 = vpop.permute.xlu0 %5051 }
 0x64f   : > { %12413 = vmatprep.mubr.f32.mxu1 %v16951_v57  ;;  %21077 = vst [vmem:[#allocation334_spill] sm:$0xff] %v17236_v10 }
 0x650   : > { %5711 = vrot.lane.b32.xlu1 %v17239_v0, %s20788_s22 }
 0x651   : > { %5946 = vrot.lane.b32.xlu0 %v21072_v13, %s20802_s1  ;;  %v17246_v23 = vpop.permute.xlu1 %4734 }
 0x652   : > { %12414 = vmatmul.mubr.f32.gmra.mrb[66].mxu1 %v16959_v12  ;;  %21078 = vst [vmem:[#allocation335_spill] sm:$0xff] %v17246_v23  ;;  %v17249_v16 = vpop.permute.xlu0 %5792  ;;  %v17262_v23 = vsel %vm4574_vm1, %v5179_v19, %v5181_v29 }
 0x653   : > { %12416 = vmatprep.mubr.f32.mxu1 %v17033_v21  ;;  %21079 = vst [vmem:[#allocation336_spill] sm:$0xff] %v17249_v16  ;;  %21082 = vst [vmem:[#allocation339_spill] sm:$0xff] %v17262_v23  ;;  %v20381_v16 = vrot.slane %v17170_v45, 7 }
 0x654   : > { %5993 = vrot.lane.b32.xlu1 %v17224_v44, %s20766_s16 }
 0x655   : > { %5896 = vrot.lane.b32.xlu0 %v5854_v14, %s20827_s7  ;;  %v17256_v53 = vpop.permute.xlu1 %5001 }
 0x656   : > { %12417 = vmatmul.mubr.f32.gmra.mrb[68].mxu1 %v17043_v3  ;;  %21080 = vst [vmem:[#allocation337_spill] sm:$0xff] %v17256_v53  ;;  %v17259_v10 = vpop.permute.xlu0 %5884 }
 0x657   : > { %12419 = vmatprep.mubr.f32.mxu1 %v17061_v49  ;;  %21081 = vst [vmem:[#allocation338_spill] sm:$0xff] %v17259_v10 }
 0x658   : > { %6040 = vrot.lane.b32.xlu1 %v17262_v23, %s20767_s24 }
 0x659   : > { %5668 = vrot.lane.b32.xlu0 %v5128_v40, %s20784_s15  ;;  %v17268_v44 = vpop.permute.xlu1 %5203  ;;  %v5646_v40 = vrot.slane %v21067_v60, 1 }
 0x65a   : > { %12420 = vmatmul.mubr.f32.gmra.mrb[70].mxu1 %v17076_v24  ;;  %21083 = vst [vmem:[#allocation340_spill] sm:$0xff] %v17268_v44  ;;  %v17272_v53 = vpop.permute.xlu0 %6093 }
 0x65b   : > { %12422 = vmatprep.mubr.f32.mxu1 %v17089_v31  ;;  %21084 = vst [vmem:[#allocation341_spill] sm:$0xff] %v17272_v53  ;;  %v21087_v53 = vrot.slane %v16877_v4, 7 }
 0x65c   : > { %5898 = vrot.lane.b32.xlu1 %v20381_v16, %s20827_s7 }
 0x65d   : > { %5715 = vrot.lane.b32.xlu0 %v5181_v29, %s20788_s22  ;;  %v17279_v19 = vpop.permute.xlu1 %5003  ;;  %v5855_v15 = vsel %vm5739_vm9, %v21087_v53, %v5854_v14  ;;  %v17293_v29 = vcombine.low %v21055_v54, %v17129_v55 }
 0x65e   : > { %12423 = vmatmul.mubr.f32.gmra.mrb[72].mxu1 %v17106_v9  ;;  %21085 = vst [vmem:[#allocation342_spill] sm:$0xff] %v17279_v19  ;;  %v17283_v44 = vpop.permute.xlu0 %5882  ;;  %v17298_v19 = vrot.slane %v21067_v60, 2  ;;  %v21098_v60 = vld [vmem:[#allocation13_spill] sm:$0xff] }
 0x65f   : > { %12425 = vmatprep.mubr.f32.mxu1 %v17125_v61  ;;  %21086 = vst [vmem:[#allocation343_spill] sm:$0xff] %v17283_v44  ;;  %v5759_v14 = vrot.slane %v17293_v29, 7 }
 0x660   : > { %6001 = vrot.lane.b32.xlu1 %v5646_v40, %s20766_s16 }
 0x661   : > { %5894 = vrot.lane.b32.xlu0 %v5855_v15, %s20827_s7  ;;  %v17295_v16 = vpop.permute.xlu1 %5205  ;;  %v17307_v15 = vsel %vm20433_vm7, %v5125_v1, %v5126_v33 }
 0x662   : > { %12426 = vmatmul.mubr.f32.gmra.mrb[74].mxu1 %v17151_v5  ;;  %21088 = vst [vmem:[#allocation344_spill] sm:$0xff] %v17295_v16  ;;  %v17302_v10 = vpop.permute.xlu0 %4554  ;;  %v5760_v16 = vsel %vm5739_vm9, %v17050_v56, %v5759_v14 }
 0x663   : > { %12430 = vmatprep.mubr.f32.mxu1 %v16862_v41  ;;  %21089 = vst [vmem:[#allocation345_spill] sm:$0xff] %v17302_v10 }
 0x664   : > { %6048 = vrot.lane.b32.xlu1 %v17298_v19, %s20767_s24 }
 0x665   : > { %5664 = vrot.lane.b32.xlu0 %v17307_v15, %s20784_s15  ;;  %v17312_v54 = vpop.permute.xlu1 %5942 }
 0x666   : > { %12431 = vmatmul.mubr.f32.vlgmr.msra.gmra.mrb[60].mxu1 %v16850_v27  ;;  %21090 = vst [vmem:[#allocation346_spill] sm:$0xff] %v17312_v54  ;;  %v17317_v53 = vpop.permute.xlu0 %4643 }
 0x667   : > { %12433 = vmatprep.mubr.f32.mxu1 %v16911_v37  ;;  %12455 = vmatpush3.msra.mxu1 %v16828_v36  ;;  %21091 = vst [vmem:[#allocation347_spill] sm:$0xff] %v17317_v53 }
 0x668   : > { %12480 = vmatprep.subr.mxu1 %v17166_v8  ;;  %6109 = vrot.lane.b32.xlu1 %v5759_v14, %s20768_s21 }
 0x669   : > { %5713 = vrot.lane.b32.xlu0 %v17262_v23, %s20788_s22  ;;  %v17324_v1 = vpop.permute.xlu1 %5101 }
 0x66a   : > { %12434 = vmatmul.mubr.f32.gmra.mrb[62].mxu1 %v16936_v47  ;;  %21092 = vst [vmem:[#allocation348_spill] sm:$0xff] %v17324_v1  ;;  %v17327_v33 = vpop.permute.xlu0 %4895  ;;  %v21097_v1 = vld [vmem:[#allocation31_spill] sm:$0xff] }
 0x66b   : > { %12436 = vmatprep.mubr.f32.mxu1 %v16939_v63  ;;  %21093 = vst [vmem:[#allocation349_spill] sm:$0xff] %v17327_v33  ;;  %v17350_v53 = vcombine.low %v21098_v60, %v21097_v1  ;;  %v21103_v60 = vld [vmem:[#allocation38_spill] sm:$0xff]  ;;  %v5690_v33 = vrot.slane %v17170_v45, 2 }
 0x66c   : > { %6107 = vrot.lane.b32.xlu1 %v5760_v16, %s20768_s21 }
 0x66d   : > { %5991 = vrot.lane.b32.xlu0 %v17307_v15, %s20766_s16  ;;  %v17335_v54 = vpop.permute.xlu1 %5356  ;;  %21099 = vst [vmem:[#allocation31_spill] sm:$0xff] %v17350_v53 }
 0x66e   : > { %12437 = vmatmul.mubr.f32.gmra.mrb[64].mxu1 %v16949_v22  ;;  %21094 = vst [vmem:[#allocation350_spill] sm:$0xff] %v17335_v54  ;;  %v17338_v23 = vpop.permute.xlu0 %4948 }
 0x66f   : > { %12439 = vmatprep.mubr.f32.mxu1 %v16978_v26  ;;  %21095 = vst [vmem:[#allocation351_spill] sm:$0xff] %v17338_v23  ;;  %v20386_v23 = vrot.slane %v17350_v53, 1 }
 0x670   : > { %5806 = vrot.lane.b32.xlu1 %v15781_v20, %s20789_s17 }
 0x671   : > { %6038 = vrot.lane.b32.xlu0 %v17239_v0, %s20767_s24  ;;  %v17345_v56 = vpop.permute.xlu1 %5886 }
 0x672   : > { %12440 = vmatmul.mubr.f32.gmra.mrb[66].mxu1 %v16981_v30  ;;  %21096 = vst [vmem:[#allocation352_spill] sm:$0xff] %v17345_v56  ;;  %v17352_v54 = vpop.permute.xlu0 %5790 }
 0x673   : > { %12442 = vmatprep.mubr.f32.mxu1 %v17053_v52  ;;  %21100 = vst [vmem:[#allocation13_spill] sm:$0xff] %v17352_v54 }
 0x674   : > { %5956 = vrot.lane.b32.xlu1 %v15776_v42, %s20802_s1 }
 0x675   : > { %5674 = vrot.lane.b32.xlu0 %v5646_v40, %s20784_s15  ;;  %v17358_v10 = vpop.permute.xlu1 %5794 }
 0x676   : > { %12443 = vmatmul.mubr.f32.gmra.mrb[68].mxu1 %v17059_v39  ;;  %21101 = vst [vmem:[#allocation353_spill] sm:$0xff] %v17358_v10  ;;  %v17361_v56 = vpop.permute.xlu0 %4732  ;;  %v5691_v10 = vrot.slane %v17350_v53, 2 }
 0x677   : > { %12445 = vmatprep.mubr.f32.mxu1 %v17074_v48  ;;  %21102 = vst [vmem:[#allocation354_spill] sm:$0xff] %v17361_v56  ;;  %v5647_v56 = vsel %vm20433_vm7, %v20386_v23, %v5646_v40 }
 0x678   : > { %6115 = vrot.lane.b32.xlu1 %v21103_v60, %s20768_s21 }
 0x679   : > { %5721 = vrot.lane.b32.xlu0 %v17298_v19, %s20788_s22  ;;  %v17369_v1 = vpop.permute.xlu1 %5989 }
 0x67a   : > { %12446 = vmatmul.mubr.f32.gmra.mrb[70].mxu1 %v17099_v7  ;;  %21104 = vst [vmem:[#allocation38_spill] sm:$0xff] %v17369_v1  ;;  %v17372_v54 = vpop.permute.xlu0 %5150 }
 0x67b   : > { %12448 = vmatprep.mubr.f32.mxu1 %v17104_v18  ;;  %21105 = vst [vmem:[#allocation355_spill] sm:$0xff] %v17372_v54  ;;  %v17388_v54 = vsel %vm4574_vm1, %v5690_v33, %v5691_v10  ;;  %v21110_v33 = vand.u32 4294901760, %v16850_v27  ;;  %v21113_v27 = vand.u32 4294901760, %v16936_v47  ;;  %v21118_v47 = vand.u32 4294901760, %v16978_v26 }
 0x67c   : > { %5672 = vrot.lane.b32.xlu1 %v5647_v56, %s20784_s15 }
 0x67d   : > { %5804 = vrot.lane.b32.xlu0 %v5759_v14, %s20789_s17  ;;  %v17382_v44 = vpop.permute.xlu1 %6036  ;;  %v21108_v14 = vand.u32 4294901760, %v16862_v41  ;;  %v5694_v41 = vsel %vm4574_vm1, %v5691_v10, %v17298_v19  ;;  %v21117_v10 = vand.u32 4294901760, %v16949_v22 }
 0x67e   : > { %12449 = vmatmul.mubr.f32.gmra.mrb[72].mxu1 %v17123_v38  ;;  %21106 = vst [vmem:[#allocation356_spill] sm:$0xff] %v17382_v44  ;;  %v17385_v1 = vpop.permute.xlu0 %5152 }
 0x67f   : > { %12451 = vmatprep.mubr.f32.mxu1 %v17146_v34  ;;  %21107 = vst [vmem:[#allocation357_spill] sm:$0xff] %v17385_v1 }
 0x680   : > { %5717 = vrot.lane.b32.xlu1 %v17388_v54, %s20788_s22 }
 0x681   : > { %5802 = vrot.lane.b32.xlu0 %v5760_v16, %s20789_s17  ;;  %v17394_v40 = vpop.permute.xlu1 %5660  ;;  %v21111_v16 = vand.u32 4294901760, %v16911_v37  ;;  %v21114_v37 = vand.u32 4294901760, %v16939_v63  ;;  %v5857_v63 = vrot.slane %v17350_v53, 7 }
 0x682   : > { %12452 = vmatmul.mubr.f32.gmra.mrb[74].mxu1 %v17164_v51  ;;  %v17398_v23 = vpop.permute.xlu0 %5256 }
 0x683   : > { %12456 = vmatprep.mubr.f32.mxu1 %v21108_v14  ;;  %21109 = vst [vmem:[#allocation358_spill] sm:$0xff] %v17398_v23  ;;  %v21116_v14 = vld [vmem:[#allocation40_spill] sm:$0xff]  ;;  %v21151_v23 = vld [vmem:[#allocation129_spill] sm:$0xff] }
 0x684   : > { %5999 = vrot.lane.b32.xlu1 %v5647_v56, %s20766_s16 }
 0x685   : > { %5952 = vrot.lane.b32.xlu0 %v17350_v53, %s20802_s1  ;;  %v17405_v1 = vpop.permute.xlu1 %4901 }
 0x686   : > { %12457 = vmatmul.mubr.f32.vlgmr.msra.gmra.mrb[60].mxu1 %v21110_v33  ;;  %v17410_v44 = vpop.permute.xlu0 %5258  ;;  %v21119_v33 = vrot.slane %v15753_v17, 1 }
 0x687   : > { %12459 = vmatprep.mubr.f32.mxu1 %v21111_v16  ;;  %12481 = vmatpush3.msra.mxu1 %v17166_v8  ;;  %21112 = vst [vmem:[#allocation359_spill] sm:$0xff] %v17410_v44  ;;  %v21120_v16 = vand.u32 4294901760, %v16981_v30  ;;  %v21126_v30 = vand.u32 4294901760, %v17074_v48  ;;  %v21130_v48 = vand.u32 4294901760, %v17104_v18  ;;  %v21134_v18 = vand.u32 4294901760, %v17146_v34  ;;  %v21138_v34 = vld [vmem:[#allocation48_spill] sm:$0xff] }
 0x688   : > { %12506 = vmatprep.subr.mxu1 %v16828_v36  ;;  %6046 = vrot.lane.b32.xlu1 %v5694_v41, %s20767_s24  ;;  %v21154_v44 = vld [vmem:[#allocation21_spill] sm:$0xff] }
 0x689   : > { %6111 = vrot.lane.b32.xlu0 %v15781_v20, %s20768_s21  ;;  %v17420_v56 = vpop.permute.xlu1 %5705 }
 0x68a   : > { %12460 = vmatmul.mubr.f32.gmra.mrb[62].mxu1 %v21113_v27  ;;  %v17424_v8 = vpop.permute.xlu0 %5103  ;;  %v21122_v27 = vand.u32 4294901760, %v17053_v52  ;;  %v21127_v52 = vrot.slane %v17170_v45, 7 }
 0x68b   : > { %12462 = vmatprep.mubr.f32.mxu1 %v21114_v37  ;;  %21115 = vst [vmem:[#allocation360_spill] sm:$0xff] %v17424_v8  ;;  %v21123_v37 = vrot.slane %v15776_v42, 7 }
 0x68c   : > { %6113 = vrot.lane.b32.xlu1 %v21116_v14, %s20768_s21 }
 0x68d   : > { %5960 = vrot.lane.b32.xlu0 %v15753_v17, %s20802_s1  ;;  %v17432_v20 = vpop.permute.xlu1 %4954 }
 0x68e   : > { %12463 = vmatmul.mubr.f32.gmra.mrb[64].mxu1 %v21117_v10  ;;  %v17436_v19 = vpop.permute.xlu0 %4846  ;;  %v21124_v10 = vand.u32 4294901760, %v17059_v39 }
 0x68f   : > { %12465 = vmatprep.mubr.f32.mxu1 %v21118_v47 }
 0x690   : > { %6007 = vrot.lane.b32.xlu1 %v21119_v33, %s20766_s16 }
 0x691   : > { %5902 = vrot.lane.b32.xlu0 %v5857_v63, %s20827_s7  ;;  %v17445_v22 = vpop.permute.xlu1 %5154 }
 0x692   : > { %12466 = vmatmul.mubr.f32.gmra.mrb[66].mxu1 %v21120_v16  ;;  %21121 = vst [vmem:[#allocation40_spill] sm:$0xff] %v17445_v22  ;;  %v17449_v26 = vpop.permute.xlu0 %5890  ;;  %v5858_v16 = vsel %vm5739_vm9, %v21127_v52, %v5857_v63  ;;  %v21152_v22 = vld [vmem:[#allocation27_spill] sm:$0xff]  ;;  %vm5603_vm9 = vcmask 457728  }
 0x693   : > { %12468 = vmatprep.mubr.f32.mxu1 %v21122_v27  ;;  %v5643_v27 = vrot.slane %v17170_v45, 1 }
 0x694   : > { %5904 = vrot.lane.b32.xlu1 %v21123_v37, %s20827_s7 }
 0x695   : > { %5810 = vrot.lane.b32.xlu0 %v21103_v60, %s20789_s17  ;;  %v17458_v47 = vpop.permute.xlu1 %5944  ;;  %v21128_v60 = vand.u32 4294901760, %v17099_v7  ;;  %v5976_v7 = vrot.slane %v15776_v42, 1 }
 0x696   : > { %12469 = vmatmul.mubr.f32.gmra.mrb[68].mxu1 %v21124_v10  ;;  %21125 = vst [vmem:[#allocation361_spill] sm:$0xff] %v17458_v47  ;;  %v17462_v33 = vpop.permute.xlu0 %5662  ;;  %v21132_v10 = vand.u32 4294901760, %v17123_v38 }
 0x697   : > { %12471 = vmatprep.mubr.f32.mxu1 %v21126_v30 }
 0x698   : > { %6121 = vrot.lane.b32.xlu1 %v15789_v59, %s20768_s21  ;;  %v21131_v59 = vrot.slane %v17350_v53, 1  ;;  %v6147_v53 = vsel %vm20435_vm3, %v21152_v22, %v21151_v23 }
 0x699   : > { %5900 = vrot.lane.b32.xlu0 %v5858_v16, %s20827_s7  ;;  %v17472_v39 = vpop.permute.xlu1 %6103 }
 0x69a   : > { %12472 = vmatmul.mubr.f32.gmra.mrb[70].mxu1 %v21128_v60  ;;  %21129 = vst [vmem:[#allocation362_spill] sm:$0xff] %v17472_v39  ;;  %v17477_v37 = vpop.permute.xlu0 %5709  ;;  %v5645_v63 = vsel %vm20433_vm7, %v5643_v27, %v21131_v59  ;;  %v21136_v60 = vand.u32 4294901760, %v17164_v51 }
 0x69b   : > { %12474 = vmatprep.mubr.f32.mxu1 %v21130_v48 }
 0x69c   : > { %6117 = vrot.lane.b32.xlu1 %v15791_v58, %s20768_s21  ;;  %v21135_v58 = vrot.slane %v15681_v46, 1 }
 0x69d   : > { %5670 = vrot.lane.b32.xlu0 %v5645_v63, %s20784_s15  ;;  %v17488_v30 = vpop.permute.xlu1 %6101 }
 0x69e   : > { %12475 = vmatmul.mubr.f32.gmra.mrb[72].mxu1 %v21132_v10  ;;  %21133 = vst [vmem:[#allocation363_spill] sm:$0xff] %v17488_v30  ;;  %v17492_v52 = vpop.permute.xlu0 %6099  ;;  %v5978_v16 = vsel %vm20433_vm7, %v5976_v7, %v21135_v58  ;;  %v21140_v7 = vld [vmem:[#allocation10_spill] sm:$0xff] }
 0x69f   : > { %12477 = vmatprep.mubr.f32.mxu1 %v21134_v18  ;;  %v21142_v18 = vrot.slane %v15753_v17, 2 }
 0x6a0   : > { %6003 = vrot.lane.b32.xlu1 %v5978_v16, %s20766_s16 }
 0x6a1   : > { %5719 = vrot.lane.b32.xlu0 %v5694_v41, %s20788_s22  ;;  %v17501_v38 = vpop.permute.xlu1 %5800 }
 0x6a2   : > { %12478 = vmatmul.mubr.f32.gmra.mrb[74].mxu1 %v21136_v60  ;;  %21137 = vst [vmem:[#allocation364_spill] sm:$0xff] %v17501_v38  ;;  %v21145_v60 = vrot.slane %v15681_v46, 7  ;;  %v17601_v38 = vld [vmem:[%s20045_s8 + $0x8] sm:$0xff] }
 0x6a3   : > { %12482 = vmatprep.mubr.f32.mxu1 %v16841_v50  ;;  %v17504_v27 = vpop.permute.xlu0 %5888  ;;  %21156 = vst [vmem:[#allocation27_spill] sm:$0xff] %v17601_v38 }
 0x6a4   : > { %6052 = vrot.lane.b32.xlu1 %v21138_v34, %s20767_s24 }
 0x6a5   : > { %5997 = vrot.lane.b32.xlu0 %v5645_v63, %s20766_s16  ;;  %v20387_v63 = vrot.slane %v16657_v62, 3 }
 0x6a6   : > { %12483 = vmatmul.mubr.f32.vlgmr.msra.gmra.mrb[60].mxu1 %v16831_v32  ;;  %v17510_v48 = vpop.permute.xlu1 %5892 }
 0x6a7   : > { %12485 = vmatprep.mubr.f32.mxu1 %v16898_v35  ;;  %12507 = vmatpush3.msra.mxu1 %v16828_v36  ;;  %v17514_v51 = vpop.permute.xlu0 %5658  ;;  %v4975_v36 = vrot.slane %v21140_v7, 3 }
 0x6a8   : > { %5156 = vrot.lane.b32.xlu1 %v16795_v11, %s20801_s0 }
 0x6a9   : > { %5808 = vrot.lane.b32.xlu0 %v21116_v14, %s20789_s17  ;;  %v17541_v10 = vsel %vm4663_vm8, %v20387_v63, %v4975_v36  ;;  %v21147_v36 = vld [vmem:[#allocation52_spill] sm:$0xff]  ;;  %s13708_s17 = smov 64  }
 0x6aa   : > { %12486 = vmatmul.mubr.f32.gmra.mrb[62].mxu1 %v16917_v43  ;;  %v17521_v41 = vpop.permute.xlu1 %5948 }
 0x6ab   : > { %21139 = vst [vmem:[#allocation48_spill] sm:$0xff] %v17521_v41  ;;  %12488 = vmatprep.mubr.f32.mxu1 %v16919_v25  ;;  %v17524_v59 = vpop.permute.xlu0 %4899  ;;  %v21171_v41 = vld [vmem:[#allocation160_spill] sm:$0xff] }
 0x6ac   : > { %5358 = vrot.lane.b32.xlu1 %v16657_v62, %s20780_s19 }
 0x6ad   : > { %6044 = vrot.lane.b32.xlu0 %v17388_v54, %s20767_s24 }
 0x6ae   : > { %12489 = vmatmul.mubr.f32.gmra.mrb[64].mxu1 %v16929_v28  ;;  %v17533_v11 = vpop.permute.xlu1 %5950 }
 0x6af   : > { %21141 = vst [vmem:[#allocation10_spill] sm:$0xff] %v17533_v11  ;;  %12491 = vmatprep.mubr.f32.mxu1 %v16951_v57  ;;  %v17536_v14 = vpop.permute.xlu0 %5707  ;;  %v21153_v11 = vld [vmem:[#allocation164_spill] sm:$0xff] }
 0x6b0   : > { %5007 = vrot.lane.b32.xlu1 %v17541_v10, %s20768_s21  ;;  %v5390_v8 = vsel %vm20435_vm3, %v21154_v44, %v21153_v11  ;;  %v21159_v44 = vld [vmem:[#allocation41_spill] sm:$0xff]  ;;  %v21160_v11 = vld [vmem:[#allocation156_spill] sm:$0xff] }
 0x6b1   : > { %6054 = vrot.lane.b32.xlu0 %v21142_v18, %s20767_s24  ;;  %v21148_v18 = vld [vmem:[#allocation53_spill] sm:$0xff] }
 0x6b2   : > { %12492 = vmatmul.mubr.f32.gmra.mrb[66].mxu1 %v16959_v12  ;;  %v17549_v54 = vpop.permute.xlu1 %5954 }
 0x6b3   : > { %21143 = vst [vmem:[#allocation365_spill] sm:$0xff] %v17549_v54  ;;  %12494 = vmatprep.mubr.f32.mxu1 %v17033_v21  ;;  %v17552_v58 = vpop.permute.xlu0 %4952  ;;  %v21161_v54 = vld [vmem:[#allocation26_spill] sm:$0xff] }
 0x6b4   : > { %5209 = vrot.lane.b32.xlu1 %v16883_v2, %s20807_s2  ;;  %v5391_v45 = vsel %vm20435_vm3, %v21161_v54, %v21160_v11  ;;  %v21166_v54 = vld [vmem:[#allocation45_spill] sm:$0xff] }
 0x6b5   : > { %5958 = vrot.lane.b32.xlu0 %v15681_v46, %s20802_s1  ;;  %v4972_v11 = vrot.slane %v21166_v54, 3 }
 0x6b6   : > { %12495 = vmatmul.mubr.f32.gmra.mrb[68].mxu1 %v17043_v3  ;;  %v17559_v16 = vpop.permute.xlu1 %5995 }
 0x6b7   : > { %21144 = vst [vmem:[#allocation366_spill] sm:$0xff] %v17559_v16  ;;  %12497 = vmatprep.mubr.f32.mxu1 %v17061_v49  ;;  %v17562_v17 = vpop.permute.xlu0 %5798 }
 0x6b8   : > { %5105 = vrot.lane.b32.xlu1 %v16877_v4, %s20777_s18 }
 0x6b9   : > { %5908 = vrot.lane.b32.xlu0 %v21145_v60, %s20827_s7 }
 0x6ba   : > { %12498 = vmatmul.mubr.f32.gmra.mrb[70].mxu1 %v17076_v24  ;;  %v17570_v2 = vpop.permute.xlu1 %6042 }
 0x6bb   : > { %21146 = vst [vmem:[#allocation367_spill] sm:$0xff] %v17570_v2  ;;  %12500 = vmatprep.mubr.f32.mxu1 %v17089_v31  ;;  %v17573_v34 = vpop.permute.xlu0 %5796  ;;  %v6023_v2 = vrot.slane %v15776_v42, 2  ;;  %v21168_v42 = vand.u32 4294901760, %v17601_v38 }
 0x6bc   : > { %5310 = vrot.lane.b32.xlu1 %v21147_v36, %s20824_s6 }
 0x6bd   : > { %5906 = vrot.lane.b32.xlu0 %v21148_v18, %s20827_s7  ;;  %v17596_v18 = vld [vmem:[%s20045_s8] sm:$0xff] }
 0x6be   : > { %12501 = vmatmul.mubr.f32.gmra.mrb[72].mxu1 %v17106_v9  ;;  %v17580_v63 = vpop.permute.xlu1 %5666  ;;  %21155 = vst [vmem:[#allocation129_spill] sm:$0xff] %v17596_v18 }
 0x6bf   : > { %21149 = vst [vmem:[#allocation52_spill] sm:$0xff] %v17580_v63  ;;  %12503 = vmatprep.mubr.f32.mxu1 %v17125_v61  ;;  %v17583_v60 = vpop.permute.xlu0 %6105  ;;  %v21157_v63 = vld [vmem:[#allocation166_spill] sm:$0xff] }
 0x6c0   : > { %21150 = vst [vmem:[#allocation53_spill] sm:$0xff] %v17583_v60  ;;  %5158 = vrot.lane.b32.xlu1 %v17307_v15, %s20801_s0  ;;  %v17605_v23 = vsel %vm20434_vm0, %v5390_v8, %v21157_v63  ;;  %v5231_v8 = vrot.slane %v16877_v4, 3  ;;  %v21165_v15 = vld [vmem:[#allocation128_spill] sm:$0xff]  ;;  %v21170_v63 = vld [vmem:[#allocation159_spill] sm:$0xff] }
 0x6c1   : > { %21158 = vst [vmem:[#allocation164_spill] sm:$0xff] %v17605_v23  ;;  %6005 = vrot.lane.b32.xlu0 %v21159_v44, %s20766_s16  ;;  %v21163_v44 = vld [vmem:[#allocation158_spill] sm:$0xff]  ;;  %v6161_v22 = vsel %vm20434_vm0, %v6147_v53, %v21165_v15  ;;  %v21173_v15 = vrot.slane %v15681_v46, 2 }
 0x6c2   : > { %12504 = vmatmul.mubr.f32.gmra.mrb[74].mxu1 %v17151_v5  ;;  %v17615_v60 = vpop.permute.xlu1 %5711  ;;  %v17623_v16 = vsel %vm20434_vm0, %v5391_v45, %v21163_v44  ;;  %v21172_v44 = vld [vmem:[#allocation161_spill] sm:$0xff] }
 0x6c3   : > { %21162 = vst [vmem:[#allocation21_spill] sm:$0xff] %v17615_v60  ;;  %12508 = vmatprep.mubr.f32.mxu1 %v16841_v50  ;;  %21164 = vst [vmem:[#allocation166_spill] sm:$0xff] %v17623_v16  ;;  %v17627_v39 = vpop.permute.xlu0 %5946  ;;  %v21167_v60 = vand.u32 4294901760, %v17596_v18  ;;  %v6177_v50 = vsel %vm5416_vm10, %v6161_v22, %v21170_v63  ;;  %v6176_v45 = vsel %vm5416_vm10, %v17623_v16, %v21171_v41  ;;  %v17657_v41 = vld [vmem:[%s20045_s8 + $0x18] sm:$0xff]  ;;  %v21176_v22 = vld [vmem:[#allocation188_spill] sm:$0xff] }
 0x6c4   : > { %v6175_v53 = vsel %vm5416_vm10, %v17605_v23, %v21172_v44  ;;  %5360 = vrot.lane.b32.xlu1 %v16877_v4, %s20780_s19  ;;  %v6025_v38 = vsel %vm4574_vm1, %v6023_v2, %v21173_v15  ;;  %21175 = vst [vmem:[#allocation26_spill] sm:$0xff] %v17657_v41  ;;  %v6201_v63 = vsel %vm5433_vm11, %v6177_v50, %v21176_v22  ;;  %v21178_v15 = vld [vmem:[#allocation200_spill] sm:$0xff]  ;;  %v21179_v16 = vld [vmem:[#allocation119_spill] sm:$0xff]  ;;  %v21181_v50 = vld [vmem:[#allocation205_spill] sm:$0xff]  ;;  %vm5518_vm1 = vcmask 293888  }
 0x6c5   : > { %v17634_v47 = vpack.c.bf16 %v21168_v42, %v21167_v60  ;;  %v17652_v60 = vld [vmem:[%s20045_s8 + $0x10] sm:$0xff]  ;;  %6050 = vrot.lane.b32.xlu0 %v6025_v38, %s20767_s24  ;;  %v5392_v23 = vsel %vm20435_vm3, %v21179_v16, %v21178_v15  ;;  %v21180_v18 = vld [vmem:[#allocation203_spill] sm:$0xff]  ;;  %v21186_v16 = vrot.slane %v21072_v13, 3  ;;  %v21189_v15 = vld [vmem:[#allocation180_spill] sm:$0xff]  ;;  %s10744_s24 = sshll.u32 %s21716_s26, 1 }
 0x6c6   : > { %21174 = vst [vmem:[#allocation156_spill] sm:$0xff] %v17652_v60  ;;  %v21177_v42 = vld [vmem:[#allocation190_spill] sm:$0xff]  ;;  %12509 = vmatmul.mubr.f32.vlgmr.msra.gmra.mrb[60].mxu1 %v16831_v32  ;;  %v20399_v46 = vand.u32 4294901760, %v17652_v60  ;;  %v6200_v4 = vsel %vm5433_vm11, %v6176_v45, %v21180_v18  ;;  %v21182_v22 = vld [vmem:[#allocation107_spill] sm:$0xff]  ;;  %v21187_v45 = vand.u32 4294901760, %v17657_v41  ;;  %v21206_v60 = vld [vmem:[#allocation204_spill] sm:$0xff]  ;;  %s492_s1 = sadd.s32 %s10744_s24, %s21718_s25 }
 0x6c7   : > { %21169 = vst [vmem:[#allocation41_spill] sm:$0xff] %v17634_v47  ;;  %v6199_v44 = vsel %vm5433_vm11, %v6175_v53, %v21177_v42  ;;  %v5393_v53 = vsel %vm20435_vm3, %v21182_v22, %v21181_v50  ;;  %v17675_v42 = vpop.permute.xlu1 %5993  ;;  %12511 = vmatprep.mubr.f32.mxu1 %v16898_v35  ;;  %12689 = vmatprep.subr.bf16.mxu0 %v17634_v47  ;;  %v21184_v32 = vld [vmem:[#allocation207_spill] sm:$0xff]  ;;  %v17683_v2 = vpop.permute.xlu0 %5896  ;;  %v21190_v22 = vld [vmem:[#allocation193_spill] sm:$0xff]  ;;  %v21196_v41 = vld [vmem:[#allocation202_spill] sm:$0xff]  ;;  %s10745_s7 = sshll.u32 %s492_s1, 3 }
 0x6c8   : > { %21183 = vst [vmem:[#allocation158_spill] sm:$0xff] %v17675_v42  ;;  %v17681_v38 = vsel %vm20434_vm0, %v5392_v23, %v21184_v32  ;;  %v5233_v18 = vsel %vm4663_vm8, %v5231_v8, %v21186_v16  ;;  %12691 = vmatpush3.bf16.msra.mxu0 %v17634_v47  ;;  %v17693_v35 = vpack.c.bf16 %v21187_v45, %v20399_v46  ;;  %v21191_v23 = vld [vmem:[#allocation59_spill] sm:$0xff]  ;;  %v21192_v42 = vld [vmem:[#allocation182_spill] sm:$0xff]  ;;  %v21193_v8 = vrot.slane %v16657_v62, 3  ;;  %s494_s14 = scalar_lea.vmem %s20050_s13, %s10745_s7 }
 0x6c9   : > { %21185 = vst [vmem:[#allocation128_spill] sm:$0xff] %v17681_v38  ;;  %v6223_v50 = vsel %vm5450_vm12, %v6199_v44, %v21189_v15  ;;  %v6148_v32 = vsel %vm20435_vm3, %v21191_v23, %v21190_v22  ;;  %v6225_v30 = vsel %vm5450_vm12, %v6201_v63, %v21192_v42  ;;  %5211 = vrot.lane.b32.xlu1 %v17239_v0, %s20807_s2  ;;  %v21194_v45 = vld [vmem:[#allocation194_spill] sm:$0xff]  ;;  %v21195_v44 = vld [vmem:[#allocation168_spill] sm:$0xff]  ;;  %v21199_v0 = vld [vmem:[#allocation195_spill] sm:$0xff] }
 0x6ca   : > { %21188 = vst [vmem:[#allocation45_spill] sm:$0xff] %v17693_v35  ;;  %v17707_v16 = vsel %vm4663_vm8, %v4972_v11, %v21193_v8  ;;  %v6249_v46 = vsel %vm5467_vm13, %v6225_v30, %v21194_v45  ;;  %v6224_v47 = vsel %vm5450_vm12, %v6200_v4, %v21195_v44  ;;  %v17715_v22 = vsel %vm20434_vm0, %v5393_v53, %v21196_v41  ;;  %v21198_v63 = vld [vmem:[#allocation50_spill] sm:$0xff]  ;;  %v21200_v42 = vld [vmem:[#allocation192_spill] sm:$0xff]  ;;  %v21201_v30 = vld [vmem:[#allocation235_spill] sm:$0xff] }
 0x6cb   : > { %21197 = vst [vmem:[#allocation159_spill] sm:$0xff] %v17715_v22  ;;  %6119 = vrot.lane.b32.xlu0 %v21198_v63, %s20768_s21  ;;  %12512 = vmatmul.mubr.f32.gmra.mrb[62].mxu1 %v16917_v43  ;;  %v6162_v11 = vsel %vm20434_vm0, %v6148_v32, %v21199_v0  ;;  %v6178_v23 = vsel %vm5416_vm10, %v17681_v38, %v21200_v42  ;;  %v17728_v8 = vpop.permute.xlu1 %6040  ;;  %v5234_v41 = vrot.slane %v17129_v55, 3  ;;  %v17736_v43 = vld [vmem:[%s20045_s8 + $0x20] sm:$0xff]  ;;  %v17741_v53 = vld [vmem:[%s20045_s8 + $0x28] sm:$0xff]  ;;  %v21205_v63 = vld [vmem:[#allocation255_spill] sm:$0xff]  ;;  %v17747_v42 = vpop.permute.xlu0 %5668 }
 0x6cc   : > { %v6179_v4 = vsel %vm5416_vm10, %v17715_v22, %v21201_v30  ;;  %12514 = vmatprep.mubr.f32.mxu1 %v16919_v25  ;;  %12693 = vmatprep.subr.bf16.mxu0 %v17693_v35  ;;  %21202 = vst [vmem:[#allocation160_spill] sm:$0xff] %v17736_v43  ;;  %21203 = vst [vmem:[#allocation161_spill] sm:$0xff] %v17741_v53  ;;  %v21204_v32 = vld [vmem:[#allocation209_spill] sm:$0xff]  ;;  %v6248_v38 = vsel %vm5467_vm13, %v6224_v47, %v21206_v60  ;;  %v21207_v22 = vld [vmem:[#allocation211_spill] sm:$0xff]  ;;  %v21213_v47 = vand.u32 4294901760, %v17736_v43 }
 0x6cd   : > { %v6247_v45 = vsel %vm5467_vm13, %v6223_v50, %v21204_v32  ;;  %v6203_v0 = vsel %vm5433_vm11, %v6179_v4, %v21205_v63  ;;  %12695 = vmatpush3.bf16.msra.mxu0 %v17693_v35  ;;  %v21208_v15 = vld [vmem:[#allocation228_spill] sm:$0xff]  ;;  %v21209_v32 = vld [vmem:[#allocation229_spill] sm:$0xff]  ;;  %5264 = vrot.lane.b32.xlu1 %v5233_v18, %s20817_s3  ;;  %v21212_v30 = vld [vmem:[#allocation162_spill] sm:$0xff] }
 0x6ce   : > { %v6271_v44 = vsel %vm5484_vm14, %v6247_v45, %v21207_v22  ;;  %v6180_v50 = vsel %vm5416_vm10, %v6162_v11, %v21208_v15  ;;  %v6202_v4 = vsel %vm5433_vm11, %v6178_v23, %v21209_v32  ;;  %v21210_v63 = vld [vmem:[#allocation245_spill] sm:$0xff]  ;;  %v21214_v15 = vand.u32 4294901760, %v17741_v53  ;;  %v21216_v18 = vld [vmem:[#allocation196_spill] sm:$0xff]  ;;  %v21217_v32 = vld [vmem:[#allocation206_spill] sm:$0xff] }
 0x6cf   : > { %v6204_v25 = vsel %vm5433_vm11, %v6180_v50, %v21210_v63  ;;  %v21211_v35 = vld [vmem:[#allocation257_spill] sm:$0xff]  ;;  %5005 = vrot.lane.b32.xlu0 %v17707_v16, %s20768_s21  ;;  %12515 = vmatmul.mubr.f32.gmra.mrb[64].mxu1 %v16929_v28  ;;  %v6273_v23 = vsel %vm5484_vm14, %v6249_v46, %v21216_v18  ;;  %v6272_v45 = vsel %vm5484_vm14, %v6248_v38, %v21217_v32  ;;  %v21218_v50 = vld [vmem:[#allocation232_spill] sm:$0xff]  ;;  %v17785_v28 = vpop.permute.xlu1 %5898  ;;  %v17794_v43 = vpop.permute.xlu0 %5715 }
 0x6d0   : > { %v5394_v55 = vsel %vm20435_vm3, %v21212_v30, %v21211_v35  ;;  %v17773_v11 = vpack.c.bf16 %v21214_v15, %v21213_v47  ;;  %v6227_v35 = vsel %vm5450_vm12, %v6203_v0, %v21218_v50  ;;  %v21219_v30 = vld [vmem:[#allocation259_spill] sm:$0xff]  ;;  %21221 = vst [vmem:[#allocation200_spill] sm:$0xff] %v17785_v28  ;;  %12517 = vmatprep.mubr.f32.mxu1 %v16951_v57  ;;  %v21222_v53 = vld [vmem:[#allocation197_spill] sm:$0xff]  ;;  %v21225_v0 = vrot.slane %v21072_v13, 3  ;;  %v17803_v57 = vld [vmem:[%s20045_s8 + $0x30] sm:$0xff] }
 0x6d1   : > { %v17783_v63 = vsel %vm20434_vm0, %v5394_v55, %v21219_v30  ;;  %v6295_v47 = vsel %vm5501_vm15, %v6271_v44, %v21222_v53  ;;  %v21223_v15 = vld [vmem:[#allocation221_spill] sm:$0xff]  ;;  %21226 = vst [vmem:[#allocation119_spill] sm:$0xff] %v17803_v57  ;;  %v17808_v44 = vld [vmem:[%s20045_s8 + $0x38] sm:$0xff]  ;;  %v21228_v53 = vld [vmem:[#allocation230_spill] sm:$0xff] }
 0x6d2   : > { %21215 = vst [vmem:[#allocation188_spill] sm:$0xff] %v17773_v11  ;;  %21220 = vst [vmem:[#allocation190_spill] sm:$0xff] %v17783_v63  ;;  %v6297_v46 = vsel %vm5501_vm15, %v6273_v23, %v21223_v15  ;;  %v21224_v18 = vld [vmem:[#allocation225_spill] sm:$0xff]  ;;  %v5235_v55 = vsel %vm4663_vm8, %v21225_v0, %v5234_v41  ;;  %12697 = vmatprep.subr.bf16.mxu0 %v17773_v11  ;;  %v6226_v23 = vsel %vm5450_vm12, %v6202_v4, %v21228_v53  ;;  %v21232_v60 = vld [vmem:[#allocation252_spill] sm:$0xff]  ;;  %vm5586_vm8 = vcmask 424960  }
 0x6d3   : > { %v6296_v38 = vsel %vm5501_vm15, %v6272_v45, %v21224_v18  ;;  %21227 = vst [vmem:[#allocation203_spill] sm:$0xff] %v17808_v44  ;;  %v21229_v45 = vld [vmem:[#allocation234_spill] sm:$0xff]  ;;  %5266 = vrot.lane.b32.xlu1 %v5235_v55, %s20817_s3  ;;  %12699 = vmatpush3.bf16.msra.mxu0 %v17773_v11  ;;  %v21230_v18 = vld [vmem:[#allocation227_spill] sm:$0xff]  ;;  %v21231_v50 = vld [vmem:[#allocation261_spill] sm:$0xff]  ;;  %v6251_v4 = vsel %vm5467_vm13, %v6227_v35, %v21232_v60  ;;  %v21238_v35 = vand.u32 4294901760, %v17803_v57 }
 0x6d4   : > { %v6228_v30 = vsel %vm5450_vm12, %v6204_v25, %v21229_v45  ;;  %v6181_v0 = vsel %vm5416_vm10, %v17783_v63, %v21230_v18  ;;  %v6250_v32 = vsel %vm5467_vm13, %v6226_v23, %v21231_v50  ;;  %5207 = vrot.lane.b32.xlu0 %v16839_v6, %s20807_s2  ;;  %12518 = vmatmul.mubr.f32.gmra.mrb[66].mxu1 %v16959_v12  ;;  %v21233_v25 = vld [vmem:[#allocation247_spill] sm:$0xff]  ;;  %v21234_v55 = vld [vmem:[#allocation6_spill] sm:$0xff]  ;;  %v21235_v15 = vld [vmem:[#allocation248_spill] sm:$0xff]  ;;  %v17836_v23 = vpop.permute.xlu1 %6001  ;;  %v21239_v6 = vand.u32 4294901760, %v17808_v44 }
 0x6d5   : > { %v6149_v45 = vsel %vm20435_vm3, %v21234_v55, %v21233_v25  ;;  %v21236_v41 = vld [vmem:[#allocation33_spill] sm:$0xff]  ;;  %v21237_v18 = vld [vmem:[#allocation263_spill] sm:$0xff]  ;;  %12520 = vmatprep.mubr.f32.mxu1 %v17033_v21  ;;  %v6344_v60 = vrot.slane %v6296_v38, 1  ;;  %v21242_v55 = vld [vmem:[#allocation250_spill] sm:$0xff]  ;;  %v6343_v21 = vrot.slane %v6295_v47, 1 }
 0x6d6   : > { %v5395_v11 = vsel %vm20435_vm3, %v21236_v41, %v21235_v15  ;;  %v6274_v63 = vsel %vm5484_vm14, %v6250_v32, %v21237_v18  ;;  %v17843_v12 = vpack.c.bf16 %v21239_v6, %v21238_v35  ;;  %v21241_v50 = vld [vmem:[#allocation249_spill] sm:$0xff]  ;;  %v21243_v15 = vld [vmem:[#allocation242_spill] sm:$0xff]  ;;  %v17853_v18 = vpop.permute.xlu0 %5894  ;;  %v21244_v53 = vld [vmem:[#allocation256_spill] sm:$0xff] }
 0x6d7   : > { %v6163_v25 = vsel %vm20434_vm0, %v6149_v45, %v21241_v50  ;;  %v17849_v41 = vsel %vm20434_vm0, %v5395_v11, %v21242_v55  ;;  %v6252_v32 = vsel %vm5467_vm13, %v6228_v30, %v21243_v15  ;;  %v6205_v57 = vsel %vm5433_vm11, %v6181_v0, %v21244_v53  ;;  %v21245_v44 = vld [vmem:[#allocation254_spill] sm:$0xff]  ;;  %v21246_v38 = vld [vmem:[#allocation284_spill] sm:$0xff]  ;;  %5316 = vrot.lane.b32.xlu1 %v17293_v29, %s20824_s6  ;;  %v21247_v30 = vld [vmem:[#allocation237_spill] sm:$0xff] }
 0x6d8   : > { %21240 = vst [vmem:[#allocation205_spill] sm:$0xff] %v17843_v12  ;;  %v6275_v35 = vsel %vm5484_vm14, %v6251_v4, %v21245_v44  ;;  %v6182_v50 = vsel %vm5416_vm10, %v17849_v41, %v21246_v38  ;;  %12701 = vmatprep.subr.bf16.mxu0 %v17843_v12  ;;  %v6346_v11 = vrot.slane %v6297_v46, 1  ;;  %v17867_v45 = vsel %vm5501_vm15, %v6274_v63, %v21247_v30  ;;  %v21248_v47 = vld [vmem:[#allocation279_spill] sm:$0xff]  ;;  %v21249_v0 = vld [vmem:[#allocation300_spill] sm:$0xff]  ;;  %v17882_v63 = vpop.permute.xlu1 %6048 }
 0x6d9   : > { %v6183_v53 = vsel %vm5416_vm10, %v6163_v25, %v21248_v47  ;;  %v6206_v4 = vsel %vm5433_vm11, %v6182_v50, %v21249_v0  ;;  %5055 = vrot.lane.b32.xlu0 %v21147_v36, %s20774_s20  ;;  %12521 = vmatmul.mubr.f32.gmra.mrb[68].mxu1 %v17043_v3  ;;  %v21250_v6 = vld [vmem:[#allocation276_spill] sm:$0xff]  ;;  %v6345_v3 = vsel %vm20433_vm7, %v6343_v21, %v6344_v60  ;;  %v21254_v50 = vld [vmem:[#allocation265_spill] sm:$0xff]  ;;  %v21255_v30 = vld [vmem:[#allocation15_spill] sm:$0xff] }
 0x6da   : > { %v17878_v29 = vsel %vm5501_vm15, %v6275_v35, %v21250_v6  ;;  %v21251_v46 = vld [vmem:[#allocation292_spill] sm:$0xff]  ;;  %12523 = vmatprep.mubr.f32.mxu1 %v17061_v49  ;;  %12703 = vmatpush3.bf16.msra.mxu0 %v17843_v12  ;;  %v17888_v38 = vpop.permute.xlu0 %5664  ;;  %v6347_v36 = vsel %vm20433_vm7, %v6344_v60, %v6346_v11  ;;  %v6348_v35 = vrot.slane %v17867_v45, 1  ;;  %v6150_v47 = vsel %vm20435_vm3, %v21255_v30, %v21254_v50  ;;  %v21257_v0 = vld [vmem:[#allocation241_spill] sm:$0xff]  ;;  %v21260_v45 = vld [vmem:[#allocation238_spill] sm:$0xff] }
 0x6db   : > { %v6207_v55 = vsel %vm5433_vm11, %v6183_v53, %v21251_v46  ;;  %v21252_v25 = vld [vmem:[#allocation244_spill] sm:$0xff]  ;;  %21253 = vst [vmem:[#allocation107_spill] sm:$0xff] %v17888_v38  ;;  %v21256_v53 = vld [vmem:[#allocation278_spill] sm:$0xff]  ;;  %v6229_v6 = vsel %vm5450_vm12, %v6205_v57, %v21257_v0  ;;  %6383 = vrot.lane.b32.xlu1 %v6345_v3, %s13708_s17  ;;  %v6349_v11 = vrot.slane %v17878_v29, 1  ;;  %v17937_v30 = vld [vmem:[%s20045_s8 + $0x58] sm:$0xff] }
 0x6dc   : > { %v6276_v15 = vsel %vm5484_vm14, %v6252_v32, %v21252_v25  ;;  %v6230_v49 = vsel %vm5450_vm12, %v6206_v4, %v21256_v53  ;;  %v21258_v32 = vld [vmem:[#allocation267_spill] sm:$0xff]  ;;  %v21259_v46 = vld [vmem:[#allocation272_spill] sm:$0xff]  ;;  %v6231_v25 = vsel %vm5450_vm12, %v6207_v55, %v21260_v45  ;;  %v17919_v4 = vld [vmem:[%s20045_s8 + $0x48] sm:$0xff]  ;;  %21266 = vst [vmem:[#allocation182_spill] sm:$0xff] %v17937_v30 }
 0x6dd   : > { %v6164_v21 = vsel %vm20434_vm0, %v6150_v47, %v21258_v32  ;;  %v6300_v60 = vsel %vm5501_vm15, %v6276_v15, %v21259_v46  ;;  %5260 = vrot.lane.b32.xlu0 %v17707_v16, %s20817_s3  ;;  %12524 = vmatmul.mubr.f32.gmra.mrb[70].mxu1 %v17076_v24  ;;  %v17914_v57 = vld [vmem:[%s20045_s8 + $0x40] sm:$0xff]  ;;  %21262 = vst [vmem:[#allocation193_spill] sm:$0xff] %v17919_v4  ;;  %v17924_v29 = vld [vmem:[%s20045_s8 + $0x50] sm:$0xff]  ;;  %v21265_v15 = vld [vmem:[#allocation179_spill] sm:$0xff]  ;;  %v17929_v24 = vpop.permute.xlu1 %6109 }
 0x6de   : > { %21261 = vst [vmem:[#allocation207_spill] sm:$0xff] %v17914_v57  ;;  %21263 = vst [vmem:[#allocation59_spill] sm:$0xff] %v17924_v29  ;;  %v21264_v55 = vld [vmem:[#allocation302_spill] sm:$0xff]  ;;  %12526 = vmatprep.mubr.f32.mxu1 %v17089_v31  ;;  %v21267_v32 = vld [vmem:[#allocation49_spill] sm:$0xff]  ;;  %v17949_v3 = vpop.permute.xlu0 %5713 }
 0x6df   : > { %v5396_v16 = vsel %vm20435_vm3, %v21265_v15, %v21264_v55  ;;  %v21268_v46 = vld [vmem:[#allocation218_spill] sm:$0xff]  ;;  %v21269_v55 = vld [vmem:[#allocation293_spill] sm:$0xff]  ;;  %v21270_v12 = vld [vmem:[#allocation304_spill] sm:$0xff]  ;;  %6385 = vrot.lane.b32.xlu1 %v6347_v36, %s13708_s17  ;;  %v21281_v36 = vand.u32 4294901760, %v17924_v29 }
 0x6e0   : > { %v5397_v45 = vsel %vm20435_vm3, %v21268_v46, %v21267_v32  ;;  %v6254_v15 = vsel %vm5467_vm13, %v6230_v49, %v21269_v55  ;;  %v17947_v31 = vsel %vm20434_vm0, %v5396_v16, %v21270_v12  ;;  %v6460_v0 = vld [vmem:[%s20045_s8 + $0x60] sm:$0xf]  ;;  %v21273_v32 = vld [vmem:[#allocation258_spill] sm:$0xff]  ;;  %v21275_v12 = vand.u32 4294901760, %v17914_v57 }
 0x6e1   : > { %21271 = vst [vmem:[#allocation194_spill] sm:$0xff] %v17947_v31  ;;  %v21272_v47 = vld [vmem:[#allocation44_spill] sm:$0xff]  ;;  %v6255_v46 = vsel %vm5467_vm13, %v6231_v25, %v21273_v32  ;;  %v21274_v49 = vld [vmem:[#allocation306_spill] sm:$0xff]  ;;  %v21276_v16 = vand.u32 4294901760, %v17919_v4  ;;  %v21280_v25 = vld [vmem:[#allocation311_spill] sm:$0xff]  ;;  %12527 = vmatmul.mubr.f32.gmra.mrb[72].mxu1 %v17106_v9  ;;  %v17985_v32 = vsel %vm2482_vm2, %v6460_v0, 0  ;;  %v17994_v9 = vpop.permute.xlu1 %6107 }
 0x6e2   : > { %v17957_v44 = vsel %vm20434_vm0, %v5397_v45, %v21272_v47  ;;  %v6253_v22 = vsel %vm5467_vm13, %v6229_v6, %v21274_v49  ;;  %v21278_v28 = vld [vmem:[#allocation8_spill] sm:$0xff]  ;;  %5057 = vrot.lane.b32.xlu0 %v21280_v25, %s20774_s20  ;;  %v21282_v6 = vand.u32 4294901760, %v17937_v30  ;;  %21284 = vst [vmem:[#allocation195_spill] sm:$0xff] %v17985_v32  ;;  %v21287_v4 = vld [vmem:[#allocation343_spill] sm:$0xff]  ;;  %12529 = vmatprep.mubr.f32.mxu1 %v17125_v61  ;;  %v21292_v61 = vld [vmem:[#allocation338_spill] sm:$0xff]  ;;  %vm5535_vm2 = vcmask 326656  }
 0x6e3   : > { %v17968_v50 = vpack.c.bf16 %v21276_v16, %v21275_v12  ;;  %v6277_v38 = vsel %vm5484_vm14, %v6253_v22, %v21278_v28  ;;  %v21279_v55 = vld [vmem:[#allocation308_spill] sm:$0xff]  ;;  %v21285_v12 = vld [vmem:[#allocation295_spill] sm:$0xff]  ;;  %v21286_v16 = vld [vmem:[#allocation25_spill] sm:$0xff]  ;;  %v18004_v28 = vpop.permute.xlu0 %5991 }
 0x6e4   : > { %v6185_v47 = vsel %vm5416_vm10, %v17957_v44, %v21279_v55  ;;  %v17982_v45 = vpack.c.bf16 %v21282_v6, %v21281_v36  ;;  %v6278_v22 = vsel %vm5484_vm14, %v6254_v15, %v21285_v12  ;;  %v6184_v55 = vsel %vm5416_vm10, %v17947_v31, %v21286_v16  ;;  %v21288_v36 = vld [vmem:[#allocation260_spill] sm:$0xff]  ;;  %v21289_v6 = vld [vmem:[#allocation294_spill] sm:$0xff] }
 0x6e5   : > { %21277 = vst [vmem:[#allocation202_spill] sm:$0xff] %v17968_v50  ;;  %v6209_v57 = vsel %vm5433_vm11, %v6185_v47, %v21287_v4  ;;  %12705 = vmatprep.subr.bf16.mxu0 %v17968_v50  ;;  %v6279_v0 = vsel %vm5484_vm14, %v6255_v46, %v21288_v36  ;;  %v6186_v30 = vsel %vm5416_vm10, %v6164_v21, %v21289_v6  ;;  %v21290_v15 = vld [vmem:[#allocation312_spill] sm:$0xff]  ;;  %v6351_v4 = vrot.slane %v6300_v60, 1  ;;  %v21291_v47 = vld [vmem:[#allocation286_spill] sm:$0xff]  ;;  %v18026_v36 = vpop.permute.xlu1 %5806 }
 0x6e6   : > { %21283 = vst [vmem:[#allocation50_spill] sm:$0xff] %v17982_v45  ;;  %v6208_v29 = vsel %vm5433_vm11, %v6184_v55, %v21290_v15  ;;  %v6350_v16 = vsel %vm20433_vm7, %v6348_v35, %v6349_v11  ;;  %12707 = vmatpush3.bf16.msra.mxu0 %v17968_v50  ;;  %v6301_v49 = vsel %vm5501_vm15, %v6277_v38, %v21291_v47  ;;  %v18015_v21 = vand.u32 4294901760, %v17985_v32  ;;  %v21294_v46 = vld [vmem:[#allocation314_spill] sm:$0xff]  ;;  %v21295_v35 = vld [vmem:[#allocation297_spill] sm:$0xff]  ;;  %v21296_v38 = vld [vmem:[#allocation296_spill] sm:$0xff] }
 0x6e7   : > { %v6210_v31 = vsel %vm5433_vm11, %v6186_v30, %v21292_v61  ;;  %6387 = vrot.lane.b32.xlu1 %v6350_v16, %s13708_s17  ;;  %12709 = vmatprep.subr.bf16.mxu0 %v17982_v45  ;;  %v6233_v55 = vsel %vm5450_vm12, %v6209_v57, %v21294_v46  ;;  %v6302_v60 = vsel %vm5501_vm15, %v6278_v22, %v21295_v35  ;;  %v21297_v15 = vld [vmem:[#allocation287_spill] sm:$0xff]  ;;  %v6353_v47 = vrot.slane %v6301_v49, 1  ;;  %v21298_v57 = vld [vmem:[#allocation64_spill] sm:$0xff]  ;;  %v21299_v61 = vld [vmem:[#allocation34_spill] sm:$0xff]  ;;  %v18038_v32 = vpop.permute.xlu0 %6038 }
 0x6e8   : > { %21293 = vst [vmem:[#allocation192_spill] sm:$0xff] %v18015_v21  ;;  %5262 = vrot.lane.b32.xlu0 %v17541_v10, %s20817_s3  ;;  %12530 = vmatmul.mubr.f32.gmra.mrb[74].mxu1 %v17151_v5  ;;  %v6232_v30 = vsel %vm5450_vm12, %v6208_v29, %v21296_v38  ;;  %v6352_v6 = vsel %vm20433_vm7, %v6349_v11, %v6351_v4  ;;  %v21300_v50 = vld [vmem:[#allocation285_spill] sm:$0xff]  ;;  %v21305_v4 = vld [vmem:[#allocation351_spill] sm:$0xff] }
 0x6e9   : > { %v6303_v16 = vsel %vm5501_vm15, %v6279_v0, %v21297_v15  ;;  %v5399_v10 = vsel %vm20435_vm3, %v21299_v61, %v21298_v57  ;;  %v6234_v22 = vsel %vm5450_vm12, %v6210_v31, %v21300_v50  ;;  %v21301_v35 = vld [vmem:[#allocation349_spill] sm:$0xff]  ;;  %v21304_v0 = vld [vmem:[#allocation327_spill] sm:$0xff]  ;;  %v6354_v50 = vrot.slane %v6302_v60, 1 }
 0x6ea   : > { %v6256_v5 = vsel %vm5467_vm13, %v6232_v30, %v21301_v35  ;;  %12711 = vmatpush3.bf16.msra.mxu0 %v17982_v45  ;;  %v21302_v29 = vld [vmem:[#allocation325_spill] sm:$0xff]  ;;  %v6257_v49 = vsel %vm5467_vm13, %v6233_v55, %v21304_v0  ;;  %v21307_v30 = vld [vmem:[#allocation231_spill] sm:$0xff]  ;;  %v18067_v45 = vpop.permute.xlu1 %5956 }
 0x6eb   : > { %v18043_v11 = vsel %vm20434_vm0, %v5399_v10, %v21302_v29  ;;  %v6280_v15 = vsel %vm5484_vm14, %v6256_v5, %v21305_v4  ;;  %6389 = vrot.lane.b32.xlu1 %v6352_v6, %s13708_s17  ;;  %12100 = vmatprep.subr.mxu0 %v18015_v21  ;;  %v21306_v31 = vld [vmem:[#allocation345_spill] sm:$0xff]  ;;  %v21309_v55 = vld [vmem:[#allocation299_spill] sm:$0xff]  ;;  %v21312_v4 = vld [vmem:[#allocation20_spill] sm:$0xff] }
 0x6ec   : > { %21303 = vst [vmem:[#allocation235_spill] sm:$0xff] %v18043_v11  ;;  %v5398_v57 = vsel %vm20435_vm3, %v21307_v30, %v21306_v31  ;;  %v21308_v61 = vld [vmem:[#allocation13_spill] sm:$0xff]  ;;  %5107 = vrot.lane.b32.xlu0 %v21072_v13, %s20777_s18  ;;  %v6258_v29 = vsel %vm5467_vm13, %v6234_v22, %v21309_v55  ;;  %v21310_v5 = vld [vmem:[#allocation347_spill] sm:$0xff]  ;;  %v6356_v31 = vrot.slane %v6303_v16, 1  ;;  %v21311_v30 = vld [vmem:[#allocation310_spill] sm:$0xff]  ;;  %v5675_v55 = vpop.permute.xlu0 %5674  ;;  %v6152_v16 = vsel %vm20435_vm3, %v21166_v54, %v17514_v51 }
 0x6ed   : > { %v6188_v10 = vsel %vm5416_vm10, %v18043_v11, %v21308_v61  ;;  %v18063_v6 = vsel %vm20434_vm0, %v5398_v57, %v21310_v5  ;;  %v6151_v61 = vsel %vm20435_vm3, %v21312_v4, %v21311_v30  ;;  %v21313_v35 = vld [vmem:[#allocation329_spill] sm:$0xff]  ;;  %v6355_v57 = vsel %vm20433_vm7, %v6353_v47, %v6354_v50  ;;  %v21318_v47 = vld [vmem:[#allocation322_spill] sm:$0xff]  ;;  %v21320_v54 = vld [vmem:[#allocation352_spill] sm:$0xff] }
 0x6ee   : > { %v6212_v60 = vsel %vm5433_vm11, %v6188_v10, %v17504_v27  ;;  %v6281_v38 = vsel %vm5484_vm14, %v6257_v49, %v21313_v35  ;;  %v21314_v11 = vld [vmem:[#allocation341_spill] sm:$0xff]  ;;  %12101 = vmatpush3.msra.mxu0 %v18015_v21  ;;  %v6357_v4 = vsel %vm20433_vm7, %v6354_v50, %v6356_v31  ;;  %v21316_v49 = vld [vmem:[#allocation336_spill] sm:$0xff]  ;;  %v6187_v30 = vsel %vm5416_vm10, %v18063_v6, %v21318_v47 }
 0x6ef   : > { %v6304_v22 = vsel %vm5501_vm15, %v6280_v15, %v21314_v11  ;;  %v21315_v5 = vld [vmem:[#allocation313_spill] sm:$0xff]  ;;  %6391 = vrot.lane.b32.xlu1 %v6355_v57, %s13708_s17  ;;  %v6211_v50 = vsel %vm5433_vm11, %v6187_v30, %v21320_v54  ;;  %v6153_v31 = vsel %vm20435_vm3, %v16657_v62, %v17394_v40  ;;  %v18101_v57 = vpop.permute.xlu1 %6115 }
 0x6f0   : > { %v6165_v27 = vsel %vm20434_vm0, %v6151_v61, %v21315_v5  ;;  %v21317_v11 = vld [vmem:[#allocation301_spill] sm:$0xff]  ;;  %5312 = vrot.lane.b32.xlu0 %v21280_v25, %s20824_s6  ;;  %v6358_v51 = vrot.slane %v6304_v22, 1  ;;  %v6166_v25 = vsel %vm20434_vm0, %v6152_v16, %v17420_v56  ;;  %v21322_v22 = vld [vmem:[#allocation30_spill] sm:$0xff]  ;;  %v6154_v56 = vsel %vm20435_vm3, %v21140_v7, %v17462_v33  ;;  %v21323_v16 = vld [vmem:[#allocation332_spill] sm:$0xff] }
 0x6f1   : > { %v6189_v10 = vsel %vm5416_vm10, %v6165_v27, %v21316_v49  ;;  %v6282_v15 = vsel %vm5484_vm14, %v6258_v29, %v21317_v11  ;;  %v21319_v21 = vld [vmem:[#allocation333_spill] sm:$0xff]  ;;  %v6235_v27 = vsel %vm5450_vm12, %v6211_v50, %v17436_v19  ;;  %v6160_v49 = vsel %vm20435_vm3, %v21322_v22, %v5675_v55  ;;  %v5722_v11 = vpop.permute.xlu0 %5721  ;;  %v21325_v7 = vld [vmem:[#allocation320_spill] sm:$0xff]  ;;  %v21326_v50 = vld [vmem:[#allocation346_spill] sm:$0xff] }
 0x6f2   : > { %v6236_v61 = vsel %vm5450_vm12, %v6212_v60, %v21319_v21  ;;  %v21321_v29 = vld [vmem:[#allocation9_spill] sm:$0xff]  ;;  %v6213_v60 = vsel %vm5433_vm11, %v6189_v10, %v17449_v26  ;;  %v6259_v40 = vsel %vm5467_vm13, %v6235_v27, %v17524_v59  ;;  %v18120_v47 = vsel %vm20434_vm0, %v6160_v49, %v5722_v11  ;;  %v21329_v11 = vld [vmem:[#allocation48_spill] sm:$0xff] }
 0x6f3   : > { %v6305_v5 = vsel %vm5501_vm15, %v6281_v38, %v21321_v29  ;;  %v6260_v62 = vsel %vm5467_vm13, %v6236_v61, %v17405_v1  ;;  %v6167_v38 = vsel %vm20434_vm0, %v6153_v31, %v17536_v14  ;;  %6393 = vrot.lane.b32.xlu1 %v6357_v4, %s13708_s17  ;;  %v6283_v26 = vsel %vm5484_vm14, %v6259_v40, %v17552_v58  ;;  %v21324_v30 = vld [vmem:[#allocation353_spill] sm:$0xff]  ;;  %v18138_v33 = vpop.permute.xlu1 %5672 }
 0x6f4   : > { %v6191_v55 = vsel %vm5416_vm10, %v6167_v38, %v17573_v34  ;;  %5160 = vrot.lane.b32.xlu0 %v21323_v16, %s20801_s0  ;;  %v6359_v10 = vrot.slane %v6305_v5, 1  ;;  %v6168_v14 = vsel %vm20434_vm0, %v6154_v56, %v17477_v37  ;;  %v6190_v4 = vsel %vm5416_vm10, %v6166_v25, %v21324_v30  ;;  %v21327_v25 = vld [vmem:[#allocation38_spill] sm:$0xff]  ;;  %v21331_v56 = vld [vmem:[#allocation361_spill] sm:$0xff]  ;;  %v21333_v30 = vld [vmem:[#allocation339_spill] sm:$0xff] }
 0x6f5   : > { %v6215_v61 = vsel %vm5433_vm11, %v6191_v55, %v17853_v18  ;;  %v6306_v54 = vsel %vm5501_vm15, %v6282_v15, %v21325_v7  ;;  %v6237_v34 = vsel %vm5450_vm12, %v6213_v60, %v21326_v50  ;;  %v6284_v31 = vsel %vm5484_vm14, %v6260_v62, %v17432_v20  ;;  %v5805_v29 = vpop.permute.xlu0 %5804  ;;  %v21332_v55 = vld [vmem:[#allocation356_spill] sm:$0xff]  ;;  %v21335_v7 = vld [vmem:[#allocation366_spill] sm:$0xff] }
 0x6f6   : > { %v6192_v37 = vsel %vm5416_vm10, %v6168_v14, %v17562_v17  ;;  %v6360_v5 = vsel %vm20433_vm7, %v6358_v51, %v6359_v10  ;;  %v6307_v18 = vsel %vm5501_vm15, %v6283_v26, %v17492_v52  ;;  %v6239_v15 = vsel %vm5450_vm12, %v6215_v61, %v17627_v39  ;;  %v21328_v52 = vld [vmem:[#allocation363_spill] sm:$0xff]  ;;  %v21334_v61 = vld [vmem:[#allocation362_spill] sm:$0xff] }
 0x6f7   : > { %v6216_v27 = vsel %vm5433_vm11, %v6192_v37, %v17683_v2  ;;  %6395 = vrot.lane.b32.xlu1 %v6360_v5, %s13708_s17  ;;  %v6214_v60 = vsel %vm5433_vm11, %v6190_v4, %v17510_v48  ;;  %v6361_v17 = vrot.slane %v6306_v54, 1  ;;  %v6261_v51 = vsel %vm5467_vm13, %v6237_v34, %v21327_v25  ;;  %v18162_v22 = vpop.permute.xlu1 %5717  ;;  %v21330_v48 = vld [vmem:[#allocation158_spill] sm:$0xff] }
 0x6f8   : > { %5362 = vrot.lane.b32.xlu0 %v21072_v13, %s20780_s19  ;;  %v6308_v2 = vsel %vm5501_vm15, %v6284_v31, %v21328_v52  ;;  %v6363_v49 = vrot.slane %v6307_v18, 1  ;;  %v6240_v62 = vsel %vm5450_vm12, %v6216_v27, %v21329_v11  ;;  %v6263_v38 = vsel %vm5467_vm13, %v6239_v15, %v21330_v48  ;;  %v21336_v27 = vld [vmem:[#allocation367_spill] sm:$0xff] }
 0x6f9   : > { %v5803_v39 = vpop.permute.xlu0 %5802  ;;  %v6362_v40 = vsel %vm20433_vm7, %v6359_v10, %v6361_v17  ;;  %v6238_v26 = vsel %vm5450_vm12, %v6214_v60, %v21331_v56  ;;  %v6285_v16 = vsel %vm5484_vm14, %v6261_v51, %v21332_v55  ;;  %v6364_v4 = vrot.slane %v6308_v2, 1  ;;  %v21337_v60 = vld [vmem:[#allocation53_spill] sm:$0xff]  ;;  %v21339_v11 = vld [vmem:[#allocation7_spill] sm:$0xff] }
 0x6fa   : > { %v6262_v14 = vsel %vm5467_vm13, %v6238_v26, %v18004_v28  ;;  %v6309_v10 = vsel %vm5501_vm15, %v6285_v16, %v21334_v61  ;;  %v6264_v54 = vsel %vm5467_vm13, %v6240_v62, %v21335_v7  ;;  %v6287_v31 = vsel %vm5484_vm14, %v6263_v38, %v17728_v8  ;;  %v21340_v38 = vld [vmem:[#allocation67_spill] sm:$0xff] }
 0x6fb   : > { %6397 = vrot.lane.b32.xlu1 %v6362_v40, %s13708_s17  ;;  %v6286_v50 = vsel %vm5484_vm14, %v6262_v14, %v18038_v32  ;;  %v6000_v34 = vpop.permute.xlu1 %5999  ;;  %v6365_v28 = vsel %vm20433_vm7, %v6363_v49, %v6364_v4  ;;  %v6311_v5 = vsel %vm5501_vm15, %v6287_v31, %v17994_v9  ;;  %v6366_v18 = vrot.slane %v6309_v10, 1  ;;  %v21338_v32 = vld [vmem:[#allocation65_spill] sm:$0xff]  ;;  %v21344_v31 = vld [vmem:[#allocation12_spill] sm:$0xff] }
 0x6fc   : > { %5213 = vrot.lane.b32.xlu0 %v21333_v30, %s20807_s2  ;;  %v6288_v15 = vsel %vm5484_vm14, %v6264_v54, %v21336_v27  ;;  %v6310_v17 = vsel %vm5501_vm15, %v6286_v50, %v21337_v60  ;;  %v6369_v51 = vrot.slane %v6311_v5, 1  ;;  %v6157_v56 = vsel %vm20435_vm3, %v21340_v38, %v17747_v42  ;;  %v21342_v54 = vld [vmem:[#allocation52_spill] sm:$0xff] }
 0x6fd   : > { %v5953_v37 = vpop.permute.xlu0 %5952  ;;  %v6312_v8 = vsel %vm5501_vm15, %v6288_v15, %v17929_v24  ;;  %v6367_v9 = vsel %vm20433_vm7, %v6364_v4, %v6366_v18  ;;  %v6368_v2 = vrot.slane %v6310_v17, 1  ;;  %v6171_v26 = vsel %vm20434_vm0, %v6157_v56, %v17794_v43  ;;  %v21341_v4 = vld [vmem:[#allocation365_spill] sm:$0xff]  ;;  %v21343_v50 = vld [vmem:[#allocation68_spill] sm:$0xff]  ;;  %v21345_v18 = vld [vmem:[#allocation71_spill] sm:$0xff] }
 0x6fe   : > { %v6371_v49 = vrot.slane %v6312_v8, 1  ;;  %v6195_v16 = vsel %vm5416_vm10, %v6171_v26, %v5805_v29  ;;  %v6156_v43 = vsel %vm20435_vm3, %v21072_v13, %v21342_v54  ;;  %v5384_v29 = vsel %vm20435_vm3, %v21344_v31, %v21343_v50  ;;  %v21346_v15 = vld [vmem:[#allocation262_spill] sm:$0xff]  ;;  %v21352_v26 = vld [vmem:[#allocation60_spill] sm:$0xff] }
 0x6ff   : > { %6399 = vrot.lane.b32.xlu1 %v6365_v28, %s13708_s17  ;;  %v6047_v25 = vpop.permute.xlu1 %6046  ;;  %v6370_v24 = vsel %vm20433_vm7, %v6368_v2, %v6369_v51  ;;  %v6170_v28 = vsel %vm20434_vm0, %v6156_v43, %v17949_v3  ;;  %v5400_v27 = vsel %vm20434_vm0, %v5384_v29, %v21345_v18  ;;  %v21356_v43 = vld [vmem:[#allocation293_spill] sm:$0xff] }
 0x700   : > { %5314 = vrot.lane.b32.xlu0 %v21338_v32, %s20824_s6  ;;  %v6372_v48 = vsel %vm20433_vm7, %v6369_v51, %v6371_v49  ;;  %v6194_v60 = vsel %vm5416_vm10, %v6170_v28, %v5803_v39  ;;  %v21347_v32 = vld [vmem:[#allocation72_spill] sm:$0xff]  ;;  %v21348_v51 = vld [vmem:[#allocation61_spill] sm:$0xff]  ;;  %v21357_v28 = vld [vmem:[#allocation290_spill] sm:$0xff] }
 0x701   : > { %v18200_v52 = vpop.permute.xlu0 %6111  ;;  %v5417_v8 = vsel %vm5416_vm10, %v5400_v27, %v21347_v32  ;;  %v21358_v27 = vld [vmem:[#allocation307_spill] sm:$0xff] }
 0x703   : > { %6401 = vrot.lane.b32.xlu1 %v6367_v9, %s13708_s17  ;;  %v6114_v62 = vpop.permute.xlu1 %6113  ;;  %v21349_v9 = vld [vmem:[#allocation5_spill] sm:$0xff] }
 0x704   : > { %5364 = vrot.lane.b32.xlu0 %v21339_v11, %s20780_s19  ;;  %v5385_v2 = vsel %vm20435_vm3, %v21349_v9, %v21348_v51  ;;  %v21362_v51 = vld [vmem:[#allocation74_spill] sm:$0xff] }
 0x705   : > { %v18206_v40 = vpop.permute.xlu0 %5960 }
 0x707   : > { %6405 = vrot.lane.b32.xlu1 %v6372_v48, %s13708_s17  ;;  %v18217_v55 = vpop.permute.xlu1 %6007  ;;  %v21351_v48 = vld [vmem:[#allocation251_spill] sm:$0xff] }
 0x708   : > { %6403 = vrot.lane.b32.xlu0 %v6370_v24, %s13708_s17 }
 0x709   : > { %v5903_v14 = vpop.permute.xlu0 %5902 }
 0x70a   : > { %v6219_v30 = vsel %vm5433_vm11, %v6195_v16, %v5903_v14  ;;  %v5434_v16 = vsel %vm5433_vm11, %v5417_v8, %v21352_v26  ;;  %v21353_v14 = vld [vmem:[#allocation303_spill] sm:$0xff]  ;;  %v21368_v26 = vld [vmem:[#allocation342_spill] sm:$0xff] }
 0x70b   : > { %v6243_v61 = vsel %vm5450_vm12, %v6219_v30, %v21341_v4  ;;  %v5905_v10 = vpop.permute.xlu1 %5904  ;;  %v5430_v30 = vsel %vm5416_vm10, %v17957_v44, %v21353_v14 }
 0x70c   : > { %v6267_v42 = vsel %vm5467_vm13, %v6243_v61, %v17836_v23  ;;  %v5428_v23 = vsel %vm5416_vm10, %v17849_v41, %v21346_v15  ;;  %v21350_v41 = vld [vmem:[#allocation69_spill] sm:$0xff]  ;;  %v5447_v18 = vsel %vm5433_vm11, %v5430_v30, %v21357_v28  ;;  %v21359_v15 = vld [vmem:[#allocation107_spill] sm:$0xff]  ;;  %v21369_v30 = vld [vmem:[#allocation62_spill] sm:$0xff] }
 0x70d   : > { %v18223_v7 = vpop.permute.xlu0 %5810  ;;  %v6291_v13 = vsel %vm5484_vm14, %v6267_v42, %v17882_v63  ;;  %v5401_v39 = vsel %vm20434_vm0, %v5385_v2, %v21350_v41  ;;  %v5445_v63 = vsel %vm5433_vm11, %v5428_v23, %v21351_v48  ;;  %v21354_v42 = vld [vmem:[#allocation102_spill] sm:$0xff]  ;;  %v21376_v28 = vld [vmem:[#allocation111_spill] sm:$0xff] }
 0x70e   : > { %v6315_v56 = vsel %vm5501_vm15, %v6291_v13, %v18101_v57  ;;  %v5418_v9 = vsel %vm5416_vm10, %v5401_v39, %v21362_v51  ;;  %v21365_v39 = vld [vmem:[#allocation21_spill] sm:$0xff] }
 0x70f   : > { %v18235_v5 = vpop.permute.xlu1 %6121  ;;  %v6376_v29 = vrot.slane %v6315_v56, 1 }
 0x711   : > { %v5901_v17 = vpop.permute.xlu0 %5900 }
 0x712   : > { %v6218_v3 = vsel %vm5433_vm11, %v6194_v60, %v5901_v17  ;;  %v5464_v17 = vsel %vm5450_vm12, %v5447_v18, %v21294_v46 }
 0x713   : > { %v6242_v49 = vsel %vm5450_vm12, %v6218_v3, %v5953_v37  ;;  %v18257_v38 = vpop.permute.xlu1 %6117  ;;  %v5462_v37 = vsel %vm5450_vm12, %v5445_v63, %v21256_v53 }
 0x714   : > { %v6266_v24 = vsel %vm5467_vm13, %v6242_v49, %v6000_v34  ;;  %v21355_v34 = vld [vmem:[#allocation19_spill] sm:$0xff]  ;;  %v5479_v57 = vsel %vm5467_vm13, %v5462_v37, %v21356_v43  ;;  %v5481_v49 = vsel %vm5467_vm13, %v5464_v17, %v21304_v0  ;;  %v21367_v0 = vld [vmem:[#allocation316_spill] sm:$0xff]  ;;  %v21381_v17 = vld [vmem:[#allocation326_spill] sm:$0xff] }
 0x715   : > { %v6290_v4 = vsel %vm5484_vm14, %v6266_v24, %v6047_v25  ;;  %v5671_v61 = vpop.permute.xlu0 %5670  ;;  %v5386_v54 = vsel %vm20435_vm3, %v21355_v34, %v21354_v42  ;;  %v5496_v44 = vsel %vm5484_vm14, %v5479_v57, %v21285_v12  ;;  %v5498_v48 = vsel %vm5484_vm14, %v5481_v49, %v21313_v35  ;;  %v21366_v24 = vld [vmem:[#allocation77_spill] sm:$0xff]  ;;  %v21371_v42 = vld [vmem:[#allocation75_spill] sm:$0xff]  ;;  %v21385_v49 = vld [vmem:[#allocation344_spill] sm:$0xff] }
 0x716   : > { %v6158_v50 = vsel %vm20435_vm3, %v21339_v11, %v5671_v61  ;;  %v18277_v31 = vsel %vm5501_vm15, %v6290_v4, %v6114_v62  ;;  %v5513_v11 = vsel %vm5501_vm15, %v5496_v44, %v21358_v27  ;;  %v21360_v62 = vld [vmem:[#allocation56_spill] sm:$0xff]  ;;  %v5451_v56 = vsel %vm5450_vm12, %v5434_v16, %v21366_v24  ;;  %v21370_v61 = vld [vmem:[#allocation106_spill] sm:$0xff]  ;;  %v21373_v57 = vld [vmem:[#allocation79_spill] sm:$0xff] }
 0x717   : > { %v6172_v53 = vsel %vm20434_vm0, %v6158_v50, %v18162_v22  ;;  %v6374_v25 = vrot.slane %v18277_v31, 1  ;;  %v6155_v23 = vsel %vm20435_vm3, %v21360_v62, %v21359_v15  ;;  %v18293_v60 = vpop.permute.xlu1 %6003  ;;  %v21361_v22 = vld [vmem:[#allocation104_spill] sm:$0xff]  ;;  %v5515_v37 = vsel %vm5501_vm15, %v5498_v48, %v21368_v26  ;;  %v21374_v44 = vld [vmem:[#allocation105_spill] sm:$0xff] }
 0x718   : > { %v6196_v12 = vsel %vm5416_vm10, %v6172_v53, %v18026_v36  ;;  %v5402_v13 = vsel %vm20434_vm0, %v5386_v54, %v21361_v22  ;;  %v21363_v36 = vld [vmem:[#allocation109_spill] sm:$0xff]  ;;  %v6169_v63 = vsel %vm20434_vm0, %v6155_v23, %v21365_v39  ;;  %v5435_v4 = vsel %vm5433_vm11, %v5418_v9, %v21369_v30  ;;  %v21375_v53 = vld [vmem:[#allocation16_spill] sm:$0xff]  ;;  %v21379_v23 = vld [vmem:[#allocation110_spill] sm:$0xff] }
 0x719   : > { %v6220_v32 = vsel %vm5433_vm11, %v6196_v12, %v5905_v10  ;;  %v18300_v8 = vpop.permute.xlu0 %5719  ;;  %v6377_v3 = vsel %vm20433_vm7, %v6374_v25, %v6376_v29  ;;  %v5419_v2 = vsel %vm5416_vm10, %v5402_v13, %v21363_v36  ;;  %v21364_v10 = vld [vmem:[#allocation291_spill] sm:$0xff]  ;;  %vm5620_vm7 = vcmask 490496   ;;  %v21372_v54 = vld [vmem:[#allocation357_spill] sm:$0xff]  ;;  %v21377_v27 = vld [vmem:[#allocation364_spill] sm:$0xff] }
 0x71a   : > { %v18313_v46 = vsel %vm5450_vm12, %v6220_v32, %v18067_v45  ;;  %6409 = vrot.lane.b32.xlu0 %v6377_v3, %s13708_s17  ;;  %v5530_v41 = vsel %vm5518_vm1, %v5513_v11, %v21364_v10  ;;  %v5468_v35 = vsel %vm5467_vm13, %v5451_v56, %v21370_v61  ;;  %v5436_v34 = vsel %vm5433_vm11, %v5419_v2, %v21371_v42  ;;  %v21378_v15 = vld [vmem:[#allocation108_spill] sm:$0xff]  ;;  %v21380_v22 = vld [vmem:[#allocation113_spill] sm:$0xff]  ;;  %v21383_v9 = vld [vmem:[#allocation335_spill] sm:$0xff] }
 0x71b   : > { %v5547_v45 = vsel %vm5535_vm2, %v5530_v41, %v21367_v0  ;;  %v18328_v14 = vpop.permute.xlu1 %6052  ;;  %v5452_v50 = vsel %vm5450_vm12, %v5435_v4, %v21373_v57  ;;  %v5387_v29 = vsel %vm20435_vm3, %v21375_v53, %v21374_v44  ;;  %v5485_v18 = vsel %vm5484_vm14, %v5468_v35, %v21376_v28  ;;  %v21382_v3 = vld [vmem:[#allocation101_spill] sm:$0xff]  ;;  %v21384_v36 = vld [vmem:[#allocation235_spill] sm:$0xff]  ;;  %v21386_v41 = vld [vmem:[#allocation360_spill] sm:$0xff] }
 0x71c   : > { %v5564_v16 = vsel %vm5552_vm4, %v5547_v45, %v21372_v54  ;;  %v6193_v11 = vsel %vm5416_vm10, %v6169_v63, %v21377_v27  ;;  %v5403_v62 = vsel %vm20434_vm0, %v5387_v29, %v21378_v15  ;;  %v5469_v12 = vsel %vm5467_vm13, %v5452_v50, %v21379_v23  ;;  %v21387_v63 = vld [vmem:[#allocation112_spill] sm:$0xff]  ;;  %v21388_v56 = vld [vmem:[#allocation359_spill] sm:$0xff]  ;;  %v21393_v54 = vld [vmem:[#allocation129_spill] sm:$0xff] }
 0x71d   : > { %v5998_v43 = vpop.permute.xlu0 %5997  ;;  %v5502_v13 = vsel %vm5501_vm15, %v5485_v18, %v21380_v22  ;;  %v5532_v32 = vsel %vm5518_vm1, %v5515_v37, %v21381_v17  ;;  %v5453_v51 = vsel %vm5450_vm12, %v5436_v34, %v21382_v3  ;;  %v5432_v2 = vsel %vm5416_vm10, %v21384_v36, %v21383_v9  ;;  %v21389_v45 = vld [vmem:[#allocation200_spill] sm:$0xff]  ;;  %v21391_v35 = vld [vmem:[#allocation131_spill] sm:$0xff]  ;;  %v21397_v29 = vld [vmem:[#allocation114_spill] sm:$0xff] }
 0x71e   : > { %v5581_v10 = vsel %vm5569_vm5, %v5564_v16, %v21385_v49  ;;  %v5549_v48 = vsel %vm5535_vm2, %v5532_v32, %v21386_v41  ;;  %v5420_v24 = vsel %vm5416_vm10, %v5403_v62, %v21387_v63  ;;  %v6217_v26 = vsel %vm5433_vm11, %v6193_v11, %v21389_v45  ;;  %v21390_v4 = vld [vmem:[#allocation76_spill] sm:$0xff]  ;;  %v21392_v42 = vld [vmem:[#allocation35_spill] sm:$0xff]  ;;  %v21398_v18 = vld [vmem:[#allocation130_spill] sm:$0xff] }
 0x71f   : > { %v5157_v39 = vpop.permute.xlu1 %5156  ;;  %v5598_v0 = vsel %vm5586_vm8, %v5581_v10, %v21388_v56  ;;  %v5519_v61 = vsel %vm5518_vm1, %v5502_v13, %v21390_v4  ;;  %v5388_v34 = vsel %vm20435_vm3, %v21392_v42, %v21391_v35  ;;  %v21394_v16 = vand.u32 4294901760, %v21393_v54  ;;  %v21395_v50 = vld [vmem:[#allocation27_spill] sm:$0xff]  ;;  %v21400_v15 = vld [vmem:[#allocation133_spill] sm:$0xff]  ;;  %v21401_v23 = vld [vmem:[#allocation324_spill] sm:$0xff] }
 0x720   : > { %v5566_v37 = vsel %vm5552_vm4, %v5549_v48, %v5157_v39  ;;  %v21396_v44 = vand.u32 4294901760, %v21395_v50  ;;  %v5486_v28 = vsel %vm5484_vm14, %v5469_v12, %v21397_v29  ;;  %v21399_v27 = vld [vmem:[#allocation23_spill] sm:$0xff]  ;;  %v5404_v62 = vsel %vm20434_vm0, %v5388_v34, %v21400_v15  ;;  %v21402_v13 = vld [vmem:[#allocation10_spill] sm:$0xff]  ;;  %v21403_v3 = vld [vmem:[#allocation328_spill] sm:$0xff] }
 0x721   : > { %v18371_v30 = vpop.permute.xlu0 %5808  ;;  %v18381_v57 = vsub.f32 %v21393_v54, %v21394_v16  ;;  %v5389_v11 = vsel %vm20435_vm3, %v21399_v27, %v21398_v18  ;;  %v5449_v22 = vsel %vm5433_vm11, %v5432_v2, %v21401_v23  ;;  %v6241_v17 = vsel %vm5450_vm12, %v6217_v26, %v21402_v13  ;;  %v21404_v49 = vld [vmem:[#allocation132_spill] sm:$0xff]  ;;  %v21405_v41 = vld [vmem:[#allocation137_spill] sm:$0xff]  ;;  %v21406_v4 = vld [vmem:[#allocation115_spill] sm:$0xff] }
 0x722   : > { %v18386_v53 = vsub.f32 %v21395_v50, %v21396_v44  ;;  %v5615_v9 = vsel %vm5603_vm9, %v5598_v0, %v21403_v3  ;;  %v5405_v10 = vsel %vm20434_vm0, %v5389_v11, %v21404_v49  ;;  %v5421_v48 = vsel %vm5416_vm10, %v5404_v62, %v21405_v41  ;;  %v21407_v35 = vld [vmem:[#allocation136_spill] sm:$0xff]  ;;  %v21410_v15 = vld [vmem:[#allocation103_spill] sm:$0xff]  ;;  %v21411_v23 = vld [vmem:[#allocation117_spill] sm:$0xff] }
 0x723   : > { %v5359_v32 = vpop.permute.xlu1 %5358  ;;  %v20451_v36 = vand.u32 4294901760, %v18381_v57  ;;  %v6265_v39 = vsel %vm5467_vm13, %v6241_v17, %v5998_v43  ;;  %v5466_v56 = vsel %vm5450_vm12, %v5449_v22, %v21319_v21  ;;  %v5503_v43 = vsel %vm5501_vm15, %v5486_v28, %v21406_v4  ;;  %v21408_v18 = vld [vmem:[#allocation80_spill] sm:$0xff]  ;;  %v21415_v3 = vld [vmem:[#allocation134_spill] sm:$0xff]  ;;  %v21416_v49 = vld [vmem:[#allocation135_spill] sm:$0xff] }
 0x724   : > { %v20449_v12 = vand.u32 4294901760, %v18386_v53  ;;  %v18409_v2 = vsel %vm5620_vm7, %v5615_v9, %v5359_v32  ;;  %v5422_v42 = vsel %vm5416_vm10, %v5405_v10, %v21407_v35  ;;  %v5483_v34 = vsel %vm5467_vm13, %v5466_v56, %v17405_v1  ;;  %v21409_v28 = vld [vmem:[#allocation116_spill] sm:$0xff]  ;;  %v21417_v41 = vld [vmem:[#allocation122_spill] sm:$0xff]  ;;  %v21420_v56 = vld [vmem:[#allocation141_spill] sm:$0xff] }
 0x725   : > { %v6045_v63 = vpop.permute.xlu0 %6044  ;;  %v6762_v45 = vsub.f32 %v18381_v57, %v20451_v36  ;;  %v5500_v54 = vsel %vm5484_vm14, %v5483_v34, %v17432_v20  ;;  %v5437_v27 = vsel %vm5433_vm11, %v5420_v24, %v21408_v18  ;;  %v5438_v11 = vsel %vm5433_vm11, %v5421_v48, %v21409_v28  ;;  %v21412_v22 = vld [vmem:[#allocation100_spill] sm:$0xff]  ;;  %v21423_v35 = vld [vmem:[#allocation145_spill] sm:$0xff]  ;;  %v21424_v34 = vld [vmem:[#allocation170_spill] sm:$0xff] }
 0x726   : > { %v6289_v0 = vsel %vm5484_vm14, %v6265_v39, %v6045_v63  ;;  %v6769_v26 = vsub.f32 %v18386_v53, %v20449_v12  ;;  %v5536_v62 = vsel %vm5535_vm2, %v5519_v61, %v21410_v15  ;;  %v5454_v20 = vsel %vm5450_vm12, %v5437_v27, %v21411_v23  ;;  %v21414_v32 = vld [vmem:[#allocation120_spill] sm:$0xff]  ;;  %v21418_v39 = vld [vmem:[#allocation138_spill] sm:$0xff]  ;;  %v21427_v27 = vld [vmem:[#allocation147_spill] sm:$0xff] }
 0x727   : > { %v6313_v21 = vsel %vm5501_vm15, %v6289_v0, %v18200_v52  ;;  %v5008_v50 = vpop.permute.xlu1 %5007  ;;  %v6763_v44 = vand.u32 4294901760, %v6762_v45  ;;  %v5520_v13 = vsel %vm5518_vm1, %v5503_v43, %v21412_v22  ;;  %vm21413_vm0 = vcmask 1046528   ;;  %v21421_v45 = vld [vmem:[#allocation125_spill] sm:$0xff]  ;;  %v21431_v22 = vld [vmem:[#allocation31_spill] sm:$0xff]  ;;  %v21562_v12 = vld [vmem:[#allocation246_spill] sm:$0xff] }
 0x728   : > { %v6373_v16 = vrot.slane %v6313_v21, 1  ;;  %v6770_v29 = vand.u32 4294901760, %v6769_v26  ;;  %v18437_v1 = vsel %vm5501_vm15, %v5500_v54, %v5008_v50  ;;  %v5537_v61 = vsel %vm5535_vm2, %v5520_v13, %v21414_v32  ;;  %v21425_v50 = vld [vmem:[#allocation140_spill] sm:$0xff]  ;;  %v21432_v13 = vld [vmem:[#allocation146_spill] sm:$0xff] }
 0x729   : > { %v18439_v52 = vpop.permute.xlu0 %6054  ;;  %v5471_v9 = vsel %vm5467_vm13, %v5454_v20, %v21415_v3  ;;  %v5470_v10 = vsel %vm5467_vm13, %v5453_v51, %v21416_v49  ;;  %v5439_v48 = vsel %vm5433_vm11, %v5422_v42, %v21417_v41  ;;  %v5553_v0 = vsel %vm5552_vm4, %v5536_v62, %v21420_v56  ;;  %v21422_v51 = vld [vmem:[#allocation142_spill] sm:$0xff]  ;;  %v21429_v62 = vld [vmem:[#allocation144_spill] sm:$0xff]  ;;  %v21434_v3 = vld [vmem:[#allocation165_spill] sm:$0xff] }
 0x72a   : > { %v6375_v24 = vsel %vm21413_vm0, %v6373_v16, %v6374_v25  ;;  %v18448_v17 = vpack.c.bf16 %v6770_v29, %v6763_v44  ;;  %v5488_v31 = vsel %vm5484_vm14, %v5471_v9, %v21418_v39  ;;  %v21419_v25 = vld [vmem:[#allocation139_spill] sm:$0xff]  ;;  %v5455_v26 = vsel %vm5450_vm12, %v5438_v11, %v21421_v45  ;;  %v21428_v11 = vld [vmem:[#allocation150_spill] sm:$0xff]  ;;  %v21430_v20 = vld [vmem:[#allocation172_spill] sm:$0xff] }
 0x72b   : > { %6407 = vrot.lane.b32.xlu1 %v6375_v24, %s13708_s17  ;;  %v5487_v63 = vsel %vm5484_vm14, %v5470_v10, %v21419_v25  ;;  %v5210_v4 = vpop.permute.xlu1 %5209  ;;  %v5505_v43 = vsel %vm5501_vm15, %v5488_v31, %v21422_v51  ;;  %v5570_v42 = vsel %vm5569_vm5, %v5553_v0, %v21423_v35  ;;  %v5472_v21 = vsel %vm5467_vm13, %v5455_v26, %v21424_v34  ;;  %v21426_v29 = vld [vmem:[#allocation143_spill] sm:$0xff]  ;;  %v21433_v32 = vld [vmem:[#allocation124_spill] sm:$0xff]  ;;  %v21437_v31 = vld [vmem:[#allocation121_spill] sm:$0xff] }
 0x72c   : > { %12713 = vmatprep.subr.bf16.mxu0 %v18448_v17  ;;  %v18475_v54 = vsel %vm5569_vm5, %v5566_v37, %v5210_v4  ;;  %v5554_v44 = vsel %vm5552_vm4, %v5537_v61, %v21425_v50  ;;  %v5504_v18 = vsel %vm5501_vm15, %v5487_v63, %v21426_v29  ;;  %v5587_v28 = vsel %vm5586_vm8, %v5570_v42, %v21427_v27  ;;  %v21435_v49 = vld [vmem:[#allocation176_spill] sm:$0xff]  ;;  %v21438_v63 = vld [vmem:[#allocation153_spill] sm:$0xff]  ;;  %v21439_v45 = vld [vmem:[#allocation163_spill] sm:$0xff] }
 0x72d   : > { %v18477_v16 = vpop.permute.xlu0 %5958  ;;  %v5456_v15 = vsel %vm5450_vm12, %v5439_v48, %v21428_v11  ;;  %v5571_v23 = vsel %vm5569_vm5, %v5554_v44, %v21429_v62  ;;  %v5522_v61 = vsel %vm5518_vm1, %v5505_v43, %v21433_v32  ;;  %v5489_v9 = vsel %vm5484_vm14, %v5472_v21, %v21434_v3  ;;  %v21436_v48 = vld [vmem:[#allocation118_spill] sm:$0xff]  ;;  %v21440_v26 = vld [vmem:[#allocation164_spill] sm:$0xff]  ;;  %v21444_v21 = vld [vmem:[#allocation123_spill] sm:$0xff] }
 0x72e   : > { %v5473_v37 = vsel %vm5467_vm13, %v5456_v15, %v21430_v20  ;;  %v5588_v24 = vsel %vm5586_vm8, %v5571_v23, %v21432_v13  ;;  %v5521_v39 = vsel %vm5518_vm1, %v5504_v18, %v21436_v48  ;;  %v5604_v25 = vsel %vm5603_vm9, %v5587_v28, %v21437_v31  ;;  %v21441_v51 = vld [vmem:[#allocation174_spill] sm:$0xff]  ;;  %v21445_v44 = vld [vmem:[#allocation173_spill] sm:$0xff]  ;;  %v21447_v11 = vld [vmem:[#allocation155_spill] sm:$0xff] }
 0x72f   : > { %5366 = vrot.lane.b32.xlu1 %v21431_v22, %s20780_s19  ;;  %v5490_v10 = vsel %vm5484_vm14, %v5473_v37, %v21435_v49  ;;  %v18501_v41 = vpop.permute.xlu1 %5105  ;;  %v5539_v56 = vsel %vm5535_vm2, %v5522_v61, %v21438_v63  ;;  %v5423_v4 = vsel %vm5416_vm10, %v21440_v26, %v21439_v45  ;;  %v21442_v43 = vld [vmem:[#allocation166_spill] sm:$0xff]  ;;  %v5605_v50 = vsel %vm5603_vm9, %v5588_v24, %v21444_v21  ;;  %v21446_v18 = vld [vmem:[#allocation169_spill] sm:$0xff]  ;;  %v21448_v62 = vld [vmem:[#allocation127_spill] sm:$0xff] }
 0x730   : > { %v5424_v35 = vsel %vm5416_vm10, %v21442_v43, %v21441_v51  ;;  %v21443_v42 = vld [vmem:[#allocation178_spill] sm:$0xff]  ;;  %v5507_v29 = vsel %vm5501_vm15, %v5490_v10, %v21445_v44  ;;  %v5506_v27 = vsel %vm5501_vm15, %v5489_v9, %v21446_v18  ;;  %v6198_v28 = vsel %vm5416_vm10, %v18120_v47, %v18223_v7  ;;  %v21450_v32 = vld [vmem:[#allocation167_spill] sm:$0xff]  ;;  %v21451_v3 = vld [vmem:[#allocation149_spill] sm:$0xff] }
 0x731   : > { %v5909_v0 = vpop.permute.xlu0 %5908  ;;  %v5556_v34 = vsel %vm5552_vm4, %v5539_v56, %v21443_v42  ;;  %v18528_v15 = vsel %vm5620_vm7, %v5605_v50, %v21447_v11  ;;  %v5538_v23 = vsel %vm5535_vm2, %v5521_v39, %v21448_v62  ;;  %v21449_v13 = vld [vmem:[#allocation126_spill] sm:$0xff]  ;;  %v5441_v47 = vsel %vm5433_vm11, %v5424_v35, %v21451_v3  ;;  %v21452_v7 = vld [vmem:[#allocation152_spill] sm:$0xff]  ;;  %v21453_v49 = vld [vmem:[#allocation175_spill] sm:$0xff] }
 0x732   : > { %v6222_v20 = vsel %vm5433_vm11, %v6198_v28, %v5909_v0  ;;  %v18537_v24 = vsel %vm5620_vm7, %v5604_v25, %v21449_v13  ;;  %v5555_v61 = vsel %vm5552_vm4, %v5538_v23, %v21450_v32  ;;  %v5440_v9 = vsel %vm5433_vm11, %v5423_v4, %v21452_v7  ;;  %v21454_v39 = vld [vmem:[#allocation171_spill] sm:$0xff]  ;;  %v21457_v45 = vld [vmem:[#allocation157_spill] sm:$0xff]  ;;  %v21458_v51 = vld [vmem:[#allocation180_spill] sm:$0xff] }
 0x733   : > { %v18533_v37 = vpop.permute.xlu1 %5310  ;;  %v5573_v10 = vsel %vm5569_vm5, %v5556_v34, %v21453_v49  ;;  %v5572_v31 = vsel %vm5569_vm5, %v5555_v61, %v21454_v39  ;;  %v21455_v63 = vld [vmem:[#allocation151_spill] sm:$0xff]  ;;  %v5523_v26 = vsel %vm5518_vm1, %v5506_v27, %v21457_v45  ;;  %v5457_v43 = vsel %vm5450_vm12, %v5440_v9, %v21458_v51  ;;  %v21460_v35 = vld [vmem:[#allocation194_spill] sm:$0xff]  ;;  %v21461_v50 = vld [vmem:[#allocation181_spill] sm:$0xff] }
 0x734   : > { %v5524_v25 = vsel %vm5518_vm1, %v5507_v29, %v21455_v63  ;;  %v21456_v56 = vld [vmem:[#allocation183_spill] sm:$0xff]  ;;  %v6159_v34 = vsel %vm20435_vm3, %v21431_v22, %v18138_v33  ;;  %v6246_v21 = vsel %vm5450_vm12, %v6222_v20, %v18206_v40  ;;  %v5589_v44 = vsel %vm5586_vm8, %v5572_v31, %v21461_v50  ;;  %v21462_v29 = vld [vmem:[#allocation168_spill] sm:$0xff]  ;;  %v21463_v27 = vld [vmem:[#allocation209_spill] sm:$0xff] }
 0x735   : > { %v5907_v48 = vpop.permute.xlu0 %5906  ;;  %v5590_v0 = vsel %vm5586_vm8, %v5573_v10, %v21456_v56  ;;  %v21459_v4 = vld [vmem:[#allocation315_spill] sm:$0xff]  ;;  %v5458_v18 = vsel %vm5450_vm12, %v5441_v47, %v21462_v29  ;;  %v5474_v28 = vsel %vm5467_vm13, %v5457_v43, %v21463_v27  ;;  %vm21464_vm0 = vcmask 64512   ;;  %v21465_v23 = vld [vmem:[#allocation177_spill] sm:$0xff]  ;;  %v21466_v22 = vld [vmem:[#allocation148_spill] sm:$0xff] }
 0x736   : > { %v5429_v42 = vsel %vm5416_vm10, %v21460_v35, %v21459_v4  ;;  %v6173_v11 = vsel %vm21464_vm0, %v6159_v34, %v18300_v8  ;;  %v5541_v33 = vsel %vm5535_vm2, %v5524_v25, %v21465_v23  ;;  %v5607_v40 = vsel %vm5603_vm9, %v5590_v0, %v21466_v22  ;;  %v21467_v20 = vld [vmem:[#allocation211_spill] sm:$0xff]  ;;  %v21468_v3 = vld [vmem:[#allocation204_spill] sm:$0xff]  ;;  %v21471_v31 = vld [vmem:[#allocation185_spill] sm:$0xff] }
 0x737   : > { %v18573_v62 = vpop.permute.xlu1 %5158  ;;  %v5491_v13 = vsel %vm5484_vm14, %v5474_v28, %v21467_v20  ;;  %v6197_v32 = vsel %vm5416_vm10, %v6173_v11, %v18371_v30  ;;  %v5475_v47 = vsel %vm5467_vm13, %v5458_v18, %v21468_v3  ;;  %v21469_v7 = vld [vmem:[#allocation280_spill] sm:$0xff]  ;;  %v6270_v9 = vsel %vm5467_vm13, %v6246_v21, %v18217_v55  ;;  %v21472_v30 = vld [vmem:[#allocation154_spill] sm:$0xff]  ;;  %v21475_v51 = vld [vmem:[#allocation159_spill] sm:$0xff] }
 0x738   : > { %v5446_v8 = vsel %vm5433_vm11, %v5429_v42, %v21469_v7  ;;  %v6221_v49 = vsel %vm5433_vm11, %v6197_v32, %v5907_v48  ;;  %v21470_v10 = vld [vmem:[#allocation184_spill] sm:$0xff]  ;;  %v18594_v63 = vsel %vm5620_vm7, %v5607_v40, %v21471_v31  ;;  %v18598_v25 = vsel %vm5603_vm9, %v5589_v44, %v21472_v30  ;;  %v21473_v56 = vld [vmem:[#allocation206_spill] sm:$0xff]  ;;  %v21477_v4 = vld [vmem:[#allocation213_spill] sm:$0xff] }
 0x739   : > { %v6006_v61 = vpop.permute.xlu0 %6005  ;;  %v5540_v39 = vsel %vm5535_vm2, %v5523_v26, %v21470_v10  ;;  %v5492_v0 = vsel %vm5484_vm14, %v5475_v47, %v21473_v56  ;;  %v21474_v45 = vld [vmem:[#allocation208_spill] sm:$0xff]  ;;  %v21476_v43 = vld [vmem:[#allocation210_spill] sm:$0xff]  ;;  %v6268_v29 = vsel %vm5467_vm13, %v18313_v46, %v18293_v60  ;;  %v6294_v18 = vsel %vm5484_vm14, %v6270_v9, %v18439_v52  ;;  %v21481_v11 = vld [vmem:[#allocation215_spill] sm:$0xff] }
 0x73a   : > { %v5426_v55 = vsel %vm5416_vm10, %v21475_v51, %v21474_v45  ;;  %v5508_v48 = vsel %vm5501_vm15, %v5491_v13, %v21476_v43  ;;  %v21478_v26 = vld [vmem:[#allocation128_spill] sm:$0xff]  ;;  %v21479_v42 = vld [vmem:[#allocation214_spill] sm:$0xff]  ;;  %v6245_v27 = vsel %vm5450_vm12, %v6221_v49, %v18477_v16  ;;  %v5557_v23 = vsel %vm5552_vm4, %v5540_v39, %v21481_v11  ;;  %v21482_v22 = vld [vmem:[#allocation349_spill] sm:$0xff] }
 0x73b   : > { %v5425_v35 = vsel %vm5416_vm10, %v21478_v26, %v21477_v4  ;;  %v5509_v34 = vsel %vm5501_vm15, %v5492_v0, %v21479_v42  ;;  %v18612_v21 = vpop.permute.xlu1 %5360  ;;  %v21480_v50 = vld [vmem:[#allocation296_spill] sm:$0xff]  ;;  %v6269_v20 = vsel %vm5467_vm13, %v6245_v27, %v6006_v61  ;;  %v21483_v32 = vld [vmem:[#allocation199_spill] sm:$0xff]  ;;  %v21486_v47 = vld [vmem:[#allocation354_spill] sm:$0xff]  ;;  %v6318_v31 = vsel %vm5501_vm15, %v6294_v18, %v18235_v5 }
 0x73c   : > { %v5463_v44 = vsel %vm5450_vm12, %v5446_v8, %v21480_v50  ;;  %v5443_v60 = vsel %vm5433_vm11, %v5426_v55, %v21483_v32  ;;  %v21484_v46 = vld [vmem:[#allocation191_spill] sm:$0xff]  ;;  %v5431_v7 = vsel %vm5416_vm10, %v18063_v6, %v21486_v47  ;;  %v21487_v8 = vld [vmem:[#allocation189_spill] sm:$0xff]  ;;  %v21490_v0 = vld [vmem:[#allocation212_spill] sm:$0xff]  ;;  %v6293_v55 = vsel %vm5484_vm14, %v6269_v20, %v18328_v14 }
 0x73d   : > { %v6051_v28 = vpop.permute.xlu0 %6050  ;;  %v5480_v40 = vsel %vm5467_vm13, %v5463_v44, %v21482_v22  ;;  %v5525_v52 = vsel %vm5518_vm1, %v5508_v48, %v21484_v46  ;;  %v21485_v3 = vld [vmem:[#allocation351_spill] sm:$0xff]  ;;  %v5442_v9 = vsel %vm5433_vm11, %v5425_v35, %v21487_v8  ;;  %v21488_v49 = vld [vmem:[#allocation201_spill] sm:$0xff]  ;;  %v5574_v6 = vsel %vm5569_vm5, %v5557_v23, %v21490_v0  ;;  %v21492_v48 = vld [vmem:[#allocation230_spill] sm:$0xff] }
 0x73e   : > { %v6292_v13 = vsel %vm5484_vm14, %v6268_v29, %v6051_v28  ;;  %v5497_v16 = vsel %vm5484_vm14, %v5480_v40, %v21485_v3  ;;  %v5526_v61 = vsel %vm5518_vm1, %v5509_v34, %v21488_v49  ;;  %v21489_v30 = vld [vmem:[#allocation217_spill] sm:$0xff]  ;;  %v21491_v45 = vld [vmem:[#allocation223_spill] sm:$0xff]  ;;  %v21494_v5 = vld [vmem:[#allocation330_spill] sm:$0xff]  ;;  %v6381_v44 = vrot.slane %v6318_v31, 1 }
 0x73f   : > { %v6316_v10 = vsel %vm5501_vm15, %v6292_v13, %v18257_v38  ;;  %v18644_v39 = vpop.permute.xlu1 %5211  ;;  %v5558_v56 = vsel %vm5552_vm4, %v5541_v33, %v21489_v30  ;;  %v5542_v51 = vsel %vm5535_vm2, %v5525_v52, %v21491_v45  ;;  %v5459_v38 = vsel %vm5450_vm12, %v5442_v9, %v21492_v48  ;;  %v21493_v4 = vld [vmem:[#allocation337_spill] sm:$0xff]  ;;  %v21495_v29 = vld [vmem:[#allocation216_spill] sm:$0xff]  ;;  %v21497_v28 = vld [vmem:[#allocation271_spill] sm:$0xff] }
 0x740   : > { %v5514_v26 = vsel %vm5501_vm15, %v5497_v16, %v21493_v4  ;;  %v5448_v35 = vsel %vm5433_vm11, %v5431_v7, %v21494_v5  ;;  %v6378_v34 = vrot.slane %v6316_v10, 1  ;;  %v5575_v14 = vsel %vm5569_vm5, %v5558_v56, %v21495_v29  ;;  %v21496_v18 = vld [vmem:[#allocation261_spill] sm:$0xff]  ;;  %v21498_v40 = vld [vmem:[#allocation334_spill] sm:$0xff]  ;;  %v21501_v52 = vld [vmem:[#allocation220_spill] sm:$0xff] }
 0x741   : > { %v6120_v43 = vpop.permute.xlu0 %6119  ;;  %v5465_v42 = vsel %vm5450_vm12, %v5448_v35, %v17436_v19  ;;  %v5476_v27 = vsel %vm5467_vm13, %v5459_v38, %v21496_v18  ;;  %v5559_v11 = vsel %vm5552_vm4, %v5542_v51, %v21497_v28  ;;  %v5531_v19 = vsel %vm5518_vm1, %v5514_v26, %v21498_v40  ;;  %v21502_v16 = vld [vmem:[#allocation263_spill] sm:$0xff]  ;;  %v21503_v7 = vld [vmem:[#allocation232_spill] sm:$0xff]  ;;  %v21505_v49 = vld [vmem:[#allocation269_spill] sm:$0xff] }
 0x742   : > { %v6317_v33 = vsel %vm5501_vm15, %v6293_v55, %v6120_v43  ;;  %v5482_v23 = vsel %vm5467_vm13, %v5465_v42, %v17524_v59  ;;  %vm21499_vm0 = vcmask 1046528   ;;  %v5591_v3 = vsel %vm5586_vm8, %v5574_v6, %v21501_v52  ;;  %v21504_v8 = vld [vmem:[#allocation264_spill] sm:$0xff]  ;;  %v21506_v10 = vld [vmem:[#allocation190_spill] sm:$0xff]  ;;  %v21513_v35 = vld [vmem:[#allocation275_spill] sm:$0xff] }
 0x743   : > { %v6379_v50 = vrot.slane %v6317_v33, 1  ;;  %v18673_v22 = vpop.permute.xlu1 %5264  ;;  %v5499_v20 = vsel %vm5484_vm14, %v5482_v23, %v17552_v58  ;;  %vm21500_vm3 = vmmov %vm21499_vm0  ;;  %v5493_v47 = vsel %vm5484_vm14, %v5476_v27, %v21502_v16  ;;  %v5460_v58 = vsel %vm5450_vm12, %v5443_v60, %v21503_v7  ;;  %v21507_v56 = vld [vmem:[#allocation222_spill] sm:$0xff]  ;;  %v21508_v6 = vld [vmem:[#allocation252_spill] sm:$0xff] }
 0x744   : > { %v5510_v9 = vsel %vm5501_vm15, %v5493_v47, %v21504_v8  ;;  %v5427_v31 = vsel %vm5416_vm10, %v21506_v10, %v21505_v49  ;;  %v18697_v30 = vpack.c.bf16 %v18386_v53, %v18381_v57  ;;  %v5592_v0 = vsel %vm5586_vm8, %v5575_v14, %v21507_v56  ;;  %v21509_v51 = vld [vmem:[#allocation266_spill] sm:$0xff]  ;;  %v21510_v55 = vld [vmem:[#allocation348_spill] sm:$0xff]  ;;  %v21522_v52 = vld [vmem:[#allocation233_spill] sm:$0xff] }
 0x745   : > { %v5006_v13 = vpop.permute.xlu0 %5005  ;;  %v6382_v32 = vsel %vm21499_vm0, %v6379_v50, %v6381_v44  ;;  %v6380_v46 = vsel %vm21500_vm3, %v6378_v34, %v6379_v50  ;;  %v5477_v45 = vsel %vm5467_vm13, %v5460_v58, %v21508_v6  ;;  %v5576_v60 = vsel %vm5569_vm5, %v5559_v11, %v21509_v51  ;;  %v21511_v38 = vld [vmem:[#allocation236_spill] sm:$0xff]  ;;  %v21512_v26 = vld [vmem:[#allocation254_spill] sm:$0xff]  ;;  %v21518_v11 = vld [vmem:[#allocation187_spill] sm:$0xff] }
 0x746   : > { %v5516_v59 = vsel %vm5501_vm15, %v5499_v20, %v5006_v13  ;;  %6413 = vrot.lane.b32.xlu1 %v6382_v32, %s13708_s17  ;;  %6411 = vrot.lane.b32.xlu0 %v6380_v46, %s13708_s17  ;;  %v5548_v43 = vsel %vm5535_vm2, %v5531_v19, %v21510_v55  ;;  %v5543_v4 = vsel %vm5535_vm2, %v5526_v61, %v21511_v38  ;;  %v21514_v42 = vld [vmem:[#allocation40_spill] sm:$0xff]  ;;  %v21515_v44 = vld [vmem:[#allocation226_spill] sm:$0xff]  ;;  %v21521_v32 = vld [vmem:[#allocation273_spill] sm:$0xff]  ;;  %vm6431_vm3 = vcmask 523264  }
 0x747   : > { %v18707_v48 = vpop.permute.xlu1 %5266  ;;  %v5494_v5 = vsel %vm5484_vm14, %v5477_v45, %v21512_v26  ;;  %v5593_v33 = vsel %vm5586_vm8, %v5576_v60, %v21513_v35  ;;  %v5565_v34 = vsel %vm5552_vm4, %v5548_v43, %v21514_v42  ;;  %v5527_v29 = vsel %vm5518_vm1, %v5510_v9, %v21515_v44  ;;  %v21516_v14 = vld [vmem:[#allocation268_spill] sm:$0xff]  ;;  %v21519_v40 = vld [vmem:[#allocation186_spill] sm:$0xff]  ;;  %v21523_v47 = vld [vmem:[#allocation219_spill] sm:$0xff] }
 0x748   : > { %v5511_v18 = vsel %vm5501_vm15, %v5494_v5, %v21516_v14  ;;  %v21517_v27 = vld [vmem:[#allocation224_spill] sm:$0xff]  ;;  %v18727_v23 = vsel %vm5620_vm7, %v18598_v25, %v21518_v11  ;;  %v5608_v19 = vsel %vm5603_vm9, %v5591_v3, %v21519_v40  ;;  %v21520_v20 = vld [vmem:[#allocation198_spill] sm:$0xff]  ;;  %v5560_v46 = vsel %vm5552_vm4, %v5543_v4, %v21521_v32  ;;  %v13645_v49 = vld [vmem:[%s20045_s8 + $0x18] sm:$0xff] }
 0x749   : > { %v5208_v50 = vpop.permute.xlu0 %5207  ;;  %v5444_v28 = vsel %vm5433_vm11, %v5427_v31, %v21517_v27  ;;  %v5609_v13 = vsel %vm5603_vm9, %v5592_v0, %v21520_v20  ;;  %v18737_v16 = vsel %vm5620_vm7, %v5608_v19, %v21522_v52  ;;  %v5610_v7 = vsel %vm5603_vm9, %v5593_v33, %v21523_v47  ;;  %v13644_v25 = vld [vmem:[%s20045_s8 + $0x10] sm:$0xff]  ;;  %v21524_v3 = vld [vmem:[#allocation156_spill] sm:$0xff]  ;;  %v21528_v0 = vld [vmem:[#allocation239_spill] sm:$0xff] }
 0x74a   : > { %v5582_v61 = vsel %vm5569_vm5, %v5565_v34, %v5208_v50  ;;  %v21525_v8 = vand.u32 4294901760, %v21524_v3  ;;  %v21526_v10 = vld [vmem:[#allocation26_spill] sm:$0xff]  ;;  %v18759_v6 = vsel %vm5620_vm7, %v5609_v13, %v21528_v0  ;;  %v21529_v45 = vld [vmem:[#allocation253_spill] sm:$0xff]  ;;  %v21531_v43 = vld [vmem:[#allocation240_spill] sm:$0xff]  ;;  %vm6468_vm10 = vcmask 818176  }
 0x74b   : > { %v18741_v58 = vpop.permute.xlu1 %5316  ;;  %v21527_v31 = vand.u32 4294901760, %v21526_v10  ;;  %v18763_v51 = vsel %vm5518_vm1, %v5511_v18, %v21529_v45  ;;  %v21530_v60 = vld [vmem:[#allocation241_spill] sm:$0xff]  ;;  %v18769_v38 = vsel %vm5535_vm2, %v5527_v29, %v21531_v43  ;;  %v21532_v26 = vld [vmem:[#allocation270_spill] sm:$0xff]  ;;  %v21533_v34 = vld [vmem:[#allocation243_spill] sm:$0xff]  ;;  %vm21660_vm11 = vcmask 64512  }
 0x74c   : > { %v18748_v9 = vsub.f32 %v13644_v25, %v21525_v8  ;;  %v5461_v55 = vsel %vm5450_vm12, %v5444_v28, %v21530_v60  ;;  %v5577_v5 = vsel %vm5569_vm5, %v5560_v46, %v21532_v26  ;;  %v18782_v50 = vsel %vm5620_vm7, %v5610_v7, %v21533_v34  ;;  %v13646_v44 = vld [vmem:[%s20045_s8 + $0x20] sm:$0xff]  ;;  %v13647_v11 = vld [vmem:[%s20045_s8 + $0x28] sm:$0xff]  ;;  %v21538_v13 = vld [vmem:[#allocation306_spill] sm:$0xff] }
 0x74d   : > { %v18755_v56 = vsub.f32 %v13645_v49, %v21527_v31  ;;  %v5056_v4 = vpop.permute.xlu0 %5055  ;;  %v21534_v29 = vld [vmem:[#allocation160_spill] sm:$0xff]  ;;  %v21536_v40 = vld [vmem:[#allocation161_spill] sm:$0xff]  ;;  %v5478_v32 = vsel %vm5467_vm13, %v5461_v55, %v21538_v13  ;;  %v13648_v47 = vld [vmem:[%s20045_s8 + $0x30] sm:$0xff] }
 0x74e   : > { %v5533_v35 = vsel %vm5518_vm1, %v5516_v59, %v5056_v4  ;;  %v21535_v14 = vand.u32 4294901760, %v21534_v29  ;;  %v20443_v28 = vand.u32 4294901760, %v18748_v9  ;;  %v21537_v19 = vand.u32 4294901760, %v21536_v40  ;;  %v21539_v7 = vld [vmem:[#allocation119_spill] sm:$0xff]  ;;  %v21544_v34 = vld [vmem:[#allocation8_spill] sm:$0xff]  ;;  %vm21662_vm13 = vmmov %vm21660_vm11 }
 0x74f   : > { %v18776_v33 = vpack.c.bf16 %v18755_v56, %v18748_v9  ;;  %v5550_v42 = vsel %vm5535_vm2, %v5533_v35, %v18501_v41  ;;  %v6384_v27 = vpop.permute.xlu1 %6383  ;;  %v20441_v41 = vand.u32 4294901760, %v18755_v56  ;;  %v21540_v25 = vand.u32 4294901760, %v21539_v7  ;;  %v21543_v35 = vld [vmem:[#allocation277_spill] sm:$0xff] }
 0x750   : > { %v18789_v59 = vsub.f32 %v13646_v44, %v21535_v14  ;;  %v5567_v18 = vsel %vm5552_vm4, %v5550_v42, %v18573_v62  ;;  %v18800_v20 = vsub.f32 %v13647_v11, %v21537_v19  ;;  %v6432_v46 = vsel %vm6431_vm3, %v18537_v24, %v6384_v27  ;;  %v13649_v24 = vld [vmem:[%s20045_s8 + $0x38] sm:$0xff] }
 0x751   : > { %v5261_v62 = vpop.permute.xlu0 %5260  ;;  %v5584_v52 = vsel %vm5569_vm5, %v5567_v18, %v18644_v39  ;;  %v18813_v3 = vsub.f32 %v13648_v47, %v21540_v25  ;;  %v6470_v8 = vsel %vm6468_vm10, %v6432_v46, 0  ;;  %v21541_v39 = vld [vmem:[#allocation203_spill] sm:$0xff]  ;;  %v6776_v4 = vsub.f32 %v18748_v9, %v20443_v28 }
 0x752   : > { %v5599_v49 = vsel %vm5586_vm8, %v5582_v61, %v5261_v62  ;;  %v18819_v10 = vsel %vm5586_vm8, %v5584_v52, %v18673_v22  ;;  %v21542_v31 = vand.u32 4294901760, %v21541_v39  ;;  %v18828_v45 = vand.u32 4294901760, %v6470_v8  ;;  %v21545_v52 = vld [vmem:[#allocation207_spill] sm:$0xff]  ;;  %v21547_v39 = vld [vmem:[#allocation193_spill] sm:$0xff] }
 0x753   : > { %v5616_v60 = vsel %vm5603_vm9, %v5599_v49, %v18533_v37  ;;  %v20439_v55 = vand.u32 4294901760, %v18789_v59  ;;  %v18835_v61 = vpack.c.bf16 %v18800_v20, %v18789_v59  ;;  %v6386_v22 = vpop.permute.xlu1 %6385  ;;  %v6783_v26 = vsub.f32 %v18755_v56, %v20441_v41 }
 0x754   : > { %v18826_v0 = vsub.f32 %v13649_v24, %v21542_v31  ;;  %v18839_v43 = vsel %vm5620_vm7, %v5616_v60, %v18612_v21  ;;  %v20438_v37 = vand.u32 4294901760, %v18800_v20  ;;  %v18850_v42 = vsel %vm5586_vm8, %v5577_v5, %v21543_v35 }
 0x755   : > { %v18854_v44 = vsel %vm5484_vm14, %v5478_v32, %v21544_v34  ;;  %v18857_v21 = vsub.f32 %v6470_v8, %v18828_v45  ;;  %v6433_v29 = vsel %vm6431_vm3, %v18528_v15, %v6386_v22  ;;  %v5058_v14 = vpop.permute.xlu0 %5057  ;;  %v20437_v11 = vand.u32 4294901760, %v18813_v3 }
 0x756   : > { %v6473_v18 = vsel %vm6468_vm10, %v6433_v29, 0  ;;  %v5534_v27 = vsel %vm5518_vm1, %v18437_v1, %v5058_v14  ;;  %v20436_v5 = vand.u32 4294901760, %v18826_v0  ;;  %v6790_v13 = vsub.f32 %v18789_v59, %v20439_v55 }
 0x757   : > { %v18866_v40 = vand.u32 4294901760, %v6473_v18  ;;  %v20445_v19 = vand.u32 4294901760, %v18857_v21  ;;  %v18874_v15 = vpack.c.bf16 %v18826_v0, %v18813_v3  ;;  %v6777_v46 = vand.u32 4294901760, %v6776_v4 }
 0x758   : > { %v6784_v62 = vand.u32 4294901760, %v6783_v26  ;;  %v6797_v1 = vsub.f32 %v18800_v20, %v20438_v37  ;;  %v21546_v47 = vand.u32 4294901760, %v21545_v52  ;;  %v21548_v31 = vand.u32 4294901760, %v21547_v39 }
 0x759   : > { %v6388_v32 = vpop.permute.xlu1 %6387  ;;  %v18885_v25 = vsub.f32 %v6473_v18, %v18866_v40  ;;  %v6601_v24 = vsub.f32 %v18857_v21, %v20445_v19  ;;  %v6811_v26 = vsub.f32 %v18826_v0, %v20436_v5 }
 0x75a   : > { %v18882_v7 = vsub.f32 %v21545_v52, %v21546_v47  ;;  %v6434_v8 = vsel %vm6431_vm3, %v18727_v23, %v6388_v32  ;;  %v5263_v49 = vpop.permute.xlu0 %5262  ;;  %v18895_v60 = vsub.f32 %v21547_v39, %v21548_v31  ;;  %v6804_v23 = vsub.f32 %v18813_v3, %v20437_v11  ;;  %v13650_v47 = vld [vmem:[%s20045_s8 + $0x50] sm:$0xff] }
 0x75b   : > { %v6476_v22 = vsel %vm6468_vm10, %v6434_v8, 0  ;;  %v18900_v4 = vsel %vm5586_vm8, %v18475_v54, %v5263_v49  ;;  %v20440_v35 = vand.u32 4294901760, %v18885_v25  ;;  %v6602_v29 = vand.u32 4294901760, %v6601_v24  ;;  %v21550_v8 = vld [vmem:[#allocation59_spill] sm:$0xff] }
 0x75c   : > { %21549 = vst [vmem:[#allocation255_spill] sm:$0xff] %v18895_v60  ;;  %v18909_v34 = vand.u32 4294901760, %v6476_v22  ;;  %v18913_v14 = vpack.c.bf16 %v18895_v60, %v18882_v7  ;;  %v12716_v54 = vpack.c.bf16 %v6784_v62, %v6777_v46  ;;  %v6791_v32 = vand.u32 4294901760, %v6790_v13  ;;  %v13651_v62 = vld [vmem:[%s20045_s8 + $0x58] sm:$0xff] }
 0x75d   : > { %v6390_v18 = vpop.permute.xlu1 %6389  ;;  %v6798_v52 = vand.u32 4294901760, %v6797_v1  ;;  %v21551_v49 = vand.u32 4294901760, %v21550_v8  ;;  %v6611_v24 = vsub.f32 %v18885_v25, %v20440_v35  ;;  %12102 = vmatprep.mubr.f32.mxu0 %v6602_v29  ;;  %v21553_v1 = vld [vmem:[#allocation182_spill] sm:$0xff]  ;;  %v20446_v11 = vand.u32 4294901760, %v18895_v60 }
 0x75e   : > { %v18926_v31 = vsub.f32 %v6476_v22, %v18909_v34  ;;  %v6435_v46 = vsel %vm6431_vm3, %v18594_v63, %v6390_v18  ;;  %v5108_v13 = vpop.permute.xlu0 %5107  ;;  %v21554_v8 = vand.u32 4294901760, %v21553_v1  ;;  %v20444_v22 = vand.u32 4294901760, %v18882_v7  ;;  %v21556_v1 = vld [vmem:[#allocation281_spill] sm:$0xff] }
 0x75f   : > { %v18920_v39 = vsub.f32 %v13650_v47, %v21551_v49  ;;  %v6479_v49 = vsel %vm6468_vm10, %v6435_v46, 0  ;;  %v5551_v5 = vsel %vm5535_vm2, %v5534_v27, %v5108_v13  ;;  %v6612_v37 = vand.u32 4294901760, %v6611_v24 }
 0x760   : > { %v18935_v47 = vsub.f32 %v13651_v62, %v21554_v8  ;;  %v18941_v63 = vand.u32 4294901760, %v6479_v49  ;;  %v20442_v29 = vand.u32 4294901760, %v18926_v31  ;;  %v5545_v62 = vsel %vm5535_vm2, %v18763_v51, %v21556_v1  ;;  %v21557_v1 = vld [vmem:[#allocation305_spill] sm:$0xff] }
 0x761   : > { %21552 = vst [vmem:[#allocation228_spill] sm:$0xff] %v18920_v39  ;;  %v6392_v46 = vpop.permute.xlu1 %6391  ;;  %v6805_v8 = vand.u32 4294901760, %v6804_v23  ;;  %v6812_v27 = vand.u32 4294901760, %v6811_v26  ;;  %v20447_v13 = vand.u32 4294901760, %v18920_v39  ;;  %12103 = vmatmul.mubr.f32.vlgmr.msra.gmra.mrb[30].mxu0 %v6612_v37  ;;  %v5512_v23 = vsel %vm5501_vm15, %v18854_v44, %v21557_v1  ;;  %v21558_v44 = vld [vmem:[#allocation317_spill] sm:$0xff] }
 0x762   : > { %21555 = vst [vmem:[#allocation229_spill] sm:$0xff] %v18935_v47  ;;  %v18946_v18 = vpack.c.bf16 %v18935_v47, %v18920_v39  ;;  %v18953_v55 = vsub.f32 %v6479_v49, %v18941_v63  ;;  %v6436_v24 = vsel %vm6431_vm3, %v18737_v16, %v6392_v46  ;;  %v18957_v35 = vpop.permute.xlu0 %5312  ;;  %v6621_v41 = vsub.f32 %v18926_v31, %v20442_v29 }
 0x763   : > { %v20450_v51 = vand.u32 4294901760, %v18935_v47  ;;  %v6482_v26 = vsel %vm6468_vm10, %v6436_v24, 0  ;;  %12715 = vmatpush3.bf16.msra.mxu0 %v18448_v17  ;;  %v12720_v49 = vpack.c.bf16 %v6798_v52, %v6791_v32  ;;  %v6818_v16 = vsub.f32 %v18882_v7, %v20444_v22  ;;  %v21559_v17 = vld [vmem:[#allocation319_spill] sm:$0xff] }
 0x764   : > { %v18971_v37 = vand.u32 4294901760, %v6482_v26  ;;  %v6622_v46 = vand.u32 4294901760, %v6621_v41  ;;  %v20448_v29 = vand.u32 4294901760, %v18953_v55  ;;  %12717 = vmatprep.subr.bf16.mxu0 %v12716_v54  ;;  %v6825_v28 = vsub.f32 %v18895_v60, %v20446_v11  ;;  %v21572_v60 = vld [vmem:[#allocation355_spill] sm:$0xff] }
 0x765   : > { %v5561_v24 = vsel %vm5552_vm4, %v18769_v38, %v21558_v44  ;;  %v5562_v32 = vsel %vm5552_vm4, %v5545_v62, %v21559_v17  ;;  %v6394_v52 = vpop.permute.xlu1 %6393  ;;  %v12724_v1 = vpack.c.bf16 %v6812_v27, %v6805_v8  ;;  %v6832_v41 = vsub.f32 %v18920_v39, %v20447_v13  ;;  %v21560_v44 = vld [vmem:[#allocation192_spill] sm:$0xff]  ;;  %v21561_v17 = vld [vmem:[#allocation195_spill] sm:$0xff] }
 0x766   : > { %v18986_v22 = vsub.f32 %v6482_v26, %v18971_v37  ;;  %v6437_v19 = vsel %vm6431_vm3, %v18759_v6, %v6394_v52  ;;  %12105 = vmatprep.mubr.f32.mxu0 %v6622_v46  ;;  %v5161_v11 = vpop.permute.xlu0 %5160  ;;  %v6631_v38 = vsub.f32 %v18953_v55, %v20448_v29  ;;  %v6839_v62 = vsub.f32 %v18935_v47, %v20450_v51  ;;  %v21566_v47 = vld [vmem:[#allocation321_spill] sm:$0xff] }
 0x767   : > { %v6485_v8 = vsel %vm6468_vm10, %v6437_v19, 0  ;;  %v5568_v27 = vsel %vm5552_vm4, %v5551_v5, %v5161_v11  ;;  %12719 = vmatpush3.bf16.msra.mxu0 %v12716_v54  ;;  %v6819_v26 = vand.u32 4294901760, %v6818_v16  ;;  %v19000_v13 = vsub.f32 %v21561_v17, %v21560_v44  ;;  %v21563_v19 = vld [vmem:[#allocation4_spill] sm:$0xff]  ;;  %v21564_v5 = vld [vmem:[#allocation309_spill] sm:$0xff]  ;;  %v21565_v16 = vld [vmem:[#allocation282_spill] sm:$0xff] }
 0x768   : > { %v19002_v6 = vand.u32 4294901760, %v6485_v8  ;;  %v6632_v46 = vand.u32 4294901760, %v6631_v38  ;;  %12721 = vmatprep.subr.bf16.mxu0 %v12720_v49  ;;  %v6826_v29 = vand.u32 4294901760, %v6825_v28  ;;  %v5611_v51 = vsel %vm5603_vm9, %v18850_v42, %v21562_v12 }
 0x769   : > { %v5578_v11 = vsel %vm5569_vm5, %v5561_v24, %v21563_v19  ;;  %v5579_v54 = vsel %vm5569_vm5, %v5562_v32, %v21564_v5  ;;  %v5529_v17 = vsel %vm5518_vm1, %v5512_v23, %v21565_v16  ;;  %v6396_v36 = vpop.permute.xlu1 %6395  ;;  %v21567_v42 = vand.u32 4294901760, %v18986_v22  ;;  %v21569_v16 = vld [vmem:[#allocation274_spill] sm:$0xff] }
 0x76a   : > { %v5595_v38 = vsel %vm5586_vm8, %v5578_v11, %v21566_v47  ;;  %v19017_v52 = vsub.f32 %v6485_v8, %v19002_v6  ;;  %v6438_v28 = vsel %vm6431_vm3, %v18782_v50, %v6396_v36  ;;  %12106 = vmatmul.mubr.f32.gmra.mrb[32].mxu0 %v6632_v46  ;;  %v19021_v12 = vpop.permute.xlu0 %5362  ;;  %v6833_v23 = vand.u32 4294901760, %v6832_v41  ;;  %v21568_v46 = vld [vmem:[#allocation288_spill] sm:$0xff]  ;;  %v21571_v41 = vld [vmem:[#allocation289_spill] sm:$0xff] }
 0x76b   : > { %v6641_v24 = vsub.f32 %v18986_v22, %v21567_v42  ;;  %v6488_v32 = vsel %vm6468_vm10, %v6438_v28, 0  ;;  %12723 = vmatpush3.bf16.msra.mxu0 %v12720_v49  ;;  %v6840_v19 = vand.u32 4294901760, %v6839_v62  ;;  %v19028_v47 = vand.u32 4294901760, %v19000_v13  ;;  %v21570_v28 = vld [vmem:[#allocation323_spill] sm:$0xff] }
 0x76c   : > { %v19030_v8 = vand.u32 4294901760, %v6488_v32  ;;  %12725 = vmatprep.subr.bf16.mxu0 %v12724_v1  ;;  %v12728_v50 = vpack.c.bf16 %v6826_v29, %v6819_v26  ;;  %v5628_v5 = vsel %vm5620_vm7, %v5611_v51, %v21568_v46  ;;  %v5612_v42 = vsel %vm5603_vm9, %v5595_v38, %v21569_v16 }
 0x76d   : > { %v6642_v11 = vand.u32 4294901760, %v6641_v24  ;;  %v5596_v49 = vsel %vm5586_vm8, %v5579_v54, %v21570_v28  ;;  %v5546_v62 = vsel %vm5535_vm2, %v5529_v17, %v21571_v41  ;;  %v6398_v39 = vpop.permute.xlu1 %6397  ;;  %v21573_v26 = vand.u32 4294901760, %v19017_v52 }
 0x76e   : > { %v5563_v24 = vsel %vm5552_vm4, %v5546_v62, %v21572_v60  ;;  %v19044_v36 = vsub.f32 %v6488_v32, %v19030_v8  ;;  %v6439_v29 = vsel %vm6431_vm3, %v5628_v5, %v6398_v39  ;;  %v5214_v51 = vpop.permute.xlu0 %5213  ;;  %v12732_v17 = vpack.c.bf16 %v6840_v19, %v6833_v23  ;;  %v21574_v5 = vld [vmem:[#allocation298_spill] sm:$0xff] }
 0x76f   : > { %12108 = vmatprep.mubr.f32.mxu0 %v6642_v11  ;;  %v6651_v38 = vsub.f32 %v19017_v52, %v21573_v26  ;;  %v6491_v54 = vsel %vm6468_vm10, %v6439_v29, 0  ;;  %v5585_v46 = vsel %vm5569_vm5, %v5568_v27, %v5214_v51  ;;  %12727 = vmatpush3.bf16.msra.mxu0 %v12724_v1  ;;  %v6846_v60 = vsub.f32 %v19000_v13, %v19028_v47  ;;  %v21575_v27 = vld [vmem:[#allocation340_spill] sm:$0xff]  ;;  %v21577_v26 = vld [vmem:[#allocation358_spill] sm:$0xff] }
 0x770   : > { %v19054_v16 = vand.u32 4294901760, %v6491_v54  ;;  %v5602_v39 = vsel %vm5586_vm8, %v5585_v46, %v18707_v48  ;;  %v6660_v11 = vand.u32 4294901760, %v19044_v36  ;;  %12729 = vmatprep.subr.bf16.mxu0 %v12728_v50  ;;  %v5629_v28 = vsel %vm5620_vm7, %v5612_v42, %v21574_v5  ;;  %v21576_v42 = vld [vmem:[#allocation283_spill] sm:$0xff] }
 0x771   : > { %v6652_v32 = vand.u32 4294901760, %v6651_v38  ;;  %v6400_v41 = vpop.permute.xlu1 %6399  ;;  %v19063_v1 = vsel %vm5603_vm9, %v5602_v39, %v18741_v58  ;;  %v5580_v23 = vsel %vm5569_vm5, %v5563_v24, %v21575_v27  ;;  %v5613_v51 = vsel %vm5603_vm9, %v5596_v49, %v21576_v42  ;;  %v21578_v5 = vld [vmem:[#allocation331_spill] sm:$0xff]  ;;  %vm21673_vm5 = vmmov %vm21660_vm11 }
 0x772   : > { %v19068_v19 = vsub.f32 %v6491_v54, %v19054_v16  ;;  %v6440_v48 = vsel %vm6431_vm3, %v5629_v28, %v6400_v41  ;;  %v5315_v62 = vpop.permute.xlu0 %5314  ;;  %v6661_v29 = vsub.f32 %v19044_v36, %v6660_v11  ;;  %v5597_v58 = vsel %vm5586_vm8, %v5580_v23, %v21577_v26 }
 0x773   : > { %12109 = vmatmul.mubr.f32.gmra.mrb[34].mxu0 %v6652_v32  ;;  %v6494_v38 = vsel %vm6468_vm10, %v6440_v48, 0  ;;  %v5618_v24 = vsel %vm5603_vm9, %v18819_v10, %v5315_v62  ;;  %v6847_v32 = vand.u32 4294901760, %v6846_v60  ;;  %v5630_v28 = vsel %vm5620_vm7, %v5613_v51, %v21578_v5 }
 0x774   : > { %12731 = vmatpush3.bf16.msra.mxu0 %v12728_v50  ;;  %v19081_v54 = vand.u32 4294901760, %v6494_v38  ;;  %v6662_v46 = vand.u32 4294901760, %v6661_v29  ;;  %v6670_v39 = vand.u32 4294901760, %v19068_v19  ;;  %v21579_v50 = vld [vmem:[#allocation318_spill] sm:$0xff] }
 0x775   : > { %12733 = vmatprep.subr.bf16.mxu0 %v12732_v17  ;;  %v6402_v49 = vpop.permute.xlu1 %6401  ;;  %v5614_v48 = vsel %vm5603_vm9, %v5597_v58, %v21579_v50  ;;  %v21580_v58 = vld [vmem:[#allocation350_spill] sm:$0xff] }
 0x776   : > { %v19087_v41 = vsub.f32 %v6494_v38, %v19081_v54  ;;  %v6441_v27 = vsel %vm6431_vm3, %v5630_v28, %v6402_v49  ;;  %12111 = vmatprep.mubr.f32.mxu0 %v6662_v46  ;;  %v5365_v23 = vpop.permute.xlu0 %5364  ;;  %v6671_v10 = vsub.f32 %v19068_v19, %v6670_v39  ;;  %v5631_v5 = vsel %vm5620_vm7, %v5614_v48, %v21580_v58 }
 0x777   : > { %v6497_v60 = vsel %vm6468_vm10, %v6441_v27, 0  ;;  %v19097_v62 = vsel %vm5620_vm7, %v5618_v24, %v5365_v23 }
 0x778   : > { %12735 = vmatpush3.bf16.msra.mxu0 %v12732_v17  ;;  %v19099_v29 = vand.u32 4294901760, %v6497_v60  ;;  %v6672_v42 = vand.u32 4294901760, %v6671_v10  ;;  %v20460_v51 = vand.u32 4294901760, %v19087_v41 }
 0x779   : > { %12150 = vmatprep.subr.mxu0 %v6847_v32  ;;  %v6406_v26 = vpop.permute.xlu1 %6405 }
 0x77a   : > { %v19103_v38 = vsub.f32 %v6497_v60, %v19099_v29  ;;  %v6443_v46 = vsel %vm6431_vm3, %v18409_v2, %v6406_v26  ;;  %12112 = vmatmul.mubr.f32.gmra.mrb[36].mxu0 %v6672_v42  ;;  %v6404_v24 = vpop.permute.xlu0 %6403  ;;  %v6681_v17 = vsub.f32 %v19087_v41, %v20460_v51 }
 0x77b   : > { %v6503_v28 = vsel %vm6468_vm10, %v6443_v46, 0  ;;  %v6442_v49 = vsel %vm6431_vm3, %v5631_v5, %v6404_v24 }
 0x77c   : > { %12151 = vmatpush3.msra.mxu0 %v6847_v32  ;;  %v19114_v27 = vand.u32 4294901760, %v6503_v28  ;;  %v6500_v23 = vsel %vm6468_vm10, %v6442_v49, 0  ;;  %v6682_v10 = vand.u32 4294901760, %v6681_v17  ;;  %v20457_v2 = vand.u32 4294901760, %v19103_v38 }
 0x77d   : > { %12737 = vmatprep.subr.bf16.mxu0 %v18697_v30  ;;  %v19119_v50 = vand.u32 4294901760, %v6500_v23  ;;  %v5617_v49 = vsel %vm5603_vm9, %v18900_v4, %v18957_v35  ;;  %vm21678_vm9 = vmmov %vm21673_vm5 }
 0x77e   : > { %v19122_v48 = vsub.f32 %v6503_v28, %v19114_v27  ;;  %12114 = vmatprep.mubr.f32.mxu0 %v6682_v10  ;;  %v6691_v60 = vsub.f32 %v19103_v38, %v20457_v2 }
 0x77f   : > { %v19128_v32 = vsub.f32 %v6500_v23, %v19119_v50  ;;  %v5634_v23 = vsel %vm5620_vm7, %v5617_v49, %v19021_v12 }
 0x780   : > { %v6692_v42 = vand.u32 4294901760, %v6691_v60  ;;  %v20455_v26 = vand.u32 4294901760, %v19122_v48 }
 0x781   : > { %v20456_v46 = vand.u32 4294901760, %v19128_v32 }
 0x782   : > { %12115 = vmatmul.mubr.f32.gmra.mrb[38].mxu0 %v6692_v42  ;;  %v6711_v58 = vsub.f32 %v19122_v48, %v20455_v26 }
 0x783   : > { %v6701_v5 = vsub.f32 %v19128_v32, %v20456_v46 }
 0x784   : > { %v6712_v17 = vand.u32 4294901760, %v6711_v58  ;;  %v19150_v58 = vld [vmem:[%s20042_s5] ss:$0 sm:$0xff] }
 0x785   : > { %v6702_v24 = vand.u32 4294901760, %v6701_v5 }
 0x787   : > { %12117 = vmatprep.mubr.f32.mxu0 %v6702_v24 }
 0x788   : > { %12118 = vmatmul.mubr.f32.gmra.mrb[40].mxu0 %v6712_v17 }
 0x78c   : > { %v6410_v28 = vpop.permute.xlu0 %6409 }
 0x78d   : > { %v6445_v10 = vsel %vm6431_vm3, %v5634_v23, %v6410_v28 }
 0x78e   : > { %v6509_v60 = vsel %vm6468_vm10, %v6445_v10, 0 }
 0x78f   : > { %v19145_v42 = vand.u32 4294901760, %v6509_v60 }
 0x791   : > { %v19153_v5 = vsub.f32 %v6509_v60, %v19145_v42 }
 0x793   : > { %v20458_v10 = vand.u32 4294901760, %v19153_v5 }
 0x799   : > { %v12510_v35 = vpop.f32.mrb[60].mxu1 }
 0x79a   : > { %v12940_v17 = vadd.f32 %v12510_v35, %v19150_v58  ;;  %v9083_v28 = vpop.f32.mrb[61].mxu1 }
 0x79b   : > { %v12941_v23 = vadd.f32 %v19150_v58, %v9083_v28  ;;  %v6731_v28 = vsub.f32 %v19153_v5, %v20458_v10 }
 0x79c   : > { %9259 = vrot.lane.b32.xlu1 %v12940_v17, %s20784_s15 }
 0x79d   : > { %v6408_v24 = vpop.permute.xlu1 %6407  ;;  %9257 = vrot.lane.b32.xlu0 %v12941_v23, %s20784_s15 }
 0x79e   : > { %v6444_v4 = vsel %vm6431_vm3, %v18839_v43, %v6408_v24  ;;  %v12513_v26 = vpop.f32.mrb[62].mxu1 }
 0x79f   : > { %v6506_v12 = vsel %vm6468_vm10, %v6444_v4, 0  ;;  %v12942_v43 = vadd.f32 %v12513_v26, %v19150_v58  ;;  %v9095_v24 = vpop.f32.mrb[63].mxu1 }
 0x7a0   : > { %v19159_v49 = vand.u32 4294901760, %v6506_v12  ;;  %v12943_v35 = vadd.f32 %v19150_v58, %v9095_v24  ;;  %v6732_v24 = vand.u32 4294901760, %v6731_v28 }
 0x7a1   : > { %9263 = vrot.lane.b32.xlu1 %v12942_v43, %s20784_s15 }
 0x7a2   : > { %v19165_v60 = vsub.f32 %v6506_v12, %v19159_v49  ;;  %v12516_v17 = vpop.f32.mrb[64].mxu1  ;;  %9261 = vrot.lane.b32.xlu0 %v12943_v35, %s20784_s15 }
 0x7a3   : > { %v12944_v26 = vadd.f32 %v12516_v17, %v19150_v58  ;;  %v9107_v23 = vpop.f32.mrb[65].mxu1 }
 0x7a4   : > { %v20459_v4 = vand.u32 4294901760, %v19165_v60  ;;  %v12945_v2 = vadd.f32 %v19150_v58, %v9107_v23 }
 0x7a5   : > { %9267 = vrot.lane.b32.xlu1 %v12944_v26, %s20784_s15  ;;  %v5367_v26 = vpop.permute.xlu1 %5366 }
 0x7a6   : > { %v6721_v12 = vsub.f32 %v19165_v60, %v20459_v4  ;;  %9265 = vrot.lane.b32.xlu0 %v12945_v2, %s20784_s15 }
 0x7a7   : > { %v12519_v10 = vpop.f32.mrb[66].mxu1 }
 0x7a8   : > { %v6722_v46 = vand.u32 4294901760, %v6721_v12  ;;  %v12946_v43 = vadd.f32 %v12519_v10, %v19150_v58  ;;  %v9119_v4 = vpop.f32.mrb[67].mxu1 }
 0x7a9   : > { %v12947_v51 = vadd.f32 %v19150_v58, %v9119_v4 }
 0x7aa   : > { %12120 = vmatprep.mubr.f32.mxu0 %v6722_v46  ;;  %9271 = vrot.lane.b32.xlu1 %v12946_v43, %s20784_s15  ;;  %v5636_v43 = vsel %vm5620_vm7, %v19063_v1, %v5367_v26  ;;  %vm21658_vm7 = vcmask 31744  }
 0x7ab   : > { %12121 = vmatmul.mubr.f32.gmra.mrb[42].mxu0 %v6732_v24  ;;  %9269 = vrot.lane.b32.xlu0 %v12947_v51, %s20784_s15  ;;  %vm21661_vm12 = vmmov %vm21658_vm7 }
 0x7ac   : > { %v12522_v35 = vpop.f32.mrb[68].mxu1  ;;  %vm21663_vm14 = vmmov %vm21658_vm7 }
 0x7ad   : > { %v12948_v12 = vadd.f32 %v12522_v35, %v19150_v58  ;;  %v9131_v28 = vpop.f32.mrb[69].mxu1  ;;  %vm21665_vm15 = vmmov %vm21658_vm7 }
 0x7ae   : > { %v12949_v17 = vadd.f32 %v19150_v58, %v9131_v28  ;;  %vm21669_vm1 = vmmov %vm21658_vm7 }
 0x7af   : > { %9275 = vrot.lane.b32.xlu1 %v12948_v12, %s20784_s15  ;;  %vm21670_vm2 = vmmov %vm21669_vm1 }
 0x7b0   : > { %v12525_v46 = vpop.f32.mrb[70].mxu1  ;;  %9273 = vrot.lane.b32.xlu0 %v12949_v17, %s20784_s15  ;;  %vm21671_vm4 = vmmov %vm21669_vm1 }
 0x7b1   : > { %v12950_v2 = vadd.f32 %v12525_v46, %v19150_v58  ;;  %v9143_v10 = vpop.f32.mrb[71].mxu1  ;;  %vm21674_vm8 = vmmov %vm21669_vm1 }
 0x7b2   : > { %v12951_v4 = vadd.f32 %v19150_v58, %v9143_v10  ;;  %vm21679_vm0 = vmmov %vm21669_vm1 }
 0x7b3   : > { %9279 = vrot.lane.b32.xlu1 %v12950_v2, %s20784_s15 }
 0x7b4   : > { %v12528_v23 = vpop.f32.mrb[72].mxu1  ;;  %9277 = vrot.lane.b32.xlu0 %v12951_v4, %s20784_s15 }
 0x7b5   : > { %v12952_v51 = vadd.f32 %v12528_v23, %v19150_v58  ;;  %v9155_v24 = vpop.f32.mrb[73].mxu1 }
 0x7b6   : > { %v12953_v28 = vadd.f32 %v19150_v58, %v9155_v24 }
 0x7b7   : > { %9283 = vrot.lane.b32.xlu1 %v12952_v51, %s20784_s15 }
 0x7b8   : > { %v6414_v35 = vpop.permute.xlu1 %6413  ;;  %v6412_v12 = vpop.permute.xlu0 %6411  ;;  %9281 = vrot.lane.b32.xlu0 %v12953_v28, %s20784_s15 }
 0x7b9   : > { %v6447_v17 = vsel %vm6431_vm3, %v5636_v43, %v6414_v35  ;;  %v6446_v46 = vsel %vm6431_vm3, %v19097_v62, %v6412_v12  ;;  %vm21680_vm3 = vmmov %vm21679_vm0 }
 0x7ba   : > { %v6515_v2 = vsel %vm6468_vm10, %v6447_v17, 0  ;;  %v6512_v10 = vsel %vm6468_vm10, %v6446_v46, 0  ;;  %vm21681_vm10 = vmmov %vm21679_vm0 }
 0x7bb   : > { %v12531_v4 = vpop.f32.mrb[74].mxu1  ;;  %v19206_v23 = vand.u32 4294901760, %v6515_v2  ;;  %v19208_v1 = vand.u32 4294901760, %v6512_v10 }
 0x7bc   : > { %v12954_v26 = vadd.f32 %v12531_v4, %v19150_v58  ;;  %v9167_v24 = vpop.f32.mrb[75].mxu1  ;;  %v21589_v4 = vand.u32 4294901760, %v18857_v21 }
 0x7bd   : > { %v12955_v43 = vadd.f32 %v19150_v58, %v9167_v24  ;;  %v19213_v62 = vsub.f32 %v6515_v2, %v19206_v23  ;;  %v19216_v51 = vsub.f32 %v6512_v10, %v19208_v1  ;;  %v21588_v2 = vand.u32 4294901760, %v18386_v53 }
 0x7be   : > { %9287 = vrot.lane.b32.xlu1 %v12954_v26, %s20784_s15  ;;  %v21590_v26 = vand.u32 4294901760, %v18748_v9  ;;  %v21591_v24 = vand.u32 4294901760, %v18755_v56  ;;  %v21592_v53 = vand.u32 4294901760, %v18885_v25  ;;  %v21597_v9 = vand.u32 4294901760, %v18986_v22 }
 0x7bf   : > { %9285 = vrot.lane.b32.xlu0 %v12955_v43, %s20784_s15  ;;  %v6740_v35 = vand.u32 4294901760, %v19216_v51  ;;  %v6750_v12 = vand.u32 4294901760, %v19213_v62  ;;  %v21593_v43 = vand.u32 4294901760, %v18926_v31  ;;  %v21598_v56 = vand.u32 4294901760, %v18813_v3 }
 0x7c0   : > { %v21604_v3 = vand.u32 4294901760, %v19087_v41 }
 0x7c1   : > { %v6741_v28 = vsub.f32 %v19216_v51, %v6740_v35  ;;  %v6751_v58 = vsub.f32 %v19213_v62, %v6750_v12 }
 0x7c3   : > { %v6742_v17 = vand.u32 4294901760, %v6741_v28  ;;  %v6752_v46 = vand.u32 4294901760, %v6751_v58  ;;  %v21594_v28 = vand.u32 4294901760, %v18789_v59  ;;  %v21595_v58 = vand.u32 4294901760, %v18800_v20  ;;  %v21602_v20 = vld [vmem:[#allocation255_spill] sm:$0xff] }
 0x7c4   : > { %v21601_v59 = vand.u32 4294901760, %v18882_v7  ;;  %v21610_v7 = vand.u32 4294901760, %v19128_v32 }
 0x7c5   : > { %12123 = vmatprep.mubr.f32.mxu0 %v6742_v17  ;;  %v12792_v17 = vpack.c.bf16 %v21595_v58, %v21594_v28  ;;  %v19449_v28 = vld [vmem:[%s20046_s9] ss:$0 sm:$0xff]  ;;  %v21631_v58 = vld [vmem:[#allocation46_spill] sm:$0xff] }
 0x7c6   : > { %12124 = vmatmul.mubr.f32.gmra.mrb[44].mxu0 %v6752_v46  ;;  %v21600_v46 = vand.u32 4294901760, %v19017_v52 }
 0x7c7   : > { %12152 = vmatprep.mubr.f32.mxu0 %v18828_v45 }
 0x7ca   : > { %12153 = vmatmul.mubr.f32.vlgmr.msra.gmra.mrb[30].mxu0 %v18866_v40 }
 0x7cb   : > { %12739 = vmatpush3.bf16.msra.mxu0 %v18697_v30  ;;  %12155 = vmatprep.mubr.f32.mxu0 %v18909_v34  ;;  %v21581_v30 = vld [vmem:[#allocation41_spill] sm:$0xff] }
 0x7cc   : > { %12741 = vmatprep.subr.bf16.mxu0 %v18776_v33 }
 0x7ce   : > { %12156 = vmatmul.mubr.f32.gmra.mrb[32].mxu0 %v18941_v63 }
 0x7cf   : > { %12158 = vmatprep.mubr.f32.mxu0 %v18971_v37  ;;  %12743 = vmatpush3.bf16.msra.mxu0 %v18776_v33  ;;  %v21582_v33 = vld [vmem:[#allocation45_spill] sm:$0xff] }
 0x7d0   : > { %12745 = vmatprep.subr.bf16.mxu0 %v18835_v61 }
 0x7d2   : > { %12159 = vmatmul.mubr.f32.gmra.mrb[34].mxu0 %v19002_v6 }
 0x7d3   : > { %12161 = vmatprep.mubr.f32.mxu0 %v19030_v8  ;;  %12747 = vmatpush3.bf16.msra.mxu0 %v18835_v61  ;;  %v21583_v61 = vld [vmem:[#allocation188_spill] sm:$0xff] }
 0x7d4   : > { %12749 = vmatprep.subr.bf16.mxu0 %v18874_v15 }
 0x7d6   : > { %12162 = vmatmul.mubr.f32.gmra.mrb[36].mxu0 %v19054_v16 }
 0x7d7   : > { %12164 = vmatprep.mubr.f32.mxu0 %v19081_v54  ;;  %12751 = vmatpush3.bf16.msra.mxu0 %v18874_v15  ;;  %v21584_v15 = vld [vmem:[#allocation205_spill] sm:$0xff] }
 0x7d8   : > { %12753 = vmatprep.subr.bf16.mxu0 %v18913_v14 }
 0x7da   : > { %12165 = vmatmul.mubr.f32.gmra.mrb[38].mxu0 %v19099_v29 }
 0x7db   : > { %12167 = vmatprep.mubr.f32.mxu0 %v19119_v50  ;;  %12755 = vmatpush3.bf16.msra.mxu0 %v18913_v14  ;;  %v21585_v14 = vld [vmem:[#allocation202_spill] sm:$0xff] }
 0x7dc   : > { %12757 = vmatprep.subr.bf16.mxu0 %v18946_v18 }
 0x7de   : > { %12168 = vmatmul.mubr.f32.gmra.mrb[40].mxu0 %v19114_v27 }
 0x7df   : > { %12170 = vmatprep.mubr.f32.mxu0 %v19159_v49  ;;  %12759 = vmatpush3.bf16.msra.mxu0 %v18946_v18  ;;  %v21586_v18 = vld [vmem:[#allocation50_spill] sm:$0xff] }
 0x7e0   : > { %12200 = vmatprep.subr.mxu0 %v19000_v13 }
 0x7e2   : > { %12171 = vmatmul.mubr.f32.gmra.mrb[42].mxu0 %v19145_v42 }
 0x7e3   : > { %12173 = vmatprep.mubr.f32.mxu0 %v19208_v1  ;;  %12201 = vmatpush3.msra.mxu0 %v19000_v13  ;;  %v21587_v13 = vand.u32 4294901760, %v18381_v57  ;;  %v12788_v57 = vpack.c.bf16 %v21591_v24, %v21590_v26  ;;  %v21629_v26 = vld [vmem:[#allocation36_spill] sm:$0xff] }
 0x7e4   : > { %12761 = vmatprep.subr.bf16.mxu0 %v21581_v30  ;;  %v10753_v24 = vrot.slane %v21629_v26, 10 }
 0x7e5   : > { %v12784_v10 = vpack.c.bf16 %v21588_v2, %v21587_v13  ;;  %v21607_v13 = vld [vmem:[#allocation229_spill] sm:$0xff]  ;;  %v21609_v2 = vand.u32 4294901760, %v19103_v38 }
 0x7e6   : > { %12174 = vmatmul.mubr.f32.gmra.mrb[44].mxu0 %v19206_v23 }
 0x7e7   : > { %12202 = vmatprep.mubr.f32.mxu0 %v18857_v21  ;;  %v21596_v21 = vand.u32 4294901760, %v18953_v55 }
 0x7ea   : > { %12203 = vmatmul.mubr.f32.vlgmr.msra.gmra.mrb[30].mxu0 %v18885_v25  ;;  %v21599_v25 = vand.u32 4294901760, %v18826_v0  ;;  %v21605_v0 = vld [vmem:[#allocation228_spill] sm:$0xff] }
 0x7eb   : > { %12763 = vmatpush3.bf16.msra.mxu0 %v21581_v30  ;;  %12205 = vmatprep.mubr.f32.mxu0 %v18926_v31 }
 0x7ec   : > { %12765 = vmatprep.subr.bf16.mxu0 %v21582_v33  ;;  %v12796_v31 = vpack.c.bf16 %v21599_v25, %v21598_v56 }
 0x7ee   : > { %12206 = vmatmul.mubr.f32.gmra.mrb[32].mxu0 %v18953_v55  ;;  %v21603_v55 = vand.u32 4294901760, %v21602_v20  ;;  %v21636_v20 = vld [vmem:[#allocation55_spill] sm:$0xff] }
 0x7ef   : > { %12208 = vmatprep.mubr.f32.mxu0 %v18986_v22  ;;  %12767 = vmatpush3.bf16.msra.mxu0 %v21582_v33 }
 0x7f0   : > { %12769 = vmatprep.subr.bf16.mxu0 %v21583_v61  ;;  %v12800_v22 = vpack.c.bf16 %v21603_v55, %v21601_v59  ;;  %v21637_v55 = vrot.slane %v21636_v20, 6 }
 0x7f2   : > { %12209 = vmatmul.mubr.f32.gmra.mrb[34].mxu0 %v19017_v52  ;;  %v21606_v52 = vand.u32 4294901760, %v21605_v0 }
 0x7f3   : > { %12211 = vmatprep.mubr.f32.mxu0 %v19044_v36  ;;  %12771 = vmatpush3.bf16.msra.mxu0 %v21583_v61  ;;  %v21608_v36 = vand.u32 4294901760, %v21607_v13 }
 0x7f4   : > { %12773 = vmatprep.subr.bf16.mxu0 %v21584_v15 }
 0x7f6   : > { %12212 = vmatmul.mubr.f32.gmra.mrb[36].mxu0 %v19068_v19  ;;  %v21611_v19 = vand.u32 4294901760, %v19122_v48 }
 0x7f7   : > { %12214 = vmatprep.mubr.f32.mxu0 %v19087_v41  ;;  %12775 = vmatpush3.bf16.msra.mxu0 %v21584_v15  ;;  %v21613_v41 = vand.u32 4294901760, %v19153_v5 }
 0x7f8   : > { %12777 = vmatprep.subr.bf16.mxu0 %v21585_v14 }
 0x7fa   : > { %12215 = vmatmul.mubr.f32.gmra.mrb[38].mxu0 %v19103_v38 }
 0x7fb   : > { %12217 = vmatprep.mubr.f32.mxu0 %v19128_v32  ;;  %12779 = vmatpush3.bf16.msra.mxu0 %v21585_v14  ;;  %v21618_v32 = vld [vmem:[#allocation14_spill] sm:$0xff] }
 0x7fc   : > { %12781 = vmatprep.subr.bf16.mxu0 %v21586_v18 }
 0x7fe   : > { %12218 = vmatmul.mubr.f32.gmra.mrb[40].mxu0 %v19122_v48 }
 0x7ff   : > { %12220 = vmatprep.mubr.f32.mxu0 %v19165_v60  ;;  %12783 = vmatpush3.bf16.msra.mxu0 %v21586_v18 }
 0x800   : > { %12250 = vmatprep.subr.mxu0 %v21560_v44 }
 0x802   : > { %12221 = vmatmul.mubr.f32.gmra.mrb[42].mxu0 %v19153_v5 }
 0x803   : > { %12223 = vmatprep.mubr.f32.mxu0 %v19216_v51  ;;  %12251 = vmatpush3.msra.mxu0 %v21560_v44  ;;  %v21622_v51 = vld [vmem:[#allocation18_spill] sm:$0xff] }
 0x804   : > { %12785 = vmatprep.subr.bf16.mxu0 %v12784_v10 }
 0x806   : > { %12224 = vmatmul.mubr.f32.gmra.mrb[44].mxu0 %v19213_v62 }
 0x807   : > { %12252 = vmatprep.mubr.f32.mxu0 %v21589_v4 }
 0x80a   : > { %12253 = vmatmul.mubr.f32.vlgmr.msra.gmra.mrb[30].mxu0 %v21592_v53 }
 0x80b   : > { %12787 = vmatpush3.bf16.msra.mxu0 %v12784_v10  ;;  %12255 = vmatprep.mubr.f32.mxu0 %v21593_v43 }
 0x80c   : > { %12789 = vmatprep.subr.bf16.mxu0 %v12788_v57 }
 0x80e   : > { %12256 = vmatmul.mubr.f32.gmra.mrb[32].mxu0 %v21596_v21 }
 0x80f   : > { %12258 = vmatprep.mubr.f32.mxu0 %v21597_v9  ;;  %12791 = vmatpush3.bf16.msra.mxu0 %v12788_v57 }
 0x810   : > { %12793 = vmatprep.subr.bf16.mxu0 %v12792_v17 }
 0x812   : > { %12259 = vmatmul.mubr.f32.gmra.mrb[34].mxu0 %v21600_v46 }
 0x813   : > { %12261 = vmatprep.mubr.f32.mxu0 %v6660_v11  ;;  %12795 = vmatpush3.bf16.msra.mxu0 %v12792_v17  ;;  %v12804_v11 = vpack.c.bf16 %v21608_v36, %v21606_v52  ;;  %v21632_v17 = vrot.slane %v21631_v58, 6  ;;  %v21639_v52 = vld [vmem:[#allocation66_spill] sm:$0xff] }
 0x814   : > { %12797 = vmatprep.subr.bf16.mxu0 %v12796_v31  ;;  %v21640_v13 = vrot.slane %v21639_v52, 6  ;;  %v21654_v52 = vld [vmem:[#allocation78_spill] sm:$0xff] }
 0x815   : > { %v19453_v21 = vrot.slane %v21632_v17, 4 }
 0x816   : > { %12262 = vmatmul.mubr.f32.gmra.mrb[36].mxu0 %v6670_v39  ;;  %v21612_v39 = vand.u32 4294901760, %v19165_v60  ;;  %v21620_v60 = vld [vmem:[#allocation73_spill] sm:$0xff]  ;;  %v19472_v36 = vrot.slane %v21640_v13, 4 }
 0x817   : > { %12264 = vmatprep.mubr.f32.mxu0 %v21604_v3  ;;  %12799 = vmatpush3.bf16.msra.mxu0 %v12796_v31  ;;  %v21634_v31 = vld [vmem:[#allocation54_spill] sm:$0xff]  ;;  %v21638_v3 = vld [vmem:[#allocation57_spill] sm:$0xff] }
 0x818   : > { %12801 = vmatprep.subr.bf16.mxu0 %v12800_v22  ;;  %v21635_v46 = vrot.slane %v21634_v31, 6  ;;  %v10755_v0 = vrot.slane %v21638_v3, 10  ;;  %v21652_v31 = vld [vmem:[#allocation85_spill] sm:$0xff] }
 0x81a   : > { %12265 = vmatmul.mubr.f32.gmra.mrb[38].mxu0 %v21609_v2  ;;  %v19463_v59 = vrot.slane %v21635_v46, 4 }
 0x81b   : > { %12267 = vmatprep.mubr.f32.mxu0 %v21610_v7  ;;  %12803 = vmatpush3.bf16.msra.mxu0 %v12800_v22  ;;  %v19467_v22 = vrot.slane %v21637_v55, 4  ;;  %v21653_v55 = vld [vmem:[#allocation70_spill] sm:$0xff] }
 0x81c   : > { %12805 = vmatprep.subr.bf16.mxu0 %v12804_v11  ;;  %v7861_v3 = vsel %vm14964_vm6, %v19463_v59, %v21653_v55 }
 0x81e   : > { %12268 = vmatmul.mubr.f32.gmra.mrb[40].mxu0 %v21611_v19  ;;  %v21641_v19 = vrot.slane %v21620_v60, 6 }
 0x81f   : > { %12270 = vmatprep.mubr.f32.mxu0 %v21612_v39  ;;  %12807 = vmatpush3.bf16.msra.mxu0 %v12804_v11 }
 0x820   : > { %12300 = vmatprep.subr.mxu0 %v19028_v47  ;;  %v19480_v39 = vrot.slane %v21641_v19, 4 }
 0x822   : > { %12271 = vmatmul.mubr.f32.gmra.mrb[42].mxu0 %v21613_v41 }
 0x823   : > { %12273 = vmatprep.mubr.f32.mxu0 %v6740_v35  ;;  %12301 = vmatpush3.msra.mxu0 %v19028_v47  ;;  %v9321_v47 = vld [vmem:[%s20047_s10] sm:$0xff]  ;;  %v21623_v35 = vrot.slane %v21622_v51, 6  ;;  %v21647_v51 = vld [vmem:[#allocation43_spill] sm:$0xff] }
 0x824   : > { %12809 = vmatprep.subr.bf16.mxu0 %v21581_v30  ;;  %v19374_v38 = vand.u32 4294901760, %v9321_v47 }
 0x826   : > { %12274 = vmatmul.mubr.f32.gmra.mrb[44].mxu0 %v6750_v12  ;;  %v19428_v12 = vrot.slane %v21623_v35, 4 }
 0x827   : > { %12302 = vmatprep.mubr.f32.mxu0 %v18828_v45 }
 0x82a   : > { %12303 = vmatmul.mubr.f32.vlgmr.msra.gmra.mrb[30].mxu0 %v18866_v40 }
 0x82b   : > { %12811 = vmatpush3.bf16.msra.mxu0 %v21581_v30  ;;  %12305 = vmatprep.mubr.f32.mxu0 %v18909_v34  ;;  %v21624_v30 = vld [vmem:[#allocation22_spill] sm:$0xff] }
 0x82c   : > { %12813 = vmatprep.subr.bf16.mxu0 %v21582_v33 }
 0x82e   : > { %12306 = vmatmul.mubr.f32.gmra.mrb[32].mxu0 %v18941_v63 }
 0x82f   : > { %12308 = vmatprep.mubr.f32.mxu0 %v18971_v37  ;;  %12815 = vmatpush3.bf16.msra.mxu0 %v21582_v33  ;;  %v21625_v33 = vrot.slane %v21624_v30, 6 }
 0x830   : > { %12817 = vmatprep.subr.bf16.mxu0 %v21583_v61 }
 0x832   : > { %12309 = vmatmul.mubr.f32.gmra.mrb[34].mxu0 %v19002_v6 }
 0x833   : > { %12311 = vmatprep.mubr.f32.mxu0 %v19030_v8  ;;  %12819 = vmatpush3.bf16.msra.mxu0 %v21583_v61  ;;  %v19432_v61 = vrot.slane %v21625_v33, 4 }
 0x834   : > { %12821 = vmatprep.subr.bf16.mxu0 %v21584_v15 }
 0x836   : > { %12312 = vmatmul.mubr.f32.gmra.mrb[36].mxu0 %v19054_v16 }
 0x837   : > { %12314 = vmatprep.mubr.f32.mxu0 %v19081_v54  ;;  %12823 = vmatpush3.bf16.msra.mxu0 %v21584_v15  ;;  %v21626_v15 = vld [vmem:[#allocation24_spill] sm:$0xff] }
 0x838   : > { %12825 = vmatprep.subr.bf16.mxu0 %v21585_v14 }
 0x83a   : > { %12315 = vmatmul.mubr.f32.gmra.mrb[38].mxu0 %v19099_v29 }
 0x83b   : > { %12317 = vmatprep.mubr.f32.mxu0 %v19119_v50  ;;  %12827 = vmatpush3.bf16.msra.mxu0 %v21585_v14  ;;  %v10751_v14 = vrot.slane %v21626_v15, 10 }
 0x83c   : > { %12829 = vmatprep.subr.bf16.mxu0 %v21586_v18 }
 0x83e   : > { %12318 = vmatmul.mubr.f32.gmra.mrb[40].mxu0 %v19114_v27 }
 0x83f   : > { %12320 = vmatprep.mubr.f32.mxu0 %v19159_v49  ;;  %12831 = vmatpush3.bf16.msra.mxu0 %v21586_v18  ;;  %v21627_v18 = vld [vmem:[#allocation29_spill] sm:$0xff] }
 0x840   : > { %12350 = vmatprep.subr.mxu0 %v21560_v44  ;;  %v21628_v10 = vrot.slane %v21627_v18, 6  ;;  %v21650_v18 = vld [vmem:[#allocation84_spill] sm:$0xff] }
 0x842   : > { %12321 = vmatmul.mubr.f32.gmra.mrb[42].mxu0 %v19145_v42  ;;  %v19437_v4 = vrot.slane %v21628_v10, 4 }
 0x843   : > { %12323 = vmatprep.mubr.f32.mxu0 %v19208_v1  ;;  %12351 = vmatpush3.msra.mxu0 %v21560_v44 }
 0x844   : > { %12532 = vmatprep.subr.mxu0 %v19374_v38 }
 0x846   : > { %12324 = vmatmul.mubr.f32.gmra.mrb[44].mxu0 %v19206_v23 }
 0x847   : > { %12352 = vmatprep.mubr.f32.mxu0 %v18828_v45  ;;  %v19399_v45 = vsub.f32 %v9321_v47, %v19374_v38 }
 0x84a   : > { %12353 = vmatmul.mubr.f32.vlgmr.msra.gmra.mrb[30].mxu0 %v18866_v40  ;;  %v19402_v40 = vand.u32 4294901760, %v19399_v45 }
 0x84b   : > { %12355 = vmatprep.mubr.f32.mxu0 %v18909_v34  ;;  %12533 = vmatpush3.msra.mxu0 %v19374_v38 }
 0x84c   : > { %v9600_v34 = vsub.f32 %v19399_v45, %v19402_v40 }
 0x84e   : > { %12356 = vmatmul.mubr.f32.gmra.mrb[32].mxu0 %v18941_v63  ;;  %v19406_v63 = vand.u32 4294901760, %v9600_v34  ;;  %v21642_v34 = vld [vmem:[#allocation32_spill] sm:$0xff] }
 0x84f   : > { %12358 = vmatprep.mubr.f32.mxu0 %v18971_v37  ;;  %v21614_v37 = vld [vmem:[#allocation17_spill] sm:$0xff] }
 0x850   : > { %12558 = vmatprep.subr.mxu0 %v19406_v63  ;;  %v7771_v44 = vcombine.high %v21614_v37, %v21614_v37 }
 0x852   : > { %12359 = vmatmul.mubr.f32.gmra.mrb[34].mxu0 %v19002_v6  ;;  %v21615_v6 = vld [vmem:[#allocation37_spill] sm:$0xff] }
 0x853   : > { %12361 = vmatprep.mubr.f32.mxu0 %v19030_v8  ;;  %v7776_v8 = vcombine.high %v21615_v6, %v21615_v6  ;;  %v21630_v57 = vrot.slane %v21615_v6, 6 }
 0x855   : > { %v19442_v53 = vrot.slane %v21630_v57, 4  ;;  %v19444_v43 = vrot.slane %v7776_v8, 6  ;;  %v21644_v8 = vld [vmem:[#allocation28_spill] sm:$0xff]  ;;  %v21651_v57 = vld [vmem:[#allocation58_spill] sm:$0xff] }
 0x856   : > { %12362 = vmatmul.mubr.f32.gmra.mrb[36].mxu0 %v19054_v16  ;;  %v19413_v16 = vpop.permute.xlu1 %9259  ;;  %v19522_v58 = vsel %vm14964_vm6, %v10753_v24, %v21651_v57  ;;  %v7877_v24 = vsel %vm14964_vm6, %v19467_v22, %v21654_v52 }
 0x857   : > { %12364 = vmatprep.mubr.f32.mxu0 %v19081_v54  ;;  %v21616_v54 = vld [vmem:[#allocation47_spill] sm:$0xff] }
 0x858   : > { %v21633_v9 = vrot.slane %v21616_v54, 6 }
 0x85a   : > { %12365 = vmatmul.mubr.f32.gmra.mrb[38].mxu0 %v19099_v29  ;;  %v7781_v29 = vcombine.high %v21616_v54, %v21616_v54  ;;  %v19457_v56 = vrot.slane %v21633_v9, 4  ;;  %v19476_v2 = vpop.permute.xlu1 %9263 }
 0x85b   : > { %12367 = vmatprep.mubr.f32.mxu0 %v19119_v50  ;;  %v21617_v50 = vld [vmem:[#allocation11_spill] sm:$0xff] }
 0x85c   : > { %v10749_v48 = vrot.slane %v21617_v50, 10  ;;  %v19459_v25 = vrot.slane %v7781_v29, 6 }
 0x85e   : > { %12368 = vmatmul.mubr.f32.gmra.mrb[40].mxu0 %v19114_v27  ;;  %v19417_v27 = vpop.permute.xlu0 %9257  ;;  %v7793_v54 = vsel %vm14964_vm6, %v10749_v48, %v21644_v8  ;;  %v7819_v48 = vsel %vm14964_vm6, %v10751_v14, %v21647_v51  ;;  %v7867_v17 = vsel %vm14964_vm6, %v19457_v56, %v19459_v25  ;;  %v9268_v9 = vpop.permute.xlu1 %9267 }
 0x85f   : > { %12370 = vmatprep.mubr.f32.mxu0 %v19159_v49  ;;  %v7814_v49 = vrot.slane %v7771_v44, 6 }
 0x862   : > { %12371 = vmatmul.mubr.f32.gmra.mrb[42].mxu0 %v19145_v42  ;;  %v21619_v42 = vrot.slane %v21618_v32, 6  ;;  %v19482_v41 = vpop.permute.xlu0 %9261  ;;  %v21645_v32 = vld [vmem:[#allocation39_spill] sm:$0xff] }
 0x863   : > { %12373 = vmatprep.mubr.f32.mxu0 %v19208_v1  ;;  %v21621_v1 = vrot.slane %v21614_v37, 6 }
 0x864   : > { %v7797_v5 = vrot.slane %v21619_v42, 4  ;;  %v7809_v42 = vsel %vm14964_vm6, %v19428_v12, %v21645_v32  ;;  %v21648_v12 = vld [vmem:[#allocation51_spill] sm:$0xff] }
 0x865   : > { %v7813_v62 = vrot.slane %v21621_v1, 4  ;;  %v7835_v33 = vsel %vm14964_vm6, %v19437_v4, %v21648_v12 }
 0x866   : > { %12374 = vmatmul.mubr.f32.gmra.mrb[44].mxu0 %v19206_v23  ;;  %v7786_v23 = vcombine.high %v21620_v60, %v21620_v60  ;;  %v7799_v44 = vsel %vm14964_vm6, %v7797_v5, %v21642_v34  ;;  %v21646_v60 = vld [vmem:[#allocation42_spill] sm:$0xff]  ;;  %v9266_v13 = vpop.permute.xlu0 %9265 }
 0x867   : > { %v7815_v50 = vsel %vm14964_vm6, %v7813_v62, %v7814_v49  ;;  %v7825_v5 = vsel %vm14964_vm6, %v19432_v61, %v21646_v60  ;;  %v7841_v49 = vsel %vm14964_vm6, %v19442_v53, %v19444_v43  ;;  %v21649_v61 = vld [vmem:[#allocation63_spill] sm:$0xff] }
 0x868   : > { %v19474_v11 = vrot.slane %v7786_v23, 6  ;;  %v7851_v15 = vsel %vm14964_vm6, %v19453_v21, %v21649_v61 }
 0x91d   : > { %v12354_v7 = vpop.f32.mrb[30].mxu0 }
 0x91e   : > { %v12924_v47 = vadd.f32 %v12354_v7, %v19449_v28  ;;  %v7673_v6 = vpop.f32.mrb[31].mxu0 }
 0x91f   : > { %v12925_v29 = vadd.f32 %v19449_v28, %v7673_v6 }
 0x920   : > { %v7943_v23 = vcombine.high %v12924_v47, %v12924_v47  ;;  %v7976_v1 = vadd.f32 %v12924_v47, %v7799_v44  ;;  %v21655_v47 = vld [vmem:[#allocation86_spill] sm:$0xff]  ;;  %v21656_v44 = vld [vmem:[#allocation81_spill] sm:$0xff] }
 0x921   : > { %v7942_v62 = vcombine.high %v12925_v29, %v12925_v29  ;;  %v7974_v35 = vadd.f32 %v12925_v29, %v7793_v54  ;;  %v12357_v30 = vpop.f32.mrb[32].mxu0  ;;  %v19542_v6 = vsel %vm14964_vm6, %v10755_v0, %v21656_v44  ;;  %v21657_v29 = vld [vmem:[#allocation87_spill] sm:$0xff] }
 0x922   : > { %v7977_v14 = vadd.f32 %v7943_v23, %v21650_v18  ;;  %v12926_v10 = vadd.f32 %v12357_v30, %v19449_v28  ;;  %v7685_v26 = vpop.f32.mrb[33].mxu0  ;;  %v7893_v23 = vsel %vm14964_vm6, %v19480_v39, %v19474_v11  ;;  %v21659_v18 = vld [vmem:[#allocation82_spill] sm:$0xff] }
 0x923   : > { %v7975_v46 = vadd.f32 %v7942_v62, %v21652_v31  ;;  %v12927_v20 = vadd.f32 %v19449_v28, %v7685_v26  ;;  %v7887_v0 = vsel %vm14964_vm6, %v19472_v36, %v21659_v18  ;;  %vm21693_vm6 = vmmov %vm21679_vm0 }
 0x924   : > { %v9210_v7 = vcombine.low %v7976_v1, %v7977_v14  ;;  %v7945_v19 = vcombine.high %v12926_v10, %v12926_v10  ;;  %v7980_v34 = vadd.f32 %v12926_v10, %v21655_v47 }
 0x925   : > { %v9209_v8 = vcombine.low %v7974_v35, %v7975_v46  ;;  %v7944_v54 = vcombine.high %v12927_v20, %v12927_v20  ;;  %v7978_v32 = vadd.f32 %v12927_v20, %v21657_v29  ;;  %v12360_v60 = vpop.f32.mrb[34].mxu0  ;;  %v9272_v46 = vpop.permute.xlu1 %9271 }
 0x926   : > { %v9306_v1 = vsel %vm21658_vm7, %v9210_v7, %v19413_v16  ;;  %v7981_v51 = vadd.f32 %v7945_v19, %v7815_v50  ;;  %v12928_v62 = vadd.f32 %v12360_v60, %v19449_v28  ;;  %v7697_v30 = vpop.f32.mrb[35].mxu0  ;;  %v9270_v29 = vpop.permute.xlu0 %9269  ;;  %vm21683_vm7 = vmmov %vm21679_vm0 }
 0x927   : > { %v9326_v35 = vsel %vm21660_vm11, %v9306_v1, 0  ;;  %v9305_v14 = vsel %vm21661_vm12, %v9209_v8, %v19417_v27  ;;  %v7979_v10 = vadd.f32 %v7944_v54, %v7809_v42  ;;  %v12929_v26 = vadd.f32 %v19449_v28, %v7697_v30  ;;  %v21664_v42 = vld [vmem:[#allocation88_spill] sm:$0xff]  ;;  %vm21687_vm11 = vmmov %vm21679_vm0 }
 0x928   : > { %v19560_v57 = vand.u32 4294901760, %v9326_v35  ;;  %v9212_v16 = vcombine.low %v7980_v34, %v7981_v51  ;;  %v7947_v50 = vcombine.high %v12928_v62, %v12928_v62  ;;  %v7984_v31 = vadd.f32 %v12928_v62, %v7825_v5  ;;  %vm21688_vm12 = vmmov %vm21673_vm5 }
 0x929   : > { %v9211_v20 = vcombine.low %v7978_v32, %v7979_v10  ;;  %v7946_v7 = vcombine.high %v12929_v26, %v12929_v26  ;;  %v7982_v19 = vadd.f32 %v12929_v26, %v7819_v48  ;;  %v12363_v47 = vpop.f32.mrb[36].mxu0  ;;  %v9323_v44 = vsel %vm21662_vm13, %v9305_v14, 0  ;;  %v21666_v32 = vld [vmem:[#allocation89_spill] sm:$0xff]  ;;  %vm21689_vm13 = vmmov %vm21673_vm5 }
 0x92a   : > { %v19564_v60 = vsub.f32 %v9326_v35, %v19560_v57  ;;  %v9308_v27 = vsel %vm21663_vm14, %v9212_v16, %v19476_v2  ;;  %v7985_v8 = vadd.f32 %v7947_v50, %v21664_v42  ;;  %v12930_v34 = vadd.f32 %v12363_v47, %v19449_v28  ;;  %v7709_v54 = vpop.f32.mrb[37].mxu0  ;;  %v21667_v35 = vld [vmem:[#allocation90_spill] sm:$0xff]  ;;  %v21668_v16 = vld [vmem:[#allocation91_spill] sm:$0xff]  ;;  %vm21690_vm14 = vmmov %vm21679_vm0 }
 0x92b   : > { %v9307_v5 = vsel %vm21665_vm15, %v9211_v20, %v19482_v41  ;;  %v7983_v48 = vadd.f32 %v7946_v7, %v21666_v32  ;;  %v12931_v1 = vadd.f32 %v19449_v28, %v7709_v54  ;;  %v19574_v51 = vand.u32 4294901760, %v9323_v44  ;;  %vm21691_vm15 = vmmov %vm21673_vm5 }
 0x92c   : > { %v9214_v62 = vcombine.low %v7984_v31, %v7985_v8  ;;  %v7949_v30 = vcombine.high %v12930_v34, %v12930_v34  ;;  %v7988_v14 = vadd.f32 %v12930_v34, %v21667_v35  ;;  %v9448_v2 = vand.u32 4294901760, %v19564_v60  ;;  %v9276_v8 = vpop.permute.xlu1 %9275 }
 0x92d   : > { %v9213_v10 = vcombine.low %v7982_v19, %v7983_v48  ;;  %v7948_v26 = vcombine.high %v12931_v1, %v12931_v1  ;;  %v7986_v50 = vadd.f32 %v12931_v1, %v21668_v16  ;;  %v12366_v47 = vpop.f32.mrb[38].mxu0  ;;  %v19580_v42 = vsub.f32 %v9323_v44, %v19574_v51 }
 0x92e   : > { %v19583_v41 = vsel %vm21669_vm1, %v9214_v62, %v9268_v9  ;;  %v7989_v31 = vadd.f32 %v7949_v30, %v7841_v49  ;;  %v12932_v20 = vadd.f32 %v12366_v47, %v19449_v28  ;;  %v7721_v7 = vpop.f32.mrb[39].mxu0  ;;  %v9449_v19 = vsub.f32 %v19564_v60, %v9448_v2  ;;  %v9274_v49 = vpop.permute.xlu0 %9273  ;;  %v21672_v30 = vld [vmem:[#allocation92_spill] sm:$0xff]  ;;  %vm21692_vm1 = vmmov %vm21673_vm5 }
 0x92f   : > { %v19595_v44 = vsel %vm21670_vm2, %v9213_v10, %v9266_v13  ;;  %v7987_v9 = vadd.f32 %v7948_v26, %v7835_v33  ;;  %v12933_v53 = vadd.f32 %v19449_v28, %v7721_v7  ;;  %v9438_v43 = vand.u32 4294901760, %v19580_v42  ;;  %vm21694_vm2 = vmmov %vm21692_vm1 }
 0x930   : > { %v9216_v34 = vcombine.low %v7988_v14, %v7989_v31  ;;  %v7951_v54 = vcombine.high %v12932_v20, %v12932_v20  ;;  %v7992_v13 = vadd.f32 %v12932_v20, %v7851_v15  ;;  %v9450_v32 = vand.u32 4294901760, %v9449_v19  ;;  %v21675_v15 = vld [vmem:[#allocation93_spill] sm:$0xff]  ;;  %v21676_v31 = vld [vmem:[#allocation94_spill] sm:$0xff]  ;;  %v9280_v7 = vpop.permute.xlu1 %9279 }
 0x931   : > { %v9215_v48 = vcombine.low %v7986_v50, %v7987_v9  ;;  %v7950_v1 = vcombine.high %v12933_v53, %v12933_v53  ;;  %v7990_v62 = vadd.f32 %v12933_v53, %v19522_v58  ;;  %v12369_v4 = vpop.f32.mrb[40].mxu0  ;;  %v9439_v12 = vsub.f32 %v19580_v42, %v9438_v43  ;;  %v21677_v53 = vld [vmem:[#allocation95_spill] sm:$0xff] }
 0x932   : > { %v19614_v33 = vsel %vm21671_vm4, %v9216_v34, %v9272_v46  ;;  %v7993_v35 = vadd.f32 %v7951_v54, %v21672_v30  ;;  %v12934_v14 = vadd.f32 %v12369_v4, %v19449_v28  ;;  %v7733_v10 = vpop.f32.mrb[41].mxu0  ;;  %v9329_v21 = vsel %vm21673_vm5, %v9307_v5, 0  ;;  %v9278_v54 = vpop.permute.xlu0 %9277  ;;  %vm21695_vm4 = vmmov %vm21692_vm1 }
 0x933   : > { %v19620_v61 = vsel %vm21674_vm8, %v9215_v48, %v9270_v29  ;;  %v7991_v58 = vadd.f32 %v7950_v1, %v21675_v15  ;;  %v12935_v26 = vadd.f32 %v19449_v28, %v7733_v10  ;;  %v9440_v16 = vand.u32 4294901760, %v9439_v12  ;;  %vm21696_vm5 = vmmov %vm21679_vm0 }
 0x934   : > { %v9218_v50 = vcombine.low %v7992_v13, %v7993_v35  ;;  %v7953_v47 = vcombine.high %v12934_v14, %v12934_v14  ;;  %v7996_v46 = vadd.f32 %v12934_v14, %v21676_v31  ;;  %v19625_v20 = vand.u32 4294901760, %v9329_v21  ;;  %v21682_v14 = vld [vmem:[#allocation96_spill] sm:$0xff]  ;;  %vm21697_vm8 = vmmov %vm21692_vm1 }
 0x935   : > { %v9217_v19 = vcombine.low %v7990_v62, %v7991_v58  ;;  %v7952_v9 = vcombine.high %v12935_v26, %v12935_v26  ;;  %v7994_v34 = vadd.f32 %v12935_v26, %v21677_v53  ;;  %12534 = vmatprep.mubr.f32.mxu0 %v9440_v16  ;;  %v12372_v5 = vpop.f32.mrb[42].mxu0  ;;  %v9332_v29 = vsel %vm21678_vm9, %v9308_v27, 0  ;;  %v21684_v58 = vld [vmem:[#allocation97_spill] sm:$0xff]  ;;  %vm21698_vm9 = vmmov %vm21692_vm1 }
 0x936   : > { %v19630_v48 = vsel %vm21679_vm0, %v9218_v50, %v9276_v8  ;;  %v7997_v13 = vadd.f32 %v7953_v47, %v7867_v17  ;;  %12535 = vmatmul.mubr.f32.vlgmr.msra.gmra.mrb[46].mxu0 %v9450_v32  ;;  %v12936_v1 = vadd.f32 %v12372_v5, %v19449_v28  ;;  %v7745_v62 = vpop.f32.mrb[43].mxu0  ;;  %v19639_v4 = vsub.f32 %v9329_v21, %v19625_v20  ;;  %v9284_v21 = vpop.permute.xlu1 %9283  ;;  %v21686_v5 = vld [vmem:[#allocation99_spill] sm:$0xff]  ;;  %vm21699_vm0 = vmmov %vm21692_vm1 }
 0x937   : > { %v9313_v12 = vsel %vm21680_vm3, %v9217_v19, %v9274_v49  ;;  %v7995_v27 = vadd.f32 %v7952_v9, %v7861_v3  ;;  %12559 = vmatpush3.msra.mxu0 %v19406_v63  ;;  %v12937_v56 = vadd.f32 %v19449_v28, %v7745_v62  ;;  %v19649_v25 = vand.u32 4294901760, %v9332_v29  ;;  %v9282_v50 = vpop.permute.xlu0 %9281  ;;  %vm21700_vm3 = vmmov %vm21699_vm0 }
 0x938   : > { %v9220_v17 = vcombine.low %v7996_v46, %v7997_v13  ;;  %v7955_v8 = vcombine.high %v12936_v1, %v12936_v1  ;;  %v8000_v49 = vadd.f32 %v12936_v1, %v7877_v24  ;;  %v9458_v32 = vand.u32 4294901760, %v19639_v4  ;;  %12584 = vmatprep.subr.mxu0 %v19399_v45 }
 0x939   : > { %v9219_v59 = vcombine.low %v7994_v34, %v7995_v27  ;;  %v7954_v55 = vcombine.high %v12937_v56, %v12937_v56  ;;  %v7998_v63 = vadd.f32 %v12937_v56, %v19542_v6  ;;  %v19660_v3 = vsub.f32 %v9332_v29, %v19649_v25  ;;  %v12375_v30 = vpop.f32.mrb[44].mxu0 }
 0x93a   : > { %v9316_v35 = vsel %vm21681_vm10, %v9220_v17, %v9280_v7  ;;  %v8001_v10 = vadd.f32 %v7955_v8, %v21682_v14  ;;  %v9459_v22 = vsub.f32 %v19639_v4, %v9458_v32  ;;  %v12938_v52 = vadd.f32 %v12375_v30, %v19449_v28  ;;  %v7757_v24 = vpop.f32.mrb[45].mxu0  ;;  %v21685_v7 = vld [vmem:[#allocation98_spill] sm:$0xff]  ;;  %vm21701_vm10 = vmmov %vm21699_vm0 }
 0x93b   : > { %v9315_v15 = vsel %vm21683_vm7, %v9219_v59, %v9278_v54  ;;  %v7999_v6 = vadd.f32 %v7954_v55, %v21684_v58  ;;  %v9468_v26 = vand.u32 4294901760, %v19660_v3  ;;  %v12939_v16 = vadd.f32 %v19449_v28, %v7757_v24  ;;  %v9286_v18 = vpop.permute.xlu0 %9285  ;;  %vm21702_vm7 = vmmov %vm21699_vm0 }
 0x93c   : > { %v9222_v47 = vcombine.low %v8000_v49, %v8001_v10  ;;  %v9460_v31 = vand.u32 4294901760, %v9459_v22  ;;  %v7957_v46 = vcombine.high %v12938_v52, %v12938_v52  ;;  %v8004_v19 = vadd.f32 %v12938_v52, %v21685_v7 }
 0x93d   : > { %v9221_v9 = vcombine.low %v7998_v63, %v7999_v6  ;;  %v9469_v53 = vsub.f32 %v19660_v3, %v9468_v26  ;;  %v7956_v34 = vcombine.high %v12939_v16, %v12939_v16  ;;  %v8002_v29 = vadd.f32 %v12939_v16, %v21686_v5 }
 0x93e   : > { %v9318_v54 = vsel %vm21687_vm11, %v9222_v47, %v9284_v21  ;;  %12537 = vmatprep.mubr.f32.mxu0 %v9460_v31  ;;  %v8005_v28 = vadd.f32 %v7957_v46, %v7893_v23  ;;  %v9335_v13 = vsel %vm21688_vm12, %v19595_v44, 0  ;;  %v9338_v1 = vsel %vm21689_vm13, %v19583_v41, 0  ;;  %v9288_v41 = vpop.permute.xlu1 %9287 }
 0x93f   : > { %v9317_v62 = vsel %vm21690_vm14, %v9221_v9, %v9282_v50  ;;  %v9470_v27 = vand.u32 4294901760, %v9469_v53  ;;  %v8003_v56 = vadd.f32 %v7956_v34, %v7887_v0  ;;  %v19693_v17 = vand.u32 4294901760, %v9335_v13 }
 0x940   : > { %v9224_v8 = vcombine.low %v8004_v19, %v8005_v28  ;;  %v19695_v11 = vand.u32 4294901760, %v9338_v1  ;;  %v9341_v39 = vsel %vm21691_vm15, %v19620_v61, 0  ;;  %v9344_v23 = vsel %vm21692_vm1, %v19614_v33, 0 }
 0x941   : > { %12538 = vmatmul.mubr.f32.gmra.mrb[48].mxu0 %v9470_v27  ;;  %v9223_v44 = vcombine.low %v8002_v29, %v8003_v56  ;;  %v19702_v37 = vsub.f32 %v9335_v13, %v19693_v17  ;;  %v19704_v49 = vand.u32 4294901760, %v9341_v39  ;;  %v19706_v36 = vand.u32 4294901760, %v9344_v23 }
 0x942   : > { %v9320_v0 = vsel %vm21693_vm6, %v9224_v8, %v9288_v41  ;;  %v19710_v59 = vsub.f32 %v9338_v1, %v19695_v11  ;;  %v9347_v61 = vsel %vm21694_vm2, %v9313_v12, 0  ;;  %v9350_v33 = vsel %vm21695_vm4, %v19630_v48, 0 }
 0x943   : > { %v9319_v55 = vsel %vm21696_vm5, %v9223_v44, %v9286_v18  ;;  %v9478_v63 = vand.u32 4294901760, %v19702_v37  ;;  %v19718_v30 = vsub.f32 %v9341_v39, %v19704_v49  ;;  %v19721_v14 = vsub.f32 %v9344_v23, %v19706_v36 }
 0x944   : > { %v9488_v10 = vand.u32 4294901760, %v19710_v59  ;;  %v19724_v22 = vand.u32 4294901760, %v9347_v61  ;;  %v19726_v52 = vand.u32 4294901760, %v9350_v33  ;;  %v9353_v12 = vsel %vm21697_vm8, %v9315_v15, 0 }
 0x945   : > { %v9479_v48 = vsub.f32 %v19702_v37, %v9478_v63  ;;  %v9498_v24 = vand.u32 4294901760, %v19718_v30  ;;  %v9508_v21 = vand.u32 4294901760, %v19721_v14  ;;  %v19734_v58 = vand.u32 4294901760, %v9353_v12 }
 0x946   : > { %v9489_v6 = vsub.f32 %v19710_v59, %v9488_v10  ;;  %v19740_v16 = vsub.f32 %v9347_v61, %v19724_v22  ;;  %v19743_v50 = vsub.f32 %v9350_v33, %v19726_v52  ;;  %v9356_v15 = vsel %vm21698_vm9, %v9316_v35, 0 }
 0x947   : > { %v9480_v47 = vand.u32 4294901760, %v9479_v48  ;;  %v9499_v31 = vsub.f32 %v19718_v30, %v9498_v24  ;;  %v9509_v46 = vsub.f32 %v19721_v14, %v9508_v21  ;;  %v19753_v7 = vsub.f32 %v9353_v12, %v19734_v58 }
 0x948   : > { %v9490_v19 = vand.u32 4294901760, %v9489_v6  ;;  %v9518_v9 = vand.u32 4294901760, %v19740_v16  ;;  %v9528_v53 = vand.u32 4294901760, %v19743_v50  ;;  %v19757_v34 = vand.u32 4294901760, %v9356_v15 }
 0x949   : > { %12540 = vmatprep.mubr.f32.mxu0 %v9480_v47  ;;  %v9500_v35 = vand.u32 4294901760, %v9499_v31  ;;  %v9538_v5 = vand.u32 4294901760, %v19753_v7  ;;  %v9359_v29 = vsel %vm21699_vm0, %v9317_v62, 0  ;;  %v9510_v28 = vand.u32 4294901760, %v9509_v46 }
 0x94a   : > { %12541 = vmatmul.mubr.f32.gmra.mrb[50].mxu0 %v9490_v19  ;;  %v9519_v13 = vsub.f32 %v19740_v16, %v9518_v9  ;;  %v19765_v1 = vsub.f32 %v9356_v15, %v19757_v34  ;;  %v19767_v27 = vand.u32 4294901760, %v9359_v29  ;;  %v9362_v8 = vsel %vm21700_vm3, %v9318_v54, 0 }
 0x94b   : > { %12543 = vmatprep.mubr.f32.mxu0 %v9500_v35  ;;  %v9539_v56 = vsub.f32 %v19753_v7, %v9538_v5  ;;  %v9365_v62 = vsel %vm21701_vm10, %v9319_v55, 0  ;;  %v9368_v39 = vsel %vm21702_vm7, %v9320_v0, 0  ;;  %v9529_v41 = vsub.f32 %v19743_v50, %v9528_v53 }
 0x94c   : > { %v9520_v23 = vand.u32 4294901760, %v9519_v13  ;;  %v9548_v44 = vand.u32 4294901760, %v19765_v1  ;;  %v19780_v18 = vsub.f32 %v9359_v29, %v19767_v27  ;;  %v19782_v61 = vand.u32 4294901760, %v9362_v8 }
 0x94d   : > { %v19784_v33 = vand.u32 4294901760, %v9365_v62  ;;  %v19786_v12 = vand.u32 4294901760, %v9368_v39  ;;  %v9540_v0 = vand.u32 4294901760, %v9539_v56  ;;  %v9530_v6 = vand.u32 4294901760, %v9529_v41 }
 0x94e   : > { %12544 = vmatmul.mubr.f32.gmra.mrb[52].mxu0 %v9510_v28  ;;  %v9558_v54 = vand.u32 4294901760, %v19780_v18  ;;  %v19790_v55 = vsub.f32 %v9362_v8, %v19782_v61  ;;  %v9549_v15 = vsub.f32 %v19765_v1, %v9548_v44 }
 0x94f   : > { %12546 = vmatprep.mubr.f32.mxu0 %v9520_v23  ;;  %v19793_v48 = vsub.f32 %v9365_v62, %v19784_v33  ;;  %v19802_v31 = vsub.f32 %v9368_v39, %v19786_v12 }
 0x950   : > { %v9559_v47 = vsub.f32 %v19780_v18, %v9558_v54  ;;  %v9568_v46 = vand.u32 4294901760, %v19790_v55  ;;  %v9550_v28 = vand.u32 4294901760, %v9549_v15 }
 0x951   : > { %v9578_v19 = vand.u32 4294901760, %v19793_v48  ;;  %v9588_v56 = vand.u32 4294901760, %v19802_v31 }
 0x952   : > { %12547 = vmatmul.mubr.f32.gmra.mrb[54].mxu0 %v9530_v6  ;;  %v9560_v35 = vand.u32 4294901760, %v9559_v47  ;;  %v9569_v13 = vsub.f32 %v19790_v55, %v9568_v46 }
 0x953   : > { %12549 = vmatprep.mubr.f32.mxu0 %v9540_v0  ;;  %v9579_v29 = vsub.f32 %v19793_v48, %v9578_v19  ;;  %v9589_v39 = vsub.f32 %v19802_v31, %v9588_v56 }
 0x954   : > { %v9570_v62 = vand.u32 4294901760, %v9569_v13 }
 0x955   : > { %v9580_v8 = vand.u32 4294901760, %v9579_v29  ;;  %v9590_v23 = vand.u32 4294901760, %v9589_v39 }
 0x956   : > { %12550 = vmatmul.mubr.f32.gmra.mrb[56].mxu0 %v9550_v28 }
 0x957   : > { %12552 = vmatprep.mubr.f32.mxu0 %v9560_v35 }
 0x95a   : > { %12553 = vmatmul.mubr.f32.gmra.mrb[58].mxu0 %v9570_v62 }
 0x95b   : > { %12555 = vmatprep.mubr.f32.mxu0 %v9580_v8 }
 0x95e   : > { %12556 = vmatmul.mubr.f32.gmra.mrb[60].mxu0 %v9590_v23 }
 0x95f   : > { %12560 = vmatprep.mubr.f32.mxu0 %v19574_v51 }
 0x962   : > { %12561 = vmatmul.mubr.f32.vlgmr.msra.gmra.mrb[46].mxu0 %v19560_v57 }
 0x963   : > { %12585 = vmatpush3.msra.mxu0 %v19399_v45  ;;  %12563 = vmatprep.mubr.f32.mxu0 %v19625_v20 }
 0x964   : > { %12610 = vmatprep.subr.mxu0 %v19374_v38 }
 0x966   : > { %12564 = vmatmul.mubr.f32.gmra.mrb[48].mxu0 %v19649_v25 }
 0x967   : > { %12566 = vmatprep.mubr.f32.mxu0 %v19693_v17 }
 0x96a   : > { %12567 = vmatmul.mubr.f32.gmra.mrb[50].mxu0 %v19695_v11 }
 0x96b   : > { %12569 = vmatprep.mubr.f32.mxu0 %v19704_v49 }
 0x96e   : > { %12570 = vmatmul.mubr.f32.gmra.mrb[52].mxu0 %v19706_v36 }
 0x96f   : > { %12572 = vmatprep.mubr.f32.mxu0 %v19724_v22 }
 0x972   : > { %12573 = vmatmul.mubr.f32.gmra.mrb[54].mxu0 %v19726_v52 }
 0x973   : > { %12575 = vmatprep.mubr.f32.mxu0 %v19734_v58 }
 0x976   : > { %12576 = vmatmul.mubr.f32.gmra.mrb[56].mxu0 %v19757_v34 }
 0x977   : > { %12578 = vmatprep.mubr.f32.mxu0 %v19767_v27 }
 0x97a   : > { %12579 = vmatmul.mubr.f32.gmra.mrb[58].mxu0 %v19782_v61 }
 0x97b   : > { %12581 = vmatprep.mubr.f32.mxu0 %v19784_v33 }
 0x97e   : > { %12582 = vmatmul.mubr.f32.gmra.mrb[60].mxu0 %v19786_v12 }
 0x97f   : > { %12586 = vmatprep.mubr.f32.mxu0 %v19580_v42 }
 0x982   : > { %12587 = vmatmul.mubr.f32.vlgmr.msra.gmra.mrb[46].mxu0 %v19564_v60 }
 0x983   : > { %12611 = vmatpush3.msra.mxu0 %v19374_v38  ;;  %12589 = vmatprep.mubr.f32.mxu0 %v19639_v4 }
 0x984   : > { %12636 = vmatprep.subr.mxu0 %v19402_v40 }
 0x986   : > { %12590 = vmatmul.mubr.f32.gmra.mrb[48].mxu0 %v19660_v3 }
 0x987   : > { %12592 = vmatprep.mubr.f32.mxu0 %v19702_v37 }
 0x98a   : > { %12593 = vmatmul.mubr.f32.gmra.mrb[50].mxu0 %v19710_v59 }
 0x98b   : > { %12595 = vmatprep.mubr.f32.mxu0 %v19718_v30 }
 0x98e   : > { %12596 = vmatmul.mubr.f32.gmra.mrb[52].mxu0 %v19721_v14 }
 0x98f   : > { %12598 = vmatprep.mubr.f32.mxu0 %v19740_v16 }
 0x992   : > { %12599 = vmatmul.mubr.f32.gmra.mrb[54].mxu0 %v19743_v50 }
 0x993   : > { %12601 = vmatprep.mubr.f32.mxu0 %v19753_v7 }
 0x996   : > { %12602 = vmatmul.mubr.f32.gmra.mrb[56].mxu0 %v19765_v1 }
 0x997   : > { %12604 = vmatprep.mubr.f32.mxu0 %v19780_v18 }
 0x99a   : > { %12605 = vmatmul.mubr.f32.gmra.mrb[58].mxu0 %v19790_v55 }
 0x99b   : > { %12607 = vmatprep.mubr.f32.mxu0 %v19793_v48 }
 0x99e   : > { %12608 = vmatmul.mubr.f32.gmra.mrb[60].mxu0 %v19802_v31 }
 0x99f   : > { %12612 = vmatprep.mubr.f32.mxu0 %v9438_v43 }
 0x9a2   : > { %12613 = vmatmul.mubr.f32.vlgmr.msra.gmra.mrb[46].mxu0 %v9448_v2 }
 0x9a3   : > { %12637 = vmatpush3.msra.mxu0 %v19402_v40  ;;  %12615 = vmatprep.mubr.f32.mxu0 %v9458_v32  ;;  %v19923_v40 = vld [vmem:[%s20049_s12] ss:$0 sm:$0xff] }
 0x9a4   : > { %12662 = vmatprep.subr.mxu0 %v19374_v38 }
 0x9a6   : > { %12616 = vmatmul.mubr.f32.gmra.mrb[48].mxu0 %v9468_v26 }
 0x9a7   : > { %12618 = vmatprep.mubr.f32.mxu0 %v9478_v63 }
 0x9aa   : > { %12619 = vmatmul.mubr.f32.gmra.mrb[50].mxu0 %v9488_v10 }
 0x9ab   : > { %12621 = vmatprep.mubr.f32.mxu0 %v9498_v24 }
 0x9ae   : > { %12622 = vmatmul.mubr.f32.gmra.mrb[52].mxu0 %v9508_v21 }
 0x9af   : > { %12624 = vmatprep.mubr.f32.mxu0 %v9518_v9 }
 0x9b2   : > { %12625 = vmatmul.mubr.f32.gmra.mrb[54].mxu0 %v9528_v53 }
 0x9b3   : > { %12627 = vmatprep.mubr.f32.mxu0 %v9538_v5 }
 0x9b6   : > { %12628 = vmatmul.mubr.f32.gmra.mrb[56].mxu0 %v9548_v44 }
 0x9b7   : > { %12630 = vmatprep.mubr.f32.mxu0 %v9558_v54 }
 0x9ba   : > { %12631 = vmatmul.mubr.f32.gmra.mrb[58].mxu0 %v9568_v46 }
 0x9bb   : > { %12633 = vmatprep.mubr.f32.mxu0 %v9578_v19 }
 0x9be   : > { %12634 = vmatmul.mubr.f32.gmra.mrb[60].mxu0 %v9588_v56 }
 0x9bf   : > { %12638 = vmatprep.mubr.f32.mxu0 %v19574_v51 }
 0x9c2   : > { %12639 = vmatmul.mubr.f32.vlgmr.msra.gmra.mrb[46].mxu0 %v19560_v57 }
 0x9c3   : > { %12663 = vmatpush3.msra.mxu0 %v19374_v38  ;;  %12641 = vmatprep.mubr.f32.mxu0 %v19625_v20  ;;  %v19918_v38 = vld [vmem:[%s20048_s11] ss:$0 sm:$0xff] }
 0x9c6   : > { %12642 = vmatmul.mubr.f32.gmra.mrb[48].mxu0 %v19649_v25 }
 0x9c7   : > { %12644 = vmatprep.mubr.f32.mxu0 %v19693_v17 }
 0x9ca   : > { %12645 = vmatmul.mubr.f32.gmra.mrb[50].mxu0 %v19695_v11 }
 0x9cb   : > { %12647 = vmatprep.mubr.f32.mxu0 %v19704_v49 }
 0x9ce   : > { %12648 = vmatmul.mubr.f32.gmra.mrb[52].mxu0 %v19706_v36 }
 0x9cf   : > { %12650 = vmatprep.mubr.f32.mxu0 %v19724_v22 }
 0x9d2   : > { %12651 = vmatmul.mubr.f32.gmra.mrb[54].mxu0 %v19726_v52 }
 0x9d3   : > { %12653 = vmatprep.mubr.f32.mxu0 %v19734_v58 }
 0x9d6   : > { %12654 = vmatmul.mubr.f32.gmra.mrb[56].mxu0 %v19757_v34 }
 0x9d7   : > { %12656 = vmatprep.mubr.f32.mxu0 %v19767_v27 }
 0x9da   : > { %12657 = vmatmul.mubr.f32.gmra.mrb[58].mxu0 %v19782_v61 }
 0x9db   : > { %12659 = vmatprep.mubr.f32.mxu0 %v19784_v33 }
 0x9de   : > { %12660 = vmatmul.mubr.f32.gmra.mrb[60].mxu0 %v19786_v12 }
 0x9df   : > { %12664 = vmatprep.mubr.f32.mxu0 %v19574_v51 }
 0x9e2   : > { %12665 = vmatmul.mubr.f32.vlgmr.msra.gmra.mrb[46].mxu0 %v19560_v57 }
 0x9e3   : > { %12667 = vmatprep.mubr.f32.mxu0 %v19625_v20 }
 0x9e6   : > { %12668 = vmatmul.mubr.f32.gmra.mrb[48].mxu0 %v19649_v25 }
 0x9e7   : > { %12670 = vmatprep.mubr.f32.mxu0 %v19693_v17 }
 0x9ea   : > { %12671 = vmatmul.mubr.f32.gmra.mrb[50].mxu0 %v19695_v11 }
 0x9eb   : > { %12673 = vmatprep.mubr.f32.mxu0 %v19704_v49 }
 0x9ee   : > { %12674 = vmatmul.mubr.f32.gmra.mrb[52].mxu0 %v19706_v36 }
 0x9ef   : > { %12676 = vmatprep.mubr.f32.mxu0 %v19724_v22 }
 0x9f2   : > { %12677 = vmatmul.mubr.f32.gmra.mrb[54].mxu0 %v19726_v52 }
 0x9f3   : > { %12679 = vmatprep.mubr.f32.mxu0 %v19734_v58 }
 0x9f6   : > { %12680 = vmatmul.mubr.f32.gmra.mrb[56].mxu0 %v19757_v34 }
 0x9f7   : > { %12682 = vmatprep.mubr.f32.mxu0 %v19767_v27 }
 0x9fa   : > { %12683 = vmatmul.mubr.f32.gmra.mrb[58].mxu0 %v19782_v61 }
 0x9fb   : > { %12685 = vmatprep.mubr.f32.mxu0 %v19784_v33 }
 0x9fe   : > { %12686 = vmatmul.mubr.f32.gmra.mrb[60].mxu0 %v19786_v12 }
 0xab5   : > { %v12666_v45 = vpop.f32.mrb[46].mxu0 }
 0xab6   : > { %v10469_v57 = vmul.f32 %v12666_v45, %v19918_v38  ;;  %v10367_v60 = vpop.f32.mrb[47].mxu0 }
 0xab7   : > { %v10468_v51 = vmul.f32 %v19918_v38, %v10367_v60 }
 0xab8   : > { %v19928_v2 = vadd.f32 %v19923_v40, %v10469_v57 }
 0xab9   : > { %v19931_v42 = vadd.f32 %v19923_v40, %v10468_v51  ;;  %v12669_v43 = vpop.f32.mrb[48].mxu0 }
 0xaba   : > { %v10508_v20 = vsub.f32 0.0, %v19928_v2  ;;  %v10471_v4 = vmul.f32 %v12669_v43, %v19918_v38  ;;  %v10379_v25 = vpop.f32.mrb[49].mxu0 }
 0xabb   : > { %v10507_v32 = vsub.f32 0.0, %v19931_v42  ;;  %v10470_v3 = vmul.f32 %v19918_v38, %v10379_v25 }
 0xabc   : > { %v10525_v26 = vmul.f32 1.442695, %v10508_v20  ;;  %v19938_v17 = vadd.f32 %v19923_v40, %v10471_v4 }
 0xabd   : > { %v10523_v11 = vmul.f32 1.442695, %v10507_v32  ;;  %v19941_v37 = vadd.f32 %v19923_v40, %v10470_v3  ;;  %v12672_v49 = vpop.f32.mrb[50].mxu0 }
 0xabe   : > { %13558 = vpow2.f32 %v10525_v26  ;;  %v10510_v36 = vsub.f32 0.0, %v19938_v17  ;;  %v10473_v59 = vmul.f32 %v12672_v49, %v19918_v38  ;;  %v10391_v63 = vpop.f32.mrb[51].mxu0 }
 0xabf   : > { %13560 = vpow2.f32 %v10523_v11  ;;  %v10509_v30 = vsub.f32 0.0, %v19941_v37  ;;  %v10472_v14 = vmul.f32 %v19918_v38, %v10391_v63 }
 0xac0   : > { %v10529_v10 = vmul.f32 1.442695, %v10510_v36  ;;  %v19948_v52 = vadd.f32 %v19923_v40, %v10473_v59 }
 0xac1   : > { %v10527_v22 = vmul.f32 1.442695, %v10509_v30  ;;  %v19951_v24 = vadd.f32 %v19923_v40, %v10472_v14  ;;  %v12675_v21 = vpop.f32.mrb[52].mxu0 }
 0xac2   : > { %v10403_v58 = vpop.f32.mrb[53].mxu0  ;;  %v10475_v7 = vmul.f32 %v12675_v21, %v19918_v38  ;;  %v10512_v9 = vsub.f32 0.0, %v19948_v52 }
 0xac3   : > { %13562 = vpow2.f32 %v10527_v22  ;;  %v10511_v16 = vsub.f32 0.0, %v19951_v24  ;;  %v10474_v50 = vmul.f32 %v19918_v38, %v10403_v58 }
 0xac4   : > { %13564 = vpow2.f32 %v10529_v10  ;;  %v19961_v41 = vadd.f32 %v19923_v40, %v10475_v7  ;;  %v10533_v18 = vmul.f32 1.442695, %v10512_v9 }
 0xac5   : > { %v10531_v53 = vmul.f32 1.442695, %v10511_v16  ;;  %v19958_v34 = vadd.f32 %v19923_v40, %v10474_v50  ;;  %v12678_v5 = vpop.f32.mrb[54].mxu0 }
 0xac6   : > { %v10415_v1 = vpop.f32.mrb[55].mxu0  ;;  %v10514_v48 = vsub.f32 0.0, %v19961_v41  ;;  %v10477_v47 = vmul.f32 %v12678_v5, %v19918_v38 }
 0xac7   : > { %13566 = vpow2.f32 %v10531_v53  ;;  %v10513_v61 = vsub.f32 0.0, %v19958_v34  ;;  %v10476_v33 = vmul.f32 %v19918_v38, %v10415_v1 }
 0xac8   : > { %v13559_v27 = vpop.eup %13558  ;;  %v10537_v28 = vmul.f32 1.442695, %v10514_v48  ;;  %v19971_v13 = vadd.f32 %v19923_v40, %v10477_v47 }
 0xac9   : > { %v13561_v44 = vpop.eup %13560  ;;  %v12681_v12 = vpop.f32.mrb[56].mxu0  ;;  %v10556_v54 = vadd.f32 1.0, %v13559_v27  ;;  %v10535_v15 = vmul.f32 1.442695, %v10513_v61  ;;  %v19968_v31 = vadd.f32 %v19923_v40, %v10476_v33 }
 0xaca   : > { %v10555_v0 = vadd.f32 1.0, %v13561_v44  ;;  %v10427_v55 = vpop.f32.mrb[57].mxu0  ;;  %v10479_v57 = vmul.f32 %v12681_v12, %v19918_v38  ;;  %v10516_v60 = vsub.f32 0.0, %v19971_v13 }
 0xacb   : > { %v10515_v56 = vsub.f32 0.0, %v19968_v31  ;;  %v10478_v8 = vmul.f32 %v19918_v38, %v10427_v55 }
 0xacc   : > { %13568 = vrcp.f32 %v10555_v0  ;;  %v19982_v26 = vadd.f32 %v19923_v40, %v10479_v57  ;;  %v10541_v11 = vmul.f32 1.442695, %v10516_v60 }
 0xacd   : > { %v13563_v6 = vpop.eup %13562  ;;  %13570 = vpow2.f32 %v10533_v18  ;;  %v12684_v46 = vpop.f32.mrb[58].mxu0  ;;  %v10539_v51 = vmul.f32 1.442695, %v10515_v56  ;;  %v19978_v43 = vadd.f32 %v19923_v40, %v10478_v8 }
 0xace   : > { %13572 = vrcp.f32 %v10556_v54  ;;  %v10557_v19 = vadd.f32 1.0, %v13563_v6  ;;  %v10439_v35 = vpop.f32.mrb[59].mxu0  ;;  %v13565_v29 = vpop.eup %13564  ;;  %v10518_v10 = vsub.f32 0.0, %v19982_v26  ;;  %v10481_v22 = vmul.f32 %v12684_v46, %v19918_v38 }
 0xacf   : > { %13574 = vpow2.f32 %v10535_v15  ;;  %v10558_v39 = vadd.f32 1.0, %v13565_v29  ;;  %v10517_v49 = vsub.f32 0.0, %v19978_v43  ;;  %v10480_v36 = vmul.f32 %v19918_v38, %v10439_v35 }
 0xad0   : > { %13576 = vrcp.f32 %v10557_v19  ;;  %v10545_v9 = vmul.f32 1.442695, %v10518_v10 }
 0xad1   : > { %v12687_v62 = vpop.f32.mrb[60].mxu0  ;;  %v13567_v45 = vpop.eup %13566  ;;  %13578 = vpow2.f32 %v10537_v28  ;;  %v19990_v21 = vadd.f32 %v19923_v40, %v10480_v36 }
 0xad2   : > { %v10451_v23 = vpop.f32.mrb[61].mxu0  ;;  %13580 = vrcp.f32 %v10558_v39  ;;  %v10559_v4 = vadd.f32 1.0, %v13567_v45  ;;  %v10483_v33 = vmul.f32 %v12687_v62, %v19918_v38 }
 0xad3   : > { %13582 = vpow2.f32 %v10539_v51  ;;  %v10519_v53 = vsub.f32 0.0, %v19990_v21  ;;  %v10482_v5 = vmul.f32 %v19918_v38, %v10451_v23 }
 0xad4   : > { %13584 = vrcp.f32 %v10559_v4 }
 0xad5   : > { %13586 = vpow2.f32 %v10541_v11  ;;  %v10547_v61 = vmul.f32 1.442695, %v10519_v53  ;;  %v20002_v12 = vadd.f32 %v19923_v40, %v10482_v5 }
 0xad6   : > { %v13569_v20 = vpop.eup %13568 }
 0xad7   : > { %v13571_v25 = vpop.eup %13570  ;;  %v10587_v32 = vmul.f32 %v13569_v20, %v19931_v42  ;;  %v10543_v42 = vmul.f32 1.442695, %v10517_v49  ;;  %v10521_v15 = vsub.f32 0.0, %v20002_v12 }
 0xad8   : > { %v13573_v3 = vpop.eup %13572  ;;  %v10560_v59 = vadd.f32 1.0, %v13571_v25 }
 0xad9   : > { %10603 = vxpose.xlu0.b32.start [1/16] (narrow) %v10587_v32, 8  ;;  %v13575_v63 = vpop.eup %13574  ;;  %v10588_v30 = vmul.f32 %v13573_v3, %v19928_v2  ;;  %v19994_v2 = vadd.f32 %v19923_v40, %v10481_v22  ;;  %v10551_v29 = vmul.f32 1.442695, %v10521_v15 }
 0xada   : > { %v13577_v14 = vpop.eup %13576  ;;  %13588 = vrcp.f32 %v10560_v59  ;;  %v10561_v58 = vadd.f32 1.0, %v13575_v63 }
 0xadb   : > { %v13579_v16 = vpop.eup %13578  ;;  %v10589_v50 = vmul.f32 %v13577_v14, %v19941_v37  ;;  %13590 = vpow2.f32 %v10543_v42  ;;  %v10520_v37 = vsub.f32 0.0, %v19994_v2 }
 0xadc   : > { %v13581_v7 = vpop.eup %13580  ;;  %v10562_v1 = vadd.f32 1.0, %v13579_v16  ;;  %13592 = vrcp.f32 %v10561_v58 }
 0xadd   : > { %10604 = vxpose.xlu0.b32.cont [2/16] (narrow) %v10588_v30, 8  ;;  %v13583_v27 = vpop.eup %13582  ;;  %v10590_v44 = vmul.f32 %v13581_v7, %v19938_v17  ;;  %13594 = vpow2.f32 %v10545_v9  ;;  %v10549_v6 = vmul.f32 1.442695, %v10520_v37  ;;  %v10506_v17 = vadd.f32 %v19923_v40, %v10483_v33 }
 0xade   : > { %v13585_v18 = vpop.eup %13584  ;;  %13596 = vrcp.f32 %v10562_v1  ;;  %v10563_v54 = vadd.f32 1.0, %v13583_v27 }
 0xadf   : > { %v13587_v0 = vpop.eup %13586  ;;  %v10591_v55 = vmul.f32 %v13585_v18, %v19951_v24  ;;  %13598 = vpow2.f32 %v10547_v61  ;;  %v10522_v35 = vsub.f32 0.0, %v10506_v17 }
 0xae0   : > { %v10564_v47 = vadd.f32 1.0, %v13587_v0  ;;  %13600 = vrcp.f32 %v10563_v54 }
 0xae1   : > { %10605 = vxpose.xlu0.b32.cont [3/16] (narrow) %v10589_v50, 8  ;;  %13602 = vpow2.f32 %v10549_v6  ;;  %v10553_v40 = vmul.f32 1.442695, %v10522_v35 }
 0xae2   : > { %13604 = vrcp.f32 %v10564_v47 }
 0xae3   : > { %13606 = vpow2.f32 %v10551_v29 }
 0xae4   : > { %v13589_v48 = vpop.eup %13588 }
 0xae5   : > { %10606 = vxpose.xlu0.b32.cont [4/16] (narrow) %v10590_v44, 8  ;;  %v13591_v38 = vpop.eup %13590  ;;  %v10592_v46 = vmul.f32 %v13589_v48, %v19948_v52 }
 0xae6   : > { %v13593_v19 = vpop.eup %13592  ;;  %v10565_v24 = vadd.f32 1.0, %v13591_v38 }
 0xae7   : > { %v13595_v28 = vpop.eup %13594  ;;  %v10593_v56 = vmul.f32 %v13593_v19, %v19958_v34 }
 0xae8   : > { %v13597_v8 = vpop.eup %13596  ;;  %v10566_v62 = vadd.f32 1.0, %v13595_v28  ;;  %13608 = vrcp.f32 %v10565_v24 }
 0xae9   : > { %10607 = vxpose.xlu0.b32.cont [5/16] (narrow) %v10591_v55, 8  ;;  %v13599_v39 = vpop.eup %13598  ;;  %v10594_v23 = vmul.f32 %v13597_v8, %v19961_v41  ;;  %13610 = vpow2.f32 %v10553_v40 }
 0xaea   : > { %v13601_v52 = vpop.eup %13600  ;;  %13612 = vrcp.f32 %v10566_v62  ;;  %v10567_v45 = vadd.f32 1.0, %v13599_v39 }
 0xaeb   : > { %v13603_v57 = vpop.eup %13602  ;;  %v10595_v60 = vmul.f32 %v13601_v52, %v19968_v31 }
 0xaec   : > { %v13605_v51 = vpop.eup %13604  ;;  %v10568_v34 = vadd.f32 1.0, %v13603_v57  ;;  %13614 = vrcp.f32 %v10567_v45 }
 0xaed   : > { %10608 = vxpose.xlu0.b32.cont [6/16] (narrow) %v10592_v46, 8  ;;  %v13607_v20 = vpop.eup %13606  ;;  %v10596_v4 = vmul.f32 %v13605_v51, %v19971_v13 }
 0xaee   : > { %13616 = vrcp.f32 %v10568_v34  ;;  %v10569_v32 = vadd.f32 1.0, %v13607_v20 }
 0xaf0   : > { %13618 = vrcp.f32 %v10569_v32 }
 0xaf1   : > { %10609 = vxpose.xlu0.b32.cont [7/16] (narrow) %v10593_v56, 8 }
 0xaf2   : > { %v13609_v25 = vpop.eup %13608 }
 0xaf3   : > { %v13611_v41 = vpop.eup %13610  ;;  %v10597_v3 = vmul.f32 %v13609_v25, %v19978_v43 }
 0xaf4   : > { %v13613_v11 = vpop.eup %13612  ;;  %v10570_v49 = vadd.f32 1.0, %v13611_v41 }
 0xaf5   : > { %10610 = vxpose.xlu0.b32.cont [8/16] (narrow) %v10594_v23, 8  ;;  %v10598_v31 = vmul.f32 %v13613_v11, %v19982_v26 }
 0xaf6   : > { %v13615_v36 = vpop.eup %13614  ;;  %13620 = vrcp.f32 %v10570_v49 }
 0xaf7   : > { %v10599_v13 = vmul.f32 %v13615_v36, %v19990_v21 }
 0xaf8   : > { %v13617_v59 = vpop.eup %13616 }
 0xaf9   : > { %10611 = vxpose.xlu0.b32.cont [9/16] (narrow) %v10595_v60, 8  ;;  %v10600_v63 = vmul.f32 %v13617_v59, %v19994_v2 }
 0xafa   : > { %v13619_v30 = vpop.eup %13618 }
 0xafb   : > { %v10601_v43 = vmul.f32 %v13619_v30, %v20002_v12 }
 0xafd   : > { %10612 = vxpose.xlu0.b32.cont [10/16] (narrow) %v10596_v4, 8 }
 0xb00   : > { %v13621_v14 = vpop.eup %13620 }
 0xb01   : > { %10613 = vxpose.xlu0.b32.cont [11/16] (narrow) %v10597_v3, 8  ;;  %v10602_v10 = vmul.f32 %v13621_v14, %v10506_v17 }
 0xb05   : > { %10614 = vxpose.xlu0.b32.cont [12/16] (narrow) %v10598_v31, 8 }
 0xb09   : > { %10615 = vxpose.xlu0.b32.cont [13/16] (narrow) %v10599_v13, 8 }
 0xb0d   : > { %10616 = vxpose.xlu0.b32.cont [14/16] (narrow) %v10600_v63, 8 }
 0xb11   : > { %10617 = vxpose.xlu0.b32.cont [15/16] (narrow) %v10601_v43, 8 }
 0xb15   : > { %10618 = vxpose.xlu0.b32.end [16/16] (narrow) %v10602_v10, 8 }
 0xb59   : > { %v10619_v26 = vpop.trf.xlu0 }
 0xb5a   : > { %10635 = vst [vmem:[%s494_s14] sm:$0xff] %v10619_v26 }
 0xb5b PF: > { %s23_s29 = sadd.s32 1, %s13690_s29   ;;  %s21703_s23 = sld [smem:[#allocation2_spill]] }
 0xb5c   : > { %p20_p7 = scmp.ge.s32.totalorder %s23_s29, 6   ;;  %s21704_s16 = sld [smem:[#allocation3_spill]] }
 0xb5d   : > { %s21705_s25 = smov %s13682_s27  ;;  %s21706_s26 = smov %s13686_s28 }
 0xb5e   :  { %22 = sbr.rel (!%p20_p7) target bundleno = 7 (0x7), region = 105 }
 0xb61   : > { %s21707_s27 = smov %s21703_s23 }
 0xb62   : > { %s21708_s28 = smov %s21704_s16 }

</bundles_post_ra>
